<compile_context>
chip_gen: v7x
topology: tpu7x:2x2x1
jax: 0.10.0
libtpu: 0.0.40
codegen_flags: <defaults>
</compile_context>

<pallas_src>
import functools
import math

import jax
import jax.numpy as jnp
from jax import lax
from jax.experimental import pallas as pl
from jax.experimental.pallas import tpu as pltpu

# ----------------------------------------------------------------------------
# Module constants.
# TODO(synk): the DEFAULT_* constants and the SelfAttention class body were not
# provided with the module; values are chosen small but structurally consistent
# (the module's assert 2**n_upsamples * latent_sr == input_sr holds), and
# SelfAttention is implemented as a standard residual multi-head attention over
# the time axis.
# ----------------------------------------------------------------------------
DEFAULT_1D_KERNEL_SIZE = 3
DEFAULT_1D_PADDING = 1
DEFAULT_LATENT_CHANNELS = 8
DEFAULT_INPUT_SR = 64
DEFAULT_LATENT_SR = 8
DEFAULT_AUDIO_DUR = 2            # seconds -> latent T = 16, output T = 128
DEFAULT_MAX_CHANNELS = 64
INPUT_CHANNELS = 2               # stereo waveform
ATTN_HEADS = 4
GN_EPS = 1e-5

_INV_SQRT2 = 1.0 / math.sqrt(2.0)


def _gelu(x):
    # exact erf-based GELU (matches torch.nn.GELU() default).
    # TODO(synk): jax.nn.gelu(approximate=True) would route through the EUP
    # (tanh) and offload the saturating VALU slot, at a small numeric delta.
    return 0.5 * x * (1.0 + lax.erf(x * _INV_SQRT2))


def _conv3_im2col(h16, w_packed, bias_row):
    """Conv1d(K=3, stride=1, pad=1) in (T, Cin) layout as ONE im2col matmul.

    h16      : (T, Cin) bf16 activation (cast once by the caller).
    w_packed : (3*Cin, Cout) bf16, rows [k=0 | k=1 | k=2], row k*Cin+ci = w[co,ci,k].
    """
    t, cin = h16.shape
    zrow = jnp.zeros((1, cin), h16.dtype)
    xm1 = jnp.concatenate([zrow, h16[:t - 1]], axis=0)      # x[t-1] (zero-pad left)
    xp1 = jnp.concatenate([h16[1:], zrow], axis=0)          # x[t+1] (zero-pad right)
    im = jnp.concatenate([xm1, h16, xp1], axis=1)           # (T, 3*Cin)
    return jnp.dot(im, w_packed, preferred_element_type=jnp.float32) + bias_row


def _tconv3_s2(h, w_packed, bias_row):
    """ConvTranspose1d(K=3, stride=2, pad=1, output_pad=1): (T, Cin) -> (2T, Cout).

    Exact even/odd phase decomposition (PyTorch weight layout (Cin, Cout, K)):
      y[2m]   = x[m] @ W[:, :, 1]
      y[2m+1] = x[m] @ W[:, :, 2] + x[m+1] @ W[:, :, 0]
    fused into ONE bf16 matmul: w_packed is (2*Cin, 2*Cout), columns [even|odd],
    rows [x[m] | x[m+1]].  The lossless row interleave is a stack+reshape (no
    MXU selector matmuls).
    """
    t_in, cin = h.shape
    cout = w_packed.shape[1] // 2
    h16 = h.astype(jnp.bfloat16)
    zrow = jnp.zeros((1, cin), jnp.bfloat16)
    x_next = jnp.concatenate([h16[1:], zrow], axis=0)        # x[m+1]
    im = jnp.concatenate([h16, x_next], axis=1)              # (T, 2*Cin)
    y = jnp.dot(im, w_packed, preferred_element_type=jnp.float32)   # (T, 2*Cout)
    y = jnp.stack([y[:, :cout], y[:, cout:]], axis=1).reshape(2 * t_in, cout)
    return y + bias_row


def _group_norm(h, gamma_row, beta_row, gmat, eps):
    """GroupNorm in (T, C) layout; gmat is the (C, C) within-group averaging matrix."""
    mean_c = jnp.mean(h, axis=0, keepdims=True)                    # (1, C)
    gmean = jnp.dot(mean_c, gmat, preferred_element_type=jnp.float32)
    d = h - gmean
    var_c = jnp.mean(d * d, axis=0, keepdims=True)                 # two-pass variance
    gvar = jnp.dot(var_c, gmat, preferred_element_type=jnp.float32)
    return d * lax.rsqrt(gvar + eps) * gamma_row + beta_row


def _mha_residual(h, wqkv, bqkv, wo, bo, n_heads):
    """Residual multi-head self-attention; 1/sqrt(d) pre-folded into Q weights."""
    t_len, c = h.shape
    d = c // n_heads
    qkv = jnp.dot(h.astype(jnp.bfloat16), wqkv,
                  preferred_element_type=jnp.float32) + bqkv        # (T, 3C) f32
    qkv16 = qkv.astype(jnp.bfloat16)                                # one cast, sliced below
    heads = []
    for i in range(n_heads):
        q = qkv16[:, i * d:(i + 1) * d]
        k = qkv16[:, c + i * d:c + (i + 1) * d]
        v = qkv16[:, 2 * c + i * d:2 * c + (i + 1) * d]
        s = jnp.dot(q, k.T, preferred_element_type=jnp.float32)     # scale pre-folded
        s = s - jnp.max(s, axis=-1, keepdims=True)
        p = jnp.exp(s)
        denom = jnp.sum(p, axis=-1, keepdims=True)
        o = jnp.dot(p.astype(jnp.bfloat16), v, preferred_element_type=jnp.float32)
        # NOTE: approx reciprocal (EUP) -> ~1e-4 rel error vs exact softmax.
        heads.append(o * pl.reciprocal(denom, approx=True))
    attn = jnp.concatenate(heads, axis=-1).astype(jnp.bfloat16)     # (T, C)
    y = jnp.dot(attn, wo, preferred_element_type=jnp.float32) + bo
    return h + y


# ----------------------------------------------------------------------------
# Fused decoder kernel: one grid step = one batch element; every layer's
# activation stays resident in VMEM.
# ----------------------------------------------------------------------------
def _decoder_kernel(x_ref, w_in_ref, b_in_ref,
                    wqkv_ref, bqkv_ref, wo_ref, bo_ref, gmat_ref,
                    up_w_ref, conv_w_ref, post_w_ref, rv_ref,
                    w_fin_ref, b_fin_ref, o_ref,
                    *, n_up, n_heads, eps):
    gmat = gmat_ref[...]                                            # (C, C) f32, hoisted

    # stem: Conv1d(Z -> C, K=3, p=1) + GELU
    x16 = x_ref[0].astype(jnp.bfloat16)                             # (T0, Z)
    h = _gelu(_conv3_im2col(x16, w_in_ref[...], b_in_ref[...]))

    # SelfAttention(channels, 4, audio_dur * latent_sr)
    # TODO(synk): SelfAttention class body was not provided; assumed to be a
    # standard residual MHA with fused qkv / output projections.
    h = _mha_residual(h, wqkv_ref[...], bqkv_ref[...], wo_ref[...], bo_ref[...],
                      n_heads)

    for l in range(n_up):
        rv = rv_ref[l]                                              # (5, C) f32 rows
        b_up, b_cv = rv[0:1, :], rv[1:2, :]
        gamma, beta, b_post = rv[2:3, :], rv[3:4, :], rv[4:5, :]
        # UpsampleLayer: ConvTranspose1d -> GELU -> (conv(x) + x) -> GroupNorm -> GELU
        h = _gelu(_tconv3_s2(h, up_w_ref[l], b_up))
        h = _conv3_im2col(h.astype(jnp.bfloat16), conv_w_ref[l], b_cv) + h
        h = _gelu(_group_norm(h, gamma, beta, gmat, eps))
        # trailing Conv1d(C -> C, K=3, p=1) + GELU
        h = _gelu(_conv3_im2col(h.astype(jnp.bfloat16), post_w_ref[l], b_post))

    # final Conv1d(C -> C_out, K=1), emitted lane-dense as (C_out, T_out):
    # last dim = T_out (128 lanes) -> unmasked stores, no wrapper transpose.
    y = jnp.dot(w_fin_ref[...], h.astype(jnp.bfloat16).T,
                preferred_element_type=jnp.float32) + b_fin_ref[...]
    o_ref[0] = y                                                    # (C_out, T_out)


# ----------------------------------------------------------------------------
# Wrapper: pure layout glue (weight repacking, one tiny input transpose);
# all math runs in the fused kernel above.
# ----------------------------------------------------------------------------
def vae_decoder_forward(params, z):
    """z: [B, Z, T'] -> reconstruction [B, input_channels, T' * 2**n_upsamples]."""
    bsz, zc, t0 = z.shape
    n_up = params["n_up"]
    c = params["attn"]["wo"].shape[0]
    c_out = params["final"]["w"].shape[0]
    t_out = t0 * (2 ** n_up)
    bf = jnp.bfloat16

    # stem conv: (Cout, Cin, K) -> im2col weight (K*Cin, Cout), rows [k=0|k=1|k=2]
    w_in = jnp.transpose(params["stem"]["w"], (2, 1, 0)).reshape(3 * zc, c).astype(bf)
    b_in = params["stem"]["b"].reshape(1, c)

    # attention: fold 1/sqrt(d) into the Q columns of the fused qkv projection
    d_head = c // ATTN_HEADS
    col_scale = jnp.concatenate([jnp.full((c,), 1.0 / math.sqrt(d_head), jnp.float32),
                                 jnp.ones((2 * c,), jnp.float32)])
    wqkv_t = (params["attn"]["wqkv"].T * col_scale[None, :]).astype(bf)   # (C, 3C)
    bqkv = (params["attn"]["bqkv"] * col_scale).reshape(1, 3 * c)
    wo_t = params["attn"]["wo"].T.astype(bf)                              # (C, C)
    bo = params["attn"]["bo"].reshape(1, c)

    # GroupNorm within-group averaging matrix, hoisted out of the kernel
    num_groups = c // 4
    gs = c // num_groups
    gidx = jnp.arange(c) // gs
    gmat = (gidx[:, None] == gidx[None, :]).astype(jnp.float32) / gs      # (C, C)

    # ConvTranspose packed weights (PyTorch layout (Cin, Cout, K)):
    #   rows [x[m] | x[m+1]], cols [even | odd]  -> (2*Cin, 2*Cout)
    def pack_up(w):
        top = jnp.concatenate([w[:, :, 1], w[:, :, 2]], axis=1)           # (Cin, 2Cout)
        bot = jnp.concatenate([jnp.zeros_like(w[:, :, 0]), w[:, :, 0]], axis=1)
        return jnp.concatenate([top, bot], axis=0)
    up_w = jnp.stack([pack_up(blk["up_w"]) for blk in params["up"]]).astype(bf)

    # regular convs (PyTorch layout (Cout, Cin, K)) -> im2col weight (3*Cin, Cout)
    def pack_conv(w):
        return jnp.transpose(w, (2, 1, 0)).reshape(3 * w.shape[1], w.shape[0])
    conv_w = jnp.stack([pack_conv(blk["conv_w"]) for blk in params["up"]]).astype(bf)
    post_w = jnp.stack([pack_conv(blk["post_w"]) for blk in params["up"]]).astype(bf)

    # lane-major per-channel vectors: rows = [up bias, conv bias, gamma, beta, post bias]
    rv = jnp.stack([jnp.stack([blk["up_b"], blk["conv_b"], blk["gamma"],
                               blk["beta"], blk["post_b"]]) for blk in params["up"]])

    w_fin_t = params["final"]["w"][:, :, 0].astype(bf)                    # (C_out, C)
    b_fin = params["final"]["b"].reshape(c_out, 1)

    z_t = jnp.transpose(z, (0, 2, 1))                                     # (B, T0, Z)

    kernel = functools.partial(_decoder_kernel, n_up=n_up, n_heads=ATTN_HEADS,
                               eps=GN_EPS)
    # TODO(synk): on v7x, switch the batch axis to pltpu.CORE_PARALLEL (or a
    # pl.core_map over create_tensorcore_mesh) to guarantee both TensorCores are
    # used; on single-TC v5e/v6e, folding B into the matmul M dim would remove
    # the per-step grid overhead entirely.
    out = pl.pallas_call(
        kernel,
        out_shape=jax.ShapeDtypeStruct((bsz, c_out, t_out), jnp.float32),
        grid=(bsz,),
        in_specs=[
            pl.BlockSpec((1, t0, zc), lambda b: (b, 0, 0)),
            pl.BlockSpec(w_in.shape, lambda b: (0, 0)),
            pl.BlockSpec(b_in.shape, lambda b: (0, 0)),
            pl.BlockSpec(wqkv_t.shape, lambda b: (0, 0)),
            pl.BlockSpec(bqkv.shape, lambda b: (0, 0)),
            pl.BlockSpec(wo_t.shape, lambda b: (0, 0)),
            pl.BlockSpec(bo.shape, lambda b: (0, 0)),
            pl.BlockSpec(gmat.shape, lambda b: (0, 0)),
            pl.BlockSpec(up_w.shape, lambda b: (0, 0, 0)),
            pl.BlockSpec(conv_w.shape, lambda b: (0, 0, 0)),
            pl.BlockSpec(post_w.shape, lambda b: (0, 0, 0)),
            pl.BlockSpec(rv.shape, lambda b: (0, 0, 0)),
            pl.BlockSpec(w_fin_t.shape, lambda b: (0, 0)),
            pl.BlockSpec(b_fin.shape, lambda b: (0, 0)),
        ],
        out_specs=pl.BlockSpec((1, c_out, t_out), lambda b: (b, 0, 0)),
        compiler_params=pltpu.CompilerParams(dimension_semantics=("parallel",)),
    )(z_t, w_in, b_in, wqkv_t, bqkv, wo_t, bo, gmat,
      up_w, conv_w, post_w, rv, w_fin_t, b_fin)

    return out                                                            # (B, C_out, T)


# ----------------------------------------------------------------------------
# Deterministic in-script parameter init (PyTorch tensor layouts).
# ----------------------------------------------------------------------------
def init_params(key):
    n_up = int(math.ceil(math.log2(DEFAULT_INPUT_SR / DEFAULT_LATENT_SR)))
    assert (2 ** n_up) * DEFAULT_LATENT_SR == DEFAULT_INPUT_SR
    c = DEFAULT_MAX_CHANNELS
    keys = iter(jax.random.split(key, 16))

    def conv_p(k, cout, cin, ksz):
        return (1.0 / math.sqrt(cin * ksz)) * jax.random.normal(
            k, (cout, cin, ksz), jnp.float32)

    def tconv_p(k, cin, cout, ksz):
        return (1.0 / math.sqrt(cout * ksz)) * jax.random.normal(
            k, (cin, cout, ksz), jnp.float32)

    params = {"n_up": n_up}
    params["stem"] = {"w": conv_p(next(keys), c, DEFAULT_LATENT_CHANNELS,
                                  DEFAULT_1D_KERNEL_SIZE),
                      "b": jnp.zeros((c,), jnp.float32)}
    params["attn"] = {
        "wqkv": (1.0 / math.sqrt(c)) * jax.random.normal(next(keys), (3 * c, c),
                                                         jnp.float32),
        "bqkv": jnp.zeros((3 * c,), jnp.float32),
        "wo": (1.0 / math.sqrt(c)) * jax.random.normal(next(keys), (c, c),
                                                       jnp.float32),
        "bo": jnp.zeros((c,), jnp.float32),
    }
    ups = []
    for _ in range(n_up):
        ups.append({
            "up_w": tconv_p(next(keys), c, c, DEFAULT_1D_KERNEL_SIZE),
            "up_b": jnp.zeros((c,), jnp.float32),
            "conv_w": conv_p(next(keys), c, c, DEFAULT_1D_KERNEL_SIZE),
            "conv_b": jnp.zeros((c,), jnp.float32),
            "gamma": jnp.ones((c,), jnp.float32),
            "beta": jnp.zeros((c,), jnp.float32),
            "post_w": conv_p(next(keys), c, c, DEFAULT_1D_KERNEL_SIZE),
            "post_b": jnp.zeros((c,), jnp.float32),
        })
    params["up"] = ups
    params["final"] = {"w": conv_p(next(keys), INPUT_CHANNELS, c, 1),
                       "b": jnp.zeros((INPUT_CHANNELS,), jnp.float32)}
    return params


if __name__ == "__main__":
    t_lat = DEFAULT_AUDIO_DUR * DEFAULT_LATENT_SR                    # 16 latent steps
    z = jax.random.normal(jax.random.PRNGKey(0),
                          (2, DEFAULT_LATENT_CHANNELS, t_lat), jnp.float32)
    params = init_params(jax.random.PRNGKey(1))

    fwd = jax.jit(lambda latent: vae_decoder_forward(params, latent))
    wav = fwd(z)
    jax.block_until_ready(wav)

    t_out = t_lat * (2 ** params["n_up"])                            # 128 output steps
    assert wav.shape == (2, INPUT_CHANNELS, t_out), wav.shape
    assert bool(jnp.all(jnp.isfinite(wav)))
    print("KERNEL_OK")
</pallas_src>

<mosaic_0001>
module attributes {stable_mosaic.version = 11 : i64} {
  func.func @_decoder_kernel(%arg0: i32, %arg1: memref<1x16x8xf32, #tpu.memory_space<vmem>>, %arg2: memref<24x64xbf16, #tpu.memory_space<vmem>>, %arg3: memref<1x64xf32, #tpu.memory_space<vmem>>, %arg4: memref<64x192xbf16, #tpu.memory_space<vmem>>, %arg5: memref<1x192xf32, #tpu.memory_space<vmem>>, %arg6: memref<64x64xbf16, #tpu.memory_space<vmem>>, %arg7: memref<1x64xf32, #tpu.memory_space<vmem>>, %arg8: memref<64x64xf32, #tpu.memory_space<vmem>>, %arg9: memref<3x128x128xbf16, #tpu.memory_space<vmem>>, %arg10: memref<3x192x64xbf16, #tpu.memory_space<vmem>>, %arg11: memref<3x192x64xbf16, #tpu.memory_space<vmem>>, %arg12: memref<3x5x64xf32, #tpu.memory_space<vmem>>, %arg13: memref<2x64xbf16, #tpu.memory_space<vmem>>, %arg14: memref<2x1xf32, #tpu.memory_space<vmem>>, %arg15: memref<1x2x128xf32, #tpu.memory_space<vmem>>) attributes {dimension_semantics = [#tpu.dimension_semantics<parallel>], iteration_bounds = array<i64: 2>, scalar_prefetch = 0 : i64, scratch_operands = 0 : i64, tpu.core_type = #tpu.core_type<tc>, window_params = [{transform_indices = @transform_0, window_bounds = array<i64: 1, 16, 8>}, {pipeline_mode = #tpu.pipeline_mode<synchronous>, transform_indices = @transform_1, window_bounds = array<i64: 24, 64>}, {pipeline_mode = #tpu.pipeline_mode<synchronous>, transform_indices = @transform_2, window_bounds = array<i64: 1, 64>}, {pipeline_mode = #tpu.pipeline_mode<synchronous>, transform_indices = @transform_3, window_bounds = array<i64: 64, 192>}, {pipeline_mode = #tpu.pipeline_mode<synchronous>, transform_indices = @transform_4, window_bounds = array<i64: 1, 192>}, {pipeline_mode = #tpu.pipeline_mode<synchronous>, transform_indices = @transform_5, window_bounds = array<i64: 64, 64>}, {pipeline_mode = #tpu.pipeline_mode<synchronous>, transform_indices = @transform_6, window_bounds = array<i64: 1, 64>}, {pipeline_mode = #tpu.pipeline_mode<synchronous>, transform_indices = @transform_7, window_bounds = array<i64: 64, 64>}, {pipeline_mode = #tpu.pipeline_mode<synchronous>, transform_indices = @transform_8, window_bounds = array<i64: 3, 128, 128>}, {pipeline_mode = #tpu.pipeline_mode<synchronous>, transform_indices = @transform_9, window_bounds = array<i64: 3, 192, 64>}, {pipeline_mode = #tpu.pipeline_mode<synchronous>, transform_indices = @transform_10, window_bounds = array<i64: 3, 192, 64>}, {pipeline_mode = #tpu.pipeline_mode<synchronous>, transform_indices = @transform_11, window_bounds = array<i64: 3, 5, 64>}, {pipeline_mode = #tpu.pipeline_mode<synchronous>, transform_indices = @transform_12, window_bounds = array<i64: 2, 64>}, {pipeline_mode = #tpu.pipeline_mode<synchronous>, transform_indices = @transform_13, window_bounds = array<i64: 2, 1>}, {transform_indices = @transform_14, window_bounds = array<i64: 1, 2, 128>}]} {
    %c0 = arith.constant 0 : index
    %c0_0 = arith.constant 0 : index
    %0 = vector.load %arg8[%c0, %c0_0] : memref<64x64xf32, #tpu.memory_space<vmem>>, vector<64x64xf32>
    %c0_1 = arith.constant 0 : index
    %c0_2 = arith.constant 0 : index
    %c0_3 = arith.constant 0 : index
    %1 = vector.load %arg1[%c0_1, %c0_2, %c0_3] : memref<1x16x8xf32, #tpu.memory_space<vmem>>, vector<1x16x8xf32>
    %2 = vector.shape_cast %1 : vector<1x16x8xf32> to vector<16x8xf32>
    %3 = arith.truncf %2 : vector<16x8xf32> to vector<16x8xbf16>
    %c0_4 = arith.constant 0 : index
    %c0_5 = arith.constant 0 : index
    %4 = vector.load %arg2[%c0_4, %c0_5] : memref<24x64xbf16, #tpu.memory_space<vmem>>, vector<24x64xbf16>
    %c0_6 = arith.constant 0 : index
    %c0_7 = arith.constant 0 : index
    %5 = vector.load %arg3[%c0_6, %c0_7] : memref<1x64xf32, #tpu.memory_space<vmem>>, vector<1x64xf32>
    %cst = arith.constant 0.000000e+00 : bf16
    %6 = vector.broadcast %cst : bf16 to vector<1x8xbf16>
    %7 = vector.extract_strided_slice %3 {offsets = [0, 0], sizes = [15, 8], strides = [1, 1]} : vector<16x8xbf16> to vector<15x8xbf16>
    %8 = tpu.concatenate %6, %7 in 0 : vector<1x8xbf16>, vector<15x8xbf16> -> vector<16x8xbf16>
    %9 = vector.extract_strided_slice %3 {offsets = [1, 0], sizes = [15, 8], strides = [1, 1]} : vector<16x8xbf16> to vector<15x8xbf16>
    %10 = tpu.concatenate %9, %6 in 0 : vector<15x8xbf16>, vector<1x8xbf16> -> vector<16x8xbf16>
    %11 = tpu.concatenate %8, %3, %10 in 1 : vector<16x8xbf16>, vector<16x8xbf16>, vector<16x8xbf16> -> vector<16x24xbf16>
    %cst_8 = arith.constant dense<0.000000e+00> : vector<16x64xf32>
    %12 = tpu.matmul %11, %4, %cst_8 {dimension_numbers = #tpu.dot_dimension_numbers<[1], [0], [0], [1], [0, 0, 1, 1], [], []>} : vector<16x24xbf16>, vector<24x64xbf16>, vector<16x64xf32> -> vector<16x64xf32>
    %13 = vector.broadcast %5 : vector<1x64xf32> to vector<16x64xf32>
    %14 = arith.addf %12, %13 : vector<16x64xf32>
    %cst_9 = arith.constant 5.000000e-01 : f32
    %15 = vector.broadcast %cst_9 : f32 to vector<16x64xf32>
    %16 = arith.mulf %15, %14 : vector<16x64xf32>
    %cst_10 = arith.constant 0.707106769 : f32
    %17 = vector.broadcast %cst_10 : f32 to vector<16x64xf32>
    %18 = arith.mulf %14, %17 : vector<16x64xf32>
    %19 = math.erf %18 : vector<16x64xf32>
    %cst_11 = arith.constant 1.000000e+00 : f32
    %20 = vector.broadcast %cst_11 : f32 to vector<16x64xf32>
    %21 = arith.addf %20, %19 : vector<16x64xf32>
    %22 = arith.mulf %16, %21 : vector<16x64xf32>
    %c0_12 = arith.constant 0 : index
    %c0_13 = arith.constant 0 : index
    %23 = vector.load %arg4[%c0_12, %c0_13] : memref<64x192xbf16, #tpu.memory_space<vmem>>, vector<64x192xbf16>
    %c0_14 = arith.constant 0 : index
    %c0_15 = arith.constant 0 : index
    %24 = vector.load %arg5[%c0_14, %c0_15] : memref<1x192xf32, #tpu.memory_space<vmem>>, vector<1x192xf32>
    %c0_16 = arith.constant 0 : index
    %c0_17 = arith.constant 0 : index
    %25 = vector.load %arg6[%c0_16, %c0_17] : memref<64x64xbf16, #tpu.memory_space<vmem>>, vector<64x64xbf16>
    %c0_18 = arith.constant 0 : index
    %c0_19 = arith.constant 0 : index
    %26 = vector.load %arg7[%c0_18, %c0_19] : memref<1x64xf32, #tpu.memory_space<vmem>>, vector<1x64xf32>
    %27 = arith.truncf %22 : vector<16x64xf32> to vector<16x64xbf16>
    %cst_20 = arith.constant dense<0.000000e+00> : vector<16x192xf32>
    %28 = tpu.matmul %27, %23, %cst_20 {dimension_numbers = #tpu.dot_dimension_numbers<[1], [0], [0], [1], [0, 0, 1, 1], [], []>} : vector<16x64xbf16>, vector<64x192xbf16>, vector<16x192xf32> -> vector<16x192xf32>
    %29 = vector.broadcast %24 : vector<1x192xf32> to vector<16x192xf32>
    %30 = arith.addf %28, %29 : vector<16x192xf32>
    %31 = arith.truncf %30 : vector<16x192xf32> to vector<16x192xbf16>
    %32 = vector.extract_strided_slice %31 {offsets = [0, 0], sizes = [16, 16], strides = [1, 1]} : vector<16x192xbf16> to vector<16x16xbf16>
    %33 = vector.extract_strided_slice %31 {offsets = [0, 64], sizes = [16, 16], strides = [1, 1]} : vector<16x192xbf16> to vector<16x16xbf16>
    %34 = vector.extract_strided_slice %31 {offsets = [0, 128], sizes = [16, 16], strides = [1, 1]} : vector<16x192xbf16> to vector<16x16xbf16>
    %35 = tpu.transpose %33, [1, 0] : vector<16x16xbf16> -> vector<16x16xbf16>
    %cst_21 = arith.constant dense<0.000000e+00> : vector<16x16xf32>
    %36 = tpu.matmul %32, %35, %cst_21 {dimension_numbers = #tpu.dot_dimension_numbers<[1], [0], [0], [1], [0, 0, 1, 1], [], []>} : vector<16x16xbf16>, vector<16x16xbf16>, vector<16x16xf32> -> vector<16x16xf32>
    %cst_22 = arith.constant dense<0xFF800000> : vector<16xf32>
    %37 = vector.multi_reduction <maximumf>, %36, %cst_22 [1] : vector<16x16xf32> to vector<16xf32>
    %38 = vector.shape_cast %37 : vector<16xf32> to vector<16x1xf32>
    %39 = vector.broadcast %38 : vector<16x1xf32> to vector<16x16xf32>
    %40 = arith.subf %36, %39 : vector<16x16xf32>
    %41 = math.exp %40 : vector<16x16xf32>
    %cst_23 = arith.constant dense<0.000000e+00> : vector<16xf32>
    %42 = vector.multi_reduction <add>, %41, %cst_23 [1] : vector<16x16xf32> to vector<16xf32>
    %43 = vector.shape_cast %42 : vector<16xf32> to vector<16x1xf32>
    %44 = arith.truncf %41 : vector<16x16xf32> to vector<16x16xbf16>
    %cst_24 = arith.constant dense<0.000000e+00> : vector<16x16xf32>
    %45 = tpu.matmul %44, %34, %cst_24 {dimension_numbers = #tpu.dot_dimension_numbers<[1], [0], [0], [1], [0, 0, 1, 1], [], []>} : vector<16x16xbf16>, vector<16x16xbf16>, vector<16x16xf32> -> vector<16x16xf32>
    %46 = tpu.reciprocal %43 {approx = true} : vector<16x1xf32> -> vector<16x1xf32>
    %47 = vector.broadcast %46 : vector<16x1xf32> to vector<16x16xf32>
    %48 = arith.mulf %45, %47 : vector<16x16xf32>
    %49 = vector.extract_strided_slice %31 {offsets = [0, 16], sizes = [16, 16], strides = [1, 1]} : vector<16x192xbf16> to vector<16x16xbf16>
    %50 = vector.extract_strided_slice %31 {offsets = [0, 80], sizes = [16, 16], strides = [1, 1]} : vector<16x192xbf16> to vector<16x16xbf16>
    %51 = vector.extract_strided_slice %31 {offsets = [0, 144], sizes = [16, 16], strides = [1, 1]} : vector<16x192xbf16> to vector<16x16xbf16>
    %52 = tpu.transpose %50, [1, 0] : vector<16x16xbf16> -> vector<16x16xbf16>
    %cst_25 = arith.constant dense<0.000000e+00> : vector<16x16xf32>
    %53 = tpu.matmul %49, %52, %cst_25 {dimension_numbers = #tpu.dot_dimension_numbers<[1], [0], [0], [1], [0, 0, 1, 1], [], []>} : vector<16x16xbf16>, vector<16x16xbf16>, vector<16x16xf32> -> vector<16x16xf32>
    %cst_26 = arith.constant dense<0xFF800000> : vector<16xf32>
    %54 = vector.multi_reduction <maximumf>, %53, %cst_26 [1] : vector<16x16xf32> to vector<16xf32>
    %55 = vector.shape_cast %54 : vector<16xf32> to vector<16x1xf32>
    %56 = vector.broadcast %55 : vector<16x1xf32> to vector<16x16xf32>
    %57 = arith.subf %53, %56 : vector<16x16xf32>
    %58 = math.exp %57 : vector<16x16xf32>
    %cst_27 = arith.constant dense<0.000000e+00> : vector<16xf32>
    %59 = vector.multi_reduction <add>, %58, %cst_27 [1] : vector<16x16xf32> to vector<16xf32>
    %60 = vector.shape_cast %59 : vector<16xf32> to vector<16x1xf32>
    %61 = arith.truncf %58 : vector<16x16xf32> to vector<16x16xbf16>
    %cst_28 = arith.constant dense<0.000000e+00> : vector<16x16xf32>
    %62 = tpu.matmul %61, %51, %cst_28 {dimension_numbers = #tpu.dot_dimension_numbers<[1], [0], [0], [1], [0, 0, 1, 1], [], []>} : vector<16x16xbf16>, vector<16x16xbf16>, vector<16x16xf32> -> vector<16x16xf32>
    %63 = tpu.reciprocal %60 {approx = true} : vector<16x1xf32> -> vector<16x1xf32>
    %64 = vector.broadcast %63 : vector<16x1xf32> to vector<16x16xf32>
    %65 = arith.mulf %62, %64 : vector<16x16xf32>
    %66 = vector.extract_strided_slice %31 {offsets = [0, 32], sizes = [16, 16], strides = [1, 1]} : vector<16x192xbf16> to vector<16x16xbf16>
    %67 = vector.extract_strided_slice %31 {offsets = [0, 96], sizes = [16, 16], strides = [1, 1]} : vector<16x192xbf16> to vector<16x16xbf16>
    %68 = vector.extract_strided_slice %31 {offsets = [0, 160], sizes = [16, 16], strides = [1, 1]} : vector<16x192xbf16> to vector<16x16xbf16>
    %69 = tpu.transpose %67, [1, 0] : vector<16x16xbf16> -> vector<16x16xbf16>
    %cst_29 = arith.constant dense<0.000000e+00> : vector<16x16xf32>
    %70 = tpu.matmul %66, %69, %cst_29 {dimension_numbers = #tpu.dot_dimension_numbers<[1], [0], [0], [1], [0, 0, 1, 1], [], []>} : vector<16x16xbf16>, vector<16x16xbf16>, vector<16x16xf32> -> vector<16x16xf32>
    %cst_30 = arith.constant dense<0xFF800000> : vector<16xf32>
    %71 = vector.multi_reduction <maximumf>, %70, %cst_30 [1] : vector<16x16xf32> to vector<16xf32>
    %72 = vector.shape_cast %71 : vector<16xf32> to vector<16x1xf32>
    %73 = vector.broadcast %72 : vector<16x1xf32> to vector<16x16xf32>
    %74 = arith.subf %70, %73 : vector<16x16xf32>
    %75 = math.exp %74 : vector<16x16xf32>
    %cst_31 = arith.constant dense<0.000000e+00> : vector<16xf32>
    %76 = vector.multi_reduction <add>, %75, %cst_31 [1] : vector<16x16xf32> to vector<16xf32>
    %77 = vector.shape_cast %76 : vector<16xf32> to vector<16x1xf32>
    %78 = arith.truncf %75 : vector<16x16xf32> to vector<16x16xbf16>
    %cst_32 = arith.constant dense<0.000000e+00> : vector<16x16xf32>
    %79 = tpu.matmul %78, %68, %cst_32 {dimension_numbers = #tpu.dot_dimension_numbers<[1], [0], [0], [1], [0, 0, 1, 1], [], []>} : vector<16x16xbf16>, vector<16x16xbf16>, vector<16x16xf32> -> vector<16x16xf32>
    %80 = tpu.reciprocal %77 {approx = true} : vector<16x1xf32> -> vector<16x1xf32>
    %81 = vector.broadcast %80 : vector<16x1xf32> to vector<16x16xf32>
    %82 = arith.mulf %79, %81 : vector<16x16xf32>
    %83 = vector.extract_strided_slice %31 {offsets = [0, 48], sizes = [16, 16], strides = [1, 1]} : vector<16x192xbf16> to vector<16x16xbf16>
    %84 = vector.extract_strided_slice %31 {offsets = [0, 112], sizes = [16, 16], strides = [1, 1]} : vector<16x192xbf16> to vector<16x16xbf16>
    %85 = vector.extract_strided_slice %31 {offsets = [0, 176], sizes = [16, 16], strides = [1, 1]} : vector<16x192xbf16> to vector<16x16xbf16>
    %86 = tpu.transpose %84, [1, 0] : vector<16x16xbf16> -> vector<16x16xbf16>
    %cst_33 = arith.constant dense<0.000000e+00> : vector<16x16xf32>
    %87 = tpu.matmul %83, %86, %cst_33 {dimension_numbers = #tpu.dot_dimension_numbers<[1], [0], [0], [1], [0, 0, 1, 1], [], []>} : vector<16x16xbf16>, vector<16x16xbf16>, vector<16x16xf32> -> vector<16x16xf32>
    %cst_34 = arith.constant dense<0xFF800000> : vector<16xf32>
    %88 = vector.multi_reduction <maximumf>, %87, %cst_34 [1] : vector<16x16xf32> to vector<16xf32>
    %89 = vector.shape_cast %88 : vector<16xf32> to vector<16x1xf32>
    %90 = vector.broadcast %89 : vector<16x1xf32> to vector<16x16xf32>
    %91 = arith.subf %87, %90 : vector<16x16xf32>
    %92 = math.exp %91 : vector<16x16xf32>
    %cst_35 = arith.constant dense<0.000000e+00> : vector<16xf32>
    %93 = vector.multi_reduction <add>, %92, %cst_35 [1] : vector<16x16xf32> to vector<16xf32>
    %94 = vector.shape_cast %93 : vector<16xf32> to vector<16x1xf32>
    %95 = arith.truncf %92 : vector<16x16xf32> to vector<16x16xbf16>
    %cst_36 = arith.constant dense<0.000000e+00> : vector<16x16xf32>
    %96 = tpu.matmul %95, %85, %cst_36 {dimension_numbers = #tpu.dot_dimension_numbers<[1], [0], [0], [1], [0, 0, 1, 1], [], []>} : vector<16x16xbf16>, vector<16x16xbf16>, vector<16x16xf32> -> vector<16x16xf32>
    %97 = tpu.reciprocal %94 {approx = true} : vector<16x1xf32> -> vector<16x1xf32>
    %98 = vector.broadcast %97 : vector<16x1xf32> to vector<16x16xf32>
    %99 = arith.mulf %96, %98 : vector<16x16xf32>
    %100 = tpu.concatenate %48, %65, %82, %99 in 1 : vector<16x16xf32>, vector<16x16xf32>, vector<16x16xf32>, vector<16x16xf32> -> vector<16x64xf32>
    %101 = arith.truncf %100 : vector<16x64xf32> to vector<16x64xbf16>
    %cst_37 = arith.constant dense<0.000000e+00> : vector<16x64xf32>
    %102 = tpu.matmul %101, %25, %cst_37 {dimension_numbers = #tpu.dot_dimension_numbers<[1], [0], [0], [1], [0, 0, 1, 1], [], []>} : vector<16x64xbf16>, vector<64x64xbf16>, vector<16x64xf32> -> vector<16x64xf32>
    %103 = vector.broadcast %26 : vector<1x64xf32> to vector<16x64xf32>
    %104 = arith.addf %102, %103 : vector<16x64xf32>
    %105 = arith.addf %22, %104 : vector<16x64xf32>
    %c0_38 = arith.constant 0 : index
    %c0_39 = arith.constant 0 : index
    %c0_40 = arith.constant 0 : index
    %106 = vector.load %arg12[%c0_38, %c0_39, %c0_40] : memref<3x5x64xf32, #tpu.memory_space<vmem>>, vector<1x5x64xf32>
    %107 = vector.shape_cast %106 : vector<1x5x64xf32> to vector<5x64xf32>
    %108 = vector.extract_strided_slice %107 {offsets = [0, 0], sizes = [1, 64], strides = [1, 1]} : vector<5x64xf32> to vector<1x64xf32>
    %109 = vector.extract_strided_slice %107 {offsets = [1, 0], sizes = [1, 64], strides = [1, 1]} : vector<5x64xf32> to vector<1x64xf32>
    %110 = vector.extract_strided_slice %107 {offsets = [2, 0], sizes = [1, 64], strides = [1, 1]} : vector<5x64xf32> to vector<1x64xf32>
    %111 = vector.extract_strided_slice %107 {offsets = [3, 0], sizes = [1, 64], strides = [1, 1]} : vector<5x64xf32> to vector<1x64xf32>
    %112 = vector.extract_strided_slice %107 {offsets = [4, 0], sizes = [1, 64], strides = [1, 1]} : vector<5x64xf32> to vector<1x64xf32>
    %c0_41 = arith.constant 0 : index
    %c0_42 = arith.constant 0 : index
    %c0_43 = arith.constant 0 : index
    %113 = vector.load %arg9[%c0_41, %c0_42, %c0_43] : memref<3x128x128xbf16, #tpu.memory_space<vmem>>, vector<1x128x128xbf16>
    %114 = vector.shape_cast %113 : vector<1x128x128xbf16> to vector<128x128xbf16>
    %115 = arith.truncf %105 : vector<16x64xf32> to vector<16x64xbf16>
    %cst_44 = arith.constant 0.000000e+00 : bf16
    %116 = vector.broadcast %cst_44 : bf16 to vector<1x64xbf16>
    %117 = vector.extract_strided_slice %115 {offsets = [1, 0], sizes = [15, 64], strides = [1, 1]} : vector<16x64xbf16> to vector<15x64xbf16>
    %118 = tpu.concatenate %117, %116 in 0 : vector<15x64xbf16>, vector<1x64xbf16> -> vector<16x64xbf16>
    %119 = tpu.concatenate %115, %118 in 1 : vector<16x64xbf16>, vector<16x64xbf16> -> vector<16x128xbf16>
    %cst_45 = arith.constant dense<0.000000e+00> : vector<16x128xf32>
    %120 = tpu.matmul %119, %114, %cst_45 {dimension_numbers = #tpu.dot_dimension_numbers<[1], [0], [0], [1], [0, 0, 1, 1], [], []>} : vector<16x128xbf16>, vector<128x128xbf16>, vector<16x128xf32> -> vector<16x128xf32>
    %121 = vector.extract_strided_slice %120 {offsets = [0, 0], sizes = [16, 64], strides = [1, 1]} : vector<16x128xf32> to vector<16x64xf32>
    %122 = vector.extract_strided_slice %120 {offsets = [0, 64], sizes = [16, 64], strides = [1, 1]} : vector<16x128xf32> to vector<16x64xf32>
    %123 = vector.shape_cast %121 : vector<16x64xf32> to vector<16x1x64xf32>
    %124 = vector.shape_cast %122 : vector<16x64xf32> to vector<16x1x64xf32>
    %125 = tpu.concatenate %123, %124 in 1 : vector<16x1x64xf32>, vector<16x1x64xf32> -> vector<16x2x64xf32>
    %126 = vector.shape_cast %125 : vector<16x2x64xf32> to vector<32x64xf32>
    %127 = vector.broadcast %108 : vector<1x64xf32> to vector<32x64xf32>
    %128 = arith.addf %126, %127 : vector<32x64xf32>
    %cst_46 = arith.constant 5.000000e-01 : f32
    %129 = vector.broadcast %cst_46 : f32 to vector<32x64xf32>
    %130 = arith.mulf %129, %128 : vector<32x64xf32>
    %cst_47 = arith.constant 0.707106769 : f32
    %131 = vector.broadcast %cst_47 : f32 to vector<32x64xf32>
    %132 = arith.mulf %128, %131 : vector<32x64xf32>
    %133 = math.erf %132 : vector<32x64xf32>
    %cst_48 = arith.constant 1.000000e+00 : f32
    %134 = vector.broadcast %cst_48 : f32 to vector<32x64xf32>
    %135 = arith.addf %134, %133 : vector<32x64xf32>
    %136 = arith.mulf %130, %135 : vector<32x64xf32>
    %137 = arith.truncf %136 : vector<32x64xf32> to vector<32x64xbf16>
    %c0_49 = arith.constant 0 : index
    %c0_50 = arith.constant 0 : index
    %c0_51 = arith.constant 0 : index
    %138 = vector.load %arg10[%c0_49, %c0_50, %c0_51] : memref<3x192x64xbf16, #tpu.memory_space<vmem>>, vector<1x192x64xbf16>
    %139 = vector.shape_cast %138 : vector<1x192x64xbf16> to vector<192x64xbf16>
    %cst_52 = arith.constant 0.000000e+00 : bf16
    %140 = vector.broadcast %cst_52 : bf16 to vector<1x64xbf16>
    %141 = vector.extract_strided_slice %137 {offsets = [0, 0], sizes = [31, 64], strides = [1, 1]} : vector<32x64xbf16> to vector<31x64xbf16>
    %142 = tpu.concatenate %140, %141 in 0 : vector<1x64xbf16>, vector<31x64xbf16> -> vector<32x64xbf16>
    %143 = vector.extract_strided_slice %137 {offsets = [1, 0], sizes = [31, 64], strides = [1, 1]} : vector<32x64xbf16> to vector<31x64xbf16>
    %144 = tpu.concatenate %143, %140 in 0 : vector<31x64xbf16>, vector<1x64xbf16> -> vector<32x64xbf16>
    %145 = tpu.concatenate %142, %137, %144 in 1 : vector<32x64xbf16>, vector<32x64xbf16>, vector<32x64xbf16> -> vector<32x192xbf16>
    %cst_53 = arith.constant dense<0.000000e+00> : vector<32x64xf32>
    %146 = tpu.matmul %145, %139, %cst_53 {dimension_numbers = #tpu.dot_dimension_numbers<[1], [0], [0], [1], [0, 0, 1, 1], [], []>} : vector<32x192xbf16>, vector<192x64xbf16>, vector<32x64xf32> -> vector<32x64xf32>
    %147 = vector.broadcast %109 : vector<1x64xf32> to vector<32x64xf32>
    %148 = arith.addf %146, %147 : vector<32x64xf32>
    %149 = arith.addf %148, %136 : vector<32x64xf32>
    %cst_54 = arith.constant dense<0.000000e+00> : vector<64xf32>
    %150 = vector.multi_reduction <add>, %149, %cst_54 [0] : vector<32x64xf32> to vector<64xf32>
    %151 = vector.shape_cast %150 : vector<64xf32> to vector<1x64xf32>
    %cst_55 = arith.constant 3.200000e+01 : f32
    %152 = vector.broadcast %cst_55 : f32 to vector<1x64xf32>
    %153 = arith.divf %151, %152 : vector<1x64xf32>
    %cst_56 = arith.constant dense<0.000000e+00> : vector<1x64xf32>
    %154 = tpu.matmul %153, %0, %cst_56 {dimension_numbers = #tpu.dot_dimension_numbers<[1], [0], [0], [1], [0, 0, 1, 1], [], []>} : vector<1x64xf32>, vector<64x64xf32>, vector<1x64xf32> -> vector<1x64xf32>
    %155 = vector.broadcast %154 : vector<1x64xf32> to vector<32x64xf32>
    %156 = arith.subf %149, %155 : vector<32x64xf32>
    %157 = arith.mulf %156, %156 : vector<32x64xf32>
    %cst_57 = arith.constant dense<0.000000e+00> : vector<64xf32>
    %158 = vector.multi_reduction <add>, %157, %cst_57 [0] : vector<32x64xf32> to vector<64xf32>
    %159 = vector.shape_cast %158 : vector<64xf32> to vector<1x64xf32>
    %cst_58 = arith.constant 3.200000e+01 : f32
    %160 = vector.broadcast %cst_58 : f32 to vector<1x64xf32>
    %161 = arith.divf %159, %160 : vector<1x64xf32>
    %cst_59 = arith.constant dense<0.000000e+00> : vector<1x64xf32>
    %162 = tpu.matmul %161, %0, %cst_59 {dimension_numbers = #tpu.dot_dimension_numbers<[1], [0], [0], [1], [0, 0, 1, 1], [], []>} : vector<1x64xf32>, vector<64x64xf32>, vector<1x64xf32> -> vector<1x64xf32>
    %cst_60 = arith.constant 9.99999974E-6 : f32
    %163 = vector.broadcast %cst_60 : f32 to vector<1x64xf32>
    %164 = arith.addf %162, %163 : vector<1x64xf32>
    %165 = math.rsqrt %164 : vector<1x64xf32>
    %166 = vector.broadcast %165 : vector<1x64xf32> to vector<32x64xf32>
    %167 = arith.mulf %156, %166 : vector<32x64xf32>
    %168 = vector.broadcast %110 : vector<1x64xf32> to vector<32x64xf32>
    %169 = arith.mulf %167, %168 : vector<32x64xf32>
    %170 = vector.broadcast %111 : vector<1x64xf32> to vector<32x64xf32>
    %171 = arith.addf %169, %170 : vector<32x64xf32>
    %cst_61 = arith.constant 5.000000e-01 : f32
    %172 = vector.broadcast %cst_61 : f32 to vector<32x64xf32>
    %173 = arith.mulf %172, %171 : vector<32x64xf32>
    %cst_62 = arith.constant 0.707106769 : f32
    %174 = vector.broadcast %cst_62 : f32 to vector<32x64xf32>
    %175 = arith.mulf %171, %174 : vector<32x64xf32>
    %176 = math.erf %175 : vector<32x64xf32>
    %cst_63 = arith.constant 1.000000e+00 : f32
    %177 = vector.broadcast %cst_63 : f32 to vector<32x64xf32>
    %178 = arith.addf %177, %176 : vector<32x64xf32>
    %179 = arith.mulf %173, %178 : vector<32x64xf32>
    %180 = arith.truncf %179 : vector<32x64xf32> to vector<32x64xbf16>
    %c0_64 = arith.constant 0 : index
    %c0_65 = arith.constant 0 : index
    %c0_66 = arith.constant 0 : index
    %181 = vector.load %arg11[%c0_64, %c0_65, %c0_66] : memref<3x192x64xbf16, #tpu.memory_space<vmem>>, vector<1x192x64xbf16>
    %182 = vector.shape_cast %181 : vector<1x192x64xbf16> to vector<192x64xbf16>
    %cst_67 = arith.constant 0.000000e+00 : bf16
    %183 = vector.broadcast %cst_67 : bf16 to vector<1x64xbf16>
    %184 = vector.extract_strided_slice %180 {offsets = [0, 0], sizes = [31, 64], strides = [1, 1]} : vector<32x64xbf16> to vector<31x64xbf16>
    %185 = tpu.concatenate %183, %184 in 0 : vector<1x64xbf16>, vector<31x64xbf16> -> vector<32x64xbf16>
    %186 = vector.extract_strided_slice %180 {offsets = [1, 0], sizes = [31, 64], strides = [1, 1]} : vector<32x64xbf16> to vector<31x64xbf16>
    %187 = tpu.concatenate %186, %183 in 0 : vector<31x64xbf16>, vector<1x64xbf16> -> vector<32x64xbf16>
    %188 = tpu.concatenate %185, %180, %187 in 1 : vector<32x64xbf16>, vector<32x64xbf16>, vector<32x64xbf16> -> vector<32x192xbf16>
    %cst_68 = arith.constant dense<0.000000e+00> : vector<32x64xf32>
    %189 = tpu.matmul %188, %182, %cst_68 {dimension_numbers = #tpu.dot_dimension_numbers<[1], [0], [0], [1], [0, 0, 1, 1], [], []>} : vector<32x192xbf16>, vector<192x64xbf16>, vector<32x64xf32> -> vector<32x64xf32>
    %190 = vector.broadcast %112 : vector<1x64xf32> to vector<32x64xf32>
    %191 = arith.addf %189, %190 : vector<32x64xf32>
    %cst_69 = arith.constant 5.000000e-01 : f32
    %192 = vector.broadcast %cst_69 : f32 to vector<32x64xf32>
    %193 = arith.mulf %192, %191 : vector<32x64xf32>
    %cst_70 = arith.constant 0.707106769 : f32
    %194 = vector.broadcast %cst_70 : f32 to vector<32x64xf32>
    %195 = arith.mulf %191, %194 : vector<32x64xf32>
    %196 = math.erf %195 : vector<32x64xf32>
    %cst_71 = arith.constant 1.000000e+00 : f32
    %197 = vector.broadcast %cst_71 : f32 to vector<32x64xf32>
    %198 = arith.addf %197, %196 : vector<32x64xf32>
    %199 = arith.mulf %193, %198 : vector<32x64xf32>
    %c1 = arith.constant 1 : index
    %c0_72 = arith.constant 0 : index
    %c0_73 = arith.constant 0 : index
    %200 = vector.load %arg12[%c1, %c0_72, %c0_73] : memref<3x5x64xf32, #tpu.memory_space<vmem>>, vector<1x5x64xf32>
    %201 = vector.shape_cast %200 : vector<1x5x64xf32> to vector<5x64xf32>
    %202 = vector.extract_strided_slice %201 {offsets = [0, 0], sizes = [1, 64], strides = [1, 1]} : vector<5x64xf32> to vector<1x64xf32>
    %203 = vector.extract_strided_slice %201 {offsets = [1, 0], sizes = [1, 64], strides = [1, 1]} : vector<5x64xf32> to vector<1x64xf32>
    %204 = vector.extract_strided_slice %201 {offsets = [2, 0], sizes = [1, 64], strides = [1, 1]} : vector<5x64xf32> to vector<1x64xf32>
    %205 = vector.extract_strided_slice %201 {offsets = [3, 0], sizes = [1, 64], strides = [1, 1]} : vector<5x64xf32> to vector<1x64xf32>
    %206 = vector.extract_strided_slice %201 {offsets = [4, 0], sizes = [1, 64], strides = [1, 1]} : vector<5x64xf32> to vector<1x64xf32>
    %c1_74 = arith.constant 1 : index
    %c0_75 = arith.constant 0 : index
    %c0_76 = arith.constant 0 : index
    %207 = vector.load %arg9[%c1_74, %c0_75, %c0_76] : memref<3x128x128xbf16, #tpu.memory_space<vmem>>, vector<1x128x128xbf16>
    %208 = vector.shape_cast %207 : vector<1x128x128xbf16> to vector<128x128xbf16>
    %209 = arith.truncf %199 : vector<32x64xf32> to vector<32x64xbf16>
    %cst_77 = arith.constant 0.000000e+00 : bf16
    %210 = vector.broadcast %cst_77 : bf16 to vector<1x64xbf16>
    %211 = vector.extract_strided_slice %209 {offsets = [1, 0], sizes = [31, 64], strides = [1, 1]} : vector<32x64xbf16> to vector<31x64xbf16>
    %212 = tpu.concatenate %211, %210 in 0 : vector<31x64xbf16>, vector<1x64xbf16> -> vector<32x64xbf16>
    %213 = tpu.concatenate %209, %212 in 1 : vector<32x64xbf16>, vector<32x64xbf16> -> vector<32x128xbf16>
    %cst_78 = arith.constant dense<0.000000e+00> : vector<32x128xf32>
    %214 = tpu.matmul %213, %208, %cst_78 {dimension_numbers = #tpu.dot_dimension_numbers<[1], [0], [0], [1], [0, 0, 1, 1], [], []>} : vector<32x128xbf16>, vector<128x128xbf16>, vector<32x128xf32> -> vector<32x128xf32>
    %215 = vector.extract_strided_slice %214 {offsets = [0, 0], sizes = [32, 64], strides = [1, 1]} : vector<32x128xf32> to vector<32x64xf32>
    %216 = vector.extract_strided_slice %214 {offsets = [0, 64], sizes = [32, 64], strides = [1, 1]} : vector<32x128xf32> to vector<32x64xf32>
    %217 = vector.shape_cast %215 : vector<32x64xf32> to vector<32x1x64xf32>
    %218 = vector.shape_cast %216 : vector<32x64xf32> to vector<32x1x64xf32>
    %219 = tpu.concatenate %217, %218 in 1 : vector<32x1x64xf32>, vector<32x1x64xf32> -> vector<32x2x64xf32>
    %220 = vector.shape_cast %219 : vector<32x2x64xf32> to vector<64x64xf32>
    %221 = vector.broadcast %202 : vector<1x64xf32> to vector<64x64xf32>
    %222 = arith.addf %220, %221 : vector<64x64xf32>
    %cst_79 = arith.constant 5.000000e-01 : f32
    %223 = vector.broadcast %cst_79 : f32 to vector<64x64xf32>
    %224 = arith.mulf %223, %222 : vector<64x64xf32>
    %cst_80 = arith.constant 0.707106769 : f32
    %225 = vector.broadcast %cst_80 : f32 to vector<64x64xf32>
    %226 = arith.mulf %222, %225 : vector<64x64xf32>
    %227 = math.erf %226 : vector<64x64xf32>
    %cst_81 = arith.constant 1.000000e+00 : f32
    %228 = vector.broadcast %cst_81 : f32 to vector<64x64xf32>
    %229 = arith.addf %228, %227 : vector<64x64xf32>
    %230 = arith.mulf %224, %229 : vector<64x64xf32>
    %231 = arith.truncf %230 : vector<64x64xf32> to vector<64x64xbf16>
    %c1_82 = arith.constant 1 : index
    %c0_83 = arith.constant 0 : index
    %c0_84 = arith.constant 0 : index
    %232 = vector.load %arg10[%c1_82, %c0_83, %c0_84] : memref<3x192x64xbf16, #tpu.memory_space<vmem>>, vector<1x192x64xbf16>
    %233 = vector.shape_cast %232 : vector<1x192x64xbf16> to vector<192x64xbf16>
    %cst_85 = arith.constant 0.000000e+00 : bf16
    %234 = vector.broadcast %cst_85 : bf16 to vector<1x64xbf16>
    %235 = vector.extract_strided_slice %231 {offsets = [0, 0], sizes = [63, 64], strides = [1, 1]} : vector<64x64xbf16> to vector<63x64xbf16>
    %236 = tpu.concatenate %234, %235 in 0 : vector<1x64xbf16>, vector<63x64xbf16> -> vector<64x64xbf16>
    %237 = vector.extract_strided_slice %231 {offsets = [1, 0], sizes = [63, 64], strides = [1, 1]} : vector<64x64xbf16> to vector<63x64xbf16>
    %238 = tpu.concatenate %237, %234 in 0 : vector<63x64xbf16>, vector<1x64xbf16> -> vector<64x64xbf16>
    %239 = tpu.concatenate %236, %231, %238 in 1 : vector<64x64xbf16>, vector<64x64xbf16>, vector<64x64xbf16> -> vector<64x192xbf16>
    %cst_86 = arith.constant dense<0.000000e+00> : vector<64x64xf32>
    %240 = tpu.matmul %239, %233, %cst_86 {dimension_numbers = #tpu.dot_dimension_numbers<[1], [0], [0], [1], [0, 0, 1, 1], [], []>} : vector<64x192xbf16>, vector<192x64xbf16>, vector<64x64xf32> -> vector<64x64xf32>
    %241 = vector.broadcast %203 : vector<1x64xf32> to vector<64x64xf32>
    %242 = arith.addf %240, %241 : vector<64x64xf32>
    %243 = arith.addf %242, %230 : vector<64x64xf32>
    %cst_87 = arith.constant dense<0.000000e+00> : vector<64xf32>
    %244 = vector.multi_reduction <add>, %243, %cst_87 [0] : vector<64x64xf32> to vector<64xf32>
    %245 = vector.shape_cast %244 : vector<64xf32> to vector<1x64xf32>
    %cst_88 = arith.constant 6.400000e+01 : f32
    %246 = vector.broadcast %cst_88 : f32 to vector<1x64xf32>
    %247 = arith.divf %245, %246 : vector<1x64xf32>
    %cst_89 = arith.constant dense<0.000000e+00> : vector<1x64xf32>
    %248 = tpu.matmul %247, %0, %cst_89 {dimension_numbers = #tpu.dot_dimension_numbers<[1], [0], [0], [1], [0, 0, 1, 1], [], []>} : vector<1x64xf32>, vector<64x64xf32>, vector<1x64xf32> -> vector<1x64xf32>
    %249 = vector.broadcast %248 : vector<1x64xf32> to vector<64x64xf32>
    %250 = arith.subf %243, %249 : vector<64x64xf32>
    %251 = arith.mulf %250, %250 : vector<64x64xf32>
    %cst_90 = arith.constant dense<0.000000e+00> : vector<64xf32>
    %252 = vector.multi_reduction <add>, %251, %cst_90 [0] : vector<64x64xf32> to vector<64xf32>
    %253 = vector.shape_cast %252 : vector<64xf32> to vector<1x64xf32>
    %cst_91 = arith.constant 6.400000e+01 : f32
    %254 = vector.broadcast %cst_91 : f32 to vector<1x64xf32>
    %255 = arith.divf %253, %254 : vector<1x64xf32>
    %cst_92 = arith.constant dense<0.000000e+00> : vector<1x64xf32>
    %256 = tpu.matmul %255, %0, %cst_92 {dimension_numbers = #tpu.dot_dimension_numbers<[1], [0], [0], [1], [0, 0, 1, 1], [], []>} : vector<1x64xf32>, vector<64x64xf32>, vector<1x64xf32> -> vector<1x64xf32>
    %cst_93 = arith.constant 9.99999974E-6 : f32
    %257 = vector.broadcast %cst_93 : f32 to vector<1x64xf32>
    %258 = arith.addf %256, %257 : vector<1x64xf32>
    %259 = math.rsqrt %258 : vector<1x64xf32>
    %260 = vector.broadcast %259 : vector<1x64xf32> to vector<64x64xf32>
    %261 = arith.mulf %250, %260 : vector<64x64xf32>
    %262 = vector.broadcast %204 : vector<1x64xf32> to vector<64x64xf32>
    %263 = arith.mulf %261, %262 : vector<64x64xf32>
    %264 = vector.broadcast %205 : vector<1x64xf32> to vector<64x64xf32>
    %265 = arith.addf %263, %264 : vector<64x64xf32>
    %cst_94 = arith.constant 5.000000e-01 : f32
    %266 = vector.broadcast %cst_94 : f32 to vector<64x64xf32>
    %267 = arith.mulf %266, %265 : vector<64x64xf32>
    %cst_95 = arith.constant 0.707106769 : f32
    %268 = vector.broadcast %cst_95 : f32 to vector<64x64xf32>
    %269 = arith.mulf %265, %268 : vector<64x64xf32>
    %270 = math.erf %269 : vector<64x64xf32>
    %cst_96 = arith.constant 1.000000e+00 : f32
    %271 = vector.broadcast %cst_96 : f32 to vector<64x64xf32>
    %272 = arith.addf %271, %270 : vector<64x64xf32>
    %273 = arith.mulf %267, %272 : vector<64x64xf32>
    %274 = arith.truncf %273 : vector<64x64xf32> to vector<64x64xbf16>
    %c1_97 = arith.constant 1 : index
    %c0_98 = arith.constant 0 : index
    %c0_99 = arith.constant 0 : index
    %275 = vector.load %arg11[%c1_97, %c0_98, %c0_99] : memref<3x192x64xbf16, #tpu.memory_space<vmem>>, vector<1x192x64xbf16>
    %276 = vector.shape_cast %275 : vector<1x192x64xbf16> to vector<192x64xbf16>
    %cst_100 = arith.constant 0.000000e+00 : bf16
    %277 = vector.broadcast %cst_100 : bf16 to vector<1x64xbf16>
    %278 = vector.extract_strided_slice %274 {offsets = [0, 0], sizes = [63, 64], strides = [1, 1]} : vector<64x64xbf16> to vector<63x64xbf16>
    %279 = tpu.concatenate %277, %278 in 0 : vector<1x64xbf16>, vector<63x64xbf16> -> vector<64x64xbf16>
    %280 = vector.extract_strided_slice %274 {offsets = [1, 0], sizes = [63, 64], strides = [1, 1]} : vector<64x64xbf16> to vector<63x64xbf16>
    %281 = tpu.concatenate %280, %277 in 0 : vector<63x64xbf16>, vector<1x64xbf16> -> vector<64x64xbf16>
    %282 = tpu.concatenate %279, %274, %281 in 1 : vector<64x64xbf16>, vector<64x64xbf16>, vector<64x64xbf16> -> vector<64x192xbf16>
    %cst_101 = arith.constant dense<0.000000e+00> : vector<64x64xf32>
    %283 = tpu.matmul %282, %276, %cst_101 {dimension_numbers = #tpu.dot_dimension_numbers<[1], [0], [0], [1], [0, 0, 1, 1], [], []>} : vector<64x192xbf16>, vector<192x64xbf16>, vector<64x64xf32> -> vector<64x64xf32>
    %284 = vector.broadcast %206 : vector<1x64xf32> to vector<64x64xf32>
    %285 = arith.addf %283, %284 : vector<64x64xf32>
    %cst_102 = arith.constant 5.000000e-01 : f32
    %286 = vector.broadcast %cst_102 : f32 to vector<64x64xf32>
    %287 = arith.mulf %286, %285 : vector<64x64xf32>
    %cst_103 = arith.constant 0.707106769 : f32
    %288 = vector.broadcast %cst_103 : f32 to vector<64x64xf32>
    %289 = arith.mulf %285, %288 : vector<64x64xf32>
    %290 = math.erf %289 : vector<64x64xf32>
    %cst_104 = arith.constant 1.000000e+00 : f32
    %291 = vector.broadcast %cst_104 : f32 to vector<64x64xf32>
    %292 = arith.addf %291, %290 : vector<64x64xf32>
    %293 = arith.mulf %287, %292 : vector<64x64xf32>
    %c2 = arith.constant 2 : index
    %c0_105 = arith.constant 0 : index
    %c0_106 = arith.constant 0 : index
    %294 = vector.load %arg12[%c2, %c0_105, %c0_106] : memref<3x5x64xf32, #tpu.memory_space<vmem>>, vector<1x5x64xf32>
    %295 = vector.shape_cast %294 : vector<1x5x64xf32> to vector<5x64xf32>
    %296 = vector.extract_strided_slice %295 {offsets = [0, 0], sizes = [1, 64], strides = [1, 1]} : vector<5x64xf32> to vector<1x64xf32>
    %297 = vector.extract_strided_slice %295 {offsets = [1, 0], sizes = [1, 64], strides = [1, 1]} : vector<5x64xf32> to vector<1x64xf32>
    %298 = vector.extract_strided_slice %295 {offsets = [2, 0], sizes = [1, 64], strides = [1, 1]} : vector<5x64xf32> to vector<1x64xf32>
    %299 = vector.extract_strided_slice %295 {offsets = [3, 0], sizes = [1, 64], strides = [1, 1]} : vector<5x64xf32> to vector<1x64xf32>
    %300 = vector.extract_strided_slice %295 {offsets = [4, 0], sizes = [1, 64], strides = [1, 1]} : vector<5x64xf32> to vector<1x64xf32>
    %c2_107 = arith.constant 2 : index
    %c0_108 = arith.constant 0 : index
    %c0_109 = arith.constant 0 : index
    %301 = vector.load %arg9[%c2_107, %c0_108, %c0_109] : memref<3x128x128xbf16, #tpu.memory_space<vmem>>, vector<1x128x128xbf16>
    %302 = vector.shape_cast %301 : vector<1x128x128xbf16> to vector<128x128xbf16>
    %303 = arith.truncf %293 : vector<64x64xf32> to vector<64x64xbf16>
    %cst_110 = arith.constant 0.000000e+00 : bf16
    %304 = vector.broadcast %cst_110 : bf16 to vector<1x64xbf16>
    %305 = vector.extract_strided_slice %303 {offsets = [1, 0], sizes = [63, 64], strides = [1, 1]} : vector<64x64xbf16> to vector<63x64xbf16>
    %306 = tpu.concatenate %305, %304 in 0 : vector<63x64xbf16>, vector<1x64xbf16> -> vector<64x64xbf16>
    %307 = tpu.concatenate %303, %306 in 1 : vector<64x64xbf16>, vector<64x64xbf16> -> vector<64x128xbf16>
    %cst_111 = arith.constant dense<0.000000e+00> : vector<64x128xf32>
    %308 = tpu.matmul %307, %302, %cst_111 {dimension_numbers = #tpu.dot_dimension_numbers<[1], [0], [0], [1], [0, 0, 1, 1], [], []>} : vector<64x128xbf16>, vector<128x128xbf16>, vector<64x128xf32> -> vector<64x128xf32>
    %309 = vector.extract_strided_slice %308 {offsets = [0, 0], sizes = [64, 64], strides = [1, 1]} : vector<64x128xf32> to vector<64x64xf32>
    %310 = vector.extract_strided_slice %308 {offsets = [0, 64], sizes = [64, 64], strides = [1, 1]} : vector<64x128xf32> to vector<64x64xf32>
    %311 = vector.shape_cast %309 : vector<64x64xf32> to vector<64x1x64xf32>
    %312 = vector.shape_cast %310 : vector<64x64xf32> to vector<64x1x64xf32>
    %313 = tpu.concatenate %311, %312 in 1 : vector<64x1x64xf32>, vector<64x1x64xf32> -> vector<64x2x64xf32>
    %314 = vector.shape_cast %313 : vector<64x2x64xf32> to vector<128x64xf32>
    %315 = vector.broadcast %296 : vector<1x64xf32> to vector<128x64xf32>
    %316 = arith.addf %314, %315 : vector<128x64xf32>
    %cst_112 = arith.constant 5.000000e-01 : f32
    %317 = vector.broadcast %cst_112 : f32 to vector<128x64xf32>
    %318 = arith.mulf %317, %316 : vector<128x64xf32>
    %cst_113 = arith.constant 0.707106769 : f32
    %319 = vector.broadcast %cst_113 : f32 to vector<128x64xf32>
    %320 = arith.mulf %316, %319 : vector<128x64xf32>
    %321 = math.erf %320 : vector<128x64xf32>
    %cst_114 = arith.constant 1.000000e+00 : f32
    %322 = vector.broadcast %cst_114 : f32 to vector<128x64xf32>
    %323 = arith.addf %322, %321 : vector<128x64xf32>
    %324 = arith.mulf %318, %323 : vector<128x64xf32>
    %325 = arith.truncf %324 : vector<128x64xf32> to vector<128x64xbf16>
    %c2_115 = arith.constant 2 : index
    %c0_116 = arith.constant 0 : index
    %c0_117 = arith.constant 0 : index
    %326 = vector.load %arg10[%c2_115, %c0_116, %c0_117] : memref<3x192x64xbf16, #tpu.memory_space<vmem>>, vector<1x192x64xbf16>
    %327 = vector.shape_cast %326 : vector<1x192x64xbf16> to vector<192x64xbf16>
    %cst_118 = arith.constant 0.000000e+00 : bf16
    %328 = vector.broadcast %cst_118 : bf16 to vector<1x64xbf16>
    %329 = vector.extract_strided_slice %325 {offsets = [0, 0], sizes = [127, 64], strides = [1, 1]} : vector<128x64xbf16> to vector<127x64xbf16>
    %330 = tpu.concatenate %328, %329 in 0 : vector<1x64xbf16>, vector<127x64xbf16> -> vector<128x64xbf16>
    %331 = vector.extract_strided_slice %325 {offsets = [1, 0], sizes = [127, 64], strides = [1, 1]} : vector<128x64xbf16> to vector<127x64xbf16>
    %332 = tpu.concatenate %331, %328 in 0 : vector<127x64xbf16>, vector<1x64xbf16> -> vector<128x64xbf16>
    %333 = tpu.concatenate %330, %325, %332 in 1 : vector<128x64xbf16>, vector<128x64xbf16>, vector<128x64xbf16> -> vector<128x192xbf16>
    %cst_119 = arith.constant dense<0.000000e+00> : vector<128x64xf32>
    %334 = tpu.matmul %333, %327, %cst_119 {dimension_numbers = #tpu.dot_dimension_numbers<[1], [0], [0], [1], [0, 0, 1, 1], [], []>} : vector<128x192xbf16>, vector<192x64xbf16>, vector<128x64xf32> -> vector<128x64xf32>
    %335 = vector.broadcast %297 : vector<1x64xf32> to vector<128x64xf32>
    %336 = arith.addf %334, %335 : vector<128x64xf32>
    %337 = arith.addf %336, %324 : vector<128x64xf32>
    %cst_120 = arith.constant dense<0.000000e+00> : vector<64xf32>
    %338 = vector.multi_reduction <add>, %337, %cst_120 [0] : vector<128x64xf32> to vector<64xf32>
    %339 = vector.shape_cast %338 : vector<64xf32> to vector<1x64xf32>
    %cst_121 = arith.constant 1.280000e+02 : f32
    %340 = vector.broadcast %cst_121 : f32 to vector<1x64xf32>
    %341 = arith.divf %339, %340 : vector<1x64xf32>
    %cst_122 = arith.constant dense<0.000000e+00> : vector<1x64xf32>
    %342 = tpu.matmul %341, %0, %cst_122 {dimension_numbers = #tpu.dot_dimension_numbers<[1], [0], [0], [1], [0, 0, 1, 1], [], []>} : vector<1x64xf32>, vector<64x64xf32>, vector<1x64xf32> -> vector<1x64xf32>
    %343 = vector.broadcast %342 : vector<1x64xf32> to vector<128x64xf32>
    %344 = arith.subf %337, %343 : vector<128x64xf32>
    %345 = arith.mulf %344, %344 : vector<128x64xf32>
    %cst_123 = arith.constant dense<0.000000e+00> : vector<64xf32>
    %346 = vector.multi_reduction <add>, %345, %cst_123 [0] : vector<128x64xf32> to vector<64xf32>
    %347 = vector.shape_cast %346 : vector<64xf32> to vector<1x64xf32>
    %cst_124 = arith.constant 1.280000e+02 : f32
    %348 = vector.broadcast %cst_124 : f32 to vector<1x64xf32>
    %349 = arith.divf %347, %348 : vector<1x64xf32>
    %cst_125 = arith.constant dense<0.000000e+00> : vector<1x64xf32>
    %350 = tpu.matmul %349, %0, %cst_125 {dimension_numbers = #tpu.dot_dimension_numbers<[1], [0], [0], [1], [0, 0, 1, 1], [], []>} : vector<1x64xf32>, vector<64x64xf32>, vector<1x64xf32> -> vector<1x64xf32>
    %cst_126 = arith.constant 9.99999974E-6 : f32
    %351 = vector.broadcast %cst_126 : f32 to vector<1x64xf32>
    %352 = arith.addf %350, %351 : vector<1x64xf32>
    %353 = math.rsqrt %352 : vector<1x64xf32>
    %354 = vector.broadcast %353 : vector<1x64xf32> to vector<128x64xf32>
    %355 = arith.mulf %344, %354 : vector<128x64xf32>
    %356 = vector.broadcast %298 : vector<1x64xf32> to vector<128x64xf32>
    %357 = arith.mulf %355, %356 : vector<128x64xf32>
    %358 = vector.broadcast %299 : vector<1x64xf32> to vector<128x64xf32>
    %359 = arith.addf %357, %358 : vector<128x64xf32>
    %cst_127 = arith.constant 5.000000e-01 : f32
    %360 = vector.broadcast %cst_127 : f32 to vector<128x64xf32>
    %361 = arith.mulf %360, %359 : vector<128x64xf32>
    %cst_128 = arith.constant 0.707106769 : f32
    %362 = vector.broadcast %cst_128 : f32 to vector<128x64xf32>
    %363 = arith.mulf %359, %362 : vector<128x64xf32>
    %364 = math.erf %363 : vector<128x64xf32>
    %cst_129 = arith.constant 1.000000e+00 : f32
    %365 = vector.broadcast %cst_129 : f32 to vector<128x64xf32>
    %366 = arith.addf %365, %364 : vector<128x64xf32>
    %367 = arith.mulf %361, %366 : vector<128x64xf32>
    %368 = arith.truncf %367 : vector<128x64xf32> to vector<128x64xbf16>
    %c2_130 = arith.constant 2 : index
    %c0_131 = arith.constant 0 : index
    %c0_132 = arith.constant 0 : index
    %369 = vector.load %arg11[%c2_130, %c0_131, %c0_132] : memref<3x192x64xbf16, #tpu.memory_space<vmem>>, vector<1x192x64xbf16>
    %370 = vector.shape_cast %369 : vector<1x192x64xbf16> to vector<192x64xbf16>
    %cst_133 = arith.constant 0.000000e+00 : bf16
    %371 = vector.broadcast %cst_133 : bf16 to vector<1x64xbf16>
    %372 = vector.extract_strided_slice %368 {offsets = [0, 0], sizes = [127, 64], strides = [1, 1]} : vector<128x64xbf16> to vector<127x64xbf16>
    %373 = tpu.concatenate %371, %372 in 0 : vector<1x64xbf16>, vector<127x64xbf16> -> vector<128x64xbf16>
    %374 = vector.extract_strided_slice %368 {offsets = [1, 0], sizes = [127, 64], strides = [1, 1]} : vector<128x64xbf16> to vector<127x64xbf16>
    %375 = tpu.concatenate %374, %371 in 0 : vector<127x64xbf16>, vector<1x64xbf16> -> vector<128x64xbf16>
    %376 = tpu.concatenate %373, %368, %375 in 1 : vector<128x64xbf16>, vector<128x64xbf16>, vector<128x64xbf16> -> vector<128x192xbf16>
    %cst_134 = arith.constant dense<0.000000e+00> : vector<128x64xf32>
    %377 = tpu.matmul %376, %370, %cst_134 {dimension_numbers = #tpu.dot_dimension_numbers<[1], [0], [0], [1], [0, 0, 1, 1], [], []>} : vector<128x192xbf16>, vector<192x64xbf16>, vector<128x64xf32> -> vector<128x64xf32>
    %378 = vector.broadcast %300 : vector<1x64xf32> to vector<128x64xf32>
    %379 = arith.addf %377, %378 : vector<128x64xf32>
    %cst_135 = arith.constant 5.000000e-01 : f32
    %380 = vector.broadcast %cst_135 : f32 to vector<128x64xf32>
    %381 = arith.mulf %380, %379 : vector<128x64xf32>
    %cst_136 = arith.constant 0.707106769 : f32
    %382 = vector.broadcast %cst_136 : f32 to vector<128x64xf32>
    %383 = arith.mulf %379, %382 : vector<128x64xf32>
    %384 = math.erf %383 : vector<128x64xf32>
    %cst_137 = arith.constant 1.000000e+00 : f32
    %385 = vector.broadcast %cst_137 : f32 to vector<128x64xf32>
    %386 = arith.addf %385, %384 : vector<128x64xf32>
    %387 = arith.mulf %381, %386 : vector<128x64xf32>
    %c0_138 = arith.constant 0 : index
    %c0_139 = arith.constant 0 : index
    %388 = vector.load %arg13[%c0_138, %c0_139] : memref<2x64xbf16, #tpu.memory_space<vmem>>, vector<2x64xbf16>
    %389 = arith.truncf %387 : vector<128x64xf32> to vector<128x64xbf16>
    %390 = tpu.transpose %389, [1, 0] : vector<128x64xbf16> -> vector<64x128xbf16>
    %cst_140 = arith.constant dense<0.000000e+00> : vector<2x128xf32>
    %391 = tpu.matmul %388, %390, %cst_140 {dimension_numbers = #tpu.dot_dimension_numbers<[1], [0], [0], [1], [0, 0, 1, 1], [], []>} : vector<2x64xbf16>, vector<64x128xbf16>, vector<2x128xf32> -> vector<2x128xf32>
    %c0_141 = arith.constant 0 : index
    %c0_142 = arith.constant 0 : index
    %392 = vector.load %arg14[%c0_141, %c0_142] : memref<2x1xf32, #tpu.memory_space<vmem>>, vector<2x1xf32>
    %393 = vector.broadcast %392 : vector<2x1xf32> to vector<2x128xf32>
    %394 = arith.addf %391, %393 : vector<2x128xf32>
    %c0_143 = arith.constant 0 : index
    %c0_144 = arith.constant 0 : index
    %c0_145 = arith.constant 0 : index
    %395 = vector.load %arg15[%c0_143, %c0_144, %c0_145] : memref<1x2x128xf32, #tpu.memory_space<vmem>>, vector<1x2x128xf32>
    %396 = vector.shape_cast %395 : vector<1x2x128xf32> to vector<2x128xf32>
    %397 = vector.shape_cast %394 : vector<2x128xf32> to vector<1x2x128xf32>
    tpu.vector_store %arg15[%c0_143, %c0_144, %c0_145], %397 {strides = array<i32>} : memref<1x2x128xf32, #tpu.memory_space<vmem>>, vector<1x2x128xf32>,
    return
  }
  func.func @transform_0(%arg0: i32) -> (i32, i32, i32) {
    %c0_i32 = arith.constant 0 : i32
    %c0_i32_0 = arith.constant 0 : i32
    %c0_i32_1 = arith.constant 0 : i32
    return %arg0, %c0_i32, %c0_i32_0 : i32, i32, i32
  }
  func.func @transform_1(%arg0: i32) -> (i32, i32) {
    %c0_i32 = arith.constant 0 : i32
    %c0_i32_0 = arith.constant 0 : i32
    %c0_i32_1 = arith.constant 0 : i32
    return %c0_i32, %c0_i32_0 : i32, i32
  }
  func.func @transform_2(%arg0: i32) -> (i32, i32) {
    %c0_i32 = arith.constant 0 : i32
    %c0_i32_0 = arith.constant 0 : i32
    %c0_i32_1 = arith.constant 0 : i32
    return %c0_i32, %c0_i32_0 : i32, i32
  }
  func.func @transform_3(%arg0: i32) -> (i32, i32) {
    %c0_i32 = arith.constant 0 : i32
    %c0_i32_0 = arith.constant 0 : i32
    %c0_i32_1 = arith.constant 0 : i32
    return %c0_i32, %c0_i32_0 : i32, i32
  }
  func.func @transform_4(%arg0: i32) -> (i32, i32) {
    %c0_i32 = arith.constant 0 : i32
    %c0_i32_0 = arith.constant 0 : i32
    %c0_i32_1 = arith.constant 0 : i32
    return %c0_i32, %c0_i32_0 : i32, i32
  }
  func.func @transform_5(%arg0: i32) -> (i32, i32) {
    %c0_i32 = arith.constant 0 : i32
    %c0_i32_0 = arith.constant 0 : i32
    %c0_i32_1 = arith.constant 0 : i32
    return %c0_i32, %c0_i32_0 : i32, i32
  }
  func.func @transform_6(%arg0: i32) -> (i32, i32) {
    %c0_i32 = arith.constant 0 : i32
    %c0_i32_0 = arith.constant 0 : i32
    %c0_i32_1 = arith.constant 0 : i32
    return %c0_i32, %c0_i32_0 : i32, i32
  }
  func.func @transform_7(%arg0: i32) -> (i32, i32) {
    %c0_i32 = arith.constant 0 : i32
    %c0_i32_0 = arith.constant 0 : i32
    %c0_i32_1 = arith.constant 0 : i32
    return %c0_i32, %c0_i32_0 : i32, i32
  }
  func.func @transform_8(%arg0: i32) -> (i32, i32, i32) {
    %c0_i32 = arith.constant 0 : i32
    %c0_i32_0 = arith.constant 0 : i32
    %c0_i32_1 = arith.constant 0 : i32
    %c0_i32_2 = arith.constant 0 : i32
    return %c0_i32, %c0_i32_0, %c0_i32_1 : i32, i32, i32
  }
  func.func @transform_9(%arg0: i32) -> (i32, i32, i32) {
    %c0_i32 = arith.constant 0 : i32
    %c0_i32_0 = arith.constant 0 : i32
    %c0_i32_1 = arith.constant 0 : i32
    %c0_i32_2 = arith.constant 0 : i32
    return %c0_i32, %c0_i32_0, %c0_i32_1 : i32, i32, i32
  }
  func.func @transform_10(%arg0: i32) -> (i32, i32, i32) {
    %c0_i32 = arith.constant 0 : i32
    %c0_i32_0 = arith.constant 0 : i32
    %c0_i32_1 = arith.constant 0 : i32
    %c0_i32_2 = arith.constant 0 : i32
    return %c0_i32, %c0_i32_0, %c0_i32_1 : i32, i32, i32
  }
  func.func @transform_11(%arg0: i32) -> (i32, i32, i32) {
    %c0_i32 = arith.constant 0 : i32
    %c0_i32_0 = arith.constant 0 : i32
    %c0_i32_1 = arith.constant 0 : i32
    %c0_i32_2 = arith.constant 0 : i32
    return %c0_i32, %c0_i32_0, %c0_i32_1 : i32, i32, i32
  }
  func.func @transform_12(%arg0: i32) -> (i32, i32) {
    %c0_i32 = arith.constant 0 : i32
    %c0_i32_0 = arith.constant 0 : i32
    %c0_i32_1 = arith.constant 0 : i32
    return %c0_i32, %c0_i32_0 : i32, i32
  }
  func.func @transform_13(%arg0: i32) -> (i32, i32) {
    %c0_i32 = arith.constant 0 : i32
    %c0_i32_0 = arith.constant 0 : i32
    %c0_i32_1 = arith.constant 0 : i32
    return %c0_i32, %c0_i32_0 : i32, i32
  }
  func.func @transform_14(%arg0: i32) -> (i32, i32, i32) {
    %c0_i32 = arith.constant 0 : i32
    %c0_i32_0 = arith.constant 0 : i32
    %c0_i32_1 = arith.constant 0 : i32
    return %arg0, %c0_i32, %c0_i32_0 : i32, i32, i32
  }
}

</mosaic_0001>

<bundles_post_ra>
// kernel: _lambda_.1
= control target key start
LH: loop header
LB: loop body
LE: loop exit
PB: predicated region body
PF: predicated region fallthrough
CT: control target
= control target key end

     0   :  { %s12409_s0 = inlined_call_operand.vmem [shape: f32[2,16,8], index: 0, kind: input, shape index: {}]   ;;  %s12410_s1 = inlined_call_operand.vmem [shape: bf16[24,64], index: 1, kind: input, shape index: {}]   ;;  %s12411_s2 = inlined_call_operand.vmem [shape: f32[1,64], index: 2, kind: input, shape index: {}, may-alias: {2,6}]   ;;  %s12412_s3 = inlined_call_operand.vmem [shape: bf16[64,192], index: 3, kind: input, shape index: {}]   ;;  %s12413_s4 = inlined_call_operand.vmem [shape: f32[1,192], index: 4, kind: input, shape index: {}]   ;;  %s12414_s5 = inlined_call_operand.hbm [shape: bf16[64,64], index: 5, kind: input, shape index: {}]   ;;  %s12415_s6 = inlined_call_operand.vmem [shape: f32[1,64], index: 6, kind: input, shape index: {}, may-alias: {2,6}]   ;;  %s12416_s7 = inlined_call_operand.vmem [shape: f32[64,64], index: 7, kind: input, shape index: {}]   ;;  %s12417_s8 = inlined_call_operand.hbm [shape: bf16[3,128,128], index: 8, kind: input, shape index: {}]   ;;  %s12418_s9 = inlined_call_operand.vmem [shape: bf16[3,192,64], index: 9, kind: input, shape index: {}]   ;;  %s12419_s10 = inlined_call_operand.hbm [shape: bf16[3,192,64], index: 10, kind: input, shape index: {}]   ;;  %s12420_s11 = inlined_call_operand.hbm [shape: f32[3,5,64], index: 11, kind: input, shape index: {}]   ;;  %s12421_s12 = inlined_call_operand.vmem [shape: bf16[2,64], index: 12, kind: input, shape index: {}]   ;;  %s12422_s13 = inlined_call_operand.vmem [shape: f32[2,1], index: 13, kind: input, shape index: {}]   ;;  %s12423_s14 = inlined_call_operand.hbm [shape: f32[2,2,128], index: 14, kind: output, shape index: {}]  }
   0x1   :  { %12499 = sst [smem:[#allocation60_spill]] %s12421_s12 }
   0x2   :  { %12500 = sst [smem:[#allocation61_spill]] %s12423_s14 }
   0x3   :  { %19 = vsyncpa [#allocation3], 0 }
   0x4   :  { %20 = vsyncpa [#allocation6], 0 }
   0x5   :  { %21 = vsyncpa [#allocation9], 0 }
   0x6   :  { %22 = vsyncpa [#allocation4], 0 }
   0x7   :  { %24 = vsyncpa [#allocation4 + $0x1], 0  ;;  %s9403_s29 = smov 0   ;;  %s9405_s30 = smov 0  }
   0x8   :  { %s9407_s15 = smov 0   ;;  %s9409_s16 = smov 0  }
   0x9 LB: > { %12501 = sst [smem:[#allocation15_spill]] %s9291_s29  ;;  %s9424_s17 = sadd.s32 4294967295, %s9303_s16   ;;  %s9303_s16 = sphi %s9409_s16, %s12624_s16   ;;  %s9299_s15 = sphi %s9407_s15, %s12627_s15   ;;  %s9295_s30 = sphi %s9405_s30, %s12626_s30   ;;  %s9291_s29 = sphi %s9403_s29, %s12625_s29  }
   0xa   : > { %12502 = sst [smem:[#allocation16_spill]] %s9295_s30  ;;  %s7827_s18 = sadd.s32 4294967294, %s9303_s16  }
   0xb   : > { %12503 = sst [smem:[#allocation17_spill]] %s9299_s15  ;;  %s9428_s19 = sadd.s32 1, %s9303_s16  }
   0xc   : > { %12504 = sst [smem:[#allocation18_spill]] %s9303_s16  ;;  %s336_s20 = sadd.s32 1, %s9299_s15 }
   0xd   : > { %12505 = sst [smem:[#allocation19_spill]] %s9428_s19  ;;  %s333_s21 = ssub.s32 %s9303_s16, %s9428_s19 }
   0xe   : > { %p346_p0 = scmp.ne.s32.totalorder %s9299_s15, %s9295_s30  ;;  %p334_p1 = scmp.eq.s32.totalorder %s333_s21, 0 }
   0xf   : > { %p347_p2 = scmp.eq.s32.totalorder %s9424_s17, 1  ;;  %p352_p3 = scmp.ne.s32.totalorder %s9295_s30, %s9291_s29 }
  0x10   : > { %p353_p4 = scmp.eq.s32.totalorder %s7827_s18, 1  ;;  %p7828_p7 = scmp.ge.s32.totalorder %s9303_s16, 1 }
  0x11   : > { %s9439_s22 = scalar_select %p334_p1, %s9299_s15, %s336_s20  }
  0x12   : > { %p9441_p5 = por %p347_p2, %p346_p0  ;;  %p9445_p6 = por %p353_p4, %p352_p3 }
  0x13   : > { %12506 = sst [smem:[#allocation20_spill]] %s9439_s22  ;;  %p360_p8 = scmp.lt.s32.totalorder %s9303_s16, 3 }
  0x14   : > { %s12507_s23 = scalar_select %p9441_p5, 1, 0 }
  0x15   : > { %s12509_s24 = scalar_select %p9445_p6, 1, 0 }
  0x16   : > { %12508 = sst [smem:[#allocation21_spill]] %s12507_s23  ;;  %p12430_p9 = scmp.eq.s32.totalorder %s9424_s17, 0 }
  0x17   : > { %12510 = sst [smem:[#allocation22_spill]] %s12509_s24  ;;  %p9452_p10 = pnand %p7828_p7, %p360_p8 }
  0x18   : > { %s9305_s26 = smov [#allocation5]   ;;  %s9306_s18 = smov [#allocation2]  }
  0x19   : > { %s12511_s25 = scalar_select %p9452_p10, 1, 0 }
  0x1a   : > { %p8527_p11 = pneg %p9452_p10  ;;  %s403_s27 = sshll.u32 %s9305_s26, 4  ;;  %s9458_s27 = int_to_ptr.vmem [resolvable:$true] %s403_s27 }
  0x1b   : > { %s384_s20 = sshll.u32 %s9306_s18, 4  ;;  %s9307_s21 = smov [#allocation7]   ;;  %s9466_s20 = int_to_ptr.vmem [resolvable:$true] %s384_s20 }
  0x1c   : > { %p9462_p12 = pnand %p12430_p9, %p8527_p11  ;;  %s9468_s22 = sshll.u32 %s9307_s21, 4  ;;  %s420_s22 = int_to_ptr.vmem [resolvable:$true] %s9468_s22 }
  0x1d   : > { %s9117_s24 = scalar_lea.hbm %s12417_s8, 3072 }
  0x1e   : > { %p9118_p13 = scmp.ne.s32.totalorder %s12417_s8, %s9117_s24  ;;  %p9478_p0 = pneg %p9462_p12 }
  0x1f   : > { %p9124_p3 = scmp.lt.u32.totalorder %s9117_s24, %s12417_s8 }
  0x20   : > { %p9120_p1 = pnand %p9478_p0, %p9118_p13 }
  0x22   : > { %p9121_p2 = pneg %p9120_p1 }
  0x24   : > { %p9126_p4 = pnand %p9124_p3, %p9121_p2 }
  0x26   : > { %9129 = shalt.err (!%p9126_p4)
}
  0x27   : > { %s9130_s29 = scalar_lea.vmem %s9458_s27, 3072  ;;  %p9138_p9 = scmp.lt.s32.totalorder %s9458_s27, %s9458_s27 }
  0x28   : > { %p9131_p7 = scmp.ne.s32.totalorder %s9458_s27, %s9130_s29  ;;  %p9139_p6 = scmp.lt.s32.totalorder %s9130_s29, %s9130_s29 }
  0x2a   : > { %p9133_p8 = pnand %p9131_p7, %p9478_p0  ;;  %p9140_p13 = por %p9139_p6, %p9138_p9 }
  0x2c   : > { %p9134_p11 = pneg %p9133_p8 }
  0x2e   : > { %p9141_p1 = pnand %p9140_p13, %p9134_p11 }
  0x30   : > { %9144 = shalt.err (!%p9141_p1)
}
  0x31   : > { %s9308_s15 = smov 64   ;;  %s9309_s19 = smov 4  }
  0x32   : > { %8533 = dma.hbm_to_vmem [thread:$0]  (!%p9462_p12), %s12417_s8, 3072, %s9458_s27, [#allocation6], %s9308_s15, %s9308_s15, %s9309_s19  }
  0x33   : > { %s9145_s29 = scalar_lea.hbm %s12414_s5, 512 }
  0x34   : > { %p9146_p6 = scmp.ne.s32.totalorder %s12414_s5, %s9145_s29  ;;  %p9152_p3 = scmp.lt.u32.totalorder %s9145_s29, %s12414_s5 }
  0x36   : > { %p9148_p9 = pnand %p9146_p6, %p9478_p0 }
  0x38   : > { %p9149_p2 = pneg %p9148_p9 }
  0x3a   : > { %p9154_p4 = pnand %p9152_p3, %p9149_p2 }
  0x3c   : > { %9157 = shalt.err (!%p9154_p4)
}
  0x3d   : > { %s9158_s27 = scalar_lea.vmem %s9466_s20, 512  ;;  %p9166_p13 = scmp.lt.s32.totalorder %s9466_s20, %s9466_s20 }
  0x3e   : > { %p9159_p7 = scmp.ne.s32.totalorder %s9466_s20, %s9158_s27  ;;  %p9167_p1 = scmp.lt.s32.totalorder %s9158_s27, %s9158_s27 }
  0x40   : > { %p9161_p8 = pnand %p9159_p7, %p9478_p0  ;;  %p9168_p6 = por %p9167_p1, %p9166_p13 }
  0x42   : > { %p9162_p11 = pneg %p9161_p8 }
  0x44   : > { %p9169_p9 = pnand %p9168_p6, %p9162_p11 }
  0x46   : > { %9172 = shalt.err (!%p9169_p9)
}
  0x47   : > { %8530 = dma.hbm_to_vmem [thread:$0]  (!%p9462_p12), %s12414_s5, 512, %s9466_s20, [#allocation3], %s9308_s15, %s9308_s15, %s9309_s19  }
  0x48   : > { %s9173_s24 = scalar_lea.hbm %s12419_s10, 4608 }
  0x49   : > { %p9174_p2 = scmp.ne.s32.totalorder %s12419_s10, %s9173_s24  ;;  %p9180_p7 = scmp.lt.u32.totalorder %s9173_s24, %s12419_s10 }
  0x4b   : > { %p9176_p3 = pnand %p9174_p2, %p9478_p0 }
  0x4d   : > { %p9177_p4 = pneg %p9176_p3 }
  0x4f   : > { %p9182_p8 = pnand %p9180_p7, %p9177_p4 }
  0x51   : > { %9185 = shalt.err (!%p9182_p8)
}
  0x52   : > { %s9186_s27 = scalar_lea.vmem %s420_s22, 4608  ;;  %p9194_p6 = scmp.lt.s32.totalorder %s420_s22, %s420_s22 }
  0x53   : > { %p9187_p11 = scmp.ne.s32.totalorder %s420_s22, %s9186_s27  ;;  %p9195_p9 = scmp.lt.s32.totalorder %s9186_s27, %s9186_s27 }
  0x55   : > { %p9189_p13 = pnand %p9187_p11, %p9478_p0  ;;  %p9196_p5 = por %p9195_p9, %p9194_p6 }
  0x57   : > { %p9190_p1 = pneg %p9189_p13 }
  0x59   : > { %p9197_p10 = pnand %p9196_p5, %p9190_p1 }
  0x5b   : > { %9200 = shalt.err (!%p9197_p10)
}
  0x5c   : > { %8536 = dma.hbm_to_vmem [thread:$0]  (!%p9462_p12), %s12419_s10, 4608, %s420_s22, [#allocation6], %s9308_s15, %s9308_s15, %s9309_s19  }
  0x5d   : > { %s9310_s14 = smov [#allocation8]   ;;  %s9201_s26 = scalar_lea.hbm %s12420_s11, 384 }
  0x5e   : > { %s432_s30 = sshll.u32 %s9310_s14, 4  ;;  %p9202_p5 = scmp.ne.s32.totalorder %s12420_s11, %s9201_s26  ;;  %s433_s30 = int_to_ptr.vmem [resolvable:$true] %s432_s30 }
  0x5f   : > { %p9208_p3 = scmp.lt.u32.totalorder %s9201_s26, %s12420_s11 }
  0x60   : > { %p9204_p10 = pnand %p9202_p5, %p9478_p0 }
  0x62   : > { %p9205_p2 = pneg %p9204_p10 }
  0x64   : > { %p9210_p4 = pnand %p9208_p3, %p9205_p2 }
  0x66   : > { %9213 = shalt.err (!%p9210_p4)
}
  0x67   : > { %s9214_s22 = scalar_lea.vmem %s433_s30, 384  ;;  %p9222_p13 = scmp.lt.s32.totalorder %s433_s30, %s433_s30 }
  0x68   : > { %p9215_p7 = scmp.ne.s32.totalorder %s433_s30, %s9214_s22  ;;  %p9223_p1 = scmp.lt.s32.totalorder %s9214_s22, %s9214_s22 }
  0x6a   : > { %p9217_p8 = pnand %p9215_p7, %p9478_p0  ;;  %p9224_p6 = por %p9223_p1, %p9222_p13 }
  0x6c   : > { %p9218_p11 = pneg %p9217_p8 }
  0x6e   : > { %p9225_p9 = pnand %p9224_p6, %p9218_p11 }
  0x70   : > { %9228 = shalt.err (!%p9225_p9)
}
  0x71   : > { %s9311_s15 = smov 128   ;;  %s9312_s19 = smov 8  }
  0x72   : > { %8539 = dma.hbm_to_vmem [thread:$0]  (!%p9462_p12), %s12420_s11, 384, %s433_s30, [#allocation9], %s9311_s15, %s9311_s15, %s9312_s19  }
  0x73   : > { %p12514_p5 = scmp.ne.s32.totalorder %s12511_s25, 0 }
  0x75   : > { %462 = sbr.rel (%p12514_p5) target bundleno = 7787 (0x1e6b), region = 76 }
  0x7c   : > { %p12515_p10 = scmp.eq.s32.totalorder %s9424_s17, 0 }
  0x7e   : > { %9274 = dma.done.wait (%p12515_p10), [#allocation3], 512   ;;  %p12516_p0 = pmov %p12515_p10 }
  0x80   : > { %9276 = vsyncadd (%p12516_p0), [#allocation3], 4294966784  ;;  %p12517_p2 = pmov %p12516_p0 }
  0x81   : > { %p12518_p3 = pmov %p12516_p0 }
  0x82   : > { %9278 = dma.done.wait (%p12517_p2), [#allocation6], 7680  }
  0x83   : > { %9280 = vsyncadd (%p12518_p3), [#allocation6], 4294959616  ;;  %p12519_p4 = pmov %p12516_p0 }
  0x84   : > { %p12520_p12 = pmov %p12516_p0 }
  0x85   : > { %9282 = dma.done.wait (%p12519_p4), [#allocation9], 384  }
  0x86   : > { %9284 = vsyncadd (%p12520_p12), [#allocation9], 4294966912  ;;  %p520_p7 = scmp.lt.s32.totalorder %s9424_s17, 1  ;;  %v12439_v0 = vmov 0.0   ;;  %vm9314_vm0 = vmmov 0   ;;  %v8623_v4 = vld [vmem:[%s12410_s1] sm:$0xff]   ;;  %v666_v48 = vlaneseq }
  0x87   : > { %8171 = vmatprep.subr.bf16.mxu0 %v12439_v0  ;;  %8203 = vmatprep.subr.bf16.mxu1 %v12439_v0  ;;  %vm591_vm1 = vcmask 1043456   ;;  %vm556_vm2 = vcmask 1047552   ;;  %vm557_vm3 = vsmask.f32 7424  ;;  %v8624_v5 = vld [vmem:[%s12410_s1 + $0x8] ss:$0 sps:$4 sm:$0xff]  }
  0x88   : > { %s521_s16 = scalar_select %p520_p7, %s9424_s17, 1  ;;  %8175 = vmatprep.mubr.msk.bf16.mxu0 %vm9314_vm0, %v12439_v0  ;;  %8205 = vmatprep.mubr.msk.bf16.mxu1 %vm9314_vm0, %v12439_v0  ;;  %v593_v8 = vsel %vm591_vm1, %v8624_v5, 0  ;;  %vm9601_vm4 = vmand %vm556_vm2, %vm557_vm3  ;;  %v12521_v10 = vmov 0  ;;  %vm549_vm5 = vcmask 1040384   ;;  %vm550_vm6 = vsmask.f32 256 }
  0x89   : > { %s9315_s21 = smov 8   ;;  %8172 = vmatpush3.bf16.msra.mxu0 %v8623_v4  ;;  %v12522_v10 = vsel %vm9601_vm4, 4294967295, %v12521_v10  ;;  %s9316_s29 = smov 16   ;;  %vm9610_vm7 = vmand %vm549_vm5, %vm550_vm6  ;;  %v12524_v15 = vmov 0  ;;  %vm566_vm8 = vcmask 64512   ;;  %vm570_vm9 = vcmask 130048  }
  0x8a   : > { %s8052_s25 = sshll.u32 %s521_s16, 4  ;;  %8173 = vmatprep.subr.bf16.mxu0 %v12439_v0  ;;  %12523 = vst [vmem:[#allocation23_spill] sm:$0xff] %v12522_v10  ;;  %v12525_v15 = vsel %vm9610_vm7, 4294967295, %v12524_v15  ;;  %vm588_vm10 = vcmask 195584   ;;  %v8627_v21 = vld [vmem:[%s12412_s3 + $0x4] ss:$8 sps:$4 sm:$0xff]  }
  0x8b   : > { %s524_s30 = scalar_lea.vmem %s12409_s0, %s8052_s25  ;;  %12526 = vst [vmem:[#allocation24_spill] sm:$0xff] %v12525_v15  ;;  %v8625_v22 = vld [vmem:[%s12412_s3] ss:$8 sps:$4 sm:$0xff]   ;;  %v8630_v23 = vld [vmem:[%s12412_s3 + $0x14] ss:$8 sps:$4 sm:$0xff]   ;;  %v12441_v29 = vmov 0  }
  0x8c   : > { %v534_v1 = vld [vmem:[%s524_s30] sm:$0xff]  ;;  %v535_v2 = vld [vmem:[%s524_s30 + $0x8] sm:$0xff]  ;;  %v8628_v24 = vld [vmem:[%s12412_s3 + $0x10] ss:$8 sps:$4 sm:$0xff]   ;;  %8622 = vset.pattern.permute.xlu0 %v12441_v29  ;;  %vm716_vm11 = vcmask 523264   ;;  %v9656_v49 = vshrl.u32 %v666_v48, 7 }
  0x8d   : > { %v536_v3 = vpack.c.bf16 %v535_v2, %v534_v1  ;;  %8174 = vmatpush3.bf16.msra.mxu0 %v593_v8  ;;  %v8633_v25 = vld [vmem:[%s12412_s3 + $0x24] ss:$8 sps:$4 sm:$0xff]   ;;  %v8631_v26 = vld [vmem:[%s12412_s3 + $0x20] ss:$8 sps:$4 sm:$0xff]   ;;  %v8636_v27 = vld [vmem:[%s12412_s3 + $0x34] ss:$8 sps:$4 sm:$0xff]  }
  0x8e   : > { %720 = vmatprep.subr.bf16.mxu0 %v8627_v21  ;;  %v8634_v28 = vld [vmem:[%s12412_s3 + $0x30] ss:$8 sps:$4 sm:$0xff]   ;;  %v7842_v30 = vld [vmem:[%s12411_s2] ss:$0 sm:$0xff]  ;;  %v9659_v50 = vsub.s32 0, %v9656_v49  ;;  %v9665_v52 = vsub.s32 1, %v9656_v49 }
  0x8f   : > { %561 = vrot.lane.b32.xlu0 %v536_v3, %s9315_s21  ;;  %v542_v6 = vshrl.u32 %v536_v3, 16  ;;  %v545_v7 = vshll.u32 %v536_v3, 16  ;;  %v654_v51 = vld [vmem:[%s12413_s4] sm:$0x3]  ;;  %s9318_s20 = smov 64   ;;  %s9319_s12 = smov 112  }
  0x90   : > { %12527 = vst [vmem:[#allocation25_spill] sm:$0xff] %v9659_v50  ;;  %12528 = vst [vmem:[#allocation26_spill] sm:$0xff] %v9665_v52  ;;  %v669_v53 = vrot.slane %v654_v51, %v9659_v50  ;;  %v673_v55 = vrot.slane %v654_v51, %v9665_v52  ;;  %s9320_s16 = smov 32   ;;  %s9321_s25 = smov 48   ;;  %vm1272_vm12 = vcmask 261120   ;;  %vm1275_vm13 = vcmask 392192  }
  0x91   : > { %v553_v9 = vrot.slane %v545_v7, 1  ;;  %v544_v11 = vrot.slane %v542_v6, 7  ;;  %s9322_s28 = smov 96   ;;  %s9323_s14 = smov 80  }
  0x92   : > { %s12617_s30 = sld [smem:[#allocation21_spill]]  ;;  %s8049_s23 = sshll.u32 %s9424_s17, 5 }
  0x93   : > { %v554_v12 = vor.u32 %v553_v9, %v542_v6  ;;  %v547_v13 = vor.u32 %v545_v7, %v544_v11  ;;  %s12618_s27 = sld [smem:[#allocation61_spill]] }
  0x95   : > { %v559_v14 = vsel %vm9601_vm4, %v554_v12, 0  ;;  %v552_v17 = vsel %vm9610_vm7, 0, %v547_v13 }
  0x96   : > { %564 = vrot.lane.b32.xlu0 %v559_v14, %s9316_s29 }
  0x98   : > { %p12619_p11 = scmp.ne.s32.totalorder %s12617_s30, 0 }
  0x99   : > { %s12367_s22 = scalar_lea.hbm %s12618_s27, %s8049_s23 }
 0x101   : > { %v562_v16 = vpop.permute.xlu0 %561 }
 0x102   : > { %v569_v18 = vsel %vm566_vm8, %v552_v17, %v562_v16 }
 0x108   : > { %v565_v19 = vpop.permute.xlu0 %564 }
 0x109   : > { %v572_v20 = vsel %vm570_vm9, %v569_v18, %v565_v19 }
 0x10a   : > { %8176 = vmatmul.mubr.msk.bf16.vlgmr.msra.gmra.mrb[0].mxu0 %vm588_vm10, %v572_v20 }
 0x10b   : > { %721 = vmatpush1.bf16.msra.mxu0 %v8625_v22  ;;  %752 = vmatprep.mubr.bf16.mxu0 %v12441_v29 }
 0x10c   : > { %722 = vmatprep.subr.bf16.mxu0 %v8630_v23 }
 0x10f   : > { %723 = vmatpush1.bf16.msra.mxu0 %v8628_v24 }
 0x110   : > { %724 = vmatprep.subr.bf16.mxu0 %v8633_v25 }
 0x113   : > { %725 = vmatpush1.bf16.msra.mxu0 %v8631_v26 }
 0x114   : > { %726 = vmatprep.subr.bf16.mxu0 %v8636_v27 }
 0x117   : > { %727 = vmatpush1.bf16.msra.mxu0 %v8634_v28 }
 0x118   : > { %8179 = vmatprep.subr.bf16.mxu0 %v12439_v0 }
 0x1dd   : > { %v629_v31 = vpop.f32.mrb[0].mxu0 }
 0x1de   : > { %v630_v32 = vadd.f32 %v7842_v30, %v629_v31  ;;  %v8177_v33 = vpop.f32.mrb[1].mxu0 }
 0x1df   : > { %v632_v34 = vpop.f32.mrb[2].mxu0 }
 0x1e0   : > { %v638_v35 = vmul.f32 0.70710677, %v630_v32  ;;  %v633_v36 = vadd.f32 %v7842_v30, %v632_v34  ;;  %v8178_v37 = vpop.f32.mrb[3].mxu0  ;;  %v636_v42 = vmul.f32 0.5, %v630_v32 }
 0x1e2   : > { %8737 = verf.f32 %v638_v35  ;;  %v639_v38 = vmul.f32 0.70710677, %v633_v36  ;;  %v637_v43 = vmul.f32 0.5, %v633_v36 }
 0x1e4   : > { %8739 = verf.f32 %v639_v38 }
 0x1ec   : > { %v8738_v39 = vpop.eup %8737 }
 0x1ed   : > { %v642_v40 = vadd.f32 1.0, %v8738_v39 }
 0x1ee   : > { %v8740_v41 = vpop.eup %8739 }
 0x1ef   : > { %v643_v44 = vadd.f32 1.0, %v8740_v41  ;;  %v9647_v45 = vmul.f32 %v642_v40, %v636_v42 }
 0x1f1   : > { %v9649_v46 = vmul.f32 %v643_v44, %v637_v43 }
 0x1f3   : > { %v664_v47 = vpack.c.bf16 %v9649_v46, %v9647_v45 }
 0x1f5   : > { %7854 = vmatmul.mubr.msk.bf16.vlgmr.msra.gmra.mrb[4].mxu0 %vm716_vm11, %v664_v47 }
 0x1f6   : > { %8181 = vmatprep.mubr.msk.bf16.mxu0 %vm9314_vm0, %v12439_v0 }
 0x2c8   : > { %v754_v54 = vpop.f32.mrb[4].mxu0 }
 0x2c9   : > { %v756_v56 = vpop.f32.mrb[5].mxu0  ;;  %v755_v58 = vadd.f32 %v754_v54, %v669_v53 }
 0x2ca   : > { %v758_v57 = vpop.f32.mrb[6].mxu0  ;;  %v757_v61 = vadd.f32 %v756_v56, %v673_v55 }
 0x2cb   : > { %v759_v59 = vadd.f32 %v758_v57, %v669_v53  ;;  %v760_v60 = vpop.f32.mrb[7].mxu0 }
 0x2cc   : > { %v761_v62 = vadd.f32 %v760_v60, %v673_v55 }
 0x2cd   : > { %v763_v63 = vpack.c.bf16 %v759_v59, %v755_v58 }
 0x2ce   : > { %v9669_v1 = vpack.c.bf16 %v761_v62, %v757_v61 }
 0x2cf   : > { %766 = vrot.lane.b32.xlu1 %v763_v63, %s9318_s20 }
 0x341   : > { %v767_v2 = vpop.permute.xlu1 %766 }
 0x342   : > { %v772_v3 = vsel %vm570_vm9, %v767_v2, 0 }
 0x343   : > { %8180 = vmatpush3.bf16.xpose.msra.mxu0 %v772_v3 }
 0x344   : > { %8185 = vmatprep.subr.bf16.mxu0 %v12439_v0 }
 0x34a   : > { %8182 = vmatmul.mubr.msk.bf16.vlgmr.msra.gmra.mrb[8].mxu0 %vm570_vm9, %v763_v63 }
 0x34b   : > { %8186 = vmatpush3.bf16.msra.mxu0 %v9669_v1  ;;  %8187 = vmatprep.mubr.msk.bf16.mxu0 %vm9314_vm0, %v12439_v0 }
 0x34c   : > { %8191 = vmatprep.subr.bf16.mxu0 %v12439_v0 }
 0x41d   : > { %v808_v4 = vpop.f32.mrb[8].mxu0 }
 0x41e   : > { %v8183_v5 = vpop.f32.mrb[9].mxu0  ;;  %v815_v6 = vsel %vm570_vm9, %v808_v4, -inf }
 0x41f   : > { %816 = vmax.xlane.f32.xlu1 %v815_v6  ;;  %v811_v7 = vpop.f32.mrb[10].mxu0 }
 0x420   : > { %v8184_v8 = vpop.f32.mrb[11].mxu0  ;;  %v818_v9 = vsel %vm570_vm9, %v811_v7, -inf }
 0x421   : > { %819 = vmax.xlane.f32.xlu0 %v818_v9 }
 0x430   : > { %882 = vrot.lane.b32.xlu1 %v763_v63, %s9319_s12 }
 0x434   : > { %1006 = vrot.lane.b32.xlu1 %v763_v63, %s9320_s16 }
 0x437   : > { %884 = vrot.lane.b32.xlu0 %v763_v63, %s9321_s25 }
 0x438   : > { %1127 = vrot.lane.b32.xlu1 %v763_v63, %s9316_s29 }
 0x43b   : > { %1004 = vrot.lane.b32.xlu0 %v763_v63, %s9322_s28 }
 0x43f   : > { %1125 = vrot.lane.b32.xlu0 %v763_v63, %s9323_s14 }
 0x4ac   : > { %v817_v11 = vpop.xlane.xlu1 %816 }
 0x4ad   : > { %v821_v12 = vsub.f32 %v808_v4, %v817_v11 }
 0x4ae   : > { %v820_v13 = vpop.xlane.xlu0 %819 }
 0x4af   : > { %v823_v14 = vmul.f32 1.442695, %v821_v12  ;;  %v822_v16 = vsub.f32 %v811_v7, %v820_v13 }
 0x4b0   : > { %v883_v17 = vpop.permute.xlu1 %882 }
 0x4b1   : > { %v825_v18 = vmul.f32 1.442695, %v822_v16  ;;  %8741 = vpow2.f32 %v823_v14 }
 0x4b2   : > { %v885_v21 = vpop.permute.xlu0 %884 }
 0x4b3   : > { %8743 = vpow2.f32 %v825_v18  ;;  %v890_v28 = vsel %vm570_vm9, %v885_v21, 0 }
 0x4b4   : > { %v1007_v19 = vpop.permute.xlu1 %1006 }
 0x4b5   : > { %v1012_v20 = vsel %vm570_vm9, %v1007_v19, 0 }
 0x4b6   : > { %8204 = vmatpush3.bf16.xpose.msra.mxu1 %v1012_v20  ;;  %v1005_v24 = vpop.permute.xlu0 %1004 }
 0x4b7   : > { %8215 = vmatprep.subr.bf16.mxu1 %v12439_v0 }
 0x4b8   : > { %v1128_v22 = vpop.permute.xlu1 %1127 }
 0x4b9   : > { %v1133_v26 = vsel %vm570_vm9, %v1128_v22, 0 }
 0x4ba   : > { %v1126_v30 = vpop.permute.xlu0 %1125 }
 0x4bb   : > { %v9689_v23 = vpop.eup %8741 }
 0x4bd   : > { %v9691_v25 = vpop.eup %8743  ;;  %8206 = vmatmul.mubr.msk.bf16.vlgmr.msra.gmra.mrb[0].mxu1 %vm570_vm9, %v1005_v24 }
 0x4be   : > { %8216 = vmatpush3.bf16.xpose.msra.mxu1 %v1133_v26  ;;  %v833_v27 = vpack.c.bf16 %v9691_v25, %v9689_v23  ;;  %8217 = vmatprep.mubr.msk.bf16.mxu1 %vm9314_vm0, %v12439_v0 }
 0x4bf   : > { %8227 = vmatprep.subr.bf16.mxu1 %v12439_v0 }
 0x4c0   : > { %8188 = vmatmul.mubr.msk.bf16.vlgmr.msra.gmra.mrb[12].mxu0 %vm570_vm9, %v833_v27 }
 0x4c1   : > { %8192 = vmatpush3.bf16.xpose.msra.mxu0 %v890_v28  ;;  %8193 = vmatprep.mubr.msk.bf16.mxu0 %vm9314_vm0, %v12439_v0 }
 0x4c2   : > { %8197 = vmatprep.subr.bf16.mxu0 %v12439_v0 }
 0x4c5   : > { %8218 = vmatmul.mubr.msk.bf16.vlgmr.msra.gmra.mrb[4].mxu1 %vm570_vm9, %v1126_v30 }
 0x4c6   : > { %8235 = vmatprep.mubr.msk.bf16.mxu1 %vm9314_vm0, %v12439_v0 }
 0x4c8   : > { %8194 = vmatmul.mubr.msk.bf16.vlgmr.msra.gmra.mrb[16].mxu0 %vm570_vm9, %v883_v17 }
 0x4c9   : > { %8199 = vmatprep.mubr.msk.bf16.mxu0 %vm9314_vm0, %v12439_v0 }
 0x590   : > { %v1048_v31 = vpop.f32.mrb[0].mxu1 }
 0x591   : > { %v8207_v32 = vpop.f32.mrb[1].mxu1  ;;  %v1055_v33 = vsel %vm570_vm9, %v1048_v31, -inf }
 0x592   : > { %1056 = vmax.xlane.f32.xlu0 %v1055_v33  ;;  %v1051_v34 = vpop.f32.mrb[2].mxu1 }
 0x593   : > { %v9712_v35 = vpop.f32.mrb[12].mxu0  ;;  %v8208_v36 = vpop.f32.mrb[3].mxu1  ;;  %v1058_v37 = vsel %vm570_vm9, %v1051_v34, -inf }
 0x594   : > { %1059 = vmax.xlane.f32.xlu1 %v1058_v37  ;;  %v8189_v38 = vpop.f32.mrb[13].mxu0  ;;  %v827_v36 = vsel %vm570_vm9, %v9689_v23, 0.0  ;;  %v830_v37 = vsel %vm570_vm9, %v9691_v25, 0.0  ;;  %v8637_v25 = vld [vmem:[#allocation2] sm:$0xff]  }
 0x595   : > { %v9715_v39 = vpop.f32.mrb[14].mxu0  ;;  %8228 = vmatpush3.bf16.msra.mxu1 %v8637_v25 }
 0x596   : > { %v8190_v40 = vpop.f32.mrb[15].mxu0  ;;  %8229 = vmatprep.subr.bf16.mxu1 %v12439_v0 }
 0x598   : > { %v1169_v41 = vpop.f32.mrb[4].mxu1 }
 0x599   : > { %v8219_v42 = vpop.f32.mrb[5].mxu1  ;;  %v1176_v43 = vsel %vm570_vm9, %v1169_v41, -inf }
 0x59a   : > { %1177 = vmax.xlane.f32.xlu0 %v1176_v43  ;;  %v1172_v44 = vpop.f32.mrb[6].mxu1 }
 0x59b   : > { %v926_v47 = vpop.f32.mrb[16].mxu0  ;;  %v8220_v48 = vpop.f32.mrb[7].mxu1  ;;  %v1179_v51 = vsel %vm570_vm9, %v1172_v44, -inf }
 0x59c   : > { %1180 = vmax.xlane.f32.xlu1 %v1179_v51  ;;  %v8195_v53 = vpop.f32.mrb[17].mxu0  ;;  %v933_v57 = vsel %vm570_vm9, %v926_v47, -inf }
 0x59d   : > { %v929_v54 = vpop.f32.mrb[18].mxu0 }
 0x59e   : > { %v8196_v55 = vpop.f32.mrb[19].mxu0  ;;  %v936_v56 = vsel %vm570_vm9, %v929_v54, -inf }
 0x59f   : > { %937 = vmax.xlane.f32.xlu0 %v936_v56  ;;  %v8638_v56 = vld [vmem:[#allocation2 + $0x8] sm:$0xff]  }
 0x5a0   : > { %934 = vmax.xlane.f32.xlu1 %v933_v57  ;;  %8230 = vmatpush3.bf16.msra.mxu1 %v8638_v56 }
 0x5a1   : > { %8231 = vmatprep.subr.bf16.mxu1 %v12439_v0 }
 0x5b1   : > { %1074 = vrot.lane.b32.xlu1 %v9669_v1, %s9322_s28  ;;  %s12616_s28 = sld [smem:[#allocation60_spill]] }
 0x5b5   : > { %1195 = vrot.lane.b32.xlu1 %v9669_v1, %s9323_s14  ;;  %953 = vrot.lane.b32.xlu0 %v9669_v1, %s9319_s12  ;;  %s12615_s12 = sld [smem:[#allocation16_spill]] }
 0x5bb   : > { %s517_s14 = sand.u32 1, %s12615_s12  }
 0x5bc   : > { %s7714_s15 = scalar_lea.sflag [#allocation4], %s517_s14 }
 0x61f   : > { %v1057_v58 = vpop.xlane.xlu0 %1056 }
 0x620   : > { %v1061_v59 = vsub.f32 %v1048_v31, %v1057_v58 }
 0x621   : > { %v1060_v60 = vpop.xlane.xlu1 %1059 }
 0x622   : > { %v1063_v61 = vmul.f32 1.442695, %v1061_v59  ;;  %v1062_v62 = vsub.f32 %v1051_v34, %v1060_v60  ;;  %v8639_v60 = vld [vmem:[#allocation2 + $0x10] sm:$0xff]  }
 0x623   : > { %8232 = vmatpush3.bf16.msra.mxu1 %v8639_v60 }
 0x624   : > { %8745 = vpow2.f32 %v1063_v61  ;;  %v1065_v63 = vmul.f32 1.442695, %v1062_v62  ;;  %8233 = vmatprep.subr.bf16.mxu1 %v12439_v0 }
 0x626   : > { %8747 = vpow2.f32 %v1065_v63 }
 0x627   : > { %v1178_v2 = vpop.xlane.xlu0 %1177 }
 0x628   : > { %v1182_v3 = vsub.f32 %v1169_v41, %v1178_v2 }
 0x629   : > { %v1181_v4 = vpop.xlane.xlu1 %1180 }
 0x62a   : > { %v1184_v5 = vmul.f32 1.442695, %v1182_v3  ;;  %v1183_v6 = vsub.f32 %v1172_v44, %v1181_v4 }
 0x62c   : > { %v1186_v7 = vmul.f32 1.442695, %v1183_v6  ;;  %v938_v8 = vpop.xlane.xlu0 %937  ;;  %8749 = vpow2.f32 %v1184_v5 }
 0x62d   : > { %v940_v9 = vsub.f32 %v929_v54, %v938_v8  ;;  %v935_v11 = vpop.xlane.xlu1 %934 }
 0x62e   : > { %v8746_v12 = vpop.eup %8745  ;;  %8751 = vpow2.f32 %v1186_v7  ;;  %v939_v1 = vsub.f32 %v926_v47, %v935_v11  ;;  %v8640_v7 = vld [vmem:[#allocation2 + $0x18] sm:$0xff]  }
 0x62f   : > { %v943_v13 = vmul.f32 1.442695, %v940_v9  ;;  %v1067_v14 = vsel %vm570_vm9, %v8746_v12, 0.0  ;;  %8234 = vmatpush3.bf16.msra.mxu1 %v8640_v7 }
 0x630   : > { %v8748_v16 = vpop.eup %8747  ;;  %v941_v17 = vmul.f32 1.442695, %v939_v1  ;;  %1068 = vadd.xlane.f32.xlu0 %v1067_v14  ;;  %v954_v18 = vpop.permute.xlu0 %953  ;;  %2078 = vmatprep.subr.bf16.mxu1 %v12441_v29 }
 0x631   : > { %8753 = vpow2.f32 %v943_v13  ;;  %8198 = vmatpush3.bf16.msra.mxu0 %v954_v18  ;;  %v1073_v19 = vpack.c.bf16 %v8748_v16, %v8746_v12  ;;  %v1070_v20 = vsel %vm570_vm9, %v8748_v16, 0.0  ;;  %v1075_v32 = vpop.permute.xlu1 %1074 }
 0x632   : > { %8755 = vpow2.f32 %v941_v17  ;;  %8209 = vmatprep.subr.bf16.mxu0 %v12439_v0 }
 0x634   : > { %1071 = vadd.xlane.f32.xlu0 %v1070_v20 }
 0x635   : > { %v1196_v38 = vpop.permute.xlu1 %1195 }
 0x636   : > { %v8750_v21 = vpop.eup %8749 }
 0x637   : > { %v1188_v33 = vsel %vm570_vm9, %v8750_v21, 0.0 }
 0x638   : > { %v8752_v22 = vpop.eup %8751 }
 0x639   : > { %v1194_v24 = vpack.c.bf16 %v8752_v22, %v8750_v21  ;;  %v1191_v34 = vsel %vm570_vm9, %v8752_v22, 0.0 }
 0x63b   : > { %v8754_v26 = vpop.eup %8753 }
 0x63c   : > { %v8756_v27 = vpop.eup %8755  ;;  %v948_v28 = vsel %vm570_vm9, %v8754_v26, 0.0 }
 0x63d   : > { %949 = vadd.xlane.f32.xlu1 %v948_v28  ;;  %v945_v30 = vsel %vm570_vm9, %v8756_v27, 0.0  ;;  %v951_v31 = vpack.c.bf16 %v8754_v26, %v8756_v27 }
 0x63e   : > { %946 = vadd.xlane.f32.xlu0 %v945_v30 }
 0x63f   : > { %8200 = vmatmul.mubr.msk.bf16.vlgmr.msra.gmra.mrb[20].mxu0 %vm570_vm9, %v951_v31 }
 0x640   : > { %8210 = vmatpush3.bf16.msra.mxu0 %v1075_v32  ;;  %8211 = vmatprep.mubr.msk.bf16.mxu0 %vm9314_vm0, %v12439_v0 }
 0x641   : > { %1189 = vadd.xlane.f32.xlu1 %v1188_v33  ;;  %8221 = vmatprep.subr.bf16.mxu0 %v12439_v0 }
 0x642   : > { %1192 = vadd.xlane.f32.xlu0 %v1191_v34 }
 0x645   : > { %828 = vadd.xlane.f32.xlu1 %v827_v36 }
 0x646   : > { %831 = vadd.xlane.f32.xlu0 %v830_v37 }
 0x647   : > { %8212 = vmatmul.mubr.msk.bf16.vlgmr.msra.gmra.mrb[24].mxu0 %vm570_vm9, %v1073_v19 }
 0x648   : > { %8222 = vmatpush3.bf16.msra.mxu0 %v1196_v38  ;;  %8223 = vmatprep.mubr.msk.bf16.mxu0 %vm9314_vm0, %v12439_v0 }
 0x649   : > { %8239 = vmatprep.subr.bf16.mxu0 %v12439_v0 }
 0x64f   : > { %8224 = vmatmul.mubr.msk.bf16.vlgmr.msra.gmra.mrb[28].mxu0 %vm570_vm9, %v1194_v24 }
 0x650   : > { %8255 = vmatprep.mubr.msk.bf16.mxu0 %vm9314_vm0, %v12439_v0 }
 0x6bd   : > { %v1069_v23 = vpop.xlane.xlu0 %1068 }
 0x6c1   : > { %v1072_v40 = vpop.xlane.xlu0 %1071 }
 0x6ca   : > { %v950_v41 = vpop.xlane.xlu1 %949 }
 0x6cb   : > { %v947_v42 = vpop.xlane.xlu0 %946  ;;  %8757 = vrcp.f32 %v950_v41 }
 0x6cc   : > { %8759 = vrcp.f32 %v947_v42 }
 0x6cd   : > { %8761 = vrcp.f32 %v1069_v23 }
 0x6ce   : > { %8763 = vrcp.f32 %v1072_v40  ;;  %v1190_v57 = vpop.xlane.xlu1 %1189 }
 0x6cf   : > { %v1193_v58 = vpop.xlane.xlu0 %1192  ;;  %8765 = vrcp.f32 %v1190_v57 }
 0x6d0   : > { %8767 = vrcp.f32 %v1193_v58 }
 0x6d2   : > { %v829_v19 = vpop.xlane.xlu1 %828 }
 0x6d3   : > { %v832_v20 = vpop.xlane.xlu0 %831  ;;  %8769 = vrcp.f32 %v829_v19 }
 0x6d4   : > { %8771 = vrcp.f32 %v832_v20 }
 0x6d5   : > { %v8758_v44 = vpop.eup %8757 }
 0x6d6   : > { %v8760_v48 = vpop.eup %8759 }
 0x6d7   : > { %v8762_v62 = vpop.eup %8761 }
 0x6d8   : > { %v8764_v2 = vpop.eup %8763 }
 0x6d9   : > { %v8766_v11 = vpop.eup %8765 }
 0x6da   : > { %v8768_v1 = vpop.eup %8767 }
 0x6dd   : > { %v8770_v22 = vpop.eup %8769 }
 0x6de   : > { %v8772_v26 = vpop.eup %8771  ;;  %v880_v32 = vmul.f32 %v8770_v22, %v9712_v35  ;;  %v8642_v35 = vld [vmem:[#allocation5 + $0x8] sm:$0xff]  }
 0x6df   : > { %v881_v33 = vmul.f32 %v8772_v26, %v9715_v39  ;;  %v8643_v39 = vld [vmem:[#allocation5 + $0x10] sm:$0xff]  }
 0x712   : > { %v993_v43 = vpop.f32.mrb[20].mxu0 }
 0x713   : > { %v8201_v47 = vpop.f32.mrb[21].mxu0  ;;  %v1002_v53 = vmul.f32 %v8760_v48, %v993_v43  ;;  %v8645_v48 = vld [vmem:[#allocation5 + $0x20] sm:$0xff]  }
 0x714   : > { %v996_v51 = vpop.f32.mrb[22].mxu0  ;;  %v8644_v47 = vld [vmem:[#allocation5 + $0x18] sm:$0xff]  }
 0x715   : > { %v1003_v54 = vmul.f32 %v8758_v44, %v996_v51  ;;  %v8202_v55 = vpop.f32.mrb[23].mxu0  ;;  %v8641_v44 = vld [vmem:[#allocation5] sm:$0xff]   ;;  %v8646_v51 = vld [vmem:[#allocation5 + $0x28] sm:$0xff]  }
 0x716   : > { %8240 = vmatpush3.bf16.msra.mxu0 %v8641_v44  ;;  %v7863_v55 = vld [vmem:[%s12415_s6] ss:$0 sm:$0xff] }
 0x717   : > { %v8607_v59 = vpack.i.bf16 %v1003_v54, %v1002_v53  ;;  %8241 = vmatprep.subr.bf16.mxu0 %v12439_v0  ;;  %v8647_v53 = vld [vmem:[#allocation5 + $0x30] sm:$0xff]   ;;  %v8648_v54 = vld [vmem:[#allocation5 + $0x38] sm:$0xff]  }
 0x719   : > { %8608 = vrot.lane.b32.xlu1 %v8607_v59, %s9316_s29  ;;  %s7839_s29 = sshll.u32 %s517_s14, 1 }
 0x71a   : > { %v1114_v61 = vpop.f32.mrb[24].mxu0  ;;  %8242 = vmatpush3.bf16.msra.mxu0 %v8642_v35  ;;  %s519_s24 = scalar_lea.vmem [#allocation10], %s7839_s29 }
 0x71b   : > { %v8213_v63 = vpop.f32.mrb[25].mxu0  ;;  %v1123_v4 = vmul.f32 %v8762_v62, %v1114_v61  ;;  %8243 = vmatprep.subr.bf16.mxu0 %v12439_v0  ;;  %s7727_s26 = sshll.u32 %s519_s24, 4  ;;  %s12369_s26 = int_to_ptr.vmem [resolvable:$true] %s7727_s26 }
 0x71c   : > { %v1117_v3 = vpop.f32.mrb[26].mxu0  ;;  %s9229_s17 = scalar_lea.vmem %s12369_s26, 32 }
 0x71d   : > { %v1124_v5 = vmul.f32 %v8764_v2, %v1117_v3  ;;  %v8214_v6 = vpop.f32.mrb[27].mxu0  ;;  %p9230_p8 = scmp.ne.s32.totalorder %s12369_s26, %s9229_s17 }
 0x71e   : > { %8244 = vmatpush3.bf16.msra.mxu0 %v8643_v39 }
 0x71f   : > { %v8612_v8 = vpack.i.bf16 %v1124_v5, %v1123_v4  ;;  %8245 = vmatprep.subr.bf16.mxu0 %v12439_v0  ;;  %p9231_p13 = pnand %p9230_p8, %p12619_p11 }
 0x721   : > { %8613 = vrot.lane.b32.xlu0 %v8612_v8, %s9320_s16  ;;  %p9232_p1 = pneg %p9231_p13 }
 0x722   : > { %v1235_v9 = vpop.f32.mrb[28].mxu0  ;;  %8246 = vmatpush3.bf16.msra.mxu0 %v8644_v47 }
 0x723   : > { %v8225_v12 = vpop.f32.mrb[29].mxu0  ;;  %v1244_v14 = vmul.f32 %v8766_v11, %v1235_v9  ;;  %8247 = vmatprep.subr.bf16.mxu0 %v12439_v0 }
 0x724   : > { %v1238_v13 = vpop.f32.mrb[30].mxu0 }
 0x725   : > { %v1245_v16 = vmul.f32 %v8768_v1, %v1238_v13  ;;  %v8226_v17 = vpop.f32.mrb[31].mxu0 }
 0x726   : > { %8248 = vmatpush3.bf16.msra.mxu0 %v8645_v48 }
 0x727   : > { %v8617_v18 = vpack.i.bf16 %v1245_v16, %v1244_v14  ;;  %8249 = vmatprep.subr.bf16.mxu0 %v12439_v0 }
 0x729   : > { %8618 = vrot.lane.b32.xlu1 %v8617_v18, %s9321_s25 }
 0x72a   : > { %8250 = vmatpush3.bf16.msra.mxu0 %v8646_v51 }
 0x72b   : > { %8251 = vmatprep.subr.bf16.mxu0 %v12439_v0 }
 0x72e   : > { %8252 = vmatpush3.bf16.msra.mxu0 %v8647_v53 }
 0x72f   : > { %8253 = vmatprep.subr.bf16.mxu0 %v12439_v0 }
 0x732   : > { %8254 = vmatpush3.bf16.msra.mxu0 %v8648_v54 }
 0x78b   : > { %v8609_v21 = vpop.permute.xlu1 %8608 }
 0x78c   : > { %v8611_v27 = vunpack.i.h.bf16 %v8609_v21  ;;  %v8610_v28 = vunpack.i.l.bf16 %v8609_v21 }
 0x78e   : > { %v1271_v36 = vsel %vm570_vm9, %v881_v33, %v8611_v27  ;;  %v1270_v37 = vsel %vm570_vm9, %v880_v32, %v8610_v28 }
 0x793   : > { %v8614_v24 = vpop.permute.xlu0 %8613 }
 0x794   : > { %v8616_v30 = vunpack.i.h.bf16 %v8614_v24  ;;  %v8615_v31 = vunpack.i.l.bf16 %v8614_v24 }
 0x796   : > { %v1274_v40 = vsel %vm1272_vm12, %v1271_v36, %v8616_v30  ;;  %v1273_v41 = vsel %vm1272_vm12, %v1270_v37, %v8615_v31 }
 0x79b   : > { %v8619_v34 = vpop.permute.xlu1 %8618 }
 0x79c   : > { %v8621_v38 = vunpack.i.h.bf16 %v8619_v34  ;;  %v8620_v23 = vunpack.i.l.bf16 %v8619_v34 }
 0x79e   : > { %v1277_v42 = vsel %vm1275_vm13, %v1274_v40, %v8621_v38  ;;  %v1276_v25 = vsel %vm1275_vm13, %v1273_v41, %v8620_v23 }
 0x79f   : > { %v1278_v43 = vpack.c.bf16 %v1277_v42, %v1276_v25 }
 0x7a1   : > { %8236 = vmatmul.mubr.msk.bf16.vlgmr.msra.gmra.mrb[8].mxu1 %vm716_vm11, %v1278_v43 }
 0x874   : > { %v1346_v56 = vpop.f32.mrb[8].mxu1 }
 0x875   : > { %v1347_v57 = vadd.f32 %v7863_v55, %v1346_v56  ;;  %v8237_v58 = vpop.f32.mrb[9].mxu1 }
 0x876   : > { %v1349_v59 = vpop.f32.mrb[10].mxu1 }
 0x877   : > { %v1350_v60 = vadd.f32 %v7863_v55, %v1349_v59  ;;  %v8238_v61 = vpop.f32.mrb[11].mxu1  ;;  %v1353_v62 = vadd.f32 %v1347_v57, %v9647_v45  ;;  %v9324_v45 = vmov 1966171168  }
 0x878   : > { %v1481_v11 = vunpack.c.l.s4 %v9324_v45  ;;  %v8656_v45 = vld [vmem:[%s12418_s9 + $0x38] sm:$0xff]  }
 0x879   : > { %v1354_v63 = vadd.f32 %v1350_v60, %v9649_v46 }
 0x87a   : > { %v1482_v46 = vunpack.c.0.s8 %v1481_v11  ;;  %v8657_v11 = vld [vmem:[%s12418_s9 + $0x40] sm:$0xff]  }
 0x87b   : > { %v1372_v2 = vpack.c.bf16 %v1354_v63, %v1353_v62 }
 0x87c   : > { %v9780_v12 = vsub.s32 %v1482_v46, %v9656_v49  ;;  %v8658_v46 = vld [vmem:[%s12418_s9 + $0x48] sm:$0xff]  }
 0x87d   : > { %v1376_v3 = vshll.u32 %v1372_v2, 16  ;;  %v1374_v4 = vshrl.u32 %v1372_v2, 16 }
 0x87e   : > { %12529 = vst [vmem:[#allocation27_spill] sm:$0xff] %v9780_v12 }
 0x87f   : > { %v1378_v5 = vrot.slane %v1376_v3, 1  ;;  %v8649_v3 = vld [vmem:[%s12418_s9] sm:$0xff]  }
 0x880   : > { %2079 = vmatpush1.bf16.msra.mxu1 %v8649_v3 }
 0x881   : > { %v1379_v6 = vor.u32 %v1378_v5, %v1374_v4  ;;  %v8650_v4 = vld [vmem:[%s12418_s9 + $0x8] sm:$0xff]   ;;  %2080 = vmatprep.subr.bf16.mxu1 %v12441_v29  ;;  %v8651_v5 = vld [vmem:[%s12418_s9 + $0x10] sm:$0xff]  }
 0x883   : > { %v1381_v7 = vsel %vm9601_vm4, %v1379_v6, 0  ;;  %v8652_v6 = vld [vmem:[%s12418_s9 + $0x18] sm:$0xff]  }
 0x884   : > { %1383 = vrot.lane.b32.xlu1 %v1381_v7, %s9318_s20  ;;  %2081 = vmatpush1.bf16.msra.mxu1 %v8650_v4  ;;  %v8653_v7 = vld [vmem:[%s12418_s9 + $0x20] sm:$0xff]  }
 0x885   : > { %2082 = vmatprep.subr.bf16.mxu1 %v12441_v29 }
 0x888   : > { %2083 = vmatpush1.bf16.msra.mxu1 %v8651_v5 }
 0x889   : > { %2084 = vmatprep.subr.bf16.mxu1 %v12441_v29 }
 0x88c   : > { %2085 = vmatpush1.bf16.msra.mxu1 %v8652_v6 }
 0x88d   : > { %2086 = vmatprep.subr.bf16.mxu1 %v12441_v29 }
 0x890   : > { %2087 = vmatpush1.bf16.msra.mxu1 %v8653_v7 }
 0x891   : > { %2088 = vmatprep.subr.bf16.mxu1 %v12441_v29 }
 0x8f6   : > { %v1384_v8 = vpop.permute.xlu1 %1383 }
 0x8f7   : > { %v1386_v9 = vsel %vm716_vm11, %v1372_v2, %v1384_v8  ;;  %v8654_v8 = vld [vmem:[%s12418_s9 + $0x28] sm:$0xff]  }
 0x8f8   : > { %8256 = vmatmul.mubr.bf16.vlgmr.msra.gmra.mrb[32].mxu0 %v1386_v9  ;;  %2089 = vmatpush1.bf16.msra.mxu1 %v8654_v8  ;;  %v8655_v9 = vld [vmem:[%s12418_s9 + $0x30] sm:$0xff]  }
 0x8f9   : > { %8275 = vmatprep.mubr.msk.f32.mxu0 %vm9314_vm0, %v12439_v0  ;;  %2090 = vmatprep.subr.bf16.mxu1 %v12441_v29 }
 0x8fc   : > { %2091 = vmatpush1.bf16.msra.mxu1 %v8655_v9 }
 0x8fd   : > { %2092 = vmatprep.subr.bf16.mxu1 %v12441_v29 }
 0x900   : > { %2093 = vmatpush1.bf16.msra.mxu1 %v8656_v45 }
 0x901   : > { %2094 = vmatprep.subr.bf16.mxu1 %v12441_v29 }
 0x904   : > { %2095 = vmatpush1.bf16.msra.mxu1 %v8657_v11 }
 0x905   : > { %2096 = vmatprep.subr.bf16.mxu1 %v12441_v29 }
 0x908   : > { %2097 = vmatpush1.bf16.msra.mxu1 %v8658_v46 }
 0x909   : > { %2098 = vmatprep.subr.bf16.mxu1 %v12441_v29 }
 0x9cb   : > { %v1470_v1 = vpop.f32.mrb[32].mxu0 }
 0x9cc   : > { %v1479_v13 = vcombine.high %v1470_v1, %v1470_v1  ;;  %v1486_v14 = vrot.slane %v1470_v1, %v9780_v12  ;;  %v8257_v16 = vpop.f32.mrb[33].mxu0  ;;  %v8659_v1 = vld [vmem:[%s12418_s9 + $0x50] sm:$0xff]  }
 0x9cd   : > { %v1473_v17 = vpop.f32.mrb[34].mxu0  ;;  %2099 = vmatpush1.bf16.msra.mxu1 %v8659_v1 }
 0x9ce   : > { %v1493_v18 = vrot.slane %v1479_v13, %v9780_v12  ;;  %v1494_v19 = vcombine.high %v1486_v14, %v1486_v14  ;;  %v9785_v20 = vrot.slane %v1486_v14, %v9780_v12  ;;  %v8258_v21 = vpop.f32.mrb[35].mxu0  ;;  %v1535_v28 = vrot.slane %v1473_v17, %v9780_v12  ;;  %v8660_v13 = vld [vmem:[%s12418_s9 + $0x58] sm:$0xff]   ;;  %2100 = vmatprep.subr.bf16.mxu1 %v12441_v29 }
 0x9cf   : > { %v1528_v40 = vcombine.high %v1473_v17, %v1473_v17  ;;  %v9325_v14 = vmov 1983009808  }
 0x9d0   : > { %v9788_v22 = vrot.slane %v1494_v19, %v9780_v12  ;;  %v1596_v24 = vrot.slane %v9785_v20, %v9659_v50  ;;  %v9794_v26 = vcombine.high %v9785_v20, %v9785_v20  ;;  %v1495_v27 = vcombine.high %v1493_v18, %v1493_v18 }
 0x9d1   : > { %v9806_v32 = vrot.slane %v1493_v18, %v9780_v12  ;;  %v1543_v36 = vcombine.high %v1535_v28, %v1535_v28  ;;  %v9818_v38 = vrot.slane %v1535_v28, %v9780_v12  ;;  %v1542_v44 = vrot.slane %v1528_v40, %v9780_v12  ;;  %2101 = vmatpush1.bf16.msra.mxu1 %v8660_v13  ;;  %v9938_v18 = vld [vmem:[#allocation8] sm:$0x1f] }
 0x9d2   : > { %v1600_v30 = vrot.slane %v9788_v22, %v9659_v50  ;;  %1657 = vrot.lane.b32.xlu0 %v1596_v24, %s9318_s20  ;;  %v9802_v31 = vcombine.high %v9788_v22, %v9788_v22  ;;  %v1604_v33 = vrot.slane %v9794_v26, %v9659_v50  ;;  %v9811_v34 = vrot.slane %v1495_v27, %v9780_v12 }
 0x9d3   : > { %v1612_v23 = vrot.slane %v9806_v32, %v9659_v50  ;;  %v9823_v41 = vrot.slane %v1543_v36, %v9780_v12  ;;  %v1628_v25 = vrot.slane %v9818_v38, %v9659_v50  ;;  %v9833_v43 = vcombine.high %v9806_v32, %v9806_v32  ;;  %2509 = vmatprep.subr.bf16.mxu1 %v12441_v29 }
 0x9d4   : > { %1659 = vrot.lane.b32.xlu1 %v1600_v30, %s9318_s20  ;;  %v1608_v37 = vrot.slane %v9802_v31, %v9659_v50  ;;  %v1616_v42 = vrot.slane %v9811_v34, %v9659_v50  ;;  %v9840_v39 = vcombine.high %v9811_v34, %v9811_v34  ;;  %v9848_v48 = vcombine.high %v9818_v38, %v9818_v38 }
 0x9d5   : > { %v1632_v35 = vrot.slane %v9823_v41, %v9659_v50  ;;  %v1620_v47 = vrot.slane %v9833_v43, %v9659_v50  ;;  %v1544_v51 = vcombine.high %v1542_v44, %v1542_v44  ;;  %v9854_v54 = vcombine.high %v9823_v41, %v9823_v41 }
 0x9d6   : > { %1661 = vrot.lane.b32.xlu0 %v1604_v33, %s9318_s20  ;;  %v1624_v53 = vrot.slane %v9840_v39, %v9659_v50  ;;  %v9859_v55 = vrot.slane %v1542_v44, %v9780_v12  ;;  %v1636_v56 = vrot.slane %v9848_v48, %v9659_v50  ;;  %v1729_v16 = vunpack.c.l.s4 %v9325_v14 }
 0x9d7   : > { %v9864_v57 = vrot.slane %v1544_v51, %v9780_v12  ;;  %v1640_v58 = vrot.slane %v9854_v54, %v9659_v50  ;;  %v1725_v21 = vrot.slane %v9938_v18, %v9659_v50 }
 0x9d8   : > { %1663 = vrot.lane.b32.xlu1 %v1608_v37, %s9318_s20  ;;  %v1644_v59 = vrot.slane %v9859_v55, %v9659_v50  ;;  %v9874_v60 = vcombine.high %v9859_v55, %v9859_v55  ;;  %v1730_v17 = vunpack.c.0.s8 %v1729_v16 }
 0x9d9   : > { %v1648_v61 = vrot.slane %v9864_v57, %v9659_v50  ;;  %v9880_v62 = vcombine.high %v9864_v57, %v9864_v57  ;;  %v1727_v24 = vcombine.high %v1725_v21, %v1725_v21 }
 0x9da   : > { %1665 = vrot.lane.b32.xlu0 %v1612_v23, %s9318_s20  ;;  %v1652_v63 = vrot.slane %v9874_v60, %v9659_v50  ;;  %v9941_v19 = vsub.s32 %v1730_v17, %v9656_v49 }
 0x9db   : > { %v1656_v2 = vrot.slane %v9880_v62, %v9659_v50 }
 0x9dc   : > { %1667 = vrot.lane.b32.xlu1 %v1616_v42, %s9318_s20  ;;  %v9946_v27 = vrot.slane %v1725_v21, %v9941_v19  ;;  %v9949_v28 = vrot.slane %v1727_v24, %v9941_v19 }
 0x9de   : > { %1673 = vrot.lane.b32.xlu0 %v1628_v25, %s9318_s20  ;;  %v9953_v33 = vcombine.high %v9946_v27, %v9946_v27  ;;  %v9959_v23 = vcombine.high %v9949_v28, %v9949_v28 }
 0x9e0   : > { %1675 = vrot.lane.b32.xlu1 %v1632_v35, %s9318_s20 }
 0x9e2   : > { %1669 = vrot.lane.b32.xlu0 %v1620_v47, %s9318_s20 }
 0x9e4   : > { %1671 = vrot.lane.b32.xlu1 %v1624_v53, %s9318_s20 }
 0x9e6   : > { %1677 = vrot.lane.b32.xlu0 %v1636_v56, %s9318_s20 }
 0x9e8   : > { %1679 = vrot.lane.b32.xlu1 %v1640_v58, %s9318_s20 }
 0x9ea   : > { %1681 = vrot.lane.b32.xlu0 %v1644_v59, %s9318_s20 }
 0x9ec   : > { %1683 = vrot.lane.b32.xlu1 %v1648_v61, %s9318_s20 }
 0x9ee   : > { %1685 = vrot.lane.b32.xlu0 %v1652_v63, %s9318_s20 }
 0x9f0   : > { %1687 = vrot.lane.b32.xlu1 %v1656_v2, %s9318_s20 }
 0xa44   : > { %v1658_v30 = vpop.permute.xlu0 %1657 }
 0xa45   : > { %v1706_v25 = vsel %vm549_vm5, %v9785_v20, %v1658_v30 }
 0xa46   : > { %v1660_v36 = vpop.permute.xlu1 %1659  ;;  %v1748_v53 = vadd.f32 %v9946_v27, %v1706_v25 }
 0xa47   : > { %v1707_v37 = vsel %vm549_vm5, %v9788_v22, %v1660_v36 }
 0xa48   : > { %v1749_v40 = vadd.f32 %v9953_v33, %v1707_v37  ;;  %v1662_v42 = vpop.permute.xlu0 %1661  ;;  %v1764_v25 = vmul.f32 0.5, %v1748_v53 }
 0xa49   : > { %v1708_v44 = vsel %vm549_vm5, %v9794_v26, %v1662_v42 }
 0xa4a   : > { %v1664_v35 = vpop.permute.xlu1 %1663  ;;  %v1750_v47 = vadd.f32 %v9949_v28, %v1708_v44  ;;  %v1781_v56 = vmul.f32 0.70710677, %v1749_v40 }
 0xa4b   : > { %v1709_v51 = vsel %vm549_vm5, %v9802_v31, %v1664_v35  ;;  %v1780_v31 = vmul.f32 0.70710677, %v1748_v53 }
 0xa4c   : > { %v1751_v22 = vadd.f32 %v9959_v23, %v1709_v51  ;;  %v1666_v58 = vpop.permute.xlu0 %1665  ;;  %v1782_v63 = vmul.f32 0.70710677, %v1750_v47  ;;  %8773 = verf.f32 %v1781_v56  ;;  %v1765_v56 = vmul.f32 0.5, %v1749_v40 }
 0xa4d   : > { %v1710_v61 = vsel %vm549_vm5, %v9806_v32, %v1666_v58  ;;  %v1766_v58 = vmul.f32 0.5, %v1750_v47 }
 0xa4e   : > { %v1783_v59 = vmul.f32 0.70710677, %v1751_v22  ;;  %v1668_v20 = vpop.permute.xlu1 %1667  ;;  %v1752_v26 = vadd.f32 %v9946_v27, %v1710_v61 }
 0xa4f   : > { %v1711_v2 = vsel %vm549_vm5, %v9811_v34, %v1668_v20 }
 0xa50   : > { %v1753_v3 = vadd.f32 %v9953_v33, %v1711_v2  ;;  %v1674_v4 = vpop.permute.xlu0 %1673  ;;  %8775 = verf.f32 %v1783_v59  ;;  %v1784_v5 = vmul.f32 0.70710677, %v1752_v26  ;;  %v1767_v2 = vmul.f32 0.5, %v1751_v22 }
 0xa51   : > { %8777 = verf.f32 %v1782_v63  ;;  %v1714_v32 = vsel %vm549_vm5, %v9818_v38, %v1674_v4  ;;  %v1768_v47 = vmul.f32 0.5, %v1752_v26 }
 0xa52   : > { %v1785_v6 = vmul.f32 0.70710677, %v1753_v3  ;;  %v1676_v7 = vpop.permute.xlu1 %1675  ;;  %v9982_v34 = vadd.f32 %v9946_v27, %v1714_v32  ;;  %v1769_v22 = vmul.f32 0.5, %v1753_v3 }
 0xa53   : > { %v1715_v8 = vsel %vm549_vm5, %v9823_v41, %v1676_v7 }
 0xa54   : > { %8779 = verf.f32 %v1785_v6  ;;  %v1670_v9 = vpop.permute.xlu0 %1669  ;;  %v9987_v46 = vadd.f32 %v9953_v33, %v1715_v8  ;;  %v1788_v16 = vmul.f32 0.70710677, %v9982_v34 }
 0xa55   : > { %8781 = verf.f32 %v1780_v31  ;;  %v1712_v45 = vsel %vm549_vm5, %v9833_v43, %v1670_v9 }
 0xa56   : > { %8783 = verf.f32 %v1784_v5  ;;  %v1672_v11 = vpop.permute.xlu1 %1671  ;;  %v1754_v1 = vadd.f32 %v9949_v28, %v1712_v45  ;;  %v8774_v24 = vpop.eup %8773  ;;  %v1789_v30 = vmul.f32 0.70710677, %v9987_v46 }
 0xa57   : > { %v1713_v38 = vsel %vm549_vm5, %v9840_v39, %v1672_v11  ;;  %v1813_v63 = vadd.f32 1.0, %v8774_v24 }
 0xa58   : > { %v1755_v41 = vadd.f32 %v9959_v23, %v1713_v38  ;;  %v1786_v13 = vmul.f32 0.70710677, %v1754_v1  ;;  %v1678_v14 = vpop.permute.xlu0 %1677 }
 0xa59   : > { %v1716_v21 = vsel %vm549_vm5, %v9848_v48, %v1678_v14  ;;  %v1829_v45 = vmul.f32 %v1813_v63, %v1765_v56 }
 0xa5a   : > { %v1787_v17 = vmul.f32 0.70710677, %v1755_v41  ;;  %v1680_v43 = vpop.permute.xlu1 %1679  ;;  %8785 = verf.f32 %v1786_v13  ;;  %v9998_v36 = vadd.f32 %v9949_v28, %v1716_v21  ;;  %v8776_v37 = vpop.eup %8775 }
 0xa5b   : > { %v1717_v39 = vsel %vm549_vm5, %v9854_v54, %v1680_v43  ;;  %v8778_v42 = vpop.eup %8777  ;;  %v1815_v54 = vadd.f32 1.0, %v8776_v37  ;;  %v1770_v43 = vmul.f32 0.5, %v1754_v1 }
 0xa5c   : > { %8787 = verf.f32 %v1787_v17  ;;  %v1790_v44 = vmul.f32 0.70710677, %v9998_v36  ;;  %v10004_v35 = vadd.f32 %v9959_v23, %v1717_v39  ;;  %v1682_v48 = vpop.permute.xlu0 %1681  ;;  %v1814_v31 = vadd.f32 1.0, %v8778_v42 }
 0xa5d   : > { %8789 = verf.f32 %v1788_v16  ;;  %v1718_v59 = vsel %vm549_vm5, %v9859_v55, %v1682_v48  ;;  %v1831_v11 = vmul.f32 %v1815_v54, %v1767_v2 }
 0xa5e   : > { %v8780_v51 = vpop.eup %8779  ;;  %v1684_v61 = vpop.permute.xlu1 %1683  ;;  %8791 = verf.f32 %v1789_v30  ;;  %v1791_v4 = vmul.f32 0.70710677, %v10004_v35  ;;  %v10010_v5 = vadd.f32 %v9946_v27, %v1718_v59  ;;  %v1830_v13 = vmul.f32 %v1814_v31, %v1766_v58 }
 0xa5f   : > { %v8782_v20 = vpop.eup %8781  ;;  %v1719_v40 = vsel %vm549_vm5, %v9864_v57, %v1684_v61  ;;  %v1817_v6 = vadd.f32 1.0, %v8780_v51  ;;  %8793 = verf.f32 %v1790_v44  ;;  %v1771_v30 = vmul.f32 0.5, %v1755_v41 }
 0xa60   : > { %v8784_v53 = vpop.eup %8783  ;;  %v1761_v55 = vadd.f32 %v9953_v33, %v1719_v40  ;;  %v1686_v7 = vpop.permute.xlu0 %1685  ;;  %v1812_v32 = vadd.f32 1.0, %v8782_v20  ;;  %8795 = verf.f32 %v1791_v4  ;;  %v1792_v8 = vmul.f32 0.70710677, %v10010_v5 }
 0xa61   : > { %v1816_v38 = vadd.f32 1.0, %v8784_v53  ;;  %v1720_v57 = vsel %vm549_vm5, %v9874_v60, %v1686_v7  ;;  %v1833_v14 = vmul.f32 %v1817_v6, %v1769_v22  ;;  %v1861_v37 = vcombine.low %v1830_v13, %v1831_v11 }
 0xa62   : > { %v1688_v9 = vpop.permute.xlu1 %1687  ;;  %v1793_v27 = vmul.f32 0.70710677, %v1761_v55  ;;  %8797 = verf.f32 %v1792_v8  ;;  %v1762_v3 = vadd.f32 %v9949_v28, %v1720_v57  ;;  %v1828_v21 = vmul.f32 %v1812_v32, %v1764_v25 }
 0xa63   : > { %v1721_v26 = vsel %vm549_vm5, %v9880_v62, %v1688_v9  ;;  %v1832_v39 = vmul.f32 %v1816_v38, %v1768_v47  ;;  %v1875_v25 = vrot.slane %v1861_v37, %v9941_v19  ;;  %v1775_v31 = vmul.f32 0.5, %v10004_v35 }
 0xa64   : > { %v8786_v33 = vpop.eup %8785  ;;  %8799 = verf.f32 %v1793_v27  ;;  %v1763_v16 = vadd.f32 %v9959_v23, %v1721_v26  ;;  %v1794_v44 = vmul.f32 0.70710677, %v1762_v3  ;;  %v1860_v48 = vcombine.low %v1828_v21, %v1829_v45 }
 0xa65   : > { %v1818_v24 = vadd.f32 1.0, %v8786_v33  ;;  %v1877_v56 = vcombine.low %v1832_v39, %v1833_v14  ;;  %v1773_v7 = vmul.f32 0.5, %v9987_v46  ;;  %v1774_v32 = vmul.f32 0.5, %v9998_v36 }
 0xa66   : > { %v8788_v17 = vpop.eup %8787  ;;  %v1795_v51 = vmul.f32 0.70710677, %v1763_v16  ;;  %8801 = verf.f32 %v1794_v44  ;;  %v1868_v41 = vrot.slane %v1860_v48, %v9941_v19  ;;  %v1772_v9 = vmul.f32 0.5, %v9982_v34 }
 0xa67   : > { %v1819_v42 = vadd.f32 1.0, %v8788_v17  ;;  %v8790_v60 = vpop.eup %8789  ;;  %v1834_v58 = vmul.f32 %v1818_v24, %v1770_v43  ;;  %v1885_v20 = vrot.slane %v1877_v56, %v9941_v19  ;;  %v1777_v11 = vmul.f32 0.5, %v1761_v55 }
 0xa68   : > { %v8792_v62 = vpop.eup %8791  ;;  %8803 = verf.f32 %v1795_v51  ;;  %v1820_v40 = vadd.f32 1.0, %v8790_v60  ;;  %v10027_v47 = vcombine.low %v1868_v41, %v1875_v25  ;;  %v1776_v26 = vmul.f32 0.5, %v10010_v5 }
 0xa69   : > { %v1835_v59 = vmul.f32 %v1819_v42, %v1771_v30  ;;  %v8794_v28 = vpop.eup %8793  ;;  %v1821_v54 = vadd.f32 1.0, %v8792_v62  ;;  %v1778_v17 = vmul.f32 0.5, %v1762_v3  ;;  %v1779_v34 = vmul.f32 0.5, %v1763_v16 }
 0xa6a   : > { %v8796_v1 = vpop.eup %8795  ;;  %v1822_v53 = vadd.f32 1.0, %v8794_v28  ;;  %v1836_v57 = vmul.f32 %v1820_v40, %v1772_v9  ;;  %v12437_v9 = vmov 0.0|0.0  }
 0xa6b   : > { %v1878_v23 = vcombine.low %v1834_v58, %v1835_v59  ;;  %v1823_v61 = vadd.f32 1.0, %v8796_v1  ;;  %v1837_v35 = vmul.f32 %v1821_v54, %v1773_v7  ;;  %8437 = vmatprep.subr.bf16.mxu0 %v12437_v9 }
 0xa6c   : > { %v8798_v2 = vpop.eup %8797  ;;  %v1838_v27 = vmul.f32 %v1822_v53, %v1774_v32  ;;  %v526_v32 = vld [vmem:[%s12416_s7] sm:$0xff] }
 0xa6d   : > { %v1892_v63 = vrot.slane %v1878_v23, %v9941_v19  ;;  %v1839_v22 = vmul.f32 %v1823_v61, %v1775_v31  ;;  %v1824_v45 = vadd.f32 1.0, %v8798_v2  ;;  %v1894_v37 = vcombine.low %v1836_v57, %v1837_v35  ;;  %v530_v35 = vld [vmem:[%s12416_s7 + $0x20] sm:$0xff]  ;;  %v532_v57 = vld [vmem:[%s12416_s7 + $0x30] sm:$0xff] }
 0xa6e   : > { %v8800_v4 = vpop.eup %8799 }
 0xa6f   : > { %v10029_v6 = vcombine.low %v1885_v20, %v1892_v63  ;;  %v1825_v8 = vadd.f32 1.0, %v8800_v4  ;;  %v1895_v36 = vcombine.low %v1838_v27, %v1839_v22  ;;  %v1840_v43 = vmul.f32 %v1824_v45, %v1776_v26  ;;  %v527_v22 = vld [vmem:[%s12416_s7 + $0x8] sm:$0xff]  ;;  %v528_v45 = vld [vmem:[%s12416_s7 + $0x10] sm:$0xff]  ;;  %v533_v26 = vld [vmem:[%s12416_s7 + $0x38] sm:$0xff] }
 0xa70   : > { %v8802_v13 = vpop.eup %8801  ;;  %v1902_v51 = vrot.slane %v1894_v37, %v9941_v19  ;;  %v531_v27 = vld [vmem:[%s12416_s7 + $0x28] sm:$0xff] }
 0xa71   : > { %v1932_v38 = vpack.c.bf16 %v10029_v6, %v10027_v47  ;;  %v1841_v33 = vmul.f32 %v1825_v8, %v1777_v11  ;;  %v1826_v21 = vadd.f32 1.0, %v8802_v13  ;;  %v1909_v5 = vrot.slane %v1895_v36, %v9941_v19  ;;  %v529_v11 = vld [vmem:[%s12416_s7 + $0x18] sm:$0xff] }
 0xa72   : > { %v8804_v46 = vpop.eup %8803  ;;  %v10062_v8 = vpack.c.bf16 %v527_v22, %v526_v32  ;;  %v10083_v13 = vpack.c.bf16 %v531_v27, %v530_v35 }
 0xa73   : > { %v1959_v14 = vshrl.u32 %v1932_v38, 16  ;;  %1984 = vrot.lane.b32.xlu0 %v1932_v38, %s9318_s20  ;;  %v1827_v55 = vadd.f32 1.0, %v8804_v46  ;;  %v1962_v24 = vshll.u32 %v1932_v38, 16  ;;  %v1911_v39 = vcombine.low %v1840_v43, %v1841_v33 }
 0xa74   : > { %v1842_v42 = vmul.f32 %v1826_v21, %v1778_v17  ;;  %v1910_v56 = vcombine.low %v1902_v51, %v1909_v5  ;;  %12530 = vst [vmem:[#allocation28_spill] sm:$0xff] %v10062_v8  ;;  %8439 = vmatpush3.bf16.msra.mxu0 %v10062_v8  ;;  %v10073_v38 = vpack.c.bf16 %v529_v11, %v528_v45  ;;  %12532 = vst [vmem:[#allocation30_spill] sm:$0xff] %v10083_v13 }
 0xa75   : > { %v1961_v30 = vrot.slane %v1959_v14, 7  ;;  %v1843_v44 = vmul.f32 %v1827_v55, %v1779_v34  ;;  %v1919_v62 = vrot.slane %v1911_v39, %v9941_v19  ;;  %v1975_v59 = vrot.slane %v1962_v24, 1  ;;  %8440 = vmatprep.subr.bf16.mxu0 %v12437_v9 }
 0xa76   : > { %12531 = vst [vmem:[#allocation29_spill] sm:$0xff] %v10073_v38  ;;  %v10093_v33 = vpack.c.bf16 %v533_v26, %v532_v57  ;;  %v1999_v21 = vrot.slane %v9938_v18, %v9665_v52 }
 0xa77   : > { %v1964_v60 = vor.u32 %v1962_v24, %v1961_v30  ;;  %v1912_v48 = vcombine.low %v1842_v42, %v1843_v44  ;;  %v1976_v25 = vor.u32 %v1975_v59, %v1959_v14 }
 0xa78   : > { %8442 = vmatpush3.bf16.msra.mxu0 %v10073_v38  ;;  %12533 = vst [vmem:[#allocation31_spill] sm:$0xff] %v10093_v33 }
 0xa79   : > { %v1926_v3 = vrot.slane %v1912_v48, %v9941_v19  ;;  %v1974_v54 = vsel %vm9610_vm7, 0, %v1964_v60  ;;  %8443 = vmatprep.subr.bf16.mxu0 %v12437_v9 }
 0xa7b   : > { %v10042_v16 = vcombine.low %v1919_v62, %v1926_v3 }
 0xa7c   : > { %8445 = vmatpush3.bf16.msra.mxu0 %v10083_v13 }
 0xa7d   : > { %v1933_v58 = vpack.c.bf16 %v10042_v16, %v1910_v56  ;;  %8446 = vmatprep.subr.bf16.mxu0 %v12437_v9 }
 0xa7f   : > { %1986 = vrot.lane.b32.xlu1 %v1933_v58, %s9318_s20  ;;  %v1969_v28 = vshll.u32 %v1933_v58, 16  ;;  %v1966_v23 = vshrl.u32 %v1933_v58, 16 }
 0xa80   : > { %8448 = vmatpush3.bf16.msra.mxu0 %v10093_v33 }
 0xa81   : > { %v1977_v1 = vrot.slane %v1969_v28, 1  ;;  %v1968_v61 = vrot.slane %v1966_v23, 7  ;;  %8449 = vmatprep.subr.bf16.mxu0 %v12437_v9 }
 0xa83   : > { %v1978_v41 = vsel %vm557_vm3, %v1976_v25, %v1977_v1  ;;  %v1979_v20 = vor.u32 %v1977_v1, %v1966_v23  ;;  %v1971_v63 = vor.u32 %v1969_v28, %v1968_v61 }
 0xa84   : > { %7889 = vmatprep.mubr.msk.bf16.mxu1 %vm716_vm11, %v1978_v41 }
 0xa85   : > { %v1972_v2 = vsel %vm550_vm6, %v1961_v30, %v1971_v63  ;;  %v1981_v4 = vsel %vm9601_vm4, %v1979_v20, 0 }
 0xae5   : > { %v1985_v53 = vpop.permute.xlu0 %1984 }
 0xae6   : > { %v1990_v31 = vsel %vm716_vm11, %v1974_v54, %v1985_v53 }
 0xae7   : > { %2111 = vmatmul.mubr.bf16.vlgmr.msra.gmra.mrb[12].mxu1 %v1990_v31 }
 0xae8   : > { %7890 = vmatprep.mubr.msk.bf16.mxu1 %vm716_vm11, %v1981_v4 }
 0xaf1   : > { %v1987_v40 = vpop.permute.xlu1 %1986 }
 0xaf2   : > { %v1994_v7 = vsel %vm716_vm11, %v1972_v2, %v1987_v40 }
 0xaf3   : > { %2119 = vmatmul.mubr.bf16.gmra.mrb[16].mxu1 %v1994_v7 }
 0xbba   : > { %v2112_v14 = vpop.f32.mrb[12].mxu1 }
 0xbbb   : > { %v2114_v46 = vpop.f32.mrb[13].mxu1  ;;  %v2113_v43 = vadd.f32 %v2112_v14, %v1999_v21 }
 0xbbc   : > { %v2115_v36 = vpop.f32.mrb[14].mxu1 }
 0xbbd   : > { %v2117_v17 = vpop.f32.mrb[15].mxu1  ;;  %v2116_v34 = vadd.f32 %v2115_v36, %v1999_v21  ;;  %v2127_v24 = vadd.f32 %v2113_v43, %v10027_v47 }
 0xbbf   : > { %v2128_v55 = vadd.f32 %v2116_v34, %v10029_v6  ;;  %v2131_v60 = vsel %vm716_vm11, %v2127_v24, 0.0 }
 0xbc1   : > { %v2132_v37 = vsel %vm716_vm11, %v2128_v55, 0.0 }
 0xbc2   : > { %v2133_v62 = vadd.f32 %v2132_v37, %v2131_v60  ;;  %v8664_v37 = vld [vmem:[#allocation7 + $0x18] sm:$0xff]  }
 0xbc3   : > { %v8668_v60 = vld [vmem:[#allocation7 + $0x38] sm:$0xff]  }
 0xbc6   : > { %v2120_v30 = vpop.f32.mrb[16].mxu1 }
 0xbc7   : > { %v2121_v39 = vadd.f32 %v2120_v30, %v1999_v21  ;;  %v2122_v42 = vpop.f32.mrb[17].mxu1  ;;  %v8663_v30 = vld [vmem:[#allocation7 + $0x10] sm:$0xff]  }
 0xbc8   : > { %v2123_v44 = vpop.f32.mrb[18].mxu1  ;;  %v8666_v42 = vld [vmem:[#allocation7 + $0x28] sm:$0xff]  }
 0xbc9   : > { %v2129_v48 = vadd.f32 %v2121_v39, %v1910_v56  ;;  %v2124_v5 = vadd.f32 %v2123_v44, %v1999_v21  ;;  %v2125_v51 = vpop.f32.mrb[19].mxu1  ;;  %v8665_v39 = vld [vmem:[#allocation7 + $0x20] sm:$0xff]   ;;  %v8667_v44 = vld [vmem:[#allocation7 + $0x30] sm:$0xff]  }
 0xbca   : > { %v8671_v51 = vld [vmem:[#allocation7 + $0x50] sm:$0xff]  }
 0xbcb   : > { %v2134_v3 = vsel %vm716_vm11, %v2129_v48, 0.0  ;;  %v2130_v58 = vadd.f32 %v2124_v5, %v10042_v16  ;;  %v8670_v5 = vld [vmem:[#allocation7 + $0x48] sm:$0xff]  }
 0xbcc   : > { %v2135_v59 = vadd.f32 %v2134_v3, %v2133_v62  ;;  %v8672_v62 = vld [vmem:[#allocation7 + $0x58] sm:$0xff]  }
 0xbcd   : > { %v2136_v6 = vsel %vm716_vm11, %v2130_v58, 0.0 }
 0xbce   : > { %v2137_v47 = vadd.f32 %v2136_v6, %v2135_v59  ;;  %v10151_v6 = vsub.s32 2, %v9656_v49 }
 0xbd0   : > { %v2138_v28 = vrot.slane %v2137_v47, 4  ;;  %12534 = vst [vmem:[#allocation32_spill] sm:$0xff] %v10151_v6 }
 0xbd2   : > { %v2139_v23 = vadd.f32 %v2138_v28, %v2137_v47  ;;  %v10154_v47 = vsub.s32 3, %v9656_v49 }
 0xbd4   : > { %v2140_v25 = vrot.slane %v2139_v23, 2  ;;  %12535 = vst [vmem:[#allocation33_spill] sm:$0xff] %v10154_v47 }
 0xbd6   : > { %v2141_v1 = vadd.f32 %v2140_v25, %v2139_v23  ;;  %v2330_v25 = vrot.slane %v9938_v18, %v10151_v6 }
 0xbd8   : > { %v2142_v61 = vrot.slane %v2141_v1, 1 }
 0xbda   : > { %v2143_v41 = vadd.f32 %v2142_v61, %v2141_v1  ;;  %v2338_v1 = vrot.slane %v9938_v18, %v10154_v47 }
 0xbdc   : > { %v2145_v20 = vmul.f32 0.03125, %v2143_v41 }
 0xbde   : > { %8276 = vmatmul.mubr.msk.f32.vlgmr.msra.gmra.mrb[36].mxu0 %vm716_vm11, %v2145_v20 }
 0xbdf   : > { %8451 = vmatpush3.bf16.msra.mxu0 %v10062_v8  ;;  %8294 = vmatprep.mubr.msk.f32.mxu0 %vm9314_vm0, %v12439_v0 }
 0xbe0   : > { %8452 = vmatprep.subr.bf16.mxu0 %v12437_v9 }
 0xbe3   : > { %8454 = vmatpush3.bf16.msra.mxu0 %v10073_v38 }
 0xbe4   : > { %8455 = vmatprep.subr.bf16.mxu0 %v12437_v9 }
 0xbe7   : > { %8457 = vmatpush3.bf16.msra.mxu0 %v10083_v13 }
 0xbe8   : > { %8458 = vmatprep.subr.bf16.mxu0 %v12437_v9 }
 0xbeb   : > { %8460 = vmatpush3.bf16.msra.mxu0 %v10093_v33 }
 0xcb1   : > { %v2215_v56 = vpop.f32.mrb[36].mxu0 }
 0xcb2   : > { %v2222_v16 = vrot.slane %v2215_v56, %v9659_v50  ;;  %v8277_v63 = vpop.f32.mrb[37].mxu0 }
 0xcb4   : > { %v10117_v2 = vsub.f32 %v2127_v24, %v2222_v16  ;;  %v10119_v54 = vsub.f32 %v2128_v55, %v2222_v16  ;;  %v10121_v53 = vsub.f32 %v2129_v48, %v2222_v16  ;;  %v10123_v31 = vsub.f32 %v2130_v58, %v2222_v16  ;;  %v8661_v55 = vld [vmem:[#allocation7] sm:$0xff]   ;;  %v8662_v24 = vld [vmem:[#allocation7 + $0x8] sm:$0xff]  }
 0xcb5   : > { %2510 = vmatpush1.bf16.msra.mxu1 %v8661_v55  ;;  %v8669_v48 = vld [vmem:[#allocation7 + $0x40] sm:$0xff]  }
 0xcb6   : > { %v2227_v4 = vmul.f32 %v10117_v2, %v10117_v2  ;;  %v2228_v40 = vmul.f32 %v10119_v54, %v10119_v54  ;;  %v2229_v7 = vmul.f32 %v10121_v53, %v10121_v53  ;;  %v2230_v32 = vmul.f32 %v10123_v31, %v10123_v31  ;;  %2511 = vmatprep.subr.bf16.mxu1 %v12441_v29 }
 0xcb8   : > { %v2231_v22 = vsel %vm716_vm11, %v2227_v4, 0.0  ;;  %v2232_v45 = vsel %vm716_vm11, %v2228_v40, 0.0  ;;  %v2234_v35 = vsel %vm716_vm11, %v2229_v7, 0.0  ;;  %v2236_v57 = vsel %vm716_vm11, %v2230_v32, 0.0 }
 0xcb9   : > { %v2233_v11 = vadd.f32 %v2232_v45, %v2231_v22  ;;  %2512 = vmatpush1.bf16.msra.mxu1 %v8662_v24 }
 0xcba   : > { %2513 = vmatprep.subr.bf16.mxu1 %v12441_v29 }
 0xcbb   : > { %v2235_v27 = vadd.f32 %v2234_v35, %v2233_v11 }
 0xcbd   : > { %v2237_v26 = vadd.f32 %v2236_v57, %v2235_v27  ;;  %2514 = vmatpush1.bf16.msra.mxu1 %v8663_v30 }
 0xcbe   : > { %2515 = vmatprep.subr.bf16.mxu1 %v12441_v29 }
 0xcbf   : > { %v2238_v14 = vrot.slane %v2237_v26, 4 }
 0xcc1   : > { %v2239_v46 = vadd.f32 %v2238_v14, %v2237_v26  ;;  %2516 = vmatpush1.bf16.msra.mxu1 %v8664_v37 }
 0xcc2   : > { %2517 = vmatprep.subr.bf16.mxu1 %v12441_v29 }
 0xcc3   : > { %v2240_v36 = vrot.slane %v2239_v46, 2 }
 0xcc5   : > { %v2241_v17 = vadd.f32 %v2240_v36, %v2239_v46  ;;  %2518 = vmatpush1.bf16.msra.mxu1 %v8665_v39 }
 0xcc6   : > { %2519 = vmatprep.subr.bf16.mxu1 %v12441_v29 }
 0xcc7   : > { %v2242_v21 = vrot.slane %v2241_v17, 1 }
 0xcc9   : > { %v2243_v34 = vadd.f32 %v2242_v21, %v2241_v17  ;;  %2520 = vmatpush1.bf16.msra.mxu1 %v8666_v42 }
 0xcca   : > { %2521 = vmatprep.subr.bf16.mxu1 %v12441_v29 }
 0xccb   : > { %v2244_v43 = vmul.f32 0.03125, %v2243_v34 }
 0xccd   : > { %8295 = vmatmul.mubr.msk.f32.vlgmr.msra.gmra.mrb[38].mxu0 %vm716_vm11, %v2244_v43  ;;  %2522 = vmatpush1.bf16.msra.mxu1 %v8667_v44 }
 0xcce   : > { %2523 = vmatprep.subr.bf16.mxu1 %v12441_v29 }
 0xcd1   : > { %2524 = vmatpush1.bf16.msra.mxu1 %v8668_v60 }
 0xcd2   : > { %2525 = vmatprep.subr.bf16.mxu1 %v12441_v29 }
 0xcd5   : > { %2526 = vmatpush1.bf16.msra.mxu1 %v8669_v48 }
 0xcd6   : > { %2527 = vmatprep.subr.bf16.mxu1 %v12441_v29 }
 0xcd9   : > { %2528 = vmatpush1.bf16.msra.mxu1 %v8670_v5 }
 0xcda   : > { %2529 = vmatprep.subr.bf16.mxu1 %v12441_v29 }
 0xcdd   : > { %2530 = vmatpush1.bf16.msra.mxu1 %v8671_v51 }
 0xcde   : > { %2531 = vmatprep.subr.bf16.mxu1 %v12441_v29 }
 0xce1   : > { %2532 = vmatpush1.bf16.msra.mxu1 %v8672_v62 }
 0xce2   : > { %8461 = vmatprep.subr.bf16.mxu1 %v12437_v9 }
 0xda0   : > { %v2314_v3 = vpop.f32.mrb[38].mxu0 }
 0xda1   : > { %v2315_v58 = vadd.f32 1e-05, %v2314_v3  ;;  %v8296_v59 = vpop.f32.mrb[39].mxu0 }
 0xda3   : > { %8805 = vrsqrt.f32 %v2315_v58 }
 0xdad   : > { %v8806_v28 = vpop.eup %8805 }
 0xdae   : > { %v2322_v23 = vrot.slane %v8806_v28, %v9659_v50 }
 0xdb0   : > { %v2325_v61 = vmul.f32 %v2322_v23, %v10121_v53  ;;  %v2326_v41 = vmul.f32 %v2322_v23, %v10123_v31  ;;  %v2323_v20 = vmul.f32 %v2322_v23, %v10117_v2  ;;  %v2324_v56 = vmul.f32 %v2322_v23, %v10119_v54 }
 0xdb2   : > { %v2333_v16 = vmul.f32 %v2330_v25, %v2325_v61  ;;  %v2334_v63 = vmul.f32 %v2330_v25, %v2326_v41  ;;  %v2331_v4 = vmul.f32 %v2330_v25, %v2323_v20  ;;  %v2332_v40 = vmul.f32 %v2330_v25, %v2324_v56 }
 0xdb4   : > { %v2341_v7 = vadd.f32 %v2338_v1, %v2333_v16  ;;  %v2342_v32 = vadd.f32 %v2338_v1, %v2334_v63  ;;  %v2339_v22 = vadd.f32 %v2338_v1, %v2331_v4  ;;  %v2340_v45 = vadd.f32 %v2338_v1, %v2332_v40  ;;  %v8673_v40 = vld [vmem:[#allocation5 + $0x40] sm:$0xff]  }
 0xdb5   : > { %8297 = vmatprep.subr.bf16.mxu0 %v8673_v40 }
 0xdb6   : > { %v2349_v11 = vmul.f32 0.70710677, %v2341_v7  ;;  %v2350_v35 = vmul.f32 0.70710677, %v2342_v32  ;;  %v2347_v27 = vmul.f32 0.70710677, %v2339_v22  ;;  %8298 = vmatpush3.bf16.msra.mxu0 %v8673_v40 }
 0xdb7   : > { %v2348_v57 = vmul.f32 0.70710677, %v2340_v45  ;;  %v2345_v31 = vmul.f32 0.5, %v2341_v7  ;;  %v2346_v14 = vmul.f32 0.5, %v2342_v32  ;;  %v2343_v21 = vmul.f32 0.5, %v2339_v22  ;;  %v8674_v7 = vld [vmem:[#allocation5 + $0x48] sm:$0xff]  }
 0xdb8   : > { %8807 = verf.f32 %v2349_v11  ;;  %v2344_v55 = vmul.f32 0.5, %v2340_v45  ;;  %8299 = vmatprep.subr.bf16.mxu0 %v8674_v7  ;;  %v8675_v32 = vld [vmem:[#allocation5 + $0x50] sm:$0xff]   ;;  %v8676_v22 = vld [vmem:[#allocation5 + $0x58] sm:$0xff]   ;;  %v8677_v45 = vld [vmem:[#allocation5 + $0x60] sm:$0xff]  }
 0xdb9   : > { %8809 = verf.f32 %v2350_v35  ;;  %v8678_v11 = vld [vmem:[#allocation5 + $0x68] sm:$0xff]   ;;  %v8679_v35 = vld [vmem:[#allocation5 + $0x70] sm:$0xff]  }
 0xdba   : > { %8811 = verf.f32 %v2347_v27  ;;  %8300 = vmatpush3.bf16.msra.mxu0 %v8674_v7  ;;  %v8680_v27 = vld [vmem:[#allocation5 + $0x78] sm:$0xff]  }
 0xdbb   : > { %8813 = verf.f32 %v2348_v57  ;;  %8301 = vmatprep.subr.bf16.mxu0 %v8675_v32  ;;  %v10189_v57 = vsub.s32 4, %v9656_v49 }
 0xdbd   : > { %12536 = vst [vmem:[#allocation34_spill] sm:$0xff] %v10189_v57 }
 0xdbe   : > { %8302 = vmatpush3.bf16.msra.mxu0 %v8675_v32 }
 0xdbf   : > { %8303 = vmatprep.subr.bf16.mxu0 %v8676_v22 }
 0xdc2   : > { %v8808_v53 = vpop.eup %8807  ;;  %8304 = vmatpush3.bf16.msra.mxu0 %v8676_v22 }
 0xdc3   : > { %v8810_v2 = vpop.eup %8809  ;;  %v2357_v54 = vadd.f32 1.0, %v8808_v53  ;;  %8305 = vmatprep.subr.bf16.mxu0 %v8677_v45  ;;  %v2430_v53 = vrot.slane %v9938_v18, %v10189_v57 }
 0xdc4   : > { %v8812_v26 = vpop.eup %8811  ;;  %v2358_v46 = vadd.f32 1.0, %v8810_v2 }
 0xdc5   : > { %v8814_v36 = vpop.eup %8813  ;;  %v2361_v17 = vmul.f32 %v2357_v54, %v2345_v31  ;;  %v2355_v34 = vadd.f32 1.0, %v8812_v26 }
 0xdc6   : > { %v2362_v43 = vmul.f32 %v2358_v46, %v2346_v14  ;;  %v2356_v24 = vadd.f32 1.0, %v8814_v36  ;;  %8306 = vmatpush3.bf16.msra.mxu0 %v8677_v45 }
 0xdc7   : > { %v2359_v30 = vmul.f32 %v2355_v34, %v2343_v21  ;;  %8307 = vmatprep.subr.bf16.mxu0 %v8678_v11 }
 0xdc8   : > { %v2364_v37 = vpack.c.bf16 %v2362_v43, %v2361_v17  ;;  %v2360_v39 = vmul.f32 %v2356_v24, %v2344_v55 }
 0xdca   : > { %2417 = vrot.lane.b32.xlu1 %v2364_v37, %s9318_s20  ;;  %v2400_v42 = vshll.u32 %v2364_v37, 16  ;;  %v2363_v44 = vpack.c.bf16 %v2360_v39, %v2359_v30  ;;  %v2397_v60 = vshrl.u32 %v2364_v37, 16  ;;  %8308 = vmatpush3.bf16.msra.mxu0 %v8678_v11 }
 0xdcb   : > { %8309 = vmatprep.subr.bf16.mxu0 %v8679_v35 }
 0xdcc   : > { %2415 = vrot.lane.b32.xlu0 %v2363_v44, %s9318_s20  ;;  %v2390_v48 = vshrl.u32 %v2363_v44, 16  ;;  %v2393_v5 = vshll.u32 %v2363_v44, 16  ;;  %v2408_v51 = vrot.slane %v2400_v42, 1  ;;  %v2399_v62 = vrot.slane %v2397_v60, 7 }
 0xdce   : > { %v2406_v3 = vrot.slane %v2393_v5, 1  ;;  %v2392_v58 = vrot.slane %v2390_v48, 7  ;;  %v2410_v59 = vor.u32 %v2408_v51, %v2397_v60  ;;  %v2402_v28 = vor.u32 %v2400_v42, %v2399_v62  ;;  %8310 = vmatpush3.bf16.msra.mxu0 %v8679_v35 }
 0xdcf   : > { %8311 = vmatprep.subr.bf16.mxu0 %v8680_v27 }
 0xdd0   : > { %v2407_v23 = vor.u32 %v2406_v3, %v2390_v48  ;;  %v2395_v25 = vor.u32 %v2393_v5, %v2392_v58  ;;  %v2403_v1 = vsel %vm550_vm6, %v2392_v58, %v2402_v28  ;;  %v2412_v16 = vsel %vm9601_vm4, %v2410_v59, 0 }
 0xdd2   : > { %v2409_v61 = vsel %vm557_vm3, %v2407_v23, %v2408_v51  ;;  %v2405_v20 = vsel %vm9610_vm7, 0, %v2395_v25  ;;  %8312 = vmatpush3.bf16.msra.mxu0 %v8680_v27 }
 0xdd3   : > { %7905 = vmatprep.mubr.msk.bf16.mxu1 %vm716_vm11, %v2409_v61  ;;  %3797 = vmatprep.subr.bf16.mxu0 %v12441_v29 }
 0xe3c   : > { %v2418_v63 = vpop.permute.xlu1 %2417 }
 0xe3d   : > { %v2425_v4 = vsel %vm716_vm11, %v2403_v1, %v2418_v63 }
 0xe3e   : > { %v2416_v41 = vpop.permute.xlu0 %2415 }
 0xe3f   : > { %v2421_v56 = vsel %vm716_vm11, %v2405_v20, %v2416_v41 }
 0xe40   : > { %2542 = vmatmul.mubr.bf16.vlgmr.msra.gmra.mrb[20].mxu1 %v2421_v56 }
 0xe41   : > { %7906 = vmatprep.mubr.msk.bf16.mxu1 %vm716_vm11, %v2412_v16  ;;  %8463 = vmatpush3.bf16.msra.mxu1 %v10062_v8 }
 0xe42   : > { %8464 = vmatprep.subr.bf16.mxu1 %v12437_v9 }
 0xe45   : > { %8466 = vmatpush3.bf16.msra.mxu1 %v10073_v38 }
 0xe46   : > { %8467 = vmatprep.subr.bf16.mxu1 %v12437_v9 }
 0xe48   : > { %2550 = vmatmul.mubr.bf16.gmra.mrb[24].mxu1 %v2425_v4 }
 0xe49   : > { %8469 = vmatpush3.bf16.msra.mxu1 %v10083_v13  ;;  %8333 = vmatprep.mubr.msk.f32.mxu1 %vm9314_vm0, %v12439_v0 }
 0xe4a   : > { %8470 = vmatprep.subr.bf16.mxu1 %v12437_v9 }
 0xe4d   : > { %8472 = vmatpush3.bf16.msra.mxu1 %v10093_v33 }
 0xe4e   : > { %8473 = vmatprep.subr.bf16.mxu1 %v12437_v9 }
 0xf13   : > { %v2543_v2 = vpop.f32.mrb[20].mxu1 }
 0xf14   : > { %v2544_v31 = vadd.f32 %v2543_v2, %v2430_v53  ;;  %v2545_v54 = vpop.f32.mrb[21].mxu1 }
 0xf15   : > { %v2546_v26 = vpop.f32.mrb[22].mxu1 }
 0xf16   : > { %v2562_v14 = vmul.f32 0.70710677, %v2544_v31  ;;  %v2547_v46 = vadd.f32 %v2546_v26, %v2430_v53  ;;  %v2548_v36 = vpop.f32.mrb[23].mxu1  ;;  %v2558_v44 = vmul.f32 0.5, %v2544_v31 }
 0xf18   : > { %8815 = verf.f32 %v2562_v14  ;;  %v2563_v17 = vmul.f32 0.70710677, %v2547_v46  ;;  %v2559_v60 = vmul.f32 0.5, %v2547_v46 }
 0xf1a   : > { %8817 = verf.f32 %v2563_v17 }
 0xf1b   : > { %v2551_v21 = vpop.f32.mrb[24].mxu1 }
 0xf1c   : > { %v2552_v34 = vadd.f32 %v2551_v21, %v2430_v53  ;;  %v2553_v43 = vpop.f32.mrb[25].mxu1 }
 0xf1d   : > { %v2554_v55 = vpop.f32.mrb[26].mxu1 }
 0xf1e   : > { %v2564_v24 = vmul.f32 0.70710677, %v2552_v34  ;;  %v2555_v49 = vadd.f32 %v2554_v55, %v2430_v53  ;;  %v2556_v30 = vpop.f32.mrb[27].mxu1  ;;  %v2560_v28 = vmul.f32 0.5, %v2552_v34 }
 0xf20   : > { %8819 = verf.f32 %v2564_v24  ;;  %v2565_v37 = vmul.f32 0.70710677, %v2555_v49  ;;  %v2561_v23 = vmul.f32 0.5, %v2555_v49 }
 0xf22   : > { %v8816_v18 = vpop.eup %8815  ;;  %8821 = verf.f32 %v2565_v37 }
 0xf23   : > { %v2570_v39 = vadd.f32 1.0, %v8816_v18 }
 0xf24   : > { %v8818_v42 = vpop.eup %8817 }
 0xf25   : > { %v2571_v48 = vadd.f32 1.0, %v8818_v42  ;;  %v2574_v5 = vmul.f32 %v2570_v39, %v2558_v44 }
 0xf27   : > { %v2575_v51 = vmul.f32 %v2571_v48, %v2559_v60 }
 0xf29   : > { %v2597_v62 = vpack.c.bf16 %v2575_v51, %v2574_v5 }
 0xf2a   : > { %v8820_v3 = vpop.eup %8819 }
 0xf2b   : > { %v2572_v58 = vadd.f32 1.0, %v8820_v3  ;;  %v2602_v1 = vshll.u32 %v2597_v62, 16  ;;  %v2600_v16 = vshrl.u32 %v2597_v62, 16 }
 0xf2c   : > { %v8822_v59 = vpop.eup %8821 }
 0xf2d   : > { %v2573_v25 = vadd.f32 1.0, %v8822_v59  ;;  %v2576_v61 = vmul.f32 %v2572_v58, %v2560_v28  ;;  %v2604_v56 = vrot.slane %v2602_v1, 1 }
 0xf2f   : > { %v2577_v41 = vmul.f32 %v2573_v25, %v2561_v23  ;;  %v2605_v4 = vor.u32 %v2604_v56, %v2600_v16 }
 0xf31   : > { %v2598_v20 = vpack.c.bf16 %v2577_v41, %v2576_v61 }
 0xf33   : > { %v2607_v63 = vshll.u32 %v2598_v20, 16  ;;  %v2611_v7 = vshrl.u32 %v2598_v20, 16 }
 0xf35   : > { %v2609_v40 = vrot.slane %v2607_v63, 1 }
 0xf37   : > { %v2610_v32 = vsel %vm557_vm3, %v2605_v4, %v2609_v40  ;;  %v2613_v22 = vor.u32 %v2611_v7, %v2609_v40 }
 0xf38   : > { %2617 = vrot.lane.b32.xlu0 %v2610_v32, %s9318_s20 }
 0xf39   : > { %v2615_v45 = vsel %vm9601_vm4, %v2613_v22, 0 }
 0xf3a   : > { %2619 = vrot.lane.b32.xlu1 %v2615_v45, %s9318_s20 }
 0xfaa   : > { %v2618_v11 = vpop.permute.xlu0 %2617 }
 0xfab   : > { %v2622_v35 = vsel %vm716_vm11, %v2597_v62, %v2618_v11 }
 0xfac   : > { %v2620_v27 = vpop.permute.xlu1 %2619  ;;  %8313 = vmatprep.mubr.bf16.mxu0 %v2622_v35 }
 0xfad   : > { %v2625_v53 = vsel %vm716_vm11, %v2598_v20, %v2620_v27 }
 0xfae   : > { %8314 = vmatmul.mubr.bf16.vlgmr.msra.gmra.mrb[40].mxu0 %v2625_v53 }
0x1081   : > { %v8315_v2 = vpop.f32.mrb[40].mxu0 }
0x1082   : > { %v2833_v31 = vrot.slane %v8315_v2, %v9780_v12  ;;  %v2709_v54 = vpop.f32.mrb[41].mxu0  ;;  %v2826_v17 = vcombine.high %v8315_v2, %v8315_v2 }
0x1083   : > { %v2735_v26 = vrot.slane %v2709_v54, %v9780_v12  ;;  %v10202_v14 = vpop.f32.mrb[42].mxu0  ;;  %v2728_v39 = vcombine.high %v2709_v54, %v2709_v54 }
0x1084   : > { %v2841_v46 = vcombine.high %v2833_v31, %v2833_v31  ;;  %v2712_v36 = vpop.f32.mrb[43].mxu0  ;;  %v10205_v21 = vrot.slane %v2833_v31, %v9780_v12  ;;  %v2840_v55 = vrot.slane %v2826_v17, %v9780_v12 }
0x1085   : > { %v2743_v43 = vcombine.high %v2735_v26, %v2735_v26  ;;  %v10212_v24 = vrot.slane %v2735_v26, %v9780_v12  ;;  %v2742_v5 = vrot.slane %v2728_v39, %v9780_v12  ;;  %v2784_v28 = vrot.slane %v2712_v36, %v9780_v12 }
0x1086   : > { %v10208_v34 = vrot.slane %v2841_v46, %v9780_v12  ;;  %v3023_v30 = vrot.slane %v10205_v21, %v9659_v50  ;;  %v2842_v18 = vcombine.high %v2840_v55, %v2840_v55  ;;  %v10229_v60 = vcombine.high %v10205_v21, %v10205_v21 }
0x1087   : > { %v10215_v49 = vrot.slane %v2743_v43, %v9780_v12  ;;  %v2959_v42 = vrot.slane %v10212_v24, %v9659_v50  ;;  %v10239_v51 = vrot.slane %v2840_v55, %v9780_v12  ;;  %v2744_v59 = vcombine.high %v2742_v5, %v2742_v5 }
0x1088   : > { %v3027_v37 = vrot.slane %v10208_v34, %v9659_v50  ;;  %3116 = vrot.lane.b32.xlu0 %v3023_v30, %s9318_s20  ;;  %v10233_v48 = vcombine.high %v10208_v34, %v10208_v34  ;;  %v10242_v62 = vrot.slane %v2842_v18, %v9780_v12  ;;  %v3031_v3 = vrot.slane %v10229_v60, %v9659_v50 }
0x1089   : > { %v2963_v44 = vrot.slane %v10215_v49, %v9659_v50  ;;  %v3039_v23 = vrot.slane %v10239_v51, %v9659_v50  ;;  %v10257_v1 = vcombine.high %v10212_v24, %v10212_v24  ;;  %v10261_v61 = vcombine.high %v10215_v49, %v10215_v49 }
0x108a   : > { %3118 = vrot.lane.b32.xlu1 %v3027_v37, %s9318_s20  ;;  %v3035_v58 = vrot.slane %v10233_v48, %v9659_v50  ;;  %v3043_v25 = vrot.slane %v10242_v62, %v9659_v50  ;;  %v10266_v41 = vrot.slane %v2742_v5, %v9780_v12  ;;  %v10269_v20 = vrot.slane %v2744_v59, %v9780_v12 }
0x108b   : > { %v2792_v56 = vcombine.high %v2784_v28, %v2784_v28  ;;  %v2967_v16 = vrot.slane %v10257_v1, %v9659_v50  ;;  %v2971_v63 = vrot.slane %v10261_v61, %v9659_v50  ;;  %v10278_v4 = vrot.slane %v2784_v28, %v9780_v12 }
0x108c   : > { %3084 = vrot.lane.b32.xlu0 %v2959_v42, %s9318_s20  ;;  %v2975_v7 = vrot.slane %v10266_v41, %v9659_v50  ;;  %v2979_v32 = vrot.slane %v10269_v20, %v9659_v50  ;;  %v2777_v22 = vcombine.high %v2712_v36, %v2712_v36  ;;  %v10295_v35 = vcombine.high %v10239_v51, %v10239_v51 }
0x108d   : > { %v10281_v40 = vrot.slane %v2792_v56, %v9780_v12  ;;  %v2991_v45 = vrot.slane %v10278_v4, %v9659_v50  ;;  %v10299_v27 = vcombine.high %v10242_v62, %v10242_v62  ;;  %v10310_v54 = vcombine.high %v10266_v41, %v10266_v41 }
0x108e   : > { %3086 = vrot.lane.b32.xlu1 %v2963_v44, %s9318_s20  ;;  %v2791_v53 = vrot.slane %v2777_v22, %v9780_v12  ;;  %v3047_v2 = vrot.slane %v10295_v35, %v9659_v50  ;;  %v10314_v26 = vcombine.high %v10269_v20, %v10269_v20  ;;  %v10324_v43 = vcombine.high %v10278_v4, %v10278_v4 }
0x108f   : > { %v2995_v11 = vrot.slane %v10281_v40, %v9659_v50  ;;  %v3051_v31 = vrot.slane %v10299_v27, %v9659_v50  ;;  %v2983_v36 = vrot.slane %v10310_v54, %v9659_v50  ;;  %v10328_v55 = vcombine.high %v10281_v40, %v10281_v40 }
0x1090   : > { %3120 = vrot.lane.b32.xlu0 %v3031_v3, %s9318_s20  ;;  %v2793_v46 = vcombine.high %v2791_v53, %v2791_v53  ;;  %v2987_v17 = vrot.slane %v10314_v26, %v9659_v50  ;;  %v2882_v30 = vrot.slane %v10202_v14, %v9780_v12  ;;  %v10335_v37 = vrot.slane %v2791_v53, %v9780_v12 }
0x1091   : > { %v2999_v39 = vrot.slane %v10324_v43, %v9659_v50  ;;  %v3003_v42 = vrot.slane %v10328_v55, %v9659_v50  ;;  %v2875_v44 = vcombine.high %v10202_v14, %v10202_v14 }
0x1092   : > { %3122 = vrot.lane.b32.xlu1 %v3035_v58, %s9318_s20  ;;  %v10338_v18 = vrot.slane %v2793_v46, %v9780_v12  ;;  %v2890_v5 = vcombine.high %v2882_v30, %v2882_v30  ;;  %v3007_v3 = vrot.slane %v10335_v37, %v9659_v50  ;;  %v10354_v59 = vcombine.high %v10335_v37, %v10335_v37 }
0x1093   : > { %v2889_v14 = vrot.slane %v2875_v44, %v9780_v12  ;;  %v8681_v44 = vld [vmem:[%s12418_s9 + $0x60] sm:$0xff]  }
0x1094   : > { %3124 = vrot.lane.b32.xlu0 %v3039_v23, %s9318_s20  ;;  %v3011_v58 = vrot.slane %v10338_v18, %v9659_v50  ;;  %v10358_v28 = vcombine.high %v10338_v18, %v10338_v18  ;;  %v10364_v23 = vrot.slane %v2882_v30, %v9780_v12  ;;  %v3015_v56 = vrot.slane %v10354_v59, %v9659_v50 }
0x1095   : > { %3798 = vmatpush1.bf16.msra.mxu0 %v8681_v44 }
0x1096   : > { %3126 = vrot.lane.b32.xlu1 %v3043_v25, %s9318_s20  ;;  %v10367_v25 = vrot.slane %v2890_v5, %v9780_v12  ;;  %v10381_v22 = vcombine.high %v10364_v23, %v10364_v23  ;;  %v8682_v5 = vld [vmem:[%s12418_s9 + $0x68] sm:$0xff]   ;;  %3799 = vmatprep.subr.bf16.mxu0 %v12441_v29 }
0x1098   : > { %3088 = vrot.lane.b32.xlu0 %v2967_v16, %s9318_s20  ;;  %v3019_v16 = vrot.slane %v10358_v28, %v9659_v50 }
0x1099   : > { %3800 = vmatpush1.bf16.msra.mxu0 %v8682_v5  ;;  %v8691_v5 = vld [vmem:[%s12418_s9 + $0xb0] sm:$0xff]  }
0x109a   : > { %3090 = vrot.lane.b32.xlu1 %v2971_v63, %s9318_s20  ;;  %v2891_v63 = vcombine.high %v2889_v14, %v2889_v14  ;;  %3801 = vmatprep.subr.bf16.mxu0 %v12441_v29 }
0x109c   : > { %3092 = vrot.lane.b32.xlu0 %v2975_v7, %s9318_s20  ;;  %v3055_v7 = vrot.slane %v10364_v23, %v9659_v50  ;;  %v10393_v53 = vrot.slane %v2891_v63, %v9780_v12  ;;  %v10448_v63 = vld [vmem:[#allocation8 + $0x8] sm:$0x1f] }
0x109d   : > { %12537 = vst [vmem:[#allocation35_spill] sm:$0xff] %v10448_v63 }
0x109e   : > { %3094 = vrot.lane.b32.xlu1 %v2979_v32, %s9318_s20  ;;  %v3059_v32 = vrot.slane %v10367_v25, %v9659_v50  ;;  %v10411_v30 = vcombine.high %v10393_v53, %v10393_v53 }
0x10a0   : > { %3100 = vrot.lane.b32.xlu0 %v2991_v45, %s9318_s20  ;;  %v10385_v45 = vcombine.high %v10367_v25, %v10367_v25 }
0x10a2   : > { %3102 = vrot.lane.b32.xlu1 %v2995_v11, %s9318_s20  ;;  %v10390_v11 = vrot.slane %v2889_v14, %v9780_v12  ;;  %v8685_v14 = vld [vmem:[%s12418_s9 + $0x80] sm:$0xff]  }
0x10a4   : > { %3128 = vrot.lane.b32.xlu0 %v3047_v2, %s9318_s20  ;;  %v3063_v2 = vrot.slane %v10381_v22, %v9659_v50  ;;  %v3071_v46 = vrot.slane %v10390_v11, %v9659_v50 }
0x10a6   : > { %3130 = vrot.lane.b32.xlu1 %v3051_v31, %s9318_s20  ;;  %v3067_v31 = vrot.slane %v10385_v45, %v9659_v50 }
0x10a8   : > { %3096 = vrot.lane.b32.xlu0 %v2983_v36, %s9318_s20  ;;  %v3075_v36 = vrot.slane %v10393_v53, %v9659_v50 }
0x10aa   : > { %3098 = vrot.lane.b32.xlu1 %v2987_v17, %s9318_s20  ;;  %v10407_v17 = vcombine.high %v10390_v11, %v10390_v11 }
0x10ac   : > { %3104 = vrot.lane.b32.xlu0 %v2999_v39, %s9318_s20  ;;  %v3079_v39 = vrot.slane %v10407_v17, %v9659_v50 }
0x10ae   : > { %3106 = vrot.lane.b32.xlu1 %v3003_v42, %s9318_s20  ;;  %v3083_v42 = vrot.slane %v10411_v30, %v9659_v50 }
0x10b0   : > { %3108 = vrot.lane.b32.xlu0 %v3007_v3, %s9318_s20  ;;  %v8683_v3 = vld [vmem:[%s12418_s9 + $0x70] sm:$0xff]  }
0x10b1   : > { %3802 = vmatpush1.bf16.msra.mxu0 %v8683_v3 }
0x10b2   : > { %3110 = vrot.lane.b32.xlu1 %v3011_v58, %s9318_s20  ;;  %v8684_v58 = vld [vmem:[%s12418_s9 + $0x78] sm:$0xff]   ;;  %3803 = vmatprep.subr.bf16.mxu0 %v12441_v29 }
0x10b4   : > { %3112 = vrot.lane.b32.xlu0 %v3015_v56, %s9318_s20  ;;  %v8686_v56 = vld [vmem:[%s12418_s9 + $0x88] sm:$0xff]  }
0x10b5   : > { %3804 = vmatpush1.bf16.msra.mxu0 %v8684_v58 }
0x10b6   : > { %3114 = vrot.lane.b32.xlu1 %v3019_v16, %s9318_s20  ;;  %3805 = vmatprep.subr.bf16.mxu0 %v12441_v29  ;;  %v8687_v16 = vld [vmem:[%s12418_s9 + $0x90] sm:$0xff]  }
0x10b8   : > { %3132 = vrot.lane.b32.xlu0 %v3055_v7, %s9318_s20  ;;  %v8688_v7 = vld [vmem:[%s12418_s9 + $0x98] sm:$0xff]  }
0x10b9   : > { %3806 = vmatpush1.bf16.msra.mxu0 %v8685_v14 }
0x10ba   : > { %3134 = vrot.lane.b32.xlu1 %v3059_v32, %s9318_s20  ;;  %3807 = vmatprep.subr.bf16.mxu0 %v12441_v29  ;;  %v3215_v32 = vrot.slane %v10448_v63, %v9659_v50 }
0x10bc   : > { %3136 = vrot.lane.b32.xlu0 %v3063_v2, %s9318_s20  ;;  %v8689_v2 = vld [vmem:[%s12418_s9 + $0xa0] sm:$0xff]  }
0x10bd   : > { %3808 = vmatpush1.bf16.msra.mxu0 %v8686_v56 }
0x10be   : > { %3138 = vrot.lane.b32.xlu1 %v3067_v31, %s9318_s20  ;;  %3809 = vmatprep.subr.bf16.mxu0 %v12441_v29  ;;  %v10461_v31 = vrot.slane %v3215_v32, %v9941_v19 }
0x10c0   : > { %3140 = vrot.lane.b32.xlu0 %v3071_v46, %s9318_s20  ;;  %v8690_v46 = vld [vmem:[%s12418_s9 + $0xa8] sm:$0xff]  }
0x10c1   : > { %3810 = vmatpush1.bf16.msra.mxu0 %v8687_v16 }
0x10c2   : > { %3142 = vrot.lane.b32.xlu1 %v3075_v36, %s9318_s20  ;;  %3811 = vmatprep.subr.bf16.mxu0 %v12441_v29  ;;  %v10469_v36 = vcombine.high %v10461_v31, %v10461_v31 }
0x10c4   : > { %3144 = vrot.lane.b32.xlu0 %v3079_v39, %s9318_s20  ;;  %v3217_v39 = vcombine.high %v3215_v32, %v3215_v32 }
0x10c5   : > { %3812 = vmatpush1.bf16.msra.mxu0 %v8688_v7 }
0x10c6   : > { %3146 = vrot.lane.b32.xlu1 %v3083_v42, %s9318_s20  ;;  %3813 = vmatprep.subr.bf16.mxu0 %v12441_v29  ;;  %v10482_v16 = vrot.slane %v3217_v39, %v9941_v19 }
0x10c9   : > { %3814 = vmatpush1.bf16.msra.mxu0 %v8689_v2 }
0x10ca   : > { %3815 = vmatprep.subr.bf16.mxu0 %v12441_v29 }
0x10cd   : > { %3816 = vmatpush1.bf16.msra.mxu0 %v8690_v46 }
0x10ce   : > { %3817 = vmatprep.subr.bf16.mxu0 %v12441_v29 }
0x10d1   : > { %3818 = vmatpush1.bf16.msra.mxu0 %v8691_v5  ;;  %v10496_v5 = vcombine.high %v10482_v16, %v10482_v16 }
0x10d2   : > { %3819 = vmatprep.subr.bf16.mxu0 %v12441_v29 }
0x10fa   : > { %v3117_v42 = vpop.permute.xlu0 %3116 }
0x10fb   : > { %v3196_v3 = vsel %vm549_vm5, %v10205_v21, %v3117_v42  ;;  %v8692_v21 = vld [vmem:[%s12418_s9 + $0xb8] sm:$0xff]  }
0x10fc   : > { %v3119_v44 = vpop.permute.xlu1 %3118  ;;  %v3254_v14 = vadd.f32 %v10461_v31, %v3196_v3  ;;  %3820 = vmatpush1.bf16.msra.mxu0 %v8692_v21 }
0x10fd   : > { %v3197_v58 = vsel %vm549_vm5, %v10208_v34, %v3119_v44 }
0x10fe   : > { %v3255_v56 = vadd.f32 %v10469_v36, %v3197_v58  ;;  %v3085_v32 = vpop.permute.xlu0 %3084  ;;  %v3318_v46 = vmul.f32 0.70710677, %v3254_v14 }
0x10ff   : > { %v3180_v34 = vsel %vm549_vm5, %v10212_v24, %v3085_v32 }
0x1100   : > { %v3319_v7 = vmul.f32 0.70710677, %v3255_v56  ;;  %v3087_v2 = vpop.permute.xlu1 %3086  ;;  %v3238_v39 = vadd.f32 %v10461_v31, %v3180_v34 }
0x1101   : > { %v3181_v42 = vsel %vm549_vm5, %v10215_v49, %v3087_v2 }
0x1102   : > { %v3239_v44 = vadd.f32 %v10469_v36, %v3181_v42  ;;  %8823 = verf.f32 %v3319_v7  ;;  %v3302_v3 = vmul.f32 0.70710677, %v3238_v39  ;;  %v3121_v9 = vpop.permute.xlu0 %3120  ;;  %v3270_v6 = vmul.f32 0.5, %v3238_v39 }
0x1103   : > { %8825 = verf.f32 %v3318_v46  ;;  %v3198_v24 = vsel %vm549_vm5, %v10229_v60, %v3121_v9 }
0x1104   : > { %v3303_v58 = vmul.f32 0.70710677, %v3239_v44  ;;  %v3123_v0 = vpop.permute.xlu1 %3122  ;;  %8827 = verf.f32 %v3302_v3  ;;  %v3256_v32 = vadd.f32 %v10482_v16, %v3198_v24 }
0x1105   : > { %v3199_v49 = vsel %vm549_vm5, %v10233_v48, %v3123_v0 }
0x1106   : > { %v3257_v2 = vadd.f32 %v10496_v5, %v3199_v49  ;;  %8829 = verf.f32 %v3303_v58  ;;  %v3320_v34 = vmul.f32 0.70710677, %v3256_v32  ;;  %v3125_v42 = vpop.permute.xlu0 %3124  ;;  %v3288_v13 = vmul.f32 0.5, %v3256_v32 }
0x1107   : > { %v3200_v21 = vsel %vm549_vm5, %v10239_v51, %v3125_v42 }
0x1108   : > { %v3321_v7 = vmul.f32 0.70710677, %v3257_v2  ;;  %v3127_v29 = vpop.permute.xlu1 %3126  ;;  %8831 = verf.f32 %v3320_v34  ;;  %v3258_v9 = vadd.f32 %v10461_v31, %v3200_v21 }
0x1109   : > { %v3201_v46 = vsel %vm549_vm5, %v10242_v62, %v3127_v29 }
0x110a   : > { %v10510_v0 = vadd.f32 %v10469_v36, %v3201_v46  ;;  %8833 = verf.f32 %v3321_v7  ;;  %v3089_v48 = vpop.permute.xlu0 %3088  ;;  %v3322_v24 = vmul.f32 0.70710677, %v3258_v9 }
0x110b   : > { %v3182_v49 = vsel %vm549_vm5, %v10257_v1, %v3089_v48  ;;  %v3286_v48 = vmul.f32 0.5, %v3254_v14 }
0x110c   : > { %v3323_v60 = vmul.f32 0.70710677, %v10510_v0  ;;  %v3091_v3 = vpop.permute.xlu1 %3090  ;;  %v8824_v58 = vpop.eup %8823  ;;  %v3240_v29 = vadd.f32 %v10482_v16, %v3182_v49 }
0x110d   : > { %v3183_v51 = vsel %vm549_vm5, %v10261_v61, %v3091_v3  ;;  %v8826_v34 = vpop.eup %8825  ;;  %v3383_v7 = vadd.f32 1.0, %v8824_v58  ;;  %v3287_v3 = vmul.f32 0.5, %v3255_v56  ;;  %v3289_v56 = vmul.f32 0.5, %v3257_v2 }
0x110e   : > { %v3241_v62 = vadd.f32 %v10496_v5, %v3183_v51  ;;  %8835 = verf.f32 %v3323_v60  ;;  %v8828_v42 = vpop.eup %8827  ;;  %v3304_v21 = vmul.f32 0.70710677, %v3240_v29  ;;  %v3093_v46 = vpop.permute.xlu0 %3092  ;;  %v3382_v60 = vadd.f32 1.0, %v8826_v34 }
0x110f   : > { %8837 = verf.f32 %v3322_v24  ;;  %v3184_v1 = vsel %vm549_vm5, %v10266_v41, %v3093_v46  ;;  %v3366_v33 = vadd.f32 1.0, %v8828_v42  ;;  %v3271_v24 = vmul.f32 0.5, %v3239_v44 }
0x1110   : > { %v3095_v12 = vpop.permute.xlu1 %3094  ;;  %v8830_v57 = vpop.eup %8829  ;;  %v3305_v47 = vmul.f32 0.70710677, %v3241_v62  ;;  %v3242_v51 = vadd.f32 %v10461_v31, %v3184_v1  ;;  %v3415_v8 = vmul.f32 %v3383_v7, %v3287_v3  ;;  %v3414_v34 = vmul.f32 %v3382_v60, %v3286_v48 }
0x1111   : > { %v3185_v61 = vsel %vm549_vm5, %v10269_v20, %v3095_v12  ;;  %v3367_v49 = vadd.f32 1.0, %v8830_v57  ;;  %v3290_v1 = vmul.f32 0.5, %v3258_v9  ;;  %v3398_v32 = vmul.f32 %v3366_v33, %v3270_v6 }
0x1112   : > { %8839 = verf.f32 %v3305_v47  ;;  %v3243_v58 = vadd.f32 %v10469_v36, %v3185_v61  ;;  %v8832_v50 = vpop.eup %8831  ;;  %v3101_v38 = vpop.permute.xlu0 %3100  ;;  %v3306_v12 = vmul.f32 0.70710677, %v3242_v51  ;;  %v3272_v33 = vmul.f32 0.5, %v3240_v29 }
0x1113   : > { %8841 = verf.f32 %v3304_v21  ;;  %v3188_v57 = vsel %vm549_vm5, %v10278_v4, %v3101_v38  ;;  %v3399_v14 = vmul.f32 %v3367_v49, %v3271_v24  ;;  %v3384_v42 = vadd.f32 1.0, %v8832_v50 }
0x1114   : > { %v3103_v41 = vpop.permute.xlu1 %3102  ;;  %v8834_v46 = vpop.eup %8833  ;;  %v3307_v20 = vmul.f32 0.70710677, %v3243_v58  ;;  %v3246_v47 = vadd.f32 %v10461_v31, %v3188_v57  ;;  %v3530_v38 = vcombine.low %v3414_v34, %v3415_v8 }
0x1115   : > { %v3385_v39 = vadd.f32 1.0, %v8834_v46  ;;  %v3189_v44 = vsel %vm549_vm5, %v10281_v40, %v3103_v41  ;;  %v3462_v9 = vcombine.low %v3398_v32, %v3399_v14  ;;  %v3291_v40 = vmul.f32 0.5, %v10510_v0 }
0x1116   : > { %8843 = verf.f32 %v3307_v20  ;;  %v3310_v21 = vmul.f32 0.70710677, %v3246_v47  ;;  %v3247_v7 = vadd.f32 %v10469_v36, %v3189_v44  ;;  %v3129_v61 = vpop.permute.xlu0 %3128  ;;  %v3416_v8 = vmul.f32 %v3384_v42, %v3288_v13 }
0x1117   : > { %8845 = verf.f32 %v3306_v12  ;;  %v3202_v4 = vsel %vm549_vm5, %v10295_v35, %v3129_v61  ;;  %v3417_v48 = vmul.f32 %v3385_v39, %v3289_v56  ;;  %v3273_v41 = vmul.f32 0.5, %v3241_v62 }
0x1118   : > { %v3131_v3 = vpop.permute.xlu1 %3130  ;;  %v8836_v63 = vpop.eup %8835  ;;  %8847 = verf.f32 %v3310_v21  ;;  %v3311_v6 = vmul.f32 0.70710677, %v3247_v7  ;;  %v3260_v49 = vadd.f32 %v10482_v16, %v3202_v4  ;;  %v10538_v46 = vmul.f32 0.5, %v3242_v51 }
0x1119   : > { %v3203_v2 = vsel %vm549_vm5, %v10299_v27, %v3131_v3  ;;  %v8838_v50 = vpop.eup %8837  ;;  %v3387_v24 = vadd.f32 1.0, %v8836_v63  ;;  %v3275_v20 = vmul.f32 0.5, %v3243_v58  ;;  %v3538_v0 = vrot.slane %v3530_v38, %v9941_v19 }
0x111a   : > { %v3261_v60 = vadd.f32 %v10496_v5, %v3203_v2  ;;  %v3097_v35 = vpop.permute.xlu0 %3096  ;;  %8849 = verf.f32 %v3311_v6  ;;  %v3324_v57 = vmul.f32 0.70710677, %v3260_v49  ;;  %v3531_v14 = vcombine.low %v3416_v8, %v3417_v48 }
0x111b   : > { %v3386_v56 = vadd.f32 1.0, %v8838_v50  ;;  %v10541_v39 = vmul.f32 0.5, %v3246_v47  ;;  %v3186_v13 = vsel %vm549_vm5, %v10310_v54, %v3097_v35  ;;  %v10548_v62 = vrot.slane %v3462_v9, %v9941_v19 }
0x111c   : > { %v3099_v12 = vpop.permute.xlu1 %3098  ;;  %v8840_v27 = vpop.eup %8839  ;;  %v3325_v34 = vmul.f32 0.70710677, %v3261_v60  ;;  %v10550_v51 = vmul.f32 %v3387_v24, %v3291_v40  ;;  %8851 = verf.f32 %v3324_v57  ;;  %v3244_v58 = vadd.f32 %v10482_v16, %v3186_v13 }
0x111d   : > { %v8842_v29 = vpop.eup %8841  ;;  %v3369_v44 = vadd.f32 1.0, %v8840_v27  ;;  %v3187_v63 = vsel %vm549_vm5, %v10314_v26, %v3099_v12  ;;  %v10558_v3 = vmul.f32 %v3386_v56, %v3290_v1  ;;  %v3279_v38 = vmul.f32 0.5, %v3247_v7 }
0x111e   : > { %v3245_v32 = vadd.f32 %v10496_v5, %v3187_v63  ;;  %v3105_v47 = vpop.permute.xlu0 %3104  ;;  %v3368_v61 = vadd.f32 1.0, %v8842_v29  ;;  %8853 = verf.f32 %v3325_v34  ;;  %v3308_v4 = vmul.f32 0.70710677, %v3244_v58 }
0x111f   : > { %v3190_v54 = vsel %vm549_vm5, %v10324_v43, %v3105_v47  ;;  %v3545_v2 = vrot.slane %v3531_v14, %v9941_v19  ;;  %v3401_v48 = vmul.f32 %v3369_v44, %v3273_v41  ;;  %v10561_v40 = vmul.f32 0.5, %v3260_v49 }
0x1120   : > { %v3107_v42 = vpop.permute.xlu1 %3106  ;;  %v8844_v21 = vpop.eup %8843  ;;  %v3309_v50 = vmul.f32 0.70710677, %v3245_v32  ;;  %v3248_v6 = vadd.f32 %v10482_v16, %v3190_v54  ;;  %v3547_v8 = vcombine.low %v10558_v3, %v10550_v51  ;;  %8855 = verf.f32 %v3308_v4 }
0x1121   : > { %v3191_v26 = vsel %vm549_vm5, %v10328_v55, %v3107_v42  ;;  %v8846_v9 = vpop.eup %8845  ;;  %v3371_v43 = vadd.f32 1.0, %v8844_v21  ;;  %v3400_v35 = vmul.f32 %v3368_v61, %v3272_v33  ;;  %v10567_v12 = vmul.f32 0.5, %v3261_v60 }
0x1122   : > { %v3249_v55 = vadd.f32 %v10496_v5, %v3191_v26  ;;  %v3109_v1 = vpop.permute.xlu0 %3108  ;;  %v8848_v7 = vpop.eup %8847  ;;  %8857 = verf.f32 %v3309_v50  ;;  %v3312_v41 = vmul.f32 0.70710677, %v3248_v6  ;;  %v3370_v49 = vadd.f32 1.0, %v8846_v9 }
0x1123   : > { %v3192_v57 = vsel %vm549_vm5, %v10335_v37, %v3109_v1  ;;  %v10571_v29 = vcombine.low %v3538_v0, %v3545_v2  ;;  %v3463_v56 = vcombine.low %v3400_v35, %v3401_v48  ;;  %v3403_v33 = vmul.f32 %v3371_v43, %v3275_v20 }
0x1124   : > { %v3111_v24 = vpop.permute.xlu1 %3110  ;;  %v3313_v27 = vmul.f32 0.70710677, %v3249_v55  ;;  %v8850_v14 = vpop.eup %8849  ;;  %8859 = verf.f32 %v3312_v41  ;;  %v3250_v34 = vadd.f32 %v10461_v31, %v3192_v57  ;;  %v3374_v60 = vadd.f32 1.0, %v8848_v7 }
0x1125   : > { %v3193_v44 = vsel %vm549_vm5, %v10338_v18, %v3111_v24  ;;  %v3375_v42 = vadd.f32 1.0, %v8850_v14  ;;  %v3402_v54 = vmul.f32 %v3370_v49, %v10538_v46  ;;  %v3276_v26 = vmul.f32 0.5, %v3244_v58 }
0x1126   : > { %8861 = verf.f32 %v3313_v27  ;;  %v3251_v13 = vadd.f32 %v10469_v36, %v3193_v44  ;;  %v3113_v63 = vpop.permute.xlu0 %3112  ;;  %v3314_v21 = vmul.f32 0.70710677, %v3250_v34  ;;  %v8852_v61 = vpop.eup %8851  ;;  %v3277_v18 = vmul.f32 0.5, %v3245_v32 }
0x1127   : > { %v3194_v37 = vsel %vm549_vm5, %v10354_v59, %v3113_v63  ;;  %v3477_v48 = vrot.slane %v3463_v56, %v9941_v19  ;;  %v3479_v50 = vcombine.low %v3402_v54, %v3403_v33  ;;  %v3280_v59 = vmul.f32 0.5, %v3248_v6 }
0x1128   : > { %v3115_v47 = vpop.permute.xlu1 %3114  ;;  %v3315_v20 = vmul.f32 0.70710677, %v3251_v13  ;;  %v8854_v4 = vpop.eup %8853  ;;  %8863 = verf.f32 %v3314_v21  ;;  %v3252_v2 = vadd.f32 %v10482_v16, %v3194_v37  ;;  %v3281_v43 = vmul.f32 0.5, %v3249_v55 }
0x1129   : > { %v3195_v0 = vsel %vm549_vm5, %v10358_v28, %v3115_v47  ;;  %v10588_v46 = vmul.f32 %v3374_v60, %v10541_v39  ;;  %v10590_v58 = vmul.f32 %v3375_v42, %v3279_v38  ;;  %v3388_v32 = vadd.f32 1.0, %v8852_v61 }
0x112a   : > { %v10584_v9 = vadd.f32 %v10496_v5, %v3195_v0  ;;  %8865 = verf.f32 %v3315_v20  ;;  %v3133_v28 = vpop.permute.xlu0 %3132  ;;  %v3316_v24 = vmul.f32 0.70710677, %v3252_v2  ;;  %v8856_v7 = vpop.eup %8855  ;;  %v3389_v35 = vadd.f32 1.0, %v8854_v4 }
0x112b   : > { %v3204_v49 = vsel %vm549_vm5, %v10364_v23, %v3133_v28  ;;  %v10597_v27 = vmul.f32 0.5, %v3250_v34  ;;  %v10603_v38 = vcombine.low %v10548_v62, %v3477_v48  ;;  %v3372_v57 = vadd.f32 1.0, %v8856_v7 }
0x112c   : > { %v3135_v1 = vpop.permute.xlu1 %3134  ;;  %v3317_v41 = vmul.f32 0.70710677, %v10584_v9  ;;  %v8858_v55 = vpop.eup %8857  ;;  %8867 = verf.f32 %v3316_v24  ;;  %v10600_v39 = vadd.f32 %v10461_v31, %v3204_v49  ;;  %v3283_v34 = vmul.f32 0.5, %v3251_v13 }
0x112d   : > { %v3205_v6 = vsel %vm549_vm5, %v10367_v25, %v3135_v1  ;;  %v3373_v14 = vadd.f32 1.0, %v8858_v55  ;;  %v3496_v25 = vcombine.low %v10588_v46, %v10590_v58  ;;  %v3420_v47 = vmul.f32 %v3388_v32, %v10561_v40 }
0x112e   : > { %8869 = verf.f32 %v3317_v41  ;;  %v10606_v56 = vadd.f32 %v10469_v36, %v3205_v6  ;;  %v3137_v23 = vpop.permute.xlu0 %3136  ;;  %v8860_v33 = vpop.eup %8859  ;;  %v3326_v60 = vmul.f32 0.70710677, %v10600_v39  ;;  %v3421_v42 = vmul.f32 %v3389_v35, %v10567_v12 }
0x112f   : > { %v3206_v63 = vsel %vm549_vm5, %v10381_v22, %v3137_v23  ;;  %v3405_v21 = vmul.f32 %v3373_v14, %v3277_v18  ;;  %v3376_v0 = vadd.f32 1.0, %v8860_v33  ;;  %v3487_v13 = vrot.slane %v3479_v50, %v9941_v19 }
0x1130   : > { %v3139_v44 = vpop.permute.xlu1 %3138  ;;  %v8862_v62 = vpop.eup %8861  ;;  %v3327_v37 = vmul.f32 0.70710677, %v10606_v56  ;;  %v3264_v61 = vadd.f32 %v10482_v16, %v3206_v63  ;;  %v3404_v20 = vmul.f32 %v3372_v57, %v3276_v26  ;;  %v3284_v12 = vmul.f32 0.5, %v3252_v2 }
0x1131   : > { %v3207_v54 = vsel %vm549_vm5, %v10385_v45, %v3139_v44  ;;  %v3377_v4 = vadd.f32 1.0, %v8862_v62  ;;  %v3548_v24 = vcombine.low %v3420_v47, %v3421_v42  ;;  %v3408_v26 = vmul.f32 %v3376_v0, %v3280_v59 }
0x1132   : > { %8871 = verf.f32 %v3327_v37  ;;  %v3265_v22 = vadd.f32 %v10496_v5, %v3207_v54  ;;  %v3141_v48 = vpop.permute.xlu0 %3140  ;;  %v8864_v28 = vpop.eup %8863  ;;  %v3328_v18 = vmul.f32 0.70710677, %v3264_v61  ;;  %v3480_v7 = vcombine.low %v3404_v20, %v3405_v21 }
0x1133   : > { %8873 = verf.f32 %v3326_v60  ;;  %v3208_v1 = vsel %vm549_vm5, %v10390_v11, %v3141_v48  ;;  %v3409_v49 = vmul.f32 %v3377_v4, %v3281_v43  ;;  %v3378_v6 = vadd.f32 1.0, %v8864_v28 }
0x1134   : > { %v3143_v40 = vpop.permute.xlu1 %3142  ;;  %v8866_v32 = vpop.eup %8865  ;;  %v3329_v45 = vmul.f32 0.70710677, %v3265_v22  ;;  %v3266_v50 = vadd.f32 %v10461_v31, %v3208_v1  ;;  %8875 = verf.f32 %v3328_v18  ;;  %v3285_v60 = vmul.f32 0.5, %v10584_v9 }
0x1135   : > { %v3379_v35 = vadd.f32 1.0, %v8866_v32  ;;  %v3209_v41 = vsel %vm549_vm5, %v10393_v53, %v3143_v40  ;;  %v3562_v9 = vrot.slane %v3548_v24, %v9941_v19  ;;  %v3504_v51 = vrot.slane %v3496_v25, %v9941_v19 }
0x1136   : > { %8877 = verf.f32 %v3329_v45  ;;  %v3330_v2 = vmul.f32 0.70710677, %v3266_v50  ;;  %v3145_v55 = vpop.permute.xlu0 %3144  ;;  %v8868_v14 = vpop.eup %8867  ;;  %v3267_v23 = vadd.f32 %v10469_v36, %v3209_v41  ;;  %v3555_v36 = vrot.slane %v3547_v8, %v9941_v19 }
0x1137   : > { %v3411_v11 = vmul.f32 %v3379_v35, %v3283_v34  ;;  %v3210_v44 = vsel %vm549_vm5, %v10407_v17, %v3145_v55  ;;  %v3380_v33 = vadd.f32 1.0, %v8868_v14  ;;  %v3497_v17 = vcombine.low %v3408_v26, %v3409_v49 }
0x1138   : > { %v3147_v57 = vpop.permute.xlu1 %3146  ;;  %v8870_v59 = vpop.eup %8869  ;;  %8879 = verf.f32 %v3330_v2  ;;  %v3268_v53 = vadd.f32 %v10482_v16, %v3210_v44  ;;  %v3331_v62 = vmul.f32 0.70710677, %v3267_v23  ;;  %v3410_v34 = vmul.f32 %v3378_v6, %v10597_v27 }
0x1139   : > { %v3211_v31 = vsel %vm549_vm5, %v10411_v30, %v3147_v57  ;;  %v3381_v63 = vadd.f32 1.0, %v8870_v59  ;;  %v3412_v30 = vmul.f32 %v3380_v33, %v3284_v12  ;;  %v3494_v16 = vrot.slane %v3480_v7, %v9941_v19 }
0x113a   : > { %v3269_v43 = vadd.f32 %v10496_v5, %v3211_v31  ;;  %v3332_v47 = vmul.f32 0.70710677, %v3268_v53  ;;  %8881 = verf.f32 %v3331_v62  ;;  %v3513_v37 = vcombine.low %v3410_v34, %v3411_v11 }
0x113b   : > { %v3413_v42 = vmul.f32 %v3381_v63, %v3285_v60  ;;  %v3294_v27 = vmul.f32 0.5, %v10600_v39  ;;  %v10646_v0 = vcombine.low %v3487_v13, %v3494_v16  ;;  %v3295_v54 = vmul.f32 0.5, %v10606_v56 }
0x113c   : > { %v3333_v21 = vmul.f32 0.70710677, %v3269_v43  ;;  %v8872_v5 = vpop.eup %8871  ;;  %8883 = verf.f32 %v3332_v47  ;;  %v3296_v20 = vmul.f32 0.5, %v3264_v61  ;;  %v10649_v4 = vcombine.low %v3555_v36, %v3562_v9 }
0x113d   : > { %v8874_v3 = vpop.eup %8873  ;;  %v3514_v8 = vcombine.low %v3412_v30, %v3413_v42  ;;  %v3511_v48 = vrot.slane %v3497_v17, %v9941_v19  ;;  %v3391_v28 = vadd.f32 1.0, %v8872_v5  ;;  %v3297_v12 = vmul.f32 0.5, %v3265_v22 }
0x113e   : > { %8885 = verf.f32 %v3333_v21  ;;  %v8876_v40 = vpop.eup %8875  ;;  %v3606_v46 = vpack.c.bf16 %v10646_v0, %v10603_v38  ;;  %v3390_v39 = vadd.f32 1.0, %v8874_v3  ;;  %v3298_v18 = vmul.f32 0.5, %v3266_v50 }
0x113f   : > { %v3528_v58 = vrot.slane %v3514_v8, %v9941_v19  ;;  %v10657_v13 = vpack.c.bf16 %v10649_v4, %v10571_v29  ;;  %v3521_v56 = vrot.slane %v3513_v37, %v9941_v19  ;;  %v3392_v61 = vadd.f32 1.0, %v8876_v40 }
0x1140   : > { %v8878_v25 = vpop.eup %8877  ;;  %v3636_v32 = vshrl.u32 %v3606_v46, 16  ;;  %v3639_v24 = vshll.u32 %v3606_v46, 16  ;;  %3685 = vrot.lane.b32.xlu0 %v3606_v46, %s9318_s20  ;;  %v3299_v7 = vmul.f32 0.5, %v3267_v23  ;;  %v10662_v26 = vcombine.low %v3504_v51, %v3511_v48 }
0x1141   : > { %v3393_v1 = vadd.f32 1.0, %v8878_v25  ;;  %v3651_v45 = vshrl.u32 %v10657_v13, 16  ;;  %v10664_v35 = vcombine.low %v3521_v56, %v3528_v58  ;;  %v3423_v50 = vmul.f32 %v3391_v28, %v3295_v54 }
0x1142   : > { %v8880_v22 = vpop.eup %8879  ;;  %v3300_v6 = vmul.f32 0.5, %v3268_v53  ;;  %v3301_v2 = vmul.f32 0.5, %v3269_v43  ;;  %v3668_v57 = vrot.slane %v3639_v24, 1  ;;  %v3638_v14 = vrot.slane %v3636_v32, 7 }
0x1143   : > { %v3425_v41 = vmul.f32 %v3393_v1, %v3297_v12  ;;  %v3394_v49 = vadd.f32 1.0, %v8880_v22  ;;  %v3607_v55 = vpack.c.bf16 %v10664_v35, %v10662_v26  ;;  %v3422_v44 = vmul.f32 %v3390_v39, %v3294_v27 }
0x1144   : > { %v8882_v11 = vpop.eup %8881  ;;  %v3424_v31 = vmul.f32 %v3392_v61, %v3296_v20  ;;  %v3654_v23 = vshll.u32 %v10657_v13, 16  ;;  %3689 = vrot.lane.b32.xlu0 %v10657_v13, %s9318_s20  ;;  %v3653_v59 = vrot.slane %v3651_v45, 7  ;;  %v3641_v63 = vor.u32 %v3639_v24, %v3638_v14 }
0x1145   : > { %v3395_v60 = vadd.f32 1.0, %v8882_v11  ;;  %3687 = vrot.lane.b32.xlu1 %v3607_v55, %s9318_s20  ;;  %v3643_v53 = vshrl.u32 %v3607_v55, 16  ;;  %v3646_v43 = vshll.u32 %v3607_v55, 16  ;;  %v3564_v36 = vcombine.low %v3422_v44, %v3423_v50 }
0x1146   : > { %v8884_v33 = vpop.eup %8883  ;;  %v3565_v17 = vcombine.low %v3424_v31, %v3425_v41  ;;  %v3426_v34 = vmul.f32 %v3394_v49, %v3298_v18  ;;  %v3669_v21 = vor.u32 %v3668_v57, %v3636_v32  ;;  %v3673_v37 = vrot.slane %v3654_v23, 1 }
0x1147   : > { %v3396_v30 = vadd.f32 1.0, %v8884_v33  ;;  %v3427_v47 = vmul.f32 %v3395_v60, %v3299_v7  ;;  %v3670_v16 = vrot.slane %v3646_v43, 1  ;;  %v3645_v9 = vrot.slane %v3643_v53, 7 }
0x1148   : > { %v8886_v62 = vpop.eup %8885  ;;  %v3656_v51 = vor.u32 %v3654_v23, %v3653_v59  ;;  %v3579_v28 = vrot.slane %v3565_v17, %v9941_v19  ;;  %v3572_v58 = vrot.slane %v3564_v36, %v9941_v19  ;;  %v3675_v32 = vor.u32 %v3673_v37, %v3651_v45 }
0x1149   : > { %v3397_v42 = vadd.f32 1.0, %v8886_v62  ;;  %v3428_v5 = vmul.f32 %v3396_v30, %v3300_v6  ;;  %v3581_v3 = vcombine.low %v3426_v34, %v3427_v47  ;;  %v3671_v27 = vsel %vm557_vm3, %v3669_v21, %v3670_v16 }
0x114a   : > { %v3672_v54 = vor.u32 %v3670_v16, %v3643_v53  ;;  %7951 = vmatprep.mubr.msk.bf16.mxu0 %vm716_vm11, %v3671_v27  ;;  %v3648_v20 = vor.u32 %v3646_v43, %v3645_v9  ;;  %v3657_v48 = vsel %vm550_vm6, %v3645_v9, %v3656_v51  ;;  %v10681_v18 = vcombine.low %v3572_v58, %v3579_v28  ;;  %v12538_v53 = vld [vmem:[#allocation35_spill] sm:$0xff] }
0x114b   : > { %v3429_v8 = vmul.f32 %v3397_v42, %v3301_v2  ;;  %v3589_v25 = vrot.slane %v3581_v3, %v9941_v19  ;;  %v3667_v49 = vsel %vm9610_vm7, 0, %v3641_v63  ;;  %v3712_v43 = vrot.slane %v12538_v53, %v9665_v52 }
0x114c   : > { %v3674_v12 = vsel %vm557_vm3, %v3672_v54, %v3673_v37  ;;  %v3649_v46 = vsel %vm550_vm6, %v3638_v14, %v3648_v20 }
0x114d   : > { %v3582_v40 = vcombine.low %v3428_v5, %v3429_v8 }
0x114f   : > { %v3596_v39 = vrot.slane %v3582_v40, %v9941_v19 }
0x1151   : > { %v10683_v13 = vcombine.low %v3589_v25, %v3596_v39 }
0x1153   : > { %v3609_v56 = vpack.c.bf16 %v10683_v13, %v10681_v18 }
0x1155   : > { %3691 = vrot.lane.b32.xlu1 %v3609_v56, %s9318_s20  ;;  %v3662_v61 = vshll.u32 %v3609_v56, 16  ;;  %v3659_v1 = vshrl.u32 %v3609_v56, 16 }
0x1157   : > { %v3676_v24 = vrot.slane %v3662_v61, 1  ;;  %v3661_v22 = vrot.slane %v3659_v1, 7 }
0x1159   : > { %v3677_v7 = vsel %vm557_vm3, %v3675_v32, %v3676_v24  ;;  %v3664_v50 = vor.u32 %v3662_v61, %v3661_v22  ;;  %v3678_v14 = vor.u32 %v3676_v24, %v3659_v1 }
0x115b   : > { %v3665_v41 = vsel %vm550_vm6, %v3653_v59, %v3664_v50  ;;  %v3680_v44 = vsel %vm9601_vm4, %v3678_v14, 0 }
0x11b2   : > { %v3686_v6 = vpop.permute.xlu0 %3685 }
0x11b3   : > { %v3695_v2 = vsel %vm716_vm11, %v3667_v49, %v3686_v6 }
0x11b4   : > { %3830 = vmatmul.mubr.bf16.vlgmr.msra.gmra.mrb[44].mxu0 %v3695_v2 }
0x11b5   : > { %7952 = vmatprep.mubr.msk.bf16.mxu0 %vm716_vm11, %v3674_v12 }
0x11b6   : > { %v3690_v45 = vpop.permute.xlu0 %3689 }
0x11b7   : > { %v3688_v55 = vpop.permute.xlu1 %3687  ;;  %v3703_v11 = vsel %vm716_vm11, %v3657_v48, %v3690_v45 }
0x11b8   : > { %v3699_v57 = vsel %vm716_vm11, %v3649_v46, %v3688_v55 }
0x11bc   : > { %3838 = vmatmul.mubr.bf16.gmra.mrb[48].mxu0 %v3699_v57 }
0x11bd   : > { %7953 = vmatprep.mubr.msk.bf16.mxu0 %vm716_vm11, %v3677_v7 }
0x11c4   : > { %3846 = vmatmul.mubr.bf16.gmra.mrb[52].mxu0 %v3703_v11 }
0x11c5   : > { %7954 = vmatprep.mubr.msk.bf16.mxu0 %vm716_vm11, %v3680_v44 }
0x11c7   : > { %v3692_v31 = vpop.permute.xlu1 %3691 }
0x11c8   : > { %v3707_v23 = vsel %vm716_vm11, %v3665_v41, %v3692_v31  ;;  %v12540_v31 = vmov 0.0  }
0x11cc   : > { %3854 = vmatmul.mubr.bf16.gmra.mrb[56].mxu0 %v3707_v23  ;;  %v12541_v23 = vmov 0.0|0.0  }
0x1287   : > { %v3831_v59 = vpop.f32.mrb[44].mxu0 }
0x1288   : > { %v3833_v33 = vpop.f32.mrb[45].mxu0  ;;  %v3832_v36 = vadd.f32 %v3831_v59, %v3712_v43  ;;  %v12543_v59 = vld [vmem:[#allocation30_spill] sm:$0xff] }
0x1289   : > { %v3834_v60 = vpop.f32.mrb[46].mxu0  ;;  %v12544_v33 = vld [vmem:[#allocation31_spill] sm:$0xff] }
0x128a   : > { %v3836_v63 = vpop.f32.mrb[47].mxu0  ;;  %v3835_v62 = vadd.f32 %v3834_v60, %v3712_v43  ;;  %v3862_v21 = vadd.f32 %v3832_v36, %v10603_v38  ;;  %v12545_v60 = vmov 0  }
0x128c   : > { %v3863_v34 = vadd.f32 %v3835_v62, %v10646_v0  ;;  %v3870_v51 = vsel %vm716_vm11, %v3862_v21, 0.0 }
0x128e   : > { %v3871_v9 = vsel %vm716_vm11, %v3863_v34, 0.0 }
0x128f   : > { %v3839_v17 = vpop.f32.mrb[48].mxu0  ;;  %v3872_v27 = vadd.f32 %v3871_v9, %v3870_v51 }
0x1290   : > { %v3840_v30 = vadd.f32 %v3839_v17, %v3712_v43  ;;  %v3841_v47 = vpop.f32.mrb[49].mxu0 }
0x1291   : > { %v3842_v42 = vpop.f32.mrb[50].mxu0 }
0x1292   : > { %v3864_v16 = vadd.f32 %v3840_v30, %v10662_v26  ;;  %v3843_v5 = vadd.f32 %v3842_v42, %v3712_v43  ;;  %v3844_v37 = vpop.f32.mrb[51].mxu0 }
0x1294   : > { %v3873_v3 = vsel %vm716_vm11, %v3864_v16, 0.0  ;;  %v3865_v8 = vadd.f32 %v3843_v5, %v10664_v35 }
0x1295   : > { %v3874_v48 = vadd.f32 %v3873_v3, %v3872_v27 }
0x1296   : > { %v3875_v38 = vsel %vm716_vm11, %v3865_v8, 0.0 }
0x1297   : > { %v3847_v54 = vpop.f32.mrb[52].mxu0  ;;  %v3876_v25 = vadd.f32 %v3875_v38, %v3874_v48 }
0x1298   : > { %v3848_v0 = vadd.f32 %v3847_v54, %v3712_v43  ;;  %v3849_v20 = vpop.f32.mrb[53].mxu0 }
0x1299   : > { %v3850_v40 = vpop.f32.mrb[54].mxu0 }
0x129a   : > { %v3866_v26 = vadd.f32 %v3848_v0, %v10571_v29  ;;  %v3851_v28 = vadd.f32 %v3850_v40, %v3712_v43  ;;  %v3852_v12 = vpop.f32.mrb[55].mxu0 }
0x129c   : > { %v3877_v46 = vsel %vm716_vm11, %v3866_v26, 0.0  ;;  %v3867_v58 = vadd.f32 %v3851_v28, %v10649_v4 }
0x129d   : > { %v3878_v39 = vadd.f32 %v3877_v46, %v3876_v25 }
0x129e   : > { %v3879_v35 = vsel %vm716_vm11, %v3867_v58, 0.0 }
0x129f   : > { %v3855_v56 = vpop.f32.mrb[56].mxu0  ;;  %v3880_v50 = vadd.f32 %v3879_v35, %v3878_v39 }
0x12a0   : > { %v3856_v61 = vadd.f32 %v3855_v56, %v3712_v43  ;;  %v3857_v1 = vpop.f32.mrb[57].mxu0 }
0x12a1   : > { %v3858_v32 = vpop.f32.mrb[58].mxu0 }
0x12a2   : > { %v3868_v24 = vadd.f32 %v3856_v61, %v10681_v18  ;;  %v3859_v22 = vadd.f32 %v3858_v32, %v3712_v43  ;;  %v3860_v7 = vpop.f32.mrb[59].mxu0  ;;  %v12539_v18 = vld [vmem:[#allocation28_spill] sm:$0xff]  ;;  %v12546_v43 = vld [vmem:[#allocation25_spill] sm:$0xff] }
0x12a4   : > { %v3881_v29 = vsel %vm716_vm11, %v3868_v24, 0.0  ;;  %v3869_v41 = vadd.f32 %v3859_v22, %v10683_v13  ;;  %v12542_v13 = vld [vmem:[#allocation29_spill] sm:$0xff] }
0x12a5   : > { %v3882_v49 = vadd.f32 %v3881_v29, %v3880_v50 }
0x12a6   : > { %v3883_v4 = vsel %vm716_vm11, %v3869_v41, 0.0 }
0x12a7   : > { %v3884_v6 = vadd.f32 %v3883_v4, %v3882_v49  ;;  %v8694_v49 = vld [vmem:[#allocation7 + $0x68] sm:$0xff]   ;;  %v8695_v4 = vld [vmem:[#allocation7 + $0x70] sm:$0xff]  }
0x12a9   : > { %v3885_v2 = vrot.slane %v3884_v6, 4 }
0x12ab   : > { %v3886_v55 = vadd.f32 %v3885_v2, %v3884_v6  ;;  %v8696_v6 = vld [vmem:[#allocation7 + $0x78] sm:$0xff]   ;;  %v8697_v2 = vld [vmem:[#allocation7 + $0x80] sm:$0xff]  }
0x12ad   : > { %v3887_v57 = vrot.slane %v3886_v55, 2 }
0x12af   : > { %v3888_v45 = vadd.f32 %v3887_v57, %v3886_v55  ;;  %v8698_v55 = vld [vmem:[#allocation7 + $0x88] sm:$0xff]   ;;  %v8699_v57 = vld [vmem:[#allocation7 + $0x90] sm:$0xff]  }
0x12b1   : > { %v3889_v14 = vrot.slane %v3888_v45, 1 }
0x12b3   : > { %v3890_v11 = vadd.f32 %v3889_v14, %v3888_v45  ;;  %v8700_v45 = vld [vmem:[#allocation7 + $0x98] sm:$0xff]   ;;  %v8701_v14 = vld [vmem:[#allocation7 + $0xa0] sm:$0xff]  }
0x12b5   : > { %v3892_v44 = vmul.f32 0.015625, %v3890_v11  ;;  %v8702_v11 = vld [vmem:[#allocation7 + $0xa8] sm:$0xff]  }
0x12b7   : > { %8334 = vmatmul.mubr.msk.f32.vlgmr.msra.gmra.mrb[28].mxu1 %vm716_vm11, %v3892_v44  ;;  %v8703_v44 = vld [vmem:[#allocation7 + $0xb0] sm:$0xff]  }
0x12b8   : > { %8475 = vmatpush3.bf16.msra.mxu1 %v12539_v18  ;;  %8352 = vmatprep.mubr.msk.f32.mxu1 %vm9314_vm0, %v12540_v31 }
0x12b9   : > { %8476 = vmatprep.subr.bf16.mxu1 %v12541_v23 }
0x12bc   : > { %8478 = vmatpush3.bf16.msra.mxu1 %v12542_v13 }
0x12bd   : > { %8479 = vmatprep.subr.bf16.mxu1 %v12541_v23 }
0x12c0   : > { %8481 = vmatpush3.bf16.msra.mxu1 %v12543_v59 }
0x12c1   : > { %8482 = vmatprep.subr.bf16.mxu1 %v12541_v23 }
0x12c4   : > { %8484 = vmatpush3.bf16.msra.mxu1 %v12544_v33 }
0x12c5   : > { %4349 = vmatprep.subr.bf16.mxu1 %v12545_v60 }
0x138a   : > { %v3962_v53 = vpop.f32.mrb[28].mxu1 }
0x138b   : > { %v3969_v63 = vrot.slane %v3962_v53, %v12546_v43  ;;  %v8335_v62 = vpop.f32.mrb[29].mxu1  ;;  %v8704_v53 = vld [vmem:[#allocation7 + $0xb8] sm:$0xff]  }
0x138d   : > { %v10731_v36 = vsub.f32 %v3862_v21, %v3969_v63  ;;  %v10733_v17 = vsub.f32 %v3863_v34, %v3969_v63  ;;  %v10735_v30 = vsub.f32 %v3864_v16, %v3969_v63  ;;  %v10737_v47 = vsub.f32 %v3865_v8, %v3969_v63 }
0x138e   : > { %v10739_v42 = vsub.f32 %v3866_v26, %v3969_v63  ;;  %v10747_v51 = vsub.f32 %v3867_v58, %v3969_v63  ;;  %v10753_v8 = vsub.f32 %v3868_v24, %v3969_v63  ;;  %v10758_v20 = vsub.f32 %v3869_v41, %v3969_v63  ;;  %v8693_v41 = vld [vmem:[#allocation7 + $0x60] sm:$0xff]  }
0x138f   : > { %v3978_v5 = vmul.f32 %v10731_v36, %v10731_v36  ;;  %v3979_v37 = vmul.f32 %v10733_v17, %v10733_v17  ;;  %v3980_v9 = vmul.f32 %v10735_v30, %v10735_v30  ;;  %v3981_v34 = vmul.f32 %v10737_v47, %v10737_v47 }
0x1390   : > { %v3982_v27 = vmul.f32 %v10739_v42, %v10739_v42  ;;  %v3983_v48 = vmul.f32 %v10747_v51, %v10747_v51  ;;  %v3984_v26 = vmul.f32 %v10753_v8, %v10753_v8  ;;  %v3985_v46 = vmul.f32 %v10758_v20, %v10758_v20 }
0x1391   : > { %v3986_v21 = vsel %vm716_vm11, %v3978_v5, 0.0  ;;  %v3987_v16 = vsel %vm716_vm11, %v3979_v37, 0.0  ;;  %v3989_v54 = vsel %vm716_vm11, %v3980_v9, 0.0  ;;  %v3991_v40 = vsel %vm716_vm11, %v3981_v34, 0.0  ;;  %v10784_v9 = vld [vmem:[#allocation8 + $0x8] sm:$0x1f] }
0x1392   : > { %v3988_v3 = vadd.f32 %v3987_v16, %v3986_v21  ;;  %v3993_v28 = vsel %vm716_vm11, %v3982_v27, 0.0  ;;  %v3995_v58 = vsel %vm716_vm11, %v3983_v48, 0.0  ;;  %v3997_v39 = vsel %vm716_vm11, %v3984_v26, 0.0  ;;  %v12547_v34 = vld [vmem:[#allocation32_spill] sm:$0xff] }
0x1393   : > { %v3999_v35 = vsel %vm716_vm11, %v3985_v46, 0.0  ;;  %v4097_v21 = vrot.slane %v10784_v9, %v12547_v34 }
0x1394   : > { %v3990_v0 = vadd.f32 %v3989_v54, %v3988_v3  ;;  %v12548_v3 = vld [vmem:[#allocation33_spill] sm:$0xff] }
0x1395   : > { %v4109_v27 = vrot.slane %v10784_v9, %v12548_v3 }
0x1396   : > { %v3992_v38 = vadd.f32 %v3991_v40, %v3990_v0 }
0x1398   : > { %v3994_v12 = vadd.f32 %v3993_v28, %v3992_v38 }
0x139a   : > { %v3996_v25 = vadd.f32 %v3995_v58, %v3994_v12 }
0x139c   : > { %v3998_v56 = vadd.f32 %v3997_v39, %v3996_v25 }
0x139e   : > { %v4000_v61 = vadd.f32 %v3999_v35, %v3998_v56 }
0x13a0   : > { %v4001_v1 = vrot.slane %v4000_v61, 4 }
0x13a2   : > { %v4002_v32 = vadd.f32 %v4001_v1, %v4000_v61 }
0x13a4   : > { %v4003_v24 = vrot.slane %v4002_v32, 2 }
0x13a6   : > { %v4004_v22 = vadd.f32 %v4003_v24, %v4002_v32 }
0x13a8   : > { %v4005_v7 = vrot.slane %v4004_v22, 1 }
0x13aa   : > { %v4006_v50 = vadd.f32 %v4005_v7, %v4004_v22 }
0x13ac   : > { %v4007_v29 = vmul.f32 0.015625, %v4006_v50 }
0x13ae   : > { %8353 = vmatmul.mubr.msk.f32.vlgmr.msra.gmra.mrb[30].mxu1 %vm716_vm11, %v4007_v29 }
0x13af   : > { %4350 = vmatpush1.bf16.msra.mxu1 %v8693_v41 }
0x13b0   : > { %4351 = vmatprep.subr.bf16.mxu1 %v12545_v60 }
0x13b3   : > { %4352 = vmatpush1.bf16.msra.mxu1 %v8694_v49 }
0x13b4   : > { %4353 = vmatprep.subr.bf16.mxu1 %v12545_v60 }
0x13b7   : > { %4354 = vmatpush1.bf16.msra.mxu1 %v8695_v4 }
0x13b8   : > { %4355 = vmatprep.subr.bf16.mxu1 %v12545_v60 }
0x13bb   : > { %4356 = vmatpush1.bf16.msra.mxu1 %v8696_v6 }
0x13bc   : > { %4357 = vmatprep.subr.bf16.mxu1 %v12545_v60 }
0x13bf   : > { %4358 = vmatpush1.bf16.msra.mxu1 %v8697_v2 }
0x13c0   : > { %4359 = vmatprep.subr.bf16.mxu1 %v12545_v60 }
0x13c3   : > { %4360 = vmatpush1.bf16.msra.mxu1 %v8698_v55 }
0x13c4   : > { %4361 = vmatprep.subr.bf16.mxu1 %v12545_v60 }
0x13c7   : > { %4362 = vmatpush1.bf16.msra.mxu1 %v8699_v57 }
0x13c8   : > { %4363 = vmatprep.subr.bf16.mxu1 %v12545_v60 }
0x13cb   : > { %4364 = vmatpush1.bf16.msra.mxu1 %v8700_v45 }
0x13cc   : > { %4365 = vmatprep.subr.bf16.mxu1 %v12545_v60 }
0x13cf   : > { %4366 = vmatpush1.bf16.msra.mxu1 %v8701_v14 }
0x13d0   : > { %4367 = vmatprep.subr.bf16.mxu1 %v12545_v60 }
0x13d3   : > { %4368 = vmatpush1.bf16.msra.mxu1 %v8702_v11 }
0x13d4   : > { %4369 = vmatprep.subr.bf16.mxu1 %v12545_v60 }
0x13d7   : > { %4370 = vmatpush1.bf16.msra.mxu1 %v8703_v44 }
0x13d8   : > { %4371 = vmatprep.subr.bf16.mxu1 %v12545_v60 }
0x13db   : > { %4372 = vmatpush1.bf16.msra.mxu1 %v8704_v53 }
0x13dc   : > { %8485 = vmatprep.subr.bf16.mxu1 %v12541_v23 }
0x1481   : > { %v4077_v63 = vpop.f32.mrb[30].mxu1 }
0x1482   : > { %v4078_v62 = vadd.f32 1e-05, %v4077_v63  ;;  %v8354_v5 = vpop.f32.mrb[31].mxu1 }
0x1484   : > { %8887 = vrsqrt.f32 %v4078_v62 }
0x148e   : > { %v8888_v37 = vpop.eup %8887 }
0x148f   : > { %v4085_v16 = vrot.slane %v8888_v37, %v12546_v43 }
0x1491   : > { %v4088_v54 = vmul.f32 %v4085_v16, %v10735_v30  ;;  %v4089_v0 = vmul.f32 %v4085_v16, %v10737_v47  ;;  %v4086_v48 = vmul.f32 %v4085_v16, %v10731_v36  ;;  %v4087_v40 = vmul.f32 %v4085_v16, %v10733_v17 }
0x1492   : > { %v4092_v38 = vmul.f32 %v4085_v16, %v10753_v8  ;;  %v4093_v26 = vmul.f32 %v4085_v16, %v10758_v20  ;;  %v4090_v28 = vmul.f32 %v4085_v16, %v10739_v42  ;;  %v4091_v12 = vmul.f32 %v4085_v16, %v10747_v51 }
0x1493   : > { %v4100_v46 = vmul.f32 %v4097_v21, %v4088_v54  ;;  %v4101_v58 = vmul.f32 %v4097_v21, %v4089_v0  ;;  %v4098_v25 = vmul.f32 %v4097_v21, %v4086_v48  ;;  %v4099_v39 = vmul.f32 %v4097_v21, %v4087_v40 }
0x1494   : > { %v4104_v56 = vmul.f32 %v4097_v21, %v4092_v38  ;;  %v4105_v30 = vmul.f32 %v4097_v21, %v4093_v26  ;;  %v4102_v35 = vmul.f32 %v4097_v21, %v4090_v28  ;;  %v4103_v47 = vmul.f32 %v4097_v21, %v4091_v12 }
0x1495   : > { %v4112_v61 = vadd.f32 %v4109_v27, %v4100_v46  ;;  %v4113_v36 = vadd.f32 %v4109_v27, %v4101_v58  ;;  %v4110_v1 = vadd.f32 %v4109_v27, %v4098_v25  ;;  %v4111_v17 = vadd.f32 %v4109_v27, %v4099_v39 }
0x1496   : > { %v4116_v32 = vadd.f32 %v4109_v27, %v4104_v56  ;;  %v4117_v8 = vadd.f32 %v4109_v27, %v4105_v30  ;;  %v4114_v24 = vadd.f32 %v4109_v27, %v4102_v35  ;;  %v4115_v20 = vadd.f32 %v4109_v27, %v4103_v47 }
0x1497   : > { %v4128_v22 = vmul.f32 0.70710677, %v4112_v61  ;;  %v4129_v42 = vmul.f32 0.70710677, %v4113_v36  ;;  %v4126_v7 = vmul.f32 0.70710677, %v4110_v1 }
0x1498   : > { %v4127_v51 = vmul.f32 0.70710677, %v4111_v17  ;;  %v4132_v50 = vmul.f32 0.70710677, %v4116_v32  ;;  %v4133_v29 = vmul.f32 0.70710677, %v4117_v8 }
0x1499   : > { %8889 = verf.f32 %v4128_v22  ;;  %v4130_v41 = vmul.f32 0.70710677, %v4114_v24  ;;  %v4131_v49 = vmul.f32 0.70710677, %v4115_v20  ;;  %v4120_v2 = vmul.f32 0.5, %v4112_v61 }
0x149a   : > { %8891 = verf.f32 %v4129_v42  ;;  %v4121_v45 = vmul.f32 0.5, %v4113_v36  ;;  %v4118_v53 = vmul.f32 0.5, %v4110_v1  ;;  %v4119_v37 = vmul.f32 0.5, %v4111_v17 }
0x149b   : > { %8893 = verf.f32 %v4126_v7  ;;  %v4124_v54 = vmul.f32 0.5, %v4116_v32  ;;  %v4125_v26 = vmul.f32 0.5, %v4117_v8  ;;  %v4122_v58 = vmul.f32 0.5, %v4114_v24 }
0x149c   : > { %8895 = verf.f32 %v4127_v51  ;;  %v4123_v47 = vmul.f32 0.5, %v4115_v20 }
0x149d   : > { %8897 = verf.f32 %v4132_v50 }
0x149e   : > { %8899 = verf.f32 %v4133_v29 }
0x149f   : > { %8901 = verf.f32 %v4130_v41 }
0x14a0   : > { %8903 = verf.f32 %v4131_v49 }
0x14a3   : > { %v8890_v4 = vpop.eup %8889 }
0x14a4   : > { %v8892_v6 = vpop.eup %8891  ;;  %v4144_v55 = vadd.f32 1.0, %v8890_v4 }
0x14a5   : > { %v8894_v57 = vpop.eup %8893  ;;  %v4145_v14 = vadd.f32 1.0, %v8892_v6 }
0x14a6   : > { %v8896_v11 = vpop.eup %8895  ;;  %v4152_v44 = vmul.f32 %v4144_v55, %v4120_v2  ;;  %v4142_v63 = vadd.f32 1.0, %v8894_v57 }
0x14a7   : > { %v8898_v62 = vpop.eup %8897  ;;  %v4153_v5 = vmul.f32 %v4145_v14, %v4121_v45  ;;  %v4143_v21 = vadd.f32 1.0, %v8896_v11 }
0x14a8   : > { %v8900_v16 = vpop.eup %8899  ;;  %v4150_v27 = vmul.f32 %v4142_v63, %v4118_v53  ;;  %v4148_v0 = vadd.f32 1.0, %v8898_v62 }
0x14a9   : > { %v8902_v48 = vpop.eup %8901  ;;  %v4159_v40 = vpack.c.bf16 %v4153_v5, %v4152_v44  ;;  %v4151_v38 = vmul.f32 %v4143_v21, %v4119_v37  ;;  %v4149_v28 = vadd.f32 1.0, %v8900_v16 }
0x14aa   : > { %v8904_v12 = vpop.eup %8903  ;;  %v4156_v46 = vmul.f32 %v4148_v0, %v4124_v54  ;;  %v4146_v25 = vadd.f32 1.0, %v8902_v48 }
0x14ab   : > { %4239 = vrot.lane.b32.xlu1 %v4159_v40, %s9318_s20  ;;  %v4195_v39 = vshrl.u32 %v4159_v40, 16  ;;  %v4198_v56 = vshll.u32 %v4159_v40, 16  ;;  %v4158_v30 = vpack.c.bf16 %v4151_v38, %v4150_v27  ;;  %v4157_v35 = vmul.f32 %v4149_v28, %v4125_v26 }
0x14ac   : > { %v4147_v61 = vadd.f32 1.0, %v8904_v12  ;;  %v4154_v36 = vmul.f32 %v4146_v25, %v4122_v58  ;;  %v8705_v25 = vld [vmem:[#allocation5 + $0x80] sm:$0xff]  }
0x14ad   : > { %4237 = vrot.lane.b32.xlu0 %v4158_v30, %s9318_s20  ;;  %v4188_v1 = vshrl.u32 %v4158_v30, 16  ;;  %v4191_v17 = vshll.u32 %v4158_v30, 16  ;;  %v4161_v32 = vpack.c.bf16 %v4157_v35, %v4156_v46  ;;  %v4222_v8 = vrot.slane %v4198_v56, 1  ;;  %8355 = vmatprep.subr.bf16.mxu0 %v8705_v25  ;;  %v8708_v30 = vld [vmem:[#allocation5 + $0x98] sm:$0xff]   ;;  %v8709_v35 = vld [vmem:[#allocation5 + $0xa0] sm:$0xff]  }
0x14ae   : > { %v4155_v22 = vmul.f32 %v4147_v61, %v4123_v47  ;;  %v4197_v42 = vrot.slane %v4195_v39, 7  ;;  %8356 = vmatpush3.bf16.msra.mxu0 %v8705_v25  ;;  %v8710_v47 = vld [vmem:[#allocation5 + $0xa8] sm:$0xff]   ;;  %v12549_v61 = vld [vmem:[#allocation34_spill] sm:$0xff] }
0x14af   : > { %4243 = vrot.lane.b32.xlu1 %v4161_v32, %s9318_s20  ;;  %v4220_v24 = vrot.slane %v4191_v17, 1  ;;  %v4190_v7 = vrot.slane %v4188_v1, 7  ;;  %v4224_v51 = vor.u32 %v4222_v8, %v4195_v39  ;;  %v4211_v41 = vshrl.u32 %v4161_v32, 16  ;;  %v8706_v39 = vld [vmem:[#allocation5 + $0x88] sm:$0xff]  }
0x14b0   : > { %v4160_v50 = vpack.c.bf16 %v4155_v22, %v4154_v36  ;;  %v4200_v29 = vor.u32 %v4198_v56, %v4197_v42  ;;  %v4214_v49 = vshll.u32 %v4161_v32, 16  ;;  %8357 = vmatprep.subr.bf16.mxu0 %v8706_v39  ;;  %v8707_v56 = vld [vmem:[#allocation5 + $0x90] sm:$0xff]   ;;  %v4264_v36 = vrot.slane %v10784_v9, %v12549_v61 }
0x14b1   : > { %v4221_v20 = vor.u32 %v4220_v24, %v4188_v1  ;;  %v4193_v4 = vor.u32 %v4191_v17, %v4190_v7  ;;  %v4213_v57 = vrot.slane %v4211_v41, 7 }
0x14b2   : > { %v4203_v6 = vshrl.u32 %v4160_v50, 16  ;;  %v4206_v2 = vshll.u32 %v4160_v50, 16  ;;  %4241 = vrot.lane.b32.xlu0 %v4160_v50, %s9318_s20  ;;  %v4201_v55 = vsel %vm550_vm6, %v4190_v7, %v4200_v29  ;;  %v4228_v53 = vrot.slane %v4214_v49, 1  ;;  %8358 = vmatpush3.bf16.msra.mxu0 %v8706_v39 }
0x14b3   : > { %v4223_v45 = vsel %vm557_vm3, %v4221_v20, %v4222_v8  ;;  %v4216_v44 = vor.u32 %v4214_v49, %v4213_v57  ;;  %v4219_v54 = vsel %vm9610_vm7, 0, %v4193_v4  ;;  %8359 = vmatprep.subr.bf16.mxu0 %v8707_v56 }
0x14b4   : > { %7969 = vmatprep.mubr.msk.bf16.mxu1 %vm716_vm11, %v4223_v45  ;;  %v4225_v14 = vrot.slane %v4206_v2, 1  ;;  %v4205_v11 = vrot.slane %v4203_v6, 7  ;;  %v4230_v26 = vor.u32 %v4228_v53, %v4211_v41 }
0x14b6   : > { %v4226_v63 = vsel %vm557_vm3, %v4224_v51, %v4225_v14  ;;  %v4227_v62 = vor.u32 %v4225_v14, %v4203_v6  ;;  %v4208_v5 = vor.u32 %v4206_v2, %v4205_v11  ;;  %v4217_v37 = vsel %vm550_vm6, %v4205_v11, %v4216_v44  ;;  %8360 = vmatpush3.bf16.msra.mxu0 %v8707_v56 }
0x14b7   : > { %v4232_v12 = vsel %vm9601_vm4, %v4230_v26, 0  ;;  %8361 = vmatprep.subr.bf16.mxu0 %v8708_v30 }
0x14b8   : > { %v4229_v21 = vsel %vm557_vm3, %v4227_v62, %v4228_v53  ;;  %v4209_v16 = vsel %vm550_vm6, %v4197_v42, %v4208_v5 }
0x14ba   : > { %8362 = vmatpush3.bf16.msra.mxu0 %v8708_v30 }
0x14bb   : > { %8363 = vmatprep.subr.bf16.mxu0 %v8709_v35 }
0x14be   : > { %8364 = vmatpush3.bf16.msra.mxu0 %v8709_v35 }
0x14bf   : > { %8365 = vmatprep.subr.bf16.mxu0 %v8710_v47 }
0x14c2   : > { %8366 = vmatpush3.bf16.msra.mxu0 %v8710_v47 }
0x151d   : > { %v4240_v48 = vpop.permute.xlu1 %4239 }
0x151e   : > { %v4251_v40 = vsel %vm716_vm11, %v4201_v55, %v4240_v48  ;;  %v8711_v48 = vld [vmem:[#allocation5 + $0xb0] sm:$0xff]  }
0x151f   : > { %v4238_v27 = vpop.permute.xlu0 %4237  ;;  %8367 = vmatprep.subr.bf16.mxu0 %v8711_v48 }
0x1520   : > { %v4247_v0 = vsel %vm716_vm11, %v4219_v54, %v4238_v27  ;;  %8368 = vmatpush3.bf16.msra.mxu0 %v8711_v48 }
0x1521   : > { %4382 = vmatmul.mubr.bf16.vlgmr.msra.gmra.mrb[32].mxu1 %v4247_v0  ;;  %v4244_v46 = vpop.permute.xlu1 %4243 }
0x1522   : > { %7970 = vmatprep.mubr.msk.bf16.mxu1 %vm716_vm11, %v4226_v63  ;;  %8487 = vmatpush3.bf16.msra.mxu1 %v12539_v18  ;;  %v4259_v58 = vsel %vm716_vm11, %v4217_v37, %v4244_v46  ;;  %v8712_v46 = vld [vmem:[#allocation5 + $0xb8] sm:$0xff]  }
0x1523   : > { %8488 = vmatprep.subr.bf16.mxu1 %v12541_v23  ;;  %8369 = vmatprep.subr.bf16.mxu0 %v8712_v46 }
0x1524   : > { %v4242_v38 = vpop.permute.xlu0 %4241  ;;  %8370 = vmatpush3.bf16.msra.mxu0 %v8712_v46 }
0x1525   : > { %v4255_v28 = vsel %vm716_vm11, %v4209_v16, %v4242_v38  ;;  %6661 = vmatprep.subr.bf16.mxu0 %v12545_v60 }
0x1526   : > { %8490 = vmatpush3.bf16.msra.mxu1 %v12542_v13 }
0x1527   : > { %8491 = vmatprep.subr.bf16.mxu1 %v12541_v23 }
0x1529   : > { %4390 = vmatmul.mubr.bf16.gmra.mrb[36].mxu1 %v4251_v40 }
0x152a   : > { %7971 = vmatprep.mubr.msk.bf16.mxu1 %vm716_vm11, %v4229_v21  ;;  %8493 = vmatpush3.bf16.msra.mxu1 %v12543_v59 }
0x152b   : > { %8494 = vmatprep.subr.bf16.mxu1 %v12541_v23 }
0x152e   : > { %8496 = vmatpush3.bf16.msra.mxu1 %v12544_v33 }
0x152f   : > { %8497 = vmatprep.subr.bf16.mxu1 %v12541_v23 }
0x1531   : > { %4398 = vmatmul.mubr.bf16.gmra.mrb[40].mxu1 %v4255_v28 }
0x1532   : > { %7972 = vmatprep.mubr.msk.bf16.mxu1 %vm716_vm11, %v4232_v12 }
0x1539   : > { %4406 = vmatmul.mubr.bf16.gmra.mrb[44].mxu1 %v4259_v58 }
0x153a   : > { %8395 = vmatprep.mubr.msk.f32.mxu1 %vm9314_vm0, %v12540_v31 }
0x15f4   : > { %v4383_v1 = vpop.f32.mrb[32].mxu1 }
0x15f5   : > { %v4384_v17 = vadd.f32 %v4383_v1, %v4264_v36  ;;  %v4385_v32 = vpop.f32.mrb[33].mxu1 }
0x15f6   : > { %v4386_v8 = vpop.f32.mrb[34].mxu1 }
0x15f7   : > { %v4422_v22 = vmul.f32 0.70710677, %v4384_v17  ;;  %v4387_v42 = vadd.f32 %v4386_v8, %v4264_v36  ;;  %v4388_v24 = vpop.f32.mrb[35].mxu1  ;;  %v4414_v11 = vmul.f32 0.5, %v4384_v17 }
0x15f9   : > { %8905 = verf.f32 %v4422_v22  ;;  %v4423_v7 = vmul.f32 0.70710677, %v4387_v42  ;;  %v4415_v44 = vmul.f32 0.5, %v4387_v42 }
0x15fb   : > { %8907 = verf.f32 %v4423_v7 }
0x15fc   : > { %v4391_v51 = vpop.f32.mrb[36].mxu1 }
0x15fd   : > { %v4392_v50 = vadd.f32 %v4391_v51, %v4264_v36  ;;  %v4393_v29 = vpop.f32.mrb[37].mxu1 }
0x15fe   : > { %v4394_v41 = vpop.f32.mrb[38].mxu1 }
0x15ff   : > { %v4424_v49 = vmul.f32 0.70710677, %v4392_v50  ;;  %v4395_v20 = vadd.f32 %v4394_v41, %v4264_v36  ;;  %v4396_v4 = vpop.f32.mrb[39].mxu1  ;;  %v4416_v58 = vmul.f32 0.5, %v4392_v50 }
0x1601   : > { %8909 = verf.f32 %v4424_v49  ;;  %v4425_v6 = vmul.f32 0.70710677, %v4395_v20  ;;  %v4417_v25 = vmul.f32 0.5, %v4395_v20 }
0x1603   : > { %v8906_v9 = vpop.eup %8905  ;;  %8911 = verf.f32 %v4425_v6 }
0x1604   : > { %v4438_v2 = vadd.f32 1.0, %v8906_v9  ;;  %v4399_v55 = vpop.f32.mrb[40].mxu1 }
0x1605   : > { %v8908_v57 = vpop.eup %8907  ;;  %v4400_v45 = vadd.f32 %v4399_v55, %v4264_v36  ;;  %v4401_v14 = vpop.f32.mrb[41].mxu1 }
0x1606   : > { %v4439_v53 = vadd.f32 1.0, %v8908_v57  ;;  %v4402_v63 = vpop.f32.mrb[42].mxu1  ;;  %v4446_v21 = vmul.f32 %v4438_v2, %v4414_v11 }
0x1607   : > { %v4426_v62 = vmul.f32 0.70710677, %v4400_v45  ;;  %v4403_v5 = vadd.f32 %v4402_v63, %v4264_v36  ;;  %v4404_v37 = vpop.f32.mrb[43].mxu1  ;;  %v4418_v41 = vmul.f32 0.5, %v4400_v45 }
0x1608   : > { %v4447_v16 = vmul.f32 %v4439_v53, %v4415_v44 }
0x1609   : > { %8913 = verf.f32 %v4426_v62  ;;  %v4427_v27 = vmul.f32 0.70710677, %v4403_v5 }
0x160a   : > { %v10833_v54 = vpack.c.bf16 %v4447_v16, %v4446_v21 }
0x160b   : > { %v8910_v0 = vpop.eup %8909  ;;  %8915 = verf.f32 %v4427_v27 }
0x160c   : > { %v4440_v40 = vadd.f32 1.0, %v8910_v0  ;;  %v4407_v38 = vpop.f32.mrb[44].mxu1  ;;  %v4480_v30 = vshll.u32 %v10833_v54, 16  ;;  %v4478_v51 = vshrl.u32 %v10833_v54, 16 }
0x160d   : > { %v8912_v26 = vpop.eup %8911  ;;  %v4408_v28 = vadd.f32 %v4407_v38, %v4264_v36  ;;  %v4409_v12 = vpop.f32.mrb[45].mxu1 }
0x160e   : > { %v4441_v39 = vadd.f32 1.0, %v8912_v26  ;;  %v4410_v56 = vpop.f32.mrb[46].mxu1  ;;  %v4448_v17 = vmul.f32 %v4440_v40, %v4416_v58  ;;  %v4482_v42 = vrot.slane %v4480_v30, 1 }
0x160f   : > { %v4428_v35 = vmul.f32 0.70710677, %v4408_v28  ;;  %v4411_v47 = vadd.f32 %v4410_v56, %v4264_v36  ;;  %v4412_v1 = vpop.f32.mrb[47].mxu1  ;;  %v4419_v36 = vmul.f32 0.5, %v4403_v5  ;;  %v4420_v63 = vmul.f32 0.5, %v4408_v28 }
0x1610   : > { %v4449_v32 = vmul.f32 %v4441_v39, %v4417_v25  ;;  %v4483_v20 = vor.u32 %v4482_v42, %v4478_v51 }
0x1611   : > { %8917 = verf.f32 %v4428_v35  ;;  %v4429_v8 = vmul.f32 0.70710677, %v4411_v47  ;;  %v4421_v62 = vmul.f32 0.5, %v4411_v47 }
0x1612   : > { %v4474_v22 = vpack.c.bf16 %v4449_v32, %v4448_v17 }
0x1613   : > { %v8914_v24 = vpop.eup %8913  ;;  %8919 = verf.f32 %v4429_v8  ;;  %v12550_v8 = vld [vmem:[#allocation27_spill] sm:$0xff] }
0x1614   : > { %v4442_v7 = vadd.f32 1.0, %v8914_v24  ;;  %v4485_v50 = vshll.u32 %v4474_v22, 16  ;;  %v4489_v11 = vshrl.u32 %v4474_v22, 16 }
0x1615   : > { %v8916_v29 = vpop.eup %8915 }
0x1616   : > { %v4443_v49 = vadd.f32 1.0, %v8916_v29  ;;  %v4487_v4 = vrot.slane %v4485_v50, 1  ;;  %v4450_v6 = vmul.f32 %v4442_v7, %v4418_v41 }
0x1618   : > { %v4451_v9 = vmul.f32 %v4443_v49, %v4419_v36  ;;  %v4488_v2 = vsel %vm557_vm3, %v4483_v20, %v4487_v4  ;;  %v4491_v45 = vor.u32 %v4489_v11, %v4487_v4 }
0x1619   : > { %4511 = vrot.lane.b32.xlu0 %v4488_v2, %s9318_s20 }
0x161a   : > { %v4475_v55 = vpack.c.bf16 %v4451_v9, %v4450_v6 }
0x161b   : > { %v8918_v57 = vpop.eup %8917 }
0x161c   : > { %v4444_v14 = vadd.f32 1.0, %v8918_v57  ;;  %v4493_v44 = vshll.u32 %v4475_v55, 16  ;;  %v4497_v48 = vshrl.u32 %v4475_v55, 16 }
0x161d   : > { %v8920_v53 = vpop.eup %8919 }
0x161e   : > { %v4445_v37 = vadd.f32 1.0, %v8920_v53  ;;  %v4495_v5 = vrot.slane %v4493_v44, 1  ;;  %v4452_v21 = vmul.f32 %v4444_v14, %v4420_v63 }
0x1620   : > { %v4453_v16 = vmul.f32 %v4445_v37, %v4421_v62  ;;  %v4496_v27 = vsel %vm557_vm3, %v4491_v45, %v4495_v5  ;;  %v4499_v38 = vor.u32 %v4497_v48, %v4495_v5 }
0x1621   : > { %4513 = vrot.lane.b32.xlu1 %v4496_v27, %s9318_s20 }
0x1622   : > { %v4476_v0 = vpack.c.bf16 %v4453_v16, %v4452_v21 }
0x1624   : > { %v4501_v40 = vshll.u32 %v4476_v0, 16  ;;  %v4505_v12 = vshrl.u32 %v4476_v0, 16 }
0x1626   : > { %v4503_v26 = vrot.slane %v4501_v40, 1 }
0x1628   : > { %v4504_v46 = vsel %vm557_vm3, %v4499_v38, %v4503_v26  ;;  %v4507_v58 = vor.u32 %v4505_v12, %v4503_v26 }
0x1629   : > { %4515 = vrot.lane.b32.xlu0 %v4504_v46, %s9318_s20 }
0x162a   : > { %v4509_v28 = vsel %vm9601_vm4, %v4507_v58, 0 }
0x162b   : > { %4517 = vrot.lane.b32.xlu1 %v4509_v28, %s9318_s20 }
0x168b   : > { %v4512_v25 = vpop.permute.xlu0 %4511 }
0x168c   : > { %v4520_v39 = vsel %vm716_vm11, %v10833_v54, %v4512_v25 }
0x168d   : > { %8371 = vmatprep.mubr.bf16.mxu0 %v4520_v39 }
0x1693   : > { %v4514_v56 = vpop.permute.xlu1 %4513 }
0x1694   : > { %v4523_v30 = vsel %vm716_vm11, %v4474_v22, %v4514_v56 }
0x1695   : > { %8372 = vmatmul.mubr.bf16.vlgmr.msra.gmra.mrb[60].mxu0 %v4523_v30 }
0x169b   : > { %v4516_v35 = vpop.permute.xlu0 %4515 }
0x169c   : > { %v4526_v47 = vsel %vm716_vm11, %v4475_v55, %v4516_v35 }
0x169d   : > { %v4518_v1 = vpop.permute.xlu1 %4517  ;;  %8375 = vmatprep.mubr.bf16.mxu0 %v4526_v47 }
0x169e   : > { %v4529_v17 = vsel %vm716_vm11, %v4476_v0, %v4518_v1 }
0x169f   : > { %8376 = vmatmul.mubr.bf16.gmra.mrb[64].mxu0 %v4529_v17 }
0x1768   : > { %v8373_v32 = vpop.f32.mrb[60].mxu0 }
0x1769   : > { %v4757_v42 = vrot.slane %v8373_v32, %v12550_v8  ;;  %v4613_v24 = vpop.f32.mrb[61].mxu0  ;;  %v4750_v6 = vcombine.high %v8373_v32, %v8373_v32 }
0x176a   : > { %v10853_v7 = vpop.f32.mrb[62].mxu0  ;;  %v4659_v50 = vrot.slane %v4613_v24, %v12550_v8  ;;  %v4652_v16 = vcombine.high %v4613_v24, %v4613_v24 }
0x176b   : > { %v4765_v54 = vcombine.high %v4757_v42, %v4757_v42  ;;  %v10855_v51 = vpop.f32.mrb[63].mxu0  ;;  %v10858_v22 = vrot.slane %v4757_v42, %v12550_v8  ;;  %v4764_v11 = vrot.slane %v4750_v6, %v12550_v8  ;;  %v4806_v62 = vrot.slane %v10853_v7, %v12550_v8 }
0x176c   : > { %v10865_v41 = vrot.slane %v4659_v50, %v12550_v8  ;;  %v4667_v49 = vcombine.high %v4659_v50, %v4659_v50  ;;  %v4666_v38 = vrot.slane %v4652_v16, %v12550_v8  ;;  %v4708_v25 = vrot.slane %v10855_v51, %v12550_v8 }
0x176d   : > { %v10862_v29 = vrot.slane %v4765_v54, %v12550_v8  ;;  %v5175_v36 = vrot.slane %v10858_v22, %v12546_v43  ;;  %v10890_v44 = vcombine.high %v10858_v22, %v10858_v22  ;;  %v4766_v63 = vcombine.high %v4764_v11, %v4764_v11 }
0x176e   : > { %v5111_v2 = vrot.slane %v10865_v41, %v12546_v43  ;;  %v10882_v57 = vrot.slane %v4667_v49, %v12550_v8  ;;  %v10898_v37 = vrot.slane %v4764_v11, %v12550_v8  ;;  %v4814_v27 = vcombine.high %v4806_v62, %v4806_v62 }
0x176f   : > { %5396 = vrot.lane.b32.xlu0 %v5175_v36, %s9318_s20  ;;  %v5179_v20 = vrot.slane %v10862_v29, %v12546_v43  ;;  %v5183_v45 = vrot.slane %v10890_v44, %v12546_v43  ;;  %v10904_v5 = vcombine.high %v10862_v29, %v10862_v29  ;;  %v10908_v21 = vrot.slane %v4766_v63, %v12550_v8 }
0x1770   : > { %v5115_v53 = vrot.slane %v10882_v57, %v12546_v43  ;;  %v10913_v48 = vrot.slane %v4806_v62, %v12550_v8  ;;  %v5191_v40 = vrot.slane %v10898_v37, %v12546_v43  ;;  %v10921_v26 = vrot.slane %v4814_v27, %v12550_v8 }
0x1771   : > { %5398 = vrot.lane.b32.xlu1 %v5179_v20, %s9318_s20  ;;  %v5187_v0 = vrot.slane %v10904_v5, %v12546_v43  ;;  %v5195_v12 = vrot.slane %v10908_v21, %v12546_v43  ;;  %v10927_v46 = vcombine.high %v10865_v41, %v10865_v41  ;;  %v4668_v28 = vcombine.high %v4666_v38, %v4666_v38 }
0x1772   : > { %v10872_v4 = vpop.f32.mrb[64].mxu0  ;;  %v5207_v58 = vrot.slane %v10913_v48, %v12546_v43  ;;  %v5211_v39 = vrot.slane %v10921_v26, %v12546_v43  ;;  %v10939_v56 = vcombine.high %v10882_v57, %v10882_v57  ;;  %v10942_v30 = vrot.slane %v4666_v38, %v12550_v8 }
0x1773   : > { %v10874_v9 = vpop.f32.mrb[65].mxu0  ;;  %5364 = vrot.lane.b32.xlu0 %v5111_v2, %s9318_s20  ;;  %v5119_v35 = vrot.slane %v10927_v46, %v12546_v43  ;;  %v10949_v47 = vrot.slane %v4668_v28, %v12550_v8  ;;  %v4716_v1 = vcombine.high %v4708_v25, %v4708_v25  ;;  %v10954_v32 = vrot.slane %v4708_v25, %v12550_v8 }
0x1774   : > { %v10879_v55 = vpop.f32.mrb[66].mxu0  ;;  %v5123_v17 = vrot.slane %v10939_v56, %v12546_v43  ;;  %v5127_v42 = vrot.slane %v10942_v30, %v12546_v43  ;;  %v4799_v24 = vcombine.high %v10853_v7, %v10853_v7  ;;  %v10971_v49 = vcombine.high %v10898_v37, %v10898_v37 }
0x1775   : > { %v10884_v14 = vpop.f32.mrb[67].mxu0  ;;  %5366 = vrot.lane.b32.xlu1 %v5115_v53, %s9318_s20  ;;  %v10963_v54 = vrot.slane %v4716_v1, %v12550_v8  ;;  %v5131_v50 = vrot.slane %v10949_v47, %v12546_v43  ;;  %v5143_v36 = vrot.slane %v10954_v32, %v12546_v43  ;;  %v10980_v6 = vcombine.high %v10908_v21, %v10908_v21 }
0x1776   : > { %v4813_v20 = vrot.slane %v4799_v24, %v12550_v8  ;;  %v10984_v2 = vcombine.high %v10913_v48, %v10913_v48  ;;  %v5199_v11 = vrot.slane %v10971_v49, %v12546_v43  ;;  %v10994_v62 = vcombine.high %v10921_v26, %v10921_v26 }
0x1777   : > { %5400 = vrot.lane.b32.xlu0 %v5183_v45, %s9318_s20  ;;  %v5147_v7 = vrot.slane %v10963_v54, %v12546_v43  ;;  %v5203_v63 = vrot.slane %v10980_v6, %v12546_v43  ;;  %v11027_v25 = vcombine.high %v10954_v32, %v10954_v32 }
0x1778   : > { %v4815_v53 = vcombine.high %v4813_v20, %v4813_v20  ;;  %v10997_v45 = vrot.slane %v4813_v20, %v12550_v8  ;;  %v5215_v16 = vrot.slane %v10984_v2, %v12546_v43 }
0x1779   : > { %5402 = vrot.lane.b32.xlu1 %v5187_v0, %s9318_s20  ;;  %v4701_v0 = vcombine.high %v10855_v51, %v10855_v51  ;;  %v11023_v51 = vcombine.high %v10949_v47, %v10949_v47  ;;  %v5151_v24 = vrot.slane %v11027_v25, %v12546_v43 }
0x177a   : > { %v11004_v27 = vrot.slane %v4815_v53, %v12550_v8  ;;  %v5223_v38 = vrot.slane %v10997_v45, %v12546_v43 }
0x177b   : > { %5404 = vrot.lane.b32.xlu0 %v5191_v40, %s9318_s20  ;;  %v5219_v40 = vrot.slane %v10994_v62, %v12546_v43  ;;  %v5139_v1 = vrot.slane %v11023_v51, %v12546_v43 }
0x177c   : > { %v5227_v28 = vrot.slane %v11004_v27, %v12546_v43 }
0x177d   : > { %5406 = vrot.lane.b32.xlu1 %v5195_v12, %s9318_s20  ;;  %v11014_v12 = vcombine.high %v10942_v30, %v10942_v30 }
0x177f   : > { %5412 = vrot.lane.b32.xlu0 %v5207_v58, %s9318_s20  ;;  %v4715_v58 = vrot.slane %v4701_v0, %v12550_v8 }
0x1781   : > { %5414 = vrot.lane.b32.xlu1 %v5211_v39, %s9318_s20  ;;  %v5135_v39 = vrot.slane %v11014_v12, %v12546_v43 }
0x1783   : > { %5368 = vrot.lane.b32.xlu0 %v5119_v35, %s9318_s20  ;;  %v4717_v35 = vcombine.high %v4715_v58, %v4715_v58 }
0x1785   : > { %5370 = vrot.lane.b32.xlu1 %v5123_v17, %s9318_s20  ;;  %v11037_v17 = vcombine.high %v10963_v54, %v10963_v54 }
0x1787   : > { %5372 = vrot.lane.b32.xlu0 %v5127_v42, %s9318_s20  ;;  %v11040_v42 = vrot.slane %v4715_v58, %v12550_v8 }
0x1789   : > { %5374 = vrot.lane.b32.xlu1 %v5131_v50, %s9318_s20  ;;  %v11047_v50 = vrot.slane %v4717_v35, %v12550_v8  ;;  %v5159_v20 = vrot.slane %v11040_v42, %v12546_v43  ;;  %v11071_v0 = vcombine.high %v11040_v42, %v11040_v42 }
0x178b   : > { %5380 = vrot.lane.b32.xlu0 %v5143_v36, %s9318_s20  ;;  %v5155_v36 = vrot.slane %v11037_v17, %v12546_v43  ;;  %v5163_v53 = vrot.slane %v11047_v50, %v12546_v43  ;;  %v5167_v35 = vrot.slane %v11071_v0, %v12546_v43 }
0x178d   : > { %5382 = vrot.lane.b32.xlu1 %v5147_v7, %s9318_s20  ;;  %v11055_v7 = vcombine.high %v10997_v45, %v10997_v45 }
0x178f   : > { %5408 = vrot.lane.b32.xlu0 %v5199_v11, %s9318_s20  ;;  %v4953_v11 = vrot.slane %v10872_v4, %v12550_v8 }
0x1791   : > { %5410 = vrot.lane.b32.xlu1 %v5203_v63, %s9318_s20  ;;  %v11065_v63 = vcombine.high %v11004_v27, %v11004_v27 }
0x1793   : > { %5416 = vrot.lane.b32.xlu0 %v5215_v16, %s9318_s20  ;;  %v5231_v16 = vrot.slane %v11055_v7, %v12546_v43  ;;  %v5235_v58 = vrot.slane %v11065_v63, %v12546_v43 }
0x1795   : > { %5418 = vrot.lane.b32.xlu1 %v5219_v40, %s9318_s20  ;;  %v4961_v40 = vcombine.high %v4953_v11, %v4953_v11 }
0x1797   : > { %5420 = vrot.lane.b32.xlu0 %v5223_v38, %s9318_s20  ;;  %v4855_v38 = vrot.slane %v10874_v9, %v12550_v8 }
0x1799   : > { %5422 = vrot.lane.b32.xlu1 %v5227_v28, %s9318_s20  ;;  %v11081_v28 = vcombine.high %v11047_v50, %v11047_v50 }
0x179b   : > { %5376 = vrot.lane.b32.xlu0 %v5135_v39, %s9318_s20  ;;  %v11084_v39 = vrot.slane %v4953_v11, %v12550_v8  ;;  %v11098_v11 = vrot.slane %v4855_v38, %v12550_v8 }
0x179d   : > { %5378 = vrot.lane.b32.xlu1 %v5139_v1, %s9318_s20  ;;  %v4946_v1 = vcombine.high %v10872_v4, %v10872_v4  ;;  %v11141_v3 = vcombine.high %v11098_v11, %v11098_v11 }
0x179f   : > { %5384 = vrot.lane.b32.xlu0 %v5151_v24, %s9318_s20  ;;  %v11093_v24 = vrot.slane %v4961_v40, %v12550_v8  ;;  %12553 = vst [vmem:[#allocation36_spill] sm:$0xff] %v11141_v3  ;;  %v5247_v33 = vrot.slane %v11141_v3, %v12546_v43 }
0x17a1   : > { %5386 = vrot.lane.b32.xlu1 %v5155_v36, %s9318_s20  ;;  %v4863_v36 = vcombine.high %v4855_v38, %v4855_v38  ;;  %v5307_v40 = vrot.slane %v11093_v24, %v12546_v43  ;;  %v5239_v38 = vrot.slane %v11098_v11, %v12546_v43 }
0x17a3   : > { %5388 = vrot.lane.b32.xlu0 %v5159_v20, %s9318_s20  ;;  %v5171_v20 = vrot.slane %v11081_v28, %v12546_v43  ;;  %v11106_v4 = vrot.slane %v4863_v36, %v12550_v8 }
0x17a5   : > { %5390 = vrot.lane.b32.xlu1 %v5163_v53, %s9318_s20  ;;  %v5303_v53 = vrot.slane %v11084_v39, %v12546_v43  ;;  %v5243_v36 = vrot.slane %v11106_v4, %v12546_v43 }
0x17a7   : > { %5424 = vrot.lane.b32.xlu0 %v5231_v16, %s9318_s20  ;;  %v4960_v16 = vrot.slane %v4946_v1, %v12550_v8  ;;  %v4848_v1 = vcombine.high %v10874_v9, %v10874_v9 }
0x17a9   : > { %5426 = vrot.lane.b32.xlu1 %v5235_v58, %s9318_s20  ;;  %v11112_v58 = vcombine.high %v11084_v39, %v11084_v39  ;;  %v4862_v9 = vrot.slane %v4848_v1, %v12550_v8 }
0x17ab   : > { %5392 = vrot.lane.b32.xlu0 %v5167_v35, %s9318_s20  ;;  %v4962_v35 = vcombine.high %v4960_v16, %v4960_v16  ;;  %v5311_v61 = vrot.slane %v11112_v58, %v12546_v43  ;;  %v11156_v34 = vrot.slane %v4862_v9, %v12550_v8 }
0x17ad   : > { %5394 = vrot.lane.b32.xlu1 %v5171_v20, %s9318_s20  ;;  %v11124_v20 = vcombine.high %v11093_v24, %v11093_v24  ;;  %12555 = vst [vmem:[#allocation38_spill] sm:$0xff] %v11156_v34  ;;  %v11199_v18 = vcombine.high %v11156_v34, %v11156_v34 }
0x17af   : > { %5460 = vrot.lane.b32.xlu0 %v5303_v53, %s9318_s20  ;;  %v11127_v53 = vrot.slane %v4960_v16, %v12550_v8  ;;  %12561 = vst [vmem:[#allocation44_spill] sm:$0xff] %v11199_v18  ;;  %v5263_v10 = vrot.slane %v11199_v18, %v12546_v43 }
0x17b1   : > { %5462 = vrot.lane.b32.xlu1 %v5307_v40, %s9318_s20  ;;  %12551 = vst [vmem:[#allocation35_spill] sm:$0xff] %v11127_v53  ;;  %v11134_v40 = vrot.slane %v4962_v35, %v12550_v8  ;;  %v5319_v16 = vrot.slane %v11127_v53, %v12546_v43  ;;  %v4904_v35 = vrot.slane %v10884_v14, %v12550_v8 }
0x17b3   : > { %5428 = vrot.lane.b32.xlu0 %v5239_v38, %s9318_s20  ;;  %12552 = vst [vmem:[#allocation27_spill] sm:$0xff] %v11134_v40  ;;  %v5315_v38 = vrot.slane %v11124_v20, %v12546_v43  ;;  %v5323_v1 = vrot.slane %v11134_v40, %v12546_v43  ;;  %v11168_v13 = vrot.slane %v4904_v35, %v12550_v8 }
0x17b5   : > { %5430 = vrot.lane.b32.xlu1 %v5243_v36, %s9318_s20  ;;  %v11153_v36 = vcombine.high %v11106_v4, %v11106_v4  ;;  %12557 = vst [vmem:[#allocation40_spill] sm:$0xff] %v11168_v13  ;;  %v11212_v52 = vcombine.high %v11168_v13, %v11168_v13 }
0x17b7   : > { %5464 = vrot.lane.b32.xlu0 %v5311_v61, %s9318_s20  ;;  %v4864_v61 = vcombine.high %v4862_v9, %v4862_v9  ;;  %12554 = vst [vmem:[#allocation37_spill] sm:$0xff] %v11153_v36  ;;  %v5251_v59 = vrot.slane %v11153_v36, %v12546_v43  ;;  %v5255_v9 = vrot.slane %v11156_v34, %v12546_v43  ;;  %12563 = vst [vmem:[#allocation46_spill] sm:$0xff] %v11212_v52 }
0x17b9   : > { %5466 = vrot.lane.b32.xlu1 %v5315_v38, %s9318_s20  ;;  %v11163_v38 = vrot.slane %v4864_v61, %v12550_v8  ;;  %v5271_v61 = vrot.slane %v11168_v13, %v12546_v43 }
0x17bb   : > { %5468 = vrot.lane.b32.xlu0 %v5319_v16, %s9318_s20  ;;  %12556 = vst [vmem:[#allocation39_spill] sm:$0xff] %v11163_v38  ;;  %v4912_v16 = vcombine.high %v4904_v35, %v4904_v35  ;;  %v11183_v35 = vcombine.high %v11127_v53, %v11127_v53 }
0x17bd   : > { %5470 = vrot.lane.b32.xlu1 %v5323_v1, %s9318_s20  ;;  %v11175_v1 = vrot.slane %v4912_v16, %v12550_v8  ;;  %12559 = vst [vmem:[#allocation42_spill] sm:$0xff] %v11183_v35  ;;  %v5327_v23 = vrot.slane %v11183_v35, %v12546_v43  ;;  %v4455_v35 = vld [vmem:[#allocation8 + $0x10] sm:$0x1f] }
0x17bf   : > { %5432 = vrot.lane.b32.xlu0 %v5247_v33, %s9318_s20  ;;  %12558 = vst [vmem:[#allocation41_spill] sm:$0xff] %v11175_v1  ;;  %v5259_v33 = vrot.slane %v11163_v38, %v12546_v43  ;;  %v5275_v16 = vrot.slane %v11175_v1, %v12546_v43 }
0x17c1   : > { %5434 = vrot.lane.b32.xlu1 %v5251_v59, %s9318_s20  ;;  %v4897_v59 = vcombine.high %v10884_v14, %v10884_v14 }
0x17c3   : > { %5436 = vrot.lane.b32.xlu0 %v5255_v9, %s9318_s20  ;;  %v11193_v9 = vcombine.high %v11134_v40, %v11134_v40  ;;  %v4911_v14 = vrot.slane %v4897_v59, %v12550_v8 }
0x17c5   : > { %5438 = vrot.lane.b32.xlu1 %v5259_v33, %s9318_s20  ;;  %12560 = vst [vmem:[#allocation43_spill] sm:$0xff] %v11193_v9  ;;  %v5331_v33 = vrot.slane %v11193_v9, %v12546_v43  ;;  %v11225_v15 = vrot.slane %v4911_v14, %v12550_v8  ;;  %v5279_v9 = vrot.slane %v11212_v52, %v12546_v43 }
0x17c7   : > { %5444 = vrot.lane.b32.xlu0 %v5271_v61, %s9318_s20  ;;  %v11208_v61 = vcombine.high %v11163_v38, %v11163_v38  ;;  %12565 = vst [vmem:[#allocation48_spill] sm:$0xff] %v11225_v15  ;;  %v11242_v52 = vcombine.high %v11225_v15, %v11225_v15 }
0x17c9   : > { %5446 = vrot.lane.b32.xlu1 %v5275_v16, %s9318_s20  ;;  %12562 = vst [vmem:[#allocation45_spill] sm:$0xff] %v11208_v61  ;;  %v5267_v59 = vrot.slane %v11208_v61, %v12546_v43  ;;  %v11222_v16 = vcombine.high %v11175_v1, %v11175_v1  ;;  %12567 = vst [vmem:[#allocation50_spill] sm:$0xff] %v11242_v52 }
0x17cb   : > { %5472 = vrot.lane.b32.xlu0 %v5327_v23, %s9318_s20  ;;  %v4913_v23 = vcombine.high %v4911_v14, %v4911_v14  ;;  %12564 = vst [vmem:[#allocation47_spill] sm:$0xff] %v11222_v16  ;;  %v5283_v61 = vrot.slane %v11222_v16, %v12546_v43  ;;  %v5287_v14 = vrot.slane %v11225_v15, %v12546_v43 }
0x17cd   : > { %5474 = vrot.lane.b32.xlu1 %v5331_v33, %s9318_s20  ;;  %v11234_v33 = vrot.slane %v4913_v23, %v12550_v8 }
0x17cf   : > { %5440 = vrot.lane.b32.xlu0 %v5263_v10, %s9318_s20  ;;  %v5002_v10 = vrot.slane %v10879_v55, %v12550_v8  ;;  %12566 = vst [vmem:[#allocation49_spill] sm:$0xff] %v11234_v33  ;;  %v5291_v16 = vrot.slane %v11234_v33, %v12546_v43  ;;  %v11253_v18 = vcombine.high %v11234_v33, %v11234_v33 }
0x17d1   : > { %5442 = vrot.lane.b32.xlu1 %v5267_v59, %s9318_s20  ;;  %v5623_v59 = vrot.slane %v4455_v35, %v12546_v43  ;;  %v5010_v23 = vcombine.high %v5002_v10, %v5002_v10  ;;  %12568 = vst [vmem:[#allocation51_spill] sm:$0xff] %v11253_v18  ;;  %v11256_v15 = vrot.slane %v5002_v10, %v12550_v8 }
0x17d2   : > { %v5295_v35 = vrot.slane %v11242_v52, %v12546_v43  ;;  %v5299_v33 = vrot.slane %v11253_v18, %v12546_v43 }
0x17d3   : > { %5448 = vrot.lane.b32.xlu0 %v5279_v9, %s9318_s20  ;;  %v4995_v9 = vcombine.high %v10879_v55, %v10879_v55  ;;  %12569 = vst [vmem:[#allocation52_spill] sm:$0xff] %v11256_v15  ;;  %v11273_v10 = vcombine.high %v11256_v15, %v11256_v15  ;;  %v5335_v52 = vrot.slane %v11256_v15, %v12546_v43 }
0x17d5   : > { %5450 = vrot.lane.b32.xlu1 %v5283_v61, %s9318_s20  ;;  %v11261_v61 = vrot.slane %v5623_v59, %v9941_v19  ;;  %v5009_v55 = vrot.slane %v4995_v9, %v12550_v8  ;;  %12571 = vst [vmem:[#allocation54_spill] sm:$0xff] %v11273_v10 }
0x17d7   : > { %5452 = vrot.lane.b32.xlu0 %v5287_v14, %s9318_s20  ;;  %v11267_v14 = vrot.slane %v5010_v23, %v12550_v8  ;;  %v5011_v18 = vcombine.high %v5009_v55, %v5009_v55 }
0x17d9   : > { %5454 = vrot.lane.b32.xlu1 %v5291_v16, %s9318_s20  ;;  %12570 = vst [vmem:[#allocation53_spill] sm:$0xff] %v11267_v14  ;;  %v11279_v16 = vcombine.high %v11261_v61, %v11261_v61  ;;  %v5339_v15 = vrot.slane %v11267_v14, %v12546_v43  ;;  %v11294_v38 = vcombine.high %v11267_v14, %v11267_v14 }
0x17da   : > { %v11311_v14 = vrot.slane %v5011_v18, %v12550_v8 }
0x17db   : > { %5456 = vrot.lane.b32.xlu0 %v5295_v35, %s9318_s20  ;;  %12572 = vst [vmem:[#allocation55_spill] sm:$0xff] %v11294_v38 }
0x17dc   : > { %12574 = vst [vmem:[#allocation57_spill] sm:$0xff] %v11311_v14 }
0x17dd   : > { %5458 = vrot.lane.b32.xlu1 %v5299_v33, %s9318_s20  ;;  %v11297_v33 = vrot.slane %v5009_v55, %v12550_v8 }
0x17df   : > { %5476 = vrot.lane.b32.xlu0 %v5335_v52, %s9318_s20  ;;  %12573 = vst [vmem:[#allocation56_spill] sm:$0xff] %v11297_v33 }
0x17e1   : > { %v5397_v1 = vpop.permute.xlu0 %5396  ;;  %5478 = vrot.lane.b32.xlu1 %v5339_v15, %s9318_s20  ;;  %v5351_v15 = vrot.slane %v11297_v33, %v12546_v43 }
0x17e2   : > { %v5572_v9 = vsel %vm549_vm5, %v10858_v22, %v5397_v1  ;;  %v5343_v1 = vrot.slane %v11273_v10, %v12546_v43 }
0x17e3   : > { %v11286_v23 = vadd.f32 %v11261_v61, %v5572_v9  ;;  %v5399_v35 = vpop.permute.xlu1 %5398 }
0x17e4   : > { %v5573_v13 = vsel %vm549_vm5, %v10862_v29, %v5399_v35  ;;  %v5625_v35 = vcombine.high %v5623_v59, %v5623_v59  ;;  %5480 = vrot.lane.b32.xlu0 %v5343_v1, %s9318_s20 }
0x17e5   : > { %v5790_v52 = vmul.f32 0.70710677, %v11286_v23  ;;  %v5663_v22 = vadd.f32 %v11279_v16, %v5573_v13  ;;  %v5365_v9 = vpop.permute.xlu0 %5364  ;;  %v5347_v13 = vrot.slane %v11294_v38, %v12546_v43 }
0x17e6   : > { %v5556_v29 = vsel %vm549_vm5, %v10865_v41, %v5365_v9  ;;  %v11319_v41 = vcombine.high %v11297_v33, %v11297_v33  ;;  %v11324_v18 = vrot.slane %v5625_v35, %v9941_v19  ;;  %v11334_v9 = vcombine.high %v11311_v14, %v11311_v14 }
0x17e7   : > { %v5791_v34 = vmul.f32 0.70710677, %v5663_v22  ;;  %v11308_v55 = vadd.f32 %v11261_v61, %v5556_v29  ;;  %8921 = verf.f32 %v5790_v52  ;;  %5482 = vrot.lane.b32.xlu1 %v5347_v13, %s9318_s20  ;;  %v5367_v1 = vpop.permute.xlu1 %5366  ;;  %v5355_v52 = vrot.slane %v11311_v14, %v12546_v43 }
0x17e8   : > { %12575 = vst [vmem:[#allocation58_spill] sm:$0xff] %v11319_v41  ;;  %v5557_v8 = vsel %vm549_vm5, %v10882_v57, %v5367_v1  ;;  %5484 = vrot.lane.b32.xlu0 %v5351_v15, %s9318_s20  ;;  %12576 = vst [vmem:[#allocation59_spill] sm:$0xff] %v11334_v9  ;;  %v5359_v13 = vrot.slane %v11319_v41, %v12546_v43  ;;  %v11343_v15 = vcombine.high %v11324_v18, %v11324_v18 }
0x17e9   : > { %8923 = verf.f32 %v5791_v34  ;;  %v5774_v59 = vmul.f32 0.70710677, %v11308_v55  ;;  %v5647_v34 = vadd.f32 %v11279_v16, %v5557_v8  ;;  %v5401_v29 = vpop.permute.xlu0 %5400  ;;  %v5363_v41 = vrot.slane %v11334_v9, %v12546_v43 }
0x17ea   : > { %v5574_v57 = vsel %vm549_vm5, %v10890_v44, %v5401_v29  ;;  %v5727_v36 = vmul.f32 0.5, %v5663_v22 }
0x17eb   : > { %8925 = verf.f32 %v5774_v59  ;;  %v5775_v35 = vmul.f32 0.70710677, %v5647_v34  ;;  %5486 = vrot.lane.b32.xlu1 %v5355_v52, %s9318_s20  ;;  %v5664_v1 = vadd.f32 %v11324_v18, %v5574_v57  ;;  %v5403_v8 = vpop.permute.xlu1 %5402  ;;  %v5711_v3 = vmul.f32 0.5, %v5647_v34 }
0x17ec   : > { %5488 = vrot.lane.b32.xlu0 %v5359_v13, %s9318_s20  ;;  %v5575_v52 = vsel %vm549_vm5, %v10904_v5, %v5403_v8 }
0x17ed   : > { %8927 = verf.f32 %v5775_v35  ;;  %v5792_v59 = vmul.f32 0.70710677, %v5664_v1  ;;  %v5405_v14 = vpop.permute.xlu0 %5404  ;;  %v5665_v44 = vadd.f32 %v11343_v15, %v5575_v52  ;;  %v5728_v53 = vmul.f32 0.5, %v5664_v1 }
0x17ee   : > { %v5576_v29 = vsel %vm549_vm5, %v10898_v37, %v5405_v14 }
0x17ef   : > { %5490 = vrot.lane.b32.xlu1 %v5363_v41, %s9318_s20  ;;  %8929 = verf.f32 %v5792_v59  ;;  %v5666_v13 = vadd.f32 %v11261_v61, %v5576_v29  ;;  %v5793_v38 = vmul.f32 0.70710677, %v5665_v44  ;;  %v5407_v43 = vpop.permute.xlu1 %5406  ;;  %v5726_v59 = vmul.f32 0.5, %v11286_v23 }
0x17f0   : > { %v5577_v5 = vsel %vm549_vm5, %v10908_v21, %v5407_v43 }
0x17f1   : > { %v8922_v33 = vpop.eup %8921  ;;  %v5794_v9 = vmul.f32 0.70710677, %v5666_v13  ;;  %v5413_v8 = vpop.permute.xlu0 %5412  ;;  %8931 = verf.f32 %v5793_v38  ;;  %v5667_v41 = vadd.f32 %v11279_v16, %v5577_v5  ;;  %v5710_v5 = vmul.f32 0.5, %v11308_v55 }
0x17f2   : > { %v5918_v10 = vadd.f32 1.0, %v8922_v33  ;;  %v5580_v37 = vsel %vm549_vm5, %v10913_v48, %v5413_v8 }
0x17f3   : > { %v8924_v57 = vpop.eup %8923  ;;  %8933 = verf.f32 %v5794_v9  ;;  %v5795_v29 = vmul.f32 0.70710677, %v5667_v41  ;;  %v5670_v40 = vadd.f32 %v11261_v61, %v5580_v37 }
0x17f4   : > { %v5919_v35 = vadd.f32 1.0, %v8924_v57  ;;  %v5415_v57 = vpop.permute.xlu1 %5414  ;;  %v5982_v33 = vmul.f32 %v5918_v10, %v5726_v59 }
0x17f5   : > { %v8926_v14 = vpop.eup %8925  ;;  %v5581_v43 = vsel %vm549_vm5, %v10921_v26, %v5415_v57  ;;  %v5369_v21 = vpop.permute.xlu0 %5368  ;;  %8935 = verf.f32 %v5795_v29  ;;  %v5729_v29 = vmul.f32 0.5, %v5665_v44  ;;  %v5731_v44 = vmul.f32 0.5, %v5667_v41 }
0x17f6   : > { %v5983_v52 = vmul.f32 %v5919_v35, %v5727_v36  ;;  %v5671_v22 = vadd.f32 %v11279_v16, %v5581_v43  ;;  %v5558_v48 = vsel %vm549_vm5, %v10927_v46, %v5369_v21  ;;  %v5902_v9 = vadd.f32 1.0, %v8926_v14 }
0x17f7   : > { %v8928_v38 = vpop.eup %8927  ;;  %v5798_v36 = vmul.f32 0.70710677, %v5670_v40  ;;  %v5648_v35 = vadd.f32 %v11324_v18, %v5558_v48 }
0x17f8   : > { %v5903_v23 = vadd.f32 1.0, %v8928_v38  ;;  %v6162_v34 = vcombine.low %v5982_v33, %v5983_v52  ;;  %v5799_v8 = vmul.f32 0.70710677, %v5671_v22  ;;  %v5371_v37 = vpop.permute.xlu1 %5370  ;;  %v5966_v43 = vmul.f32 %v5902_v9, %v5710_v5 }
0x17f9   : > { %v8930_v26 = vpop.eup %8929  ;;  %8937 = verf.f32 %v5798_v36  ;;  %v5776_v10 = vmul.f32 0.70710677, %v5648_v35  ;;  %v5373_v59 = vpop.permute.xlu0 %5372  ;;  %v5559_v46 = vsel %vm549_vm5, %v10939_v56, %v5371_v37  ;;  %v5730_v38 = vmul.f32 0.5, %v5666_v13  ;;  %v8713_v56 = vld [vmem:[%s12418_s9 + $0xc0] sm:$0xff]   ;;  %v8714_v13 = vld [vmem:[%s12418_s9 + $0xc8] sm:$0xff]  }
0x17fa   : > { %v5967_v57 = vmul.f32 %v5903_v23, %v5711_v3  ;;  %8939 = verf.f32 %v5799_v8  ;;  %v5560_v14 = vsel %vm549_vm5, %v10942_v30, %v5373_v59  ;;  %v5649_v55 = vadd.f32 %v11343_v15, %v5559_v46  ;;  %6662 = vmatpush1.bf16.msra.mxu0 %v8713_v56 }
0x17fb   : > { %8941 = verf.f32 %v5776_v10  ;;  %v5650_v52 = vadd.f32 %v11261_v61, %v5560_v14  ;;  %v8932_v21 = vpop.eup %8931  ;;  %v11377_v3 = vrot.slane %v6162_v34, %v9941_v19  ;;  %v5920_v1 = vadd.f32 1.0, %v8930_v26  ;;  %6663 = vmatprep.subr.bf16.mxu0 %v12545_v60 }
0x17fc   : > { %v5375_v33 = vpop.permute.xlu1 %5374  ;;  %v6094_v30 = vcombine.low %v5966_v43, %v5967_v57  ;;  %v5921_v9 = vadd.f32 1.0, %v8932_v21  ;;  %v5734_v23 = vmul.f32 0.5, %v5670_v40  ;;  %v5777_v36 = vmul.f32 0.70710677, %v5649_v55 }
0x17fd   : > { %v8934_v48 = vpop.eup %8933  ;;  %v5381_v5 = vpop.permute.xlu0 %5380  ;;  %v5735_v8 = vmul.f32 0.5, %v5671_v22  ;;  %v11382_v37 = vmul.f32 0.5, %v5648_v35  ;;  %v5778_v10 = vmul.f32 0.70710677, %v5650_v52  ;;  %v5561_v34 = vsel %vm549_vm5, %v10949_v47, %v5375_v33 }
0x17fe   : > { %v5985_v41 = vmul.f32 %v5921_v9, %v5729_v29  ;;  %8943 = verf.f32 %v5777_v36  ;;  %v5651_v26 = vadd.f32 %v11279_v16, %v5561_v34  ;;  %v5564_v40 = vsel %vm549_vm5, %v10954_v32, %v5381_v5  ;;  %6664 = vmatpush1.bf16.msra.mxu0 %v8714_v13 }
0x17ff   : > { %v8936_v22 = vpop.eup %8935  ;;  %v5984_v35 = vmul.f32 %v5920_v1, %v5728_v53  ;;  %v5922_v57 = vadd.f32 1.0, %v8934_v48  ;;  %8945 = verf.f32 %v5778_v10  ;;  %v5654_v47 = vadd.f32 %v11261_v61, %v5564_v40  ;;  %v8715_v1 = vld [vmem:[%s12418_s9 + $0xd0] sm:$0xff]   ;;  %6665 = vmatprep.subr.bf16.mxu0 %v12545_v60 }
0x1800   : > { %v5383_v59 = vpop.permute.xlu1 %5382  ;;  %v11395_v46 = vrot.slane %v6094_v30, %v9941_v19  ;;  %v5923_v14 = vadd.f32 1.0, %v8936_v22  ;;  %v5713_v29 = vmul.f32 0.5, %v5649_v55  ;;  %v5779_v43 = vmul.f32 0.70710677, %v5651_v26 }
0x1801   : > { %v5409_v21 = vpop.permute.xlu0 %5408  ;;  %v6163_v33 = vcombine.low %v5984_v35, %v5985_v41  ;;  %v5782_v56 = vmul.f32 0.70710677, %v5654_v47  ;;  %v5565_v32 = vsel %vm549_vm5, %v10963_v54, %v5383_v59  ;;  %v11404_v9 = vmul.f32 0.5, %v5650_v52 }
0x1802   : > { %v5578_v53 = vsel %vm549_vm5, %v10971_v49, %v5409_v21  ;;  %v5987_v30 = vmul.f32 %v5923_v14, %v5731_v44  ;;  %8947 = verf.f32 %v5779_v43  ;;  %v5655_v55 = vadd.f32 %v11279_v16, %v5565_v32  ;;  %6666 = vmatpush1.bf16.msra.mxu0 %v8715_v1 }
0x1803   : > { %v8938_v48 = vpop.eup %8937  ;;  %v5986_v5 = vmul.f32 %v5922_v57, %v5730_v38  ;;  %8949 = verf.f32 %v5782_v56  ;;  %v5668_v49 = vadd.f32 %v11324_v18, %v5578_v53  ;;  %v5715_v41 = vmul.f32 0.5, %v5651_v26  ;;  %v8716_v38 = vld [vmem:[%s12418_s9 + $0xd8] sm:$0xff]   ;;  %6667 = vmatprep.subr.bf16.mxu0 %v12545_v60 }
0x1804   : > { %v8940_v36 = vpop.eup %8939  ;;  %v5926_v54 = vadd.f32 1.0, %v8938_v48  ;;  %v5411_v10 = vpop.permute.xlu1 %5410  ;;  %v11409_v40 = vmul.f32 0.5, %v5654_v47  ;;  %v5783_v44 = vmul.f32 0.70710677, %v5655_v55  ;;  %v6177_v22 = vrot.slane %v6163_v33, %v9941_v19 }
0x1805   : > { %v8942_v34 = vpop.eup %8941  ;;  %v5927_v13 = vadd.f32 1.0, %v8940_v36  ;;  %v5417_v52 = vpop.permute.xlu0 %5416  ;;  %v6179_v35 = vcombine.low %v5986_v5, %v5987_v30  ;;  %v5796_v14 = vmul.f32 0.70710677, %v5668_v49  ;;  %v5579_v26 = vsel %vm549_vm5, %v10980_v6, %v5411_v10 }
0x1806   : > { %v5990_v59 = vmul.f32 %v5926_v54, %v5734_v23  ;;  %v5904_v43 = vadd.f32 1.0, %v8942_v34  ;;  %8951 = verf.f32 %v5783_v44  ;;  %v11418_v47 = vmul.f32 0.5, %v5655_v55  ;;  %6668 = vmatpush1.bf16.msra.mxu0 %v8716_v38 }
0x1807   : > { %v5991_v57 = vmul.f32 %v5927_v13, %v5735_v8  ;;  %8953 = verf.f32 %v5796_v14  ;;  %v5669_v21 = vadd.f32 %v11343_v15, %v5579_v26  ;;  %v5582_v23 = vsel %vm549_vm5, %v10984_v2, %v5417_v52  ;;  %v8717_v2 = vld [vmem:[%s12418_s9 + $0xe0] sm:$0xff]   ;;  %6669 = vmatprep.subr.bf16.mxu0 %v12545_v60 }
0x1808   : > { %v5419_v33 = vpop.permute.xlu1 %5418  ;;  %v8944_v56 = vpop.eup %8943  ;;  %v11423_v53 = vmul.f32 0.5, %v5668_v49  ;;  %v5672_v8 = vadd.f32 %v11324_v18, %v5582_v23  ;;  %v11429_v30 = vrot.slane %v6179_v35, %v9941_v19  ;;  %v5968_v54 = vmul.f32 %v5904_v43, %v11382_v37  ;;  %v8718_v43 = vld [vmem:[%s12418_s9 + $0xe8] sm:$0xff]  }
0x1809   : > { %v6196_v32 = vcombine.low %v5990_v59, %v5991_v57  ;;  %v5583_v6 = vsel %vm549_vm5, %v10994_v62, %v5419_v33  ;;  %v5421_v1 = vpop.permute.xlu0 %5420  ;;  %v8946_v48 = vpop.eup %8945  ;;  %v5905_v55 = vadd.f32 1.0, %v8944_v56  ;;  %v5797_v36 = vmul.f32 0.70710677, %v5669_v21 }
0x180a   : > { %v5673_v5 = vadd.f32 %v11343_v15, %v5583_v6  ;;  %v11436_v49 = vmul.f32 0.5, %v5669_v21  ;;  %v5800_v10 = vmul.f32 0.70710677, %v5672_v8  ;;  %v11439_v62 = vcombine.low %v11377_v3, %v6177_v22  ;;  %6670 = vmatpush1.bf16.msra.mxu0 %v8717_v2 }
0x180b   : > { %v5969_v34 = vmul.f32 %v5905_v55, %v5713_v29  ;;  %v5906_v13 = vadd.f32 1.0, %v8946_v48  ;;  %8955 = verf.f32 %v5797_v36  ;;  %v11443_v59 = vrot.slane %v6196_v32, %v9941_v19  ;;  %6671 = vmatprep.subr.bf16.mxu0 %v12545_v60 }
0x180c   : > { %v5801_v44 = vmul.f32 0.70710677, %v5673_v5  ;;  %v5423_v52 = vpop.permute.xlu1 %5422  ;;  %v8948_v35 = vpop.eup %8947  ;;  %8957 = verf.f32 %v5800_v10  ;;  %v5584_v37 = vsel %vm549_vm5, %v10997_v45, %v5421_v1  ;;  %v11453_v21 = vmul.f32 0.5, %v5672_v8 }
0x180d   : > { %v5585_v14 = vsel %vm549_vm5, %v11004_v27, %v5423_v52  ;;  %v5377_v3 = vpop.permute.xlu0 %5376  ;;  %v8950_v22 = vpop.eup %8949  ;;  %v6095_v38 = vcombine.low %v5968_v54, %v5969_v34  ;;  %v5907_v57 = vadd.f32 1.0, %v8948_v35  ;;  %v5674_v29 = vadd.f32 %v11261_v61, %v5584_v37 }
0x180e   : > { %8959 = verf.f32 %v5801_v44  ;;  %v5910_v26 = vadd.f32 1.0, %v8950_v22  ;;  %v5675_v45 = vadd.f32 %v11279_v16, %v5585_v14  ;;  %v5562_v27 = vsel %vm549_vm5, %v11014_v12, %v5377_v3  ;;  %6672 = vmatpush1.bf16.msra.mxu0 %v8718_v43 }
0x180f   : > { %v5970_v23 = vmul.f32 %v5906_v13, %v11404_v9  ;;  %v5971_v33 = vmul.f32 %v5907_v57, %v5715_v41  ;;  %v5737_v56 = vmul.f32 0.5, %v5673_v5  ;;  %v5802_v32 = vmul.f32 0.70710677, %v5674_v29  ;;  %v8719_v41 = vld [vmem:[%s12418_s9 + $0xf0] sm:$0xff]   ;;  %6673 = vmatprep.subr.bf16.mxu0 %v12545_v60 }
0x1810   : > { %v5379_v6 = vpop.permute.xlu1 %5378  ;;  %v8952_v1 = vpop.eup %8951  ;;  %v11461_v48 = vrot.slane %v6095_v38, %v9941_v19  ;;  %v11463_v55 = vmul.f32 0.5, %v5674_v29  ;;  %v5803_v8 = vmul.f32 0.70710677, %v5675_v45  ;;  %v5652_v36 = vadd.f32 %v11324_v18, %v5562_v27 }
0x1811   : > { %v5385_v2 = vpop.permute.xlu0 %5384  ;;  %v8954_v54 = vpop.eup %8953  ;;  %v6111_v12 = vcombine.low %v5970_v23, %v5971_v33  ;;  %v5911_v10 = vadd.f32 1.0, %v8952_v1  ;;  %8961 = verf.f32 %v5802_v32  ;;  %v5563_v9 = vsel %vm549_vm5, %v11023_v51, %v5379_v6 }
0x1812   : > { %v5974_v5 = vmul.f32 %v5910_v26, %v11409_v40  ;;  %v5924_v34 = vadd.f32 1.0, %v8954_v54  ;;  %8963 = verf.f32 %v5803_v8  ;;  %v5780_v13 = vmul.f32 0.70710677, %v5652_v36  ;;  %6674 = vmatpush1.bf16.msra.mxu0 %v8719_v41 }
0x1813   : > { %v5975_v44 = vmul.f32 %v5911_v10, %v11418_v47  ;;  %v11474_v52 = vmul.f32 0.5, %v5675_v45  ;;  %v5653_v35 = vadd.f32 %v11343_v15, %v5563_v9  ;;  %v5566_v51 = vsel %vm549_vm5, %v11027_v25, %v5385_v2  ;;  %v8720_v25 = vld [vmem:[%s12418_s9 + $0xf8] sm:$0xff]   ;;  %6675 = vmatprep.subr.bf16.mxu0 %v12545_v60 }
0x1814   : > { %v5387_v37 = vpop.permute.xlu1 %5386  ;;  %v11479_v14 = vmul.f32 0.5, %v5652_v36  ;;  %8965 = verf.f32 %v5780_v13  ;;  %v5656_v40 = vadd.f32 %v11324_v18, %v5566_v51  ;;  %v11485_v47 = vrot.slane %v6111_v12, %v9941_v19 }
0x1815   : > { %v5567_v3 = vsel %vm549_vm5, %v11037_v17, %v5387_v37  ;;  %v5389_v22 = vpop.permute.xlu0 %5388  ;;  %v8956_v38 = vpop.eup %8955  ;;  %v6128_v57 = vcombine.low %v5974_v5, %v5975_v44  ;;  %v5781_v29 = vmul.f32 0.70710677, %v5653_v35  ;;  %v5988_v45 = vmul.f32 %v5924_v34, %v11423_v53 }
0x1816   : > { %v5657_v43 = vadd.f32 %v11343_v15, %v5567_v3  ;;  %v8958_v26 = vpop.eup %8957  ;;  %v5925_v27 = vadd.f32 1.0, %v8956_v38  ;;  %v5784_v23 = vmul.f32 0.70710677, %v5656_v40  ;;  %v5568_v17 = vsel %vm549_vm5, %v11040_v42, %v5389_v22  ;;  %6676 = vmatpush1.bf16.msra.mxu0 %v8720_v25 }
0x1817   : > { %v5928_v32 = vadd.f32 1.0, %v8958_v26  ;;  %v11495_v6 = vmul.f32 0.5, %v5653_v35  ;;  %8967 = verf.f32 %v5781_v29  ;;  %v11497_v1 = vmul.f32 0.5, %v5656_v40  ;;  %6677 = vmatprep.subr.bf16.mxu0 %v12545_v60 }
0x1818   : > { %v8960_v33 = vpop.eup %8959  ;;  %v5391_v8 = vpop.permute.xlu1 %5390  ;;  %v5989_v36 = vmul.f32 %v5925_v27, %v11436_v49  ;;  %8969 = verf.f32 %v5784_v23  ;;  %v5785_v53 = vmul.f32 0.70710677, %v5657_v43  ;;  %v11501_v12 = vrot.slane %v6128_v57, %v9941_v19  ;;  %v8721_v49 = vld [vmem:[%s12418_s9 + $0x100] sm:$0xff]  }
0x1819   : > { %v5929_v2 = vadd.f32 1.0, %v8960_v33  ;;  %v5425_v54 = vpop.permute.xlu0 %5424  ;;  %v5658_v42 = vadd.f32 %v11261_v61, %v5568_v17  ;;  %v5569_v10 = vsel %vm549_vm5, %v11047_v50, %v5391_v8  ;;  %v5992_v44 = vmul.f32 %v5928_v32, %v11453_v21 }
0x181a   : > { %v5586_v9 = vsel %vm549_vm5, %v11055_v7, %v5425_v54  ;;  %v6180_v41 = vcombine.low %v5988_v45, %v5989_v36  ;;  %8971 = verf.f32 %v5785_v53  ;;  %v5659_v34 = vadd.f32 %v11279_v16, %v5569_v10  ;;  %6678 = vmatpush1.bf16.msra.mxu0 %v8721_v49 }
0x181b   : > { %v5993_v5 = vmul.f32 %v5929_v2, %v5737_v56  ;;  %v8962_v13 = vpop.eup %8961  ;;  %v11514_v35 = vmul.f32 0.5, %v5657_v43  ;;  %v5786_v50 = vmul.f32 0.70710677, %v5658_v42  ;;  %v5676_v7 = vadd.f32 %v11324_v18, %v5586_v9  ;;  %v8722_v43 = vld [vmem:[%s12418_s9 + $0x108] sm:$0xff]   ;;  %6679 = vmatprep.subr.bf16.mxu0 %v12545_v60 }
0x181c   : > { %v5427_v51 = vpop.permute.xlu1 %5426  ;;  %v8964_v37 = vpop.eup %8963  ;;  %v6194_v40 = vrot.slane %v6180_v41, %v9941_v19  ;;  %v5930_v3 = vadd.f32 1.0, %v8962_v13  ;;  %v11518_v22 = vmul.f32 0.5, %v5658_v42  ;;  %v11522_v38 = vcombine.low %v11395_v46, %v11461_v48  ;;  %v8723_v42 = vld [vmem:[%s12418_s9 + $0x110] sm:$0xff]  }
0x181d   : > { %v5393_v56 = vpop.permute.xlu0 %5392  ;;  %v6197_v57 = vcombine.low %v5992_v44, %v5993_v5  ;;  %v5931_v29 = vadd.f32 1.0, %v8964_v37  ;;  %8973 = verf.f32 %v5786_v50  ;;  %v5787_v21 = vmul.f32 0.70710677, %v5659_v34 }
0x181e   : > { %v8966_v25 = vpop.eup %8965  ;;  %v5994_v26 = vmul.f32 %v5930_v3, %v11463_v55  ;;  %v11528_v45 = vmul.f32 0.5, %v5659_v34  ;;  %v5804_v27 = vmul.f32 0.70710677, %v5676_v7  ;;  %v5587_v23 = vsel %vm549_vm5, %v11065_v63, %v5427_v51  ;;  %6680 = vmatpush1.bf16.msra.mxu0 %v8722_v43 }
0x181f   : > { %v5995_v46 = vmul.f32 %v5931_v29, %v11474_v52  ;;  %v5908_v48 = vadd.f32 1.0, %v8966_v25  ;;  %8975 = verf.f32 %v5787_v21  ;;  %v5677_v17 = vadd.f32 %v11343_v15, %v5587_v23  ;;  %6681 = vmatprep.subr.bf16.mxu0 %v12545_v60 }
0x1820   : > { %v5395_v33 = vpop.permute.xlu1 %5394  ;;  %v11535_v32 = vmul.f32 0.5, %v5676_v7  ;;  %8977 = verf.f32 %v5804_v27  ;;  %v5570_v55 = vsel %vm549_vm5, %v11071_v0, %v5393_v56  ;;  %v11542_v2 = vrot.slane %v6197_v57, %v9941_v19  ;;  %v8724_v56 = vld [vmem:[%s12418_s9 + $0x118] sm:$0xff]  }
0x1821   : > { %v5571_v8 = vsel %vm549_vm5, %v11081_v28, %v5395_v33  ;;  %v5461_v36 = vpop.permute.xlu0 %5460  ;;  %v8968_v63 = vpop.eup %8967  ;;  %v6213_v52 = vcombine.low %v5994_v26, %v5995_v46  ;;  %v5805_v53 = vmul.f32 0.70710677, %v5677_v17  ;;  %v11545_v54 = vcombine.low %v11429_v30, %v6194_v40 }
0x1822   : > { %v8970_v10 = vpop.eup %8969  ;;  %v5909_v0 = vadd.f32 1.0, %v8968_v63  ;;  %v5660_v9 = vadd.f32 %v11324_v18, %v5570_v55  ;;  %v5661_v28 = vadd.f32 %v11343_v15, %v5571_v8  ;;  %v5604_v49 = vsel %vm549_vm5, %v11084_v39, %v5461_v36  ;;  %6682 = vmatpush1.bf16.msra.mxu0 %v8723_v42 }
0x1823   : > { %v5972_v41 = vmul.f32 %v5908_v48, %v11479_v14  ;;  %v5912_v30 = vadd.f32 1.0, %v8970_v10  ;;  %8979 = verf.f32 %v5805_v53  ;;  %v5694_v5 = vadd.f32 %v11261_v61, %v5604_v49  ;;  %6683 = vmatprep.subr.bf16.mxu0 %v12545_v60 }
0x1824   : > { %v5463_v34 = vpop.permute.xlu1 %5462  ;;  %v8972_v13 = vpop.eup %8971  ;;  %v11558_v44 = vrot.slane %v6213_v52, %v9941_v19  ;;  %v5973_v50 = vmul.f32 %v5909_v0, %v11495_v6  ;;  %v5741_v7 = vmul.f32 0.5, %v5677_v17  ;;  %v5788_v51 = vmul.f32 0.70710677, %v5660_v9 }
0x1825   : > { %v5429_v37 = vpop.permute.xlu0 %5428  ;;  %v5976_v39 = vmul.f32 %v5912_v30, %v11497_v1  ;;  %v5913_v40 = vadd.f32 1.0, %v8972_v13  ;;  %v11562_v3 = vmul.f32 0.5, %v5660_v9  ;;  %v5789_v14 = vmul.f32 0.70710677, %v5661_v28 }
0x1826   : > { %v6112_v57 = vcombine.low %v5972_v41, %v5973_v50  ;;  %8981 = verf.f32 %v5788_v51  ;;  %v5822_v29 = vmul.f32 0.70710677, %v5694_v5  ;;  %v5605_v6 = vsel %vm549_vm5, %v11093_v24, %v5463_v34  ;;  %6684 = vmatpush1.bf16.msra.mxu0 %v8724_v56 }
0x1827   : > { %v8974_v21 = vpop.eup %8973  ;;  %v5977_v1 = vmul.f32 %v5913_v40, %v11514_v35  ;;  %8983 = verf.f32 %v5789_v14  ;;  %v5695_v43 = vadd.f32 %v11279_v16, %v5605_v6  ;;  %v5588_v25 = vsel %vm549_vm5, %v11098_v11, %v5429_v37  ;;  %8417 = vmatprep.subr.bf16.mxu0 %v12540_v31  ;;  %v12577_v37 = vld [vmem:[#allocation35_spill] sm:$0xff] }
0x1828   : > { %v5431_v26 = vpop.permute.xlu1 %5430  ;;  %v5914_v27 = vadd.f32 1.0, %v8974_v21  ;;  %v5725_v23 = vmul.f32 0.5, %v5661_v28  ;;  %8985 = verf.f32 %v5822_v29  ;;  %v5678_v46 = vadd.f32 %v11261_v61, %v5588_v25 }
0x1829   : > { %v5465_v48 = vpop.permute.xlu0 %5464  ;;  %v8976_v17 = vpop.eup %8975  ;;  %v6129_v24 = vcombine.low %v5976_v39, %v5977_v1  ;;  %v11575_v33 = vmul.f32 0.5, %v5694_v5  ;;  %v5823_v55 = vmul.f32 0.70710677, %v5695_v43  ;;  %v5589_v35 = vsel %vm549_vm5, %v11106_v4, %v5431_v26 }
0x182a   : > { %v8978_v8 = vpop.eup %8977  ;;  %v6126_v36 = vrot.slane %v6112_v57, %v9941_v19  ;;  %v5915_v11 = vadd.f32 1.0, %v8976_v17  ;;  %v11580_v63 = vmul.f32 0.5, %v5695_v43  ;;  %v5806_v52 = vmul.f32 0.70710677, %v5678_v46 }
0x182b   : > { %v5978_v53 = vmul.f32 %v5914_v27, %v11518_v22  ;;  %v5932_v42 = vadd.f32 1.0, %v8978_v8  ;;  %8987 = verf.f32 %v5823_v55  ;;  %v5679_v10 = vadd.f32 %v11279_v16, %v5589_v35 }
0x182c   : > { %v5467_v0 = vpop.permute.xlu1 %5466  ;;  %v5979_v9 = vmul.f32 %v5915_v11, %v11528_v45  ;;  %8989 = verf.f32 %v5806_v52  ;;  %v5606_v4 = vsel %vm549_vm5, %v11112_v58, %v5465_v48  ;;  %v11591_v30 = vrot.slane %v6129_v24, %v9941_v19 }
0x182d   : > { %v5607_v28 = vsel %vm549_vm5, %v11124_v20, %v5467_v0  ;;  %v5469_v49 = vpop.permute.xlu0 %5468  ;;  %v8980_v41 = vpop.eup %8979  ;;  %v5742_v22 = vmul.f32 0.5, %v5678_v46  ;;  %v5807_v5 = vmul.f32 0.70710677, %v5679_v10  ;;  %v5696_v34 = vadd.f32 %v11324_v18, %v5606_v4  ;;  %v12578_v46 = vld [vmem:[#allocation27_spill] sm:$0xff] }
0x182e   : > { %v5996_v13 = vmul.f32 %v5932_v42, %v11535_v32  ;;  %v5933_v50 = vadd.f32 1.0, %v8980_v41  ;;  %v5697_v45 = vadd.f32 %v11343_v15, %v5607_v28  ;;  %v11597_v51 = vcombine.low %v11485_v47, %v6126_v36 }
0x182f   : > { %v6145_v58 = vcombine.low %v5978_v53, %v5979_v9  ;;  %8991 = verf.f32 %v5807_v5  ;;  %v5824_v20 = vmul.f32 0.70710677, %v5696_v34  ;;  %v5608_v39 = vsel %vm549_vm5, %v12577_v37, %v5469_v49  ;;  %v12580_v9 = vld [vmem:[#allocation37_spill] sm:$0xff] }
0x1830   : > { %v5471_v40 = vpop.permute.xlu1 %5470  ;;  %v8982_v14 = vpop.eup %8981  ;;  %v5997_v56 = vmul.f32 %v5933_v50, %v5741_v7  ;;  %v5743_v57 = vmul.f32 0.5, %v5679_v10  ;;  %v11601_v29 = vmul.f32 0.5, %v5696_v34  ;;  %v5825_v6 = vmul.f32 0.70710677, %v5697_v45 }
0x1831   : > { %v5433_v32 = vpop.permute.xlu0 %5432  ;;  %v8984_v21 = vpop.eup %8983  ;;  %v5916_v1 = vadd.f32 1.0, %v8982_v14  ;;  %8993 = verf.f32 %v5824_v20  ;;  %v11605_v47 = vpack.c.bf16 %v11597_v51, %v11522_v38  ;;  %v5698_v43 = vadd.f32 %v11261_v61, %v5608_v39 }
0x1832   : > { %v8986_v25 = vpop.eup %8985  ;;  %v6214_v26 = vcombine.low %v5996_v13, %v5997_v56  ;;  %v5917_v27 = vadd.f32 1.0, %v8984_v21  ;;  %8995 = verf.f32 %v5825_v6  ;;  %v5609_v7 = vsel %vm549_vm5, %v12578_v46, %v5471_v40 }
0x1833   : > { %v11611_v48 = vrot.slane %v6145_v58, %v9941_v19  ;;  %v5980_v17 = vmul.f32 %v5916_v1, %v11562_v3  ;;  %v5761_v24 = vmul.f32 0.5, %v5697_v45  ;;  %6513 = vrot.lane.b32.xlu0 %v11605_v47, %s9318_s20  ;;  %v5826_v55 = vmul.f32 0.70710677, %v5698_v43  ;;  %v12579_v3 = vld [vmem:[#allocation36_spill] sm:$0xff]  ;;  %v12581_v45 = vld [vmem:[#allocation38_spill] sm:$0xff] }
0x1834   : > { %v5435_v35 = vpop.permute.xlu1 %5434  ;;  %v5981_v8 = vmul.f32 %v5917_v27, %v5725_v23  ;;  %v5950_v36 = vadd.f32 1.0, %v8986_v25  ;;  %v11616_v11 = vmul.f32 0.5, %v5698_v43  ;;  %v5699_v52 = vadd.f32 %v11279_v16, %v5609_v7  ;;  %v12582_v7 = vld [vmem:[#allocation39_spill] sm:$0xff] }
0x1835   : > { %v5437_v53 = vpop.permute.xlu0 %5436  ;;  %v8988_v42 = vpop.eup %8987  ;;  %8997 = verf.f32 %v5826_v55  ;;  %v11621_v10 = vpack.c.bf16 %v11545_v54, %v11439_v62  ;;  %v5590_v0 = vsel %vm549_vm5, %v12579_v3, %v5433_v32  ;;  %v5591_v4 = vsel %vm549_vm5, %v12580_v9, %v5435_v35 }
0x1836   : > { %v8990_v28 = vpop.eup %8989  ;;  %v11628_v23 = vrot.slane %v6214_v26, %v9941_v19  ;;  %v6146_v49 = vcombine.low %v5980_v17, %v5981_v8  ;;  %v5951_v41 = vadd.f32 1.0, %v8988_v42  ;;  %v5827_v5 = vmul.f32 0.70710677, %v5699_v52  ;;  %v12583_v17 = vld [vmem:[#allocation40_spill] sm:$0xff] }
0x1837   : > { %v5934_v34 = vadd.f32 1.0, %v8990_v28  ;;  %6517 = vrot.lane.b32.xlu0 %v11621_v10, %s9318_s20  ;;  %v5680_v13 = vadd.f32 %v11324_v18, %v5590_v0  ;;  %v5681_v50 = vadd.f32 %v11343_v15, %v5591_v4  ;;  %v5592_v58 = vsel %vm549_vm5, %v12581_v45, %v5437_v53 }
0x1838   : > { %v5439_v20 = vpop.permute.xlu1 %5438  ;;  %v6014_v37 = vmul.f32 %v5950_v36, %v11575_v33  ;;  %v6015_v39 = vmul.f32 %v5951_v41, %v11580_v63  ;;  %8999 = verf.f32 %v5827_v5  ;;  %v5682_v40 = vadd.f32 %v11261_v61, %v5592_v58 }
0x1839   : > { %v5445_v14 = vpop.permute.xlu0 %5444  ;;  %v8992_v56 = vpop.eup %8991  ;;  %v6160_v6 = vrot.slane %v6146_v49, %v9941_v19  ;;  %v5998_v32 = vmul.f32 %v5934_v34, %v5742_v22  ;;  %v5763_v21 = vmul.f32 0.5, %v5699_v52  ;;  %v5808_v1 = vmul.f32 0.70710677, %v5680_v13  ;;  %v12584_v49 = vld [vmem:[#allocation41_spill] sm:$0xff] }
0x183a   : > { %v6298_v43 = vcombine.low %v6014_v37, %v6015_v39  ;;  %v5935_v25 = vadd.f32 1.0, %v8992_v56  ;;  %v11640_v26 = vmul.f32 0.5, %v5680_v13  ;;  %v5809_v27 = vmul.f32 0.70710677, %v5681_v50 }
0x183b   : > { %v8994_v46 = vpop.eup %8993  ;;  %9001 = verf.f32 %v5808_v1  ;;  %v5810_v33 = vmul.f32 0.70710677, %v5682_v40  ;;  %v5593_v63 = vsel %vm549_vm5, %v12582_v7, %v5439_v20  ;;  %v5596_v55 = vsel %vm549_vm5, %v12583_v17, %v5445_v14 }
0x183c   : > { %v5447_v35 = vpop.permute.xlu1 %5446  ;;  %v8996_v8 = vpop.eup %8995  ;;  %v5999_v36 = vmul.f32 %v5935_v25, %v5743_v57  ;;  %v5952_v22 = vadd.f32 1.0, %v8994_v46  ;;  %v11646_v52 = vmul.f32 0.5, %v5681_v50  ;;  %9003 = verf.f32 %v5809_v27 }
0x183d   : > { %v5473_v53 = vpop.permute.xlu0 %5472  ;;  %v5953_v42 = vadd.f32 1.0, %v8996_v8  ;;  %9005 = verf.f32 %v5810_v33  ;;  %v5683_v3 = vadd.f32 %v11279_v16, %v5593_v63  ;;  %v5686_v0 = vadd.f32 %v11261_v61, %v5596_v55  ;;  %v12586_v33 = vld [vmem:[#allocation43_spill] sm:$0xff] }
0x183e   : > { %v11651_v9 = vrot.slane %v6298_v43, %v9941_v19  ;;  %v6230_v4 = vcombine.low %v5998_v32, %v5999_v36  ;;  %v11653_v28 = vmul.f32 0.5, %v5682_v40  ;;  %v5597_v57 = vsel %vm549_vm5, %v12584_v49, %v5447_v35 }
0x183f   : > { %v8998_v41 = vpop.eup %8997  ;;  %v6016_v5 = vmul.f32 %v5952_v22, %v11601_v29  ;;  %v6017_v34 = vmul.f32 %v5953_v42, %v5761_v24  ;;  %v5811_v13 = vmul.f32 0.70710677, %v5683_v3  ;;  %v11660_v50 = vcombine.low %v11501_v12, %v11591_v30  ;;  %v12585_v29 = vld [vmem:[#allocation42_spill] sm:$0xff] }
0x1840   : > { %v5475_v45 = vpop.permute.xlu1 %5474  ;;  %v5954_v58 = vadd.f32 1.0, %v8998_v41  ;;  %v11662_v20 = vmul.f32 0.5, %v5683_v3  ;;  %v5814_v37 = vmul.f32 0.70710677, %v5686_v0  ;;  %v5687_v39 = vadd.f32 %v11279_v16, %v5597_v57 }
0x1841   : > { %v5441_v40 = vpop.permute.xlu0 %5440  ;;  %9007 = verf.f32 %v5811_v13  ;;  %v11665_v14 = vmul.f32 0.5, %v5686_v0  ;;  %v11668_v56 = vcombine.low %v11611_v48, %v6160_v6  ;;  %v5610_v24 = vsel %vm549_vm5, %v12585_v29, %v5473_v53 }
0x1842   : > { %v9000_v32 = vpop.eup %8999  ;;  %v11673_v12 = vrot.slane %v6230_v4, %v9941_v19  ;;  %v6299_v30 = vcombine.low %v6016_v5, %v6017_v34  ;;  %9009 = verf.f32 %v5814_v37  ;;  %v5815_v1 = vmul.f32 0.70710677, %v5687_v39 }
0x1843   : > { %v6018_v43 = vmul.f32 %v5954_v58, %v11616_v11  ;;  %v5955_v25 = vadd.f32 1.0, %v9000_v32  ;;  %v11678_v27 = vpack.c.bf16 %v11668_v56, %v11660_v50  ;;  %v5700_v48 = vadd.f32 %v11324_v18, %v5610_v24  ;;  %v12587_v58 = vld [vmem:[#allocation44_spill] sm:$0xff] }
0x1844   : > { %v5443_v6 = vpop.permute.xlu1 %5442  ;;  %v11681_v46 = vmul.f32 0.5, %v5687_v39  ;;  %9011 = verf.f32 %v5815_v1  ;;  %v5611_v7 = vsel %vm549_vm5, %v12586_v33, %v5475_v45  ;;  %v11687_v63 = vcombine.low %v11558_v44, %v11628_v23 }
0x1845   : > { %v5449_v17 = vpop.permute.xlu0 %5448  ;;  %v9002_v11 = vpop.eup %9001  ;;  %v6019_v55 = vmul.f32 %v5955_v25, %v5763_v21  ;;  %6515 = vrot.lane.b32.xlu1 %v11678_v27, %s9318_s20  ;;  %v5828_v35 = vmul.f32 0.70710677, %v5700_v48  ;;  %v5701_v8 = vadd.f32 %v11343_v15, %v5611_v7  ;;  %v11694_v36 = vcombine.low %v11443_v59, %v11542_v2 }
0x1846   : > { %v9004_v22 = vpop.eup %9003  ;;  %v11697_v53 = vrot.slane %v6299_v30, %v9941_v19  ;;  %v5936_v42 = vadd.f32 1.0, %v9002_v11  ;;  %v11699_v44 = vmul.f32 0.5, %v5700_v48  ;;  %v6419_v23 = vshll.u32 %v11605_v47, 16  ;;  %v12588_v30 = vld [vmem:[#allocation45_spill] sm:$0xff] }
0x1847   : > { %v9006_v21 = vpop.eup %9005  ;;  %v5937_v3 = vadd.f32 1.0, %v9004_v22  ;;  %9013 = verf.f32 %v5828_v35  ;;  %v11704_v0 = vpack.c.bf16 %v11687_v63, %v11694_v36  ;;  %v6416_v4 = vshrl.u32 %v11605_v47, 16 }
0x1848   : > { %v5451_v59 = vpop.permute.xlu1 %5450  ;;  %v6315_v2 = vcombine.low %v6018_v43, %v6019_v55  ;;  %v6000_v49 = vmul.f32 %v5936_v42, %v11640_v26  ;;  %v5829_v57 = vmul.f32 0.70710677, %v5701_v8  ;;  %v6426_v41 = vshll.u32 %v11678_v27, 16  ;;  %v12589_v43 = vld [vmem:[#allocation46_spill] sm:$0xff] }
0x1849   : > { %v5453_v5 = vpop.permute.xlu0 %5452  ;;  %v6001_v34 = vmul.f32 %v5937_v3, %v11646_v52  ;;  %v5938_v13 = vadd.f32 1.0, %v9006_v21  ;;  %6519 = vrot.lane.b32.xlu1 %v11704_v0, %s9318_s20  ;;  %v6480_v45 = vrot.slane %v6419_v23, 1  ;;  %v5594_v37 = vsel %vm549_vm5, %v12587_v58, %v5441_v40  ;;  %v12590_v58 = vld [vmem:[#allocation47_spill] sm:$0xff] }
0x184a   : > { %v11716_v39 = vmul.f32 0.5, %v5701_v8  ;;  %9015 = verf.f32 %v5829_v57  ;;  %v11720_v26 = vrot.slane %v6426_v41, 1  ;;  %v5684_v29 = vadd.f32 %v11324_v18, %v5594_v37 }
0x184b   : > { %v9008_v52 = vpop.eup %9007  ;;  %v6231_v24 = vcombine.low %v6000_v49, %v6001_v34  ;;  %v6481_v32 = vor.u32 %v6480_v45, %v6416_v4  ;;  %v5595_v1 = vsel %vm549_vm5, %v12588_v30, %v5443_v6  ;;  %v5598_v40 = vsel %vm549_vm5, %v12589_v43, %v5449_v17 }
0x184c   : > { %v5455_v25 = vpop.permute.xlu1 %5454  ;;  %v9010_v48 = vpop.eup %9009  ;;  %v11730_v33 = vrot.slane %v6315_v2, %v9941_v19  ;;  %v5939_v7 = vadd.f32 1.0, %v9008_v52  ;;  %v5812_v11 = vmul.f32 0.70710677, %v5684_v29  ;;  %v5685_v55 = vadd.f32 %v11343_v15, %v5595_v1 }
0x184d   : > { %v5457_v35 = vpop.permute.xlu0 %5456  ;;  %v6002_v8 = vmul.f32 %v5938_v13, %v11653_v28  ;;  %v5942_v22 = vadd.f32 1.0, %v9010_v48  ;;  %v6483_v42 = vsel %vm557_vm3, %v6481_v32, %v11720_v26  ;;  %v5688_v6 = vadd.f32 %v11324_v18, %v5598_v40  ;;  %v12592_v40 = vld [vmem:[#allocation49_spill] sm:$0xff] }
0x184e   : > { %v9012_v21 = vpop.eup %9011  ;;  %v6003_v17 = vmul.f32 %v5939_v7, %v11662_v20  ;;  %8017 = vmatprep.mubr.msk.bf16.mxu0 %vm716_vm11, %v6483_v42  ;;  %v11739_v3 = vmul.f32 0.5, %v5684_v29  ;;  %9017 = verf.f32 %v5812_v11  ;;  %v5813_v2 = vmul.f32 0.70710677, %v5685_v55  ;;  %v12591_v20 = vld [vmem:[#allocation48_spill] sm:$0xff]  ;;  %v12593_v7 = vld [vmem:[#allocation50_spill] sm:$0xff] }
0x184f   : > { %v11742_v49 = vrot.slane %v6231_v24, %v9941_v19  ;;  %v6006_v28 = vmul.f32 %v5942_v22, %v11665_v14  ;;  %v5943_v57 = vadd.f32 1.0, %v9012_v21  ;;  %v5816_v34 = vmul.f32 0.70710677, %v5688_v6 }
0x1850   : > { %v5459_v13 = vpop.permute.xlu1 %5458  ;;  %v6247_v45 = vcombine.low %v6002_v8, %v6003_v17  ;;  %9019 = verf.f32 %v5813_v2  ;;  %v5599_v37 = vsel %vm549_vm5, %v12590_v58, %v5451_v59  ;;  %v5600_v52 = vsel %vm549_vm5, %v12591_v20, %v5453_v5 }
0x1851   : > { %v5477_v29 = vpop.permute.xlu0 %5476  ;;  %v9014_v32 = vpop.eup %9013  ;;  %v6007_v30 = vmul.f32 %v5943_v57, %v11681_v46  ;;  %9021 = verf.f32 %v5816_v34  ;;  %v5689_v24 = vadd.f32 %v11343_v15, %v5599_v37  ;;  %v5690_v14 = vadd.f32 %v11261_v61, %v5600_v52  ;;  %v12594_v34 = vld [vmem:[#allocation51_spill] sm:$0xff] }
0x1852   : > { %v5956_v1 = vadd.f32 1.0, %v9014_v32  ;;  %v5749_v43 = vmul.f32 0.5, %v5685_v55  ;;  %v5601_v48 = vsel %vm549_vm5, %v12592_v40, %v5455_v25  ;;  %v5602_v59 = vsel %vm549_vm5, %v12593_v7, %v5457_v35  ;;  %v12595_v32 = vld [vmem:[#allocation52_spill] sm:$0xff]  ;;  %v12596_v40 = vld [vmem:[#allocation53_spill] sm:$0xff]  ;;  %v12597_v7 = vld [vmem:[#allocation54_spill] sm:$0xff] }
0x1853   : > { %v11757_v11 = vrot.slane %v6247_v45, %v9941_v19  ;;  %v6264_v5 = vcombine.low %v6006_v28, %v6007_v30  ;;  %v11759_v8 = vmul.f32 0.5, %v5688_v6  ;;  %v5817_v46 = vmul.f32 0.70710677, %v5689_v24 }
0x1854   : > { %v5479_v22 = vpop.permute.xlu1 %5478  ;;  %v9016_v42 = vpop.eup %9015  ;;  %v11761_v21 = vmul.f32 0.5, %v5689_v24  ;;  %v5818_v17 = vmul.f32 0.70710677, %v5690_v14  ;;  %v5691_v55 = vadd.f32 %v11279_v16, %v5601_v48  ;;  %v5692_v2 = vadd.f32 %v11324_v18, %v5602_v59 }
0x1855   : > { %v5957_v57 = vadd.f32 1.0, %v9016_v42  ;;  %9023 = verf.f32 %v5817_v46  ;;  %v11765_v35 = vmul.f32 0.5, %v5690_v14  ;;  %v5603_v28 = vsel %vm549_vm5, %v12594_v34, %v5459_v13 }
0x1856   : > { %v5481_v25 = vpop.permute.xlu0 %5480  ;;  %v11770_v6 = vrot.slane %v6264_v5, %v9941_v19  ;;  %v6020_v45 = vmul.f32 %v5956_v1, %v11699_v44  ;;  %9025 = verf.f32 %v5818_v17  ;;  %v5819_v58 = vmul.f32 0.70710677, %v5691_v55 }
0x1857   : > { %v6021_v37 = vmul.f32 %v5957_v57, %v11716_v39  ;;  %v5820_v20 = vmul.f32 0.70710677, %v5692_v2  ;;  %v5693_v52 = vadd.f32 %v11343_v15, %v5603_v28  ;;  %v5612_v30 = vsel %vm549_vm5, %v12595_v32, %v5477_v29 }
0x1858   : > { %v9018_v14 = vpop.eup %9017  ;;  %9027 = verf.f32 %v5819_v58  ;;  %v5702_v13 = vadd.f32 %v11261_v61, %v5612_v30  ;;  %v5613_v48 = vsel %vm549_vm5, %v12596_v40, %v5479_v22  ;;  %v5614_v44 = vsel %vm549_vm5, %v12597_v7, %v5481_v25 }
0x1859   : > { %v5483_v24 = vpop.permute.xlu1 %5482  ;;  %v6316_v59 = vcombine.low %v6020_v45, %v6021_v37  ;;  %v5940_v39 = vadd.f32 1.0, %v9018_v14  ;;  %v5755_v5 = vmul.f32 0.5, %v5691_v55  ;;  %9029 = verf.f32 %v5820_v20 }
0x185a   : > { %v5485_v1 = vpop.permute.xlu0 %5484  ;;  %v9020_v46 = vpop.eup %9019  ;;  %v11782_v42 = vmul.f32 0.5, %v5692_v2  ;;  %v5821_v29 = vmul.f32 0.70710677, %v5693_v52  ;;  %v5830_v17 = vmul.f32 0.70710677, %v5702_v13  ;;  %v5703_v57 = vadd.f32 %v11279_v16, %v5613_v48  ;;  %v12599_v48 = vld [vmem:[#allocation56_spill] sm:$0xff] }
0x185b   : > { %v9022_v34 = vpop.eup %9021  ;;  %v5941_v28 = vadd.f32 1.0, %v9020_v46  ;;  %v11785_v58 = vmul.f32 0.5, %v5693_v52  ;;  %v11787_v22 = vmul.f32 0.5, %v5702_v13  ;;  %v5704_v25 = vadd.f32 %v11324_v18, %v5614_v44  ;;  %v12598_v52 = vld [vmem:[#allocation55_spill] sm:$0xff] }
0x185c   : > { %v11791_v45 = vrot.slane %v6316_v59, %v9941_v19  ;;  %v6004_v55 = vmul.f32 %v5940_v39, %v11739_v3  ;;  %9031 = verf.f32 %v5821_v29  ;;  %v5831_v2 = vmul.f32 0.70710677, %v5703_v57 }
0x185d   : > { %v5487_v32 = vpop.permute.xlu1 %5486  ;;  %v6005_v37 = vmul.f32 %v5941_v28, %v5749_v43  ;;  %v5944_v20 = vadd.f32 1.0, %v9022_v34  ;;  %9033 = verf.f32 %v5830_v17  ;;  %v5832_v30 = vmul.f32 0.70710677, %v5704_v25  ;;  %v12601_v28 = vld [vmem:[#allocation58_spill] sm:$0xff] }
0x185e   : > { %v5489_v14 = vpop.permute.xlu0 %5488  ;;  %v5767_v40 = vmul.f32 0.5, %v5703_v57  ;;  %9035 = verf.f32 %v5831_v2  ;;  %v5615_v13 = vsel %vm549_vm5, %v12598_v52, %v5483_v24  ;;  %v5616_v7 = vsel %vm549_vm5, %v12599_v48, %v5485_v1  ;;  %v12600_v57 = vld [vmem:[#allocation57_spill] sm:$0xff] }
0x185f   : > { %v9024_v44 = vpop.eup %9023  ;;  %v6248_v59 = vcombine.low %v6004_v55, %v6005_v37  ;;  %9037 = verf.f32 %v5832_v30  ;;  %v5705_v3 = vadd.f32 %v11343_v15, %v5615_v13  ;;  %v5706_v39 = vadd.f32 %v11261_v61, %v5616_v7  ;;  %v12602_v37 = vld [vmem:[#allocation59_spill] sm:$0xff] }
0x1860   : > { %v9026_v46 = vpop.eup %9025  ;;  %v5945_v29 = vadd.f32 1.0, %v9024_v44  ;;  %v11800_v17 = vmul.f32 0.5, %v5704_v25  ;;  %v5617_v34 = vsel %vm549_vm5, %v12600_v57, %v5487_v32  ;;  %v5618_v24 = vsel %vm549_vm5, %v12601_v28, %v5489_v14 }
0x1861   : > { %v5491_v43 = vpop.permute.xlu1 %5490  ;;  %v6008_v1 = vmul.f32 %v5944_v20, %v11759_v8  ;;  %v5946_v2 = vadd.f32 1.0, %v9026_v46  ;;  %v5833_v55 = vmul.f32 0.70710677, %v5705_v3  ;;  %v6262_v61 = vrot.slane %v6248_v59, %v9941_v19 }
0x1862   : > { %v5619_v30 = vsel %vm549_vm5, %v12602_v37, %v5491_v43  ;;  %v9028_v52 = vpop.eup %9027  ;;  %v6009_v13 = vmul.f32 %v5945_v29, %v11761_v21  ;;  %v5834_v25 = vmul.f32 0.70710677, %v5706_v39  ;;  %v5707_v48 = vadd.f32 %v11279_v16, %v5617_v34 }
0x1863   : > { %v9030_v7 = vpop.eup %9029  ;;  %v5947_v32 = vadd.f32 1.0, %v9028_v52  ;;  %v5769_v44 = vmul.f32 0.5, %v5705_v3  ;;  %9039 = verf.f32 %v5833_v55  ;;  %v5708_v14 = vadd.f32 %v11324_v18, %v5618_v24 }
0x1864   : > { %v6265_v8 = vcombine.low %v6008_v1, %v6009_v13  ;;  %v6010_v20 = vmul.f32 %v5946_v2, %v11765_v35  ;;  %v11814_v46 = vmul.f32 0.5, %v5706_v39  ;;  %9041 = verf.f32 %v5834_v25 }
0x1865   : > { %v6011_v43 = vmul.f32 %v5947_v32, %v5755_v5  ;;  %v5948_v57 = vadd.f32 1.0, %v9030_v7  ;;  %v5835_v59 = vmul.f32 0.70710677, %v5707_v48  ;;  %v5836_v28 = vmul.f32 0.70710677, %v5708_v14 }
0x1866   : > { %v9032_v21 = vpop.eup %9031  ;;  %v6279_v29 = vrot.slane %v6265_v8, %v9941_v19  ;;  %v11817_v16 = vmul.f32 0.5, %v5707_v48  ;;  %v11819_v34 = vmul.f32 0.5, %v5708_v14  ;;  %v5709_v3 = vadd.f32 %v11343_v15, %v5619_v30 }
0x1867   : > { %v9034_v18 = vpop.eup %9033  ;;  %v5949_v24 = vadd.f32 1.0, %v9032_v21  ;;  %9043 = verf.f32 %v5835_v59  ;;  %v11824_v35 = vcombine.low %v11673_v12, %v11742_v49  ;;  %v11827_v5 = vcombine.low %v11757_v11, %v6262_v61 }
0x1868   : > { %v9036_v39 = vpop.eup %9035  ;;  %v6281_v1 = vcombine.low %v6010_v20, %v6011_v43  ;;  %v5958_v2 = vadd.f32 1.0, %v9034_v18  ;;  %9045 = verf.f32 %v5836_v28  ;;  %v5837_v55 = vmul.f32 0.70710677, %v5709_v3 }
0x1869   : > { %v9038_v37 = vpop.eup %9037  ;;  %v6012_v52 = vmul.f32 %v5948_v57, %v11782_v42  ;;  %v6013_v15 = vmul.f32 %v5949_v24, %v11785_v58  ;;  %v5959_v30 = vadd.f32 1.0, %v9036_v39  ;;  %v11833_v13 = vpack.c.bf16 %v11827_v5, %v11824_v35 }
0x186a   : > { %v6022_v12 = vmul.f32 %v5958_v2, %v11787_v22  ;;  %v5960_v49 = vadd.f32 1.0, %v9038_v37  ;;  %v5773_v11 = vmul.f32 0.5, %v5709_v3  ;;  %9047 = verf.f32 %v5837_v55 }
0x186b   : > { %v6282_v61 = vcombine.low %v6012_v52, %v6013_v15  ;;  %v6023_v25 = vmul.f32 %v5959_v30, %v5767_v40  ;;  %6521 = vrot.lane.b32.xlu0 %v11833_v13, %s9318_s20  ;;  %v11840_v42 = vcombine.low %v11651_v9, %v11697_v53  ;;  %v11844_v58 = vcombine.low %v11730_v33, %v11791_v45 }
0x186c   : > { %v6289_v48 = vrot.slane %v6281_v1, %v9941_v19  ;;  %v6418_v22 = vrot.slane %v6416_v4, 7  ;;  %v6423_v7 = vshrl.u32 %v11678_v27, 16  ;;  %v6434_v40 = vshll.u32 %v11621_v10, 16 }
0x186d   : > { %v9040_v32 = vpop.eup %9039  ;;  %v6296_v14 = vrot.slane %v6282_v61, %v9941_v19  ;;  %v6332_v8 = vcombine.low %v6022_v12, %v6023_v25  ;;  %v11854_v9 = vpack.c.bf16 %v11844_v58, %v11840_v42  ;;  %v6431_v53 = vshrl.u32 %v11621_v10, 16 }
0x186e   : > { %v9042_v33 = vpop.eup %9041  ;;  %v5961_v45 = vadd.f32 1.0, %v9040_v32  ;;  %v11859_v20 = vor.u32 %v6419_v23, %v6418_v22  ;;  %v6484_v4 = vor.u32 %v11720_v26, %v6423_v7  ;;  %v6485_v43 = vrot.slane %v6434_v40, 1 }
0x186f   : > { %v6024_v57 = vmul.f32 %v5960_v49, %v11800_v17  ;;  %6525 = vrot.lane.b32.xlu0 %v11854_v9, %s9318_s20  ;;  %v11866_v59 = vcombine.low %v11770_v6, %v6279_v29  ;;  %v11868_v28 = vcombine.low %v6289_v48, %v6296_v14  ;;  %v6425_v10 = vrot.slane %v6423_v7, 7 }
0x1870   : > { %v6025_v21 = vmul.f32 %v5961_v45, %v5769_v44  ;;  %v5962_v3 = vadd.f32 1.0, %v9042_v33  ;;  %v11871_v47 = vsel %vm557_vm3, %v6484_v4, %v6485_v43  ;;  %v6442_v23 = vshll.u32 %v11704_v0, 16 }
0x1871   : > { %v9044_v26 = vpop.eup %9043  ;;  %v6340_v18 = vrot.slane %v6332_v8, %v9941_v19  ;;  %v6387_v17 = vpack.c.bf16 %v11868_v28, %v11866_v59  ;;  %v6428_v6 = vor.u32 %v6426_v41, %v6425_v10  ;;  %v6487_v29 = vor.u32 %v6485_v43, %v6431_v53 }
0x1872   : > { %v9046_v24 = vpop.eup %9045  ;;  %v6333_v39 = vcombine.low %v6024_v57, %v6025_v21  ;;  %v5963_v1 = vadd.f32 1.0, %v9044_v26  ;;  %v6488_v44 = vrot.slane %v6442_v23, 1  ;;  %v6433_v2 = vrot.slane %v6431_v53, 7 }
0x1873   : > { %v5964_v55 = vadd.f32 1.0, %v9046_v24  ;;  %6523 = vrot.lane.b32.xlu1 %v6387_v17, %s9318_s20  ;;  %v6429_v37 = vsel %vm550_vm6, %v6418_v22, %v6428_v6  ;;  %v6439_v52 = vshrl.u32 %v11704_v0, 16  ;;  %v6450_v15 = vshll.u32 %v11833_v13, 16 }
0x1874   : > { %v9048_v30 = vpop.eup %9047  ;;  %v6026_v12 = vmul.f32 %v5962_v3, %v11814_v46  ;;  %v6027_v27 = vmul.f32 %v5963_v1, %v11817_v16  ;;  %v6489_v41 = vsel %vm557_vm3, %v6487_v29, %v6488_v44  ;;  %v6436_v49 = vor.u32 %v6434_v40, %v6433_v2 }
0x1875   : > { %v6347_v61 = vrot.slane %v6333_v39, %v9941_v19  ;;  %v5965_v25 = vadd.f32 1.0, %v9048_v30  ;;  %v6490_v48 = vor.u32 %v6488_v44, %v6439_v52  ;;  %v6491_v7 = vrot.slane %v6450_v15, 1 }
0x1876   : > { %v6349_v32 = vcombine.low %v6026_v12, %v6027_v27  ;;  %v6028_v22 = vmul.f32 %v5964_v55, %v11819_v34  ;;  %v6437_v0 = vsel %vm550_vm6, %v6425_v10, %v6436_v49  ;;  %v6441_v14 = vrot.slane %v6439_v52, 7 }
0x1877   : > { %v6029_v8 = vmul.f32 %v5965_v25, %v5773_v11  ;;  %v6492_v53 = vsel %vm557_vm3, %v6490_v48, %v6491_v7  ;;  %v6447_v46 = vshrl.u32 %v11833_v13, 16  ;;  %v6458_v16 = vshll.u32 %v6387_v17, 16 }
0x1878   : > { %v6357_v33 = vrot.slane %v6349_v32, %v9941_v19  ;;  %v6444_v40 = vor.u32 %v6442_v23, %v6441_v14  ;;  %v6455_v45 = vshrl.u32 %v6387_v17, 16  ;;  %v6466_v4 = vshll.u32 %v11854_v9, 16 }
0x1879   : > { %v6350_v43 = vcombine.low %v6028_v22, %v6029_v8  ;;  %v6493_v57 = vor.u32 %v6491_v7, %v6447_v46  ;;  %v6494_v21 = vrot.slane %v6458_v16, 1  ;;  %v6449_v3 = vrot.slane %v6447_v46, 7 }
0x187a   : > { %v6445_v34 = vsel %vm550_vm6, %v6433_v2, %v6444_v40  ;;  %v6497_v10 = vrot.slane %v6466_v4, 1  ;;  %v6457_v26 = vrot.slane %v6455_v45, 7  ;;  %v6463_v11 = vshrl.u32 %v11854_v9, 16 }
0x187b   : > { %v6364_v6 = vrot.slane %v6350_v43, %v9941_v19  ;;  %v6495_v13 = vsel %vm557_vm3, %v6493_v57, %v6494_v21  ;;  %v6452_v29 = vor.u32 %v6450_v15, %v6449_v3  ;;  %v6496_v24 = vor.u32 %v6494_v21, %v6455_v45 }
0x187c   : > { %v6460_v23 = vor.u32 %v6458_v16, %v6457_v26  ;;  %v6465_v17 = vrot.slane %v6463_v11, 7  ;;  %v11897_v39 = vcombine.low %v6340_v18, %v6347_v61  ;;  %v6499_v18 = vor.u32 %v6497_v10, %v6463_v11 }
0x187d   : > { %v11899_v1 = vcombine.low %v6357_v33, %v6364_v6  ;;  %v6453_v44 = vsel %vm550_vm6, %v6441_v14, %v6452_v29  ;;  %v6498_v2 = vsel %vm557_vm3, %v6496_v24, %v6497_v10  ;;  %v6479_v7 = vsel %vm9610_vm7, 0, %v11859_v20 }
0x187e   : > { %v6461_v55 = vsel %vm550_vm6, %v6449_v3, %v6460_v23  ;;  %v6468_v52 = vor.u32 %v6466_v4, %v6465_v17 }
0x187f   : > { %v6389_v19 = vpack.c.bf16 %v11899_v1, %v11897_v39 }
0x1880   : > { %v6469_v9 = vsel %vm550_vm6, %v6457_v26, %v6468_v52  ;;  %v12605_v52 = vld [vmem:[#allocation26_spill] sm:$0xff] }
0x1881   : > { %6527 = vrot.lane.b32.xlu1 %v6389_v19, %s9318_s20  ;;  %v6474_v15 = vshll.u32 %v6389_v19, 16  ;;  %v6471_v30 = vshrl.u32 %v6389_v19, 16 }
0x1883   : > { %v6500_v12 = vrot.slane %v6474_v15, 1  ;;  %v6473_v27 = vrot.slane %v6471_v30, 7 }
0x1885   : > { %v6501_v49 = vsel %vm557_vm3, %v6499_v18, %v6500_v12  ;;  %v6476_v61 = vor.u32 %v6474_v15, %v6473_v27 }
0x1887   : > { %v6477_v25 = vsel %vm550_vm6, %v6465_v17, %v6476_v61 }
0x18a5   : > { %v6514_v32 = vpop.permute.xlu0 %6513 }
0x18a6   : > { %v6531_v22 = vsel %vm716_vm11, %v6479_v7, %v6514_v32 }
0x18a7   : > { %6694 = vmatmul.mubr.bf16.vlgmr.msra.gmra.mrb[68].mxu0 %v6531_v22 }
0x18a8   : > { %8018 = vmatprep.mubr.msk.bf16.mxu0 %vm716_vm11, %v11871_v47 }
0x18a9   : > { %v6518_v46 = vpop.permute.xlu0 %6517 }
0x18aa   : > { %v6539_v16 = vsel %vm716_vm11, %v6437_v0, %v6518_v46 }
0x18b7   : > { %v6516_v14 = vpop.permute.xlu1 %6515 }
0x18b8   : > { %v6535_v8 = vsel %vm716_vm11, %v6429_v37, %v6516_v14 }
0x18b9   : > { %6702 = vmatmul.mubr.bf16.gmra.mrb[72].mxu0 %v6535_v8 }
0x18ba   : > { %8019 = vmatprep.mubr.msk.bf16.mxu0 %vm716_vm11, %v6489_v41 }
0x18bb   : > { %v6520_v20 = vpop.permute.xlu1 %6519 }
0x18bc   : > { %v6543_v33 = vsel %vm716_vm11, %v6445_v34, %v6520_v20 }
0x18c1   : > { %6710 = vmatmul.mubr.bf16.gmra.mrb[76].mxu0 %v6539_v16 }
0x18c2   : > { %8020 = vmatprep.mubr.msk.bf16.mxu0 %vm716_vm11, %v6492_v53  ;;  %v6502_v53 = vor.u32 %v6500_v12, %v6471_v30 }
0x18c4   : > { %v6504_v43 = vsel %vm9601_vm4, %v6502_v53, 0 }
0x18c9   : > { %6718 = vmatmul.mubr.bf16.gmra.mrb[80].mxu0 %v6543_v33 }
0x18ca   : > { %8021 = vmatprep.mubr.msk.bf16.mxu0 %vm716_vm11, %v6495_v13 }
0x18dd   : > { %v6522_v40 = vpop.permute.xlu0 %6521 }
0x18de   : > { %v6547_v47 = vsel %vm716_vm11, %v6453_v44, %v6522_v40 }
0x18df   : > { %6726 = vmatmul.mubr.bf16.gmra.mrb[84].mxu0 %v6547_v47 }
0x18e0   : > { %8022 = vmatprep.mubr.msk.bf16.mxu0 %vm716_vm11, %v6498_v2 }
0x18e1   : > { %v6526_v0 = vpop.permute.xlu0 %6525 }
0x18e2   : > { %v6555_v45 = vsel %vm716_vm11, %v6469_v9, %v6526_v0 }
0x18e5   : > { %v6524_v37 = vpop.permute.xlu1 %6523 }
0x18e6   : > { %v6551_v41 = vsel %vm716_vm11, %v6461_v55, %v6524_v37  ;;  %v11933_v55 = vld [vmem:[#allocation8 + $0x10] sm:$0x1f] }
0x18e7   : > { %6734 = vmatmul.mubr.bf16.gmra.mrb[88].mxu0 %v6551_v41  ;;  %v11937_v19 = vrot.slane %v11933_v55, %v12605_v52 }
0x18e8   : > { %8023 = vmatprep.mubr.msk.bf16.mxu0 %vm716_vm11, %v6501_v49 }
0x18ef   : > { %6742 = vmatmul.mubr.bf16.gmra.mrb[92].mxu0 %v6555_v45 }
0x18f0   : > { %8024 = vmatprep.mubr.msk.bf16.mxu0 %vm716_vm11, %v6504_v43 }
0x18f3   : > { %v6528_v57 = vpop.permute.xlu1 %6527 }
0x18f4   : > { %v6559_v21 = vsel %vm716_vm11, %v6477_v25, %v6528_v57 }
0x18f7   : > { %6750 = vmatmul.mubr.bf16.gmra.mrb[96].mxu0 %v6559_v21 }
0x18f8   : > { %8433 = vmatprep.mubr.msk.bf16.mxu0 %vm9314_vm0, %v12540_v31 }
0x197a   : > { %v6695_v3 = vpop.f32.mrb[68].mxu0 }
0x197b   : > { %v6697_v34 = vpop.f32.mrb[69].mxu0  ;;  %v6696_v12 = vadd.f32 %v6695_v3, %v11937_v19 }
0x197c   : > { %v6698_v10 = vpop.f32.mrb[70].mxu0 }
0x197d   : > { %v6700_v26 = vpop.f32.mrb[71].mxu0  ;;  %v6699_v30 = vadd.f32 %v6698_v10, %v11937_v19  ;;  %v11946_v61 = vadd.f32 %v6696_v12, %v11522_v38 }
0x197f   : > { %v11943_v49 = vadd.f32 %v6699_v30, %v11597_v51  ;;  %v6774_v14 = vsel %vm716_vm11, %v11946_v61, 0.0 }
0x1981   : > { %v6775_v32 = vsel %vm716_vm11, %v11943_v49, 0.0 }
0x1982   : > { %v6776_v38 = vadd.f32 %v6775_v32, %v6774_v14 }
0x198c   : > { %v6703_v11 = vpop.f32.mrb[72].mxu0 }
0x198d   : > { %v6705_v6 = vpop.f32.mrb[73].mxu0  ;;  %v6704_v27 = vadd.f32 %v6703_v11, %v11937_v19 }
0x198e   : > { %v6706_v13 = vpop.f32.mrb[74].mxu0 }
0x198f   : > { %v6708_v29 = vpop.f32.mrb[75].mxu0  ;;  %v11949_v25 = vadd.f32 %v6704_v27, %v11660_v50  ;;  %v6707_v7 = vadd.f32 %v6706_v13, %v11937_v19 }
0x1991   : > { %v6777_v51 = vsel %vm716_vm11, %v11949_v25, 0.0  ;;  %v11960_v8 = vadd.f32 %v6707_v7, %v11668_v56 }
0x1992   : > { %v6778_v16 = vadd.f32 %v6777_v51, %v6776_v38 }
0x1993   : > { %v6779_v20 = vsel %vm716_vm11, %v11960_v8, 0.0 }
0x1994   : > { %v6711_v24 = vpop.f32.mrb[76].mxu0  ;;  %v6780_v56 = vadd.f32 %v6779_v20, %v6778_v16 }
0x1995   : > { %v6713_v23 = vpop.f32.mrb[77].mxu0  ;;  %v6712_v22 = vadd.f32 %v6711_v24, %v11937_v19 }
0x1996   : > { %v6714_v17 = vpop.f32.mrb[78].mxu0 }
0x1997   : > { %v6716_v44 = vpop.f32.mrb[79].mxu0  ;;  %v11963_v50 = vadd.f32 %v6712_v22, %v11439_v62  ;;  %v6715_v46 = vadd.f32 %v6714_v17, %v11937_v19 }
0x1999   : > { %v6781_v40 = vsel %vm716_vm11, %v11963_v50, 0.0  ;;  %v11972_v47 = vadd.f32 %v6715_v46, %v11545_v54 }
0x199a   : > { %v6782_v41 = vadd.f32 %v6781_v40, %v6780_v56 }
0x199b   : > { %v6783_v53 = vsel %vm716_vm11, %v11972_v47, 0.0 }
0x199c   : > { %v6719_v2 = vpop.f32.mrb[80].mxu0 }
0x199d   : > { %v6721_v9 = vpop.f32.mrb[81].mxu0  ;;  %v6720_v33 = vadd.f32 %v6719_v2, %v11937_v19 }
0x199e   : > { %v6722_v15 = vpop.f32.mrb[82].mxu0 }
0x199f   : > { %v6724_v18 = vpop.f32.mrb[83].mxu0  ;;  %v11975_v37 = vadd.f32 %v6720_v33, %v11694_v36  ;;  %v6723_v62 = vadd.f32 %v6722_v15, %v11937_v19  ;;  %v6784_v36 = vadd.f32 %v6783_v53, %v6782_v41 }
0x19a1   : > { %v6785_v21 = vsel %vm716_vm11, %v11975_v37, 0.0  ;;  %v11984_v54 = vadd.f32 %v6723_v62, %v11687_v63 }
0x19a2   : > { %v6786_v26 = vadd.f32 %v6785_v21, %v6784_v36 }
0x19a3   : > { %v6787_v11 = vsel %vm716_vm11, %v11984_v54, 0.0 }
0x19a4   : > { %v6788_v23 = vadd.f32 %v6787_v11, %v6786_v26 }
0x19b2   : > { %v6727_v0 = vpop.f32.mrb[84].mxu0 }
0x19b3   : > { %v6728_v45 = vadd.f32 %v6727_v0, %v11937_v19  ;;  %v6729_v43 = vpop.f32.mrb[85].mxu0 }
0x19b4   : > { %v6730_v57 = vpop.f32.mrb[86].mxu0 }
0x19b5   : > { %v6732_v3 = vpop.f32.mrb[87].mxu0  ;;  %v11987_v34 = vadd.f32 %v6728_v45, %v11824_v35  ;;  %v6731_v10 = vadd.f32 %v6730_v57, %v11937_v19 }
0x19b7   : > { %v6789_v13 = vsel %vm716_vm11, %v11987_v34, 0.0  ;;  %v11995_v29 = vadd.f32 %v6731_v10, %v11827_v5 }
0x19b8   : > { %v6790_v52 = vadd.f32 %v6789_v13, %v6788_v23  ;;  %v12608_v13 = vld [vmem:[#allocation29_spill] sm:$0xff] }
0x19b9   : > { %v6791_v9 = vsel %vm716_vm11, %v11995_v29, 0.0 }
0x19ba   : > { %v6735_v6 = vpop.f32.mrb[88].mxu0  ;;  %v6792_v30 = vadd.f32 %v6791_v9, %v6790_v52 }
0x19bb   : > { %v6736_v63 = vadd.f32 %v6735_v6, %v11937_v19  ;;  %v6737_v24 = vpop.f32.mrb[89].mxu0  ;;  %v12606_v6 = vld [vmem:[#allocation28_spill] sm:$0xff] }
0x19bc   : > { %v6738_v17 = vpop.f32.mrb[90].mxu0  ;;  %v12610_v24 = vld [vmem:[#allocation31_spill] sm:$0xff] }
0x19bd   : > { %v11999_v35 = vadd.f32 %v6736_v63, %v11866_v59  ;;  %v6739_v44 = vadd.f32 %v6738_v17, %v11937_v19  ;;  %v6740_v2 = vpop.f32.mrb[91].mxu0  ;;  %v12609_v63 = vld [vmem:[#allocation30_spill] sm:$0xff]  ;;  %v12611_v17 = vld [vmem:[#allocation25_spill] sm:$0xff] }
0x19bf   : > { %v6793_v15 = vsel %vm716_vm11, %v11999_v35, 0.0  ;;  %v12007_v5 = vadd.f32 %v6739_v44, %v11868_v28 }
0x19c0   : > { %v6794_v59 = vadd.f32 %v6793_v15, %v6792_v30 }
0x19c1   : > { %v6795_v32 = vsel %vm716_vm11, %v12007_v5, 0.0 }
0x19c2   : > { %v6743_v18 = vpop.f32.mrb[92].mxu0  ;;  %v6796_v46 = vadd.f32 %v6795_v32, %v6794_v59 }
0x19c3   : > { %v6744_v12 = vadd.f32 %v6743_v18, %v11937_v19  ;;  %v6745_v27 = vpop.f32.mrb[93].mxu0 }
0x19c4   : > { %v6746_v7 = vpop.f32.mrb[94].mxu0 }
0x19c5   : > { %v12013_v22 = vadd.f32 %v6744_v12, %v11840_v42  ;;  %v6747_v14 = vadd.f32 %v6746_v7, %v11937_v19  ;;  %v6748_v51 = vpop.f32.mrb[95].mxu0 }
0x19c7   : > { %v6797_v28 = vsel %vm716_vm11, %v12013_v22, 0.0  ;;  %v12019_v38 = vadd.f32 %v6747_v14, %v11844_v58 }
0x19c8   : > { %v6798_v16 = vadd.f32 %v6797_v28, %v6796_v46 }
0x19c9   : > { %v6799_v33 = vsel %vm716_vm11, %v12019_v38, 0.0 }
0x19ca   : > { %v6751_v20 = vpop.f32.mrb[96].mxu0  ;;  %v6800_v53 = vadd.f32 %v6799_v33, %v6798_v16 }
0x19cb   : > { %v6752_v40 = vadd.f32 %v6751_v20, %v11937_v19  ;;  %v6753_v56 = vpop.f32.mrb[97].mxu0 }
0x19cc   : > { %v6754_v42 = vpop.f32.mrb[98].mxu0 }
0x19cd   : > { %v12025_v62 = vadd.f32 %v6752_v40, %v11897_v39  ;;  %v6755_v41 = vadd.f32 %v6754_v42, %v11937_v19  ;;  %v6756_v0 = vpop.f32.mrb[99].mxu0 }
0x19cf   : > { %v6801_v58 = vsel %vm716_vm11, %v12025_v62, 0.0  ;;  %v12031_v45 = vadd.f32 %v6755_v41, %v11899_v1  ;;  %v12607_v1 = vmov 0.0|0.0  }
0x19d0   : > { %v6802_v43 = vadd.f32 %v6801_v58, %v6800_v53 }
0x19d1   : > { %v6803_v57 = vsel %vm716_vm11, %v12031_v45, 0.0 }
0x19d2   : > { %v6804_v21 = vadd.f32 %v6803_v57, %v6802_v43 }
0x19d4   : > { %v6805_v3 = vrot.slane %v6804_v21, 4 }
0x19d6   : > { %v6806_v36 = vadd.f32 %v6805_v3, %v6804_v21 }
0x19d8   : > { %v6807_v10 = vrot.slane %v6806_v36, 2 }
0x19da   : > { %v6808_v39 = vadd.f32 %v6807_v10, %v6806_v36 }
0x19dc   : > { %v6809_v26 = vrot.slane %v6808_v39, 1 }
0x19de   : > { %v6810_v11 = vadd.f32 %v6809_v26, %v6808_v39 }
0x19e0   : > { %v6812_v19 = vmul.f32 0.0078125, %v6810_v11 }
0x19e2   : > { %8396 = vmatmul.mubr.msk.f32.vlgmr.msra.gmra.mrb[48].mxu1 %vm716_vm11, %v6812_v19 }
0x19e3   : > { %8499 = vmatpush3.bf16.msra.mxu1 %v12606_v6  ;;  %8414 = vmatprep.mubr.msk.f32.mxu1 %vm9314_vm0, %v12540_v31 }
0x19e4   : > { %8500 = vmatprep.subr.bf16.mxu1 %v12607_v1 }
0x19e7   : > { %8502 = vmatpush3.bf16.msra.mxu1 %v12608_v13 }
0x19e8   : > { %8503 = vmatprep.subr.bf16.mxu1 %v12607_v1 }
0x19eb   : > { %8505 = vmatpush3.bf16.msra.mxu1 %v12609_v63 }
0x19ec   : > { %8506 = vmatprep.subr.bf16.mxu1 %v12607_v1 }
0x19ef   : > { %8508 = vmatpush3.bf16.msra.mxu1 %v12610_v24 }
0x19f0   : > { %7453 = vmatprep.subr.bf16.mxu1 %v12545_v60 }
0x1ab5   : > { %v6882_v23 = vpop.f32.mrb[48].mxu1 }
0x1ab6   : > { %v6889_v44 = vrot.slane %v6882_v23, %v12611_v17  ;;  %v8397_v2 = vpop.f32.mrb[49].mxu1 }
0x1ab8   : > { %v12048_v52 = vsub.f32 %v11946_v61, %v6889_v44  ;;  %v12051_v9 = vsub.f32 %v11943_v49, %v6889_v44  ;;  %v12054_v15 = vsub.f32 %v11949_v25, %v6889_v44  ;;  %v12057_v30 = vsub.f32 %v11960_v8, %v6889_v44 }
0x1ab9   : > { %v12064_v27 = vsub.f32 %v11963_v50, %v6889_v44  ;;  %v12069_v49 = vsub.f32 %v11972_v47, %v6889_v44  ;;  %v12076_v32 = vsub.f32 %v11975_v37, %v6889_v44  ;;  %v12082_v47 = vsub.f32 %v11984_v54, %v6889_v44 }
0x1aba   : > { %v6906_v18 = vmul.f32 %v12048_v52, %v12048_v52  ;;  %v6907_v12 = vmul.f32 %v12051_v9, %v12051_v9  ;;  %v6908_v61 = vmul.f32 %v12054_v15, %v12054_v15  ;;  %v6909_v25 = vmul.f32 %v12057_v30, %v12057_v30 }
0x1abb   : > { %v6910_v50 = vmul.f32 %v12064_v27, %v12064_v27  ;;  %v6911_v28 = vmul.f32 %v12069_v49, %v12069_v49  ;;  %v12088_v20 = vsub.f32 %v11987_v34, %v6889_v44  ;;  %v6912_v37 = vmul.f32 %v12076_v32, %v12076_v32 }
0x1abc   : > { %v6922_v8 = vsel %vm716_vm11, %v6906_v18, 0.0  ;;  %v6923_v59 = vsel %vm716_vm11, %v6907_v12, 0.0  ;;  %v6925_v14 = vsel %vm716_vm11, %v6908_v61, 0.0  ;;  %v6927_v46 = vsel %vm716_vm11, %v6909_v25, 0.0 }
0x1abd   : > { %v6924_v7 = vadd.f32 %v6923_v59, %v6922_v8  ;;  %v6929_v33 = vsel %vm716_vm11, %v6910_v50, 0.0  ;;  %v12094_v56 = vsub.f32 %v11995_v29, %v6889_v44  ;;  %v6913_v54 = vmul.f32 %v12082_v47, %v12082_v47 }
0x1abe   : > { %v6931_v42 = vsel %vm716_vm11, %v6911_v28, 0.0  ;;  %v12100_v0 = vsub.f32 %v11999_v35, %v6889_v44  ;;  %v6914_v34 = vmul.f32 %v12088_v20, %v12088_v20  ;;  %v6933_v53 = vsel %vm716_vm11, %v6912_v37, 0.0  ;;  %v8726_v37 = vld [vmem:[#allocation7 + $0xc8] sm:$0xff]  }
0x1abf   : > { %v6926_v51 = vadd.f32 %v6925_v14, %v6924_v7  ;;  %v12106_v43 = vsub.f32 %v12007_v5, %v6889_v44  ;;  %v6915_v29 = vmul.f32 %v12094_v56, %v12094_v56  ;;  %v6935_v57 = vsel %vm716_vm11, %v6913_v54, 0.0  ;;  %v8729_v54 = vld [vmem:[#allocation7 + $0xe0] sm:$0xff]  }
0x1ac0   : > { %v12112_v3 = vsub.f32 %v12013_v22, %v6889_v44  ;;  %v6916_v35 = vmul.f32 %v12100_v0, %v12100_v0  ;;  %v6937_v36 = vsel %vm716_vm11, %v6914_v34, 0.0  ;;  %v12118_v39 = vsub.f32 %v12019_v38, %v6889_v44  ;;  %v8732_v34 = vld [vmem:[#allocation7 + $0xf8] sm:$0xff]  }
0x1ac1   : > { %v6928_v16 = vadd.f32 %v6927_v46, %v6926_v51  ;;  %v6917_v5 = vmul.f32 %v12106_v43, %v12106_v43  ;;  %v6939_v26 = vsel %vm716_vm11, %v6915_v29, 0.0  ;;  %v12124_v19 = vsub.f32 %v12025_v62, %v6889_v44  ;;  %v8735_v29 = vld [vmem:[#allocation7 + $0x110] sm:$0xff]  }
0x1ac2   : > { %v6918_v22 = vmul.f32 %v12112_v3, %v12112_v3  ;;  %v6941_v6 = vsel %vm716_vm11, %v6916_v35, 0.0  ;;  %v12130_v13 = vsub.f32 %v12031_v45, %v6889_v44  ;;  %v6919_v38 = vmul.f32 %v12118_v39, %v12118_v39 }
0x1ac3   : > { %v6930_v40 = vadd.f32 %v6929_v33, %v6928_v16  ;;  %v6943_v63 = vsel %vm716_vm11, %v6917_v5, 0.0  ;;  %v6920_v23 = vmul.f32 %v12124_v19, %v12124_v19  ;;  %v8725_v16 = vld [vmem:[#allocation7 + $0xc0] sm:$0xff]   ;;  %v8727_v33 = vld [vmem:[#allocation7 + $0xd0] sm:$0xff]  }
0x1ac4   : > { %v6945_v62 = vsel %vm716_vm11, %v6918_v22, 0.0  ;;  %v6921_v18 = vmul.f32 %v12130_v13, %v12130_v13  ;;  %v6947_v12 = vsel %vm716_vm11, %v6919_v38, 0.0  ;;  %v12612_v5 = vld [vmem:[#allocation32_spill] sm:$0xff]  ;;  %v12613_v22 = vld [vmem:[#allocation33_spill] sm:$0xff] }
0x1ac5   : > { %v6932_v41 = vadd.f32 %v6931_v42, %v6930_v40  ;;  %v6949_v45 = vsel %vm716_vm11, %v6920_v23, 0.0  ;;  %v8728_v40 = vld [vmem:[#allocation7 + $0xd8] sm:$0xff]   ;;  %v8730_v42 = vld [vmem:[#allocation7 + $0xe8] sm:$0xff]  }
0x1ac6   : > { %v6951_v25 = vsel %vm716_vm11, %v6921_v18, 0.0 }
0x1ac7   : > { %v6934_v58 = vadd.f32 %v6933_v53, %v6932_v41  ;;  %v8731_v41 = vld [vmem:[#allocation7 + $0xf0] sm:$0xff]   ;;  %v8733_v53 = vld [vmem:[#allocation7 + $0x100] sm:$0xff]  }
0x1ac9   : > { %v6936_v21 = vadd.f32 %v6935_v57, %v6934_v58  ;;  %v8734_v58 = vld [vmem:[#allocation7 + $0x108] sm:$0xff]   ;;  %v8736_v57 = vld [vmem:[#allocation7 + $0x118] sm:$0xff]  }
0x1acb   : > { %v6938_v10 = vadd.f32 %v6937_v36, %v6936_v21 }
0x1acd   : > { %v6940_v11 = vadd.f32 %v6939_v26, %v6938_v10  ;;  %v12157_v26 = vrot.slane %v11933_v55, %v12612_v5 }
0x1acf   : > { %v6942_v1 = vadd.f32 %v6941_v6, %v6940_v11  ;;  %v12164_v6 = vrot.slane %v11933_v55, %v12613_v22 }
0x1ad1   : > { %v6944_v24 = vadd.f32 %v6943_v63, %v6942_v1 }
0x1ad3   : > { %v6946_v2 = vadd.f32 %v6945_v62, %v6944_v24 }
0x1ad5   : > { %v6948_v61 = vadd.f32 %v6947_v12, %v6946_v2 }
0x1ad7   : > { %v6950_v44 = vadd.f32 %v6949_v45, %v6948_v61 }
0x1ad9   : > { %v6952_v8 = vadd.f32 %v6951_v25, %v6950_v44 }
0x1adb   : > { %v6953_v59 = vrot.slane %v6952_v8, 4 }
0x1add   : > { %v6954_v7 = vadd.f32 %v6953_v59, %v6952_v8 }
0x1adf   : > { %v6955_v50 = vrot.slane %v6954_v7, 2 }
0x1ae1   : > { %v6956_v14 = vadd.f32 %v6955_v50, %v6954_v7 }
0x1ae3   : > { %v6957_v51 = vrot.slane %v6956_v14, 1 }
0x1ae5   : > { %v6958_v28 = vadd.f32 %v6957_v51, %v6956_v14 }
0x1ae7   : > { %v6959_v46 = vmul.f32 0.0078125, %v6958_v28 }
0x1ae9   : > { %8415 = vmatmul.mubr.msk.f32.vlgmr.msra.gmra.mrb[50].mxu1 %vm716_vm11, %v6959_v46 }
0x1aea   : > { %7454 = vmatpush1.bf16.msra.mxu1 %v8725_v16 }
0x1aeb   : > { %7455 = vmatprep.subr.bf16.mxu1 %v12545_v60 }
0x1aee   : > { %7456 = vmatpush1.bf16.msra.mxu1 %v8726_v37 }
0x1aef   : > { %7457 = vmatprep.subr.bf16.mxu1 %v12545_v60 }
0x1af2   : > { %7458 = vmatpush1.bf16.msra.mxu1 %v8727_v33 }
0x1af3   : > { %7459 = vmatprep.subr.bf16.mxu1 %v12545_v60 }
0x1af6   : > { %7460 = vmatpush1.bf16.msra.mxu1 %v8728_v40 }
0x1af7   : > { %7461 = vmatprep.subr.bf16.mxu1 %v12545_v60 }
0x1afa   : > { %7462 = vmatpush1.bf16.msra.mxu1 %v8729_v54 }
0x1afb   : > { %7463 = vmatprep.subr.bf16.mxu1 %v12545_v60 }
0x1afe   : > { %7464 = vmatpush1.bf16.msra.mxu1 %v8730_v42 }
0x1aff   : > { %7465 = vmatprep.subr.bf16.mxu1 %v12545_v60 }
0x1b02   : > { %7466 = vmatpush1.bf16.msra.mxu1 %v8731_v41 }
0x1b03   : > { %7467 = vmatprep.subr.bf16.mxu1 %v12545_v60 }
0x1b06   : > { %7468 = vmatpush1.bf16.msra.mxu1 %v8732_v34 }
0x1b07   : > { %7469 = vmatprep.subr.bf16.mxu1 %v12545_v60 }
0x1b0a   : > { %7470 = vmatpush1.bf16.msra.mxu1 %v8733_v53 }
0x1b0b   : > { %7471 = vmatprep.subr.bf16.mxu1 %v12545_v60 }
0x1b0e   : > { %7472 = vmatpush1.bf16.msra.mxu1 %v8734_v58 }
0x1b0f   : > { %7473 = vmatprep.subr.bf16.mxu1 %v12545_v60 }
0x1b12   : > { %7474 = vmatpush1.bf16.msra.mxu1 %v8735_v29 }
0x1b13   : > { %7475 = vmatprep.subr.bf16.mxu1 %v12545_v60 }
0x1b16   : > { %7476 = vmatpush1.bf16.msra.mxu1 %v8736_v57 }
0x1bbc   : > { %v7029_v21 = vpop.f32.mrb[50].mxu1 }
0x1bbd   : > { %v7030_v35 = vadd.f32 1e-05, %v7029_v21  ;;  %v8416_v36 = vpop.f32.mrb[51].mxu1 }
0x1bbf   : > { %9049 = vrsqrt.f32 %v7030_v35 }
0x1bc9   : > { %v9050_v10 = vpop.eup %9049 }
0x1bca   : > { %v12160_v11 = vrot.slane %v9050_v10, %v12611_v17 }
0x1bcc   : > { %v7040_v60 = vmul.f32 %v12160_v11, %v12054_v15  ;;  %v7041_v1 = vmul.f32 %v12160_v11, %v12057_v30  ;;  %v7038_v38 = vmul.f32 %v12160_v11, %v12048_v52  ;;  %v7039_v63 = vmul.f32 %v12160_v11, %v12051_v9 }
0x1bcd   : > { %v7044_v17 = vmul.f32 %v12160_v11, %v12076_v32  ;;  %v7045_v24 = vmul.f32 %v12160_v11, %v12082_v47  ;;  %v7042_v23 = vmul.f32 %v12160_v11, %v12064_v27  ;;  %v7043_v15 = vmul.f32 %v12160_v11, %v12069_v49 }
0x1bce   : > { %v7060_v30 = vmul.f32 %v12157_v26, %v7040_v60  ;;  %v7061_v62 = vmul.f32 %v12157_v26, %v7041_v1  ;;  %v7058_v52 = vmul.f32 %v12157_v26, %v7038_v38  ;;  %v7059_v9 = vmul.f32 %v12157_v26, %v7039_v63 }
0x1bcf   : > { %v7064_v2 = vmul.f32 %v12157_v26, %v7044_v17  ;;  %v7065_v32 = vmul.f32 %v12157_v26, %v7045_v24  ;;  %v7062_v47 = vmul.f32 %v12157_v26, %v7042_v23  ;;  %v7063_v18 = vmul.f32 %v12157_v26, %v7043_v15 }
0x1bd0   : > { %v7080_v27 = vadd.f32 %v12164_v6, %v7060_v30  ;;  %v7081_v49 = vadd.f32 %v12164_v6, %v7061_v62  ;;  %v7078_v12 = vadd.f32 %v12164_v6, %v7058_v52  ;;  %v7079_v61 = vadd.f32 %v12164_v6, %v7059_v9 }
0x1bd1   : > { %v7084_v45 = vadd.f32 %v12164_v6, %v7064_v2  ;;  %v7085_v44 = vadd.f32 %v12164_v6, %v7065_v32  ;;  %v7082_v25 = vadd.f32 %v12164_v6, %v7062_v47  ;;  %v7083_v8 = vadd.f32 %v12164_v6, %v7063_v18 }
0x1bd2   : > { %v7112_v59 = vmul.f32 0.70710677, %v7080_v27  ;;  %v7113_v7 = vmul.f32 0.70710677, %v7081_v49  ;;  %v7096_v50 = vmul.f32 0.5, %v7080_v27  ;;  %v12198_v14 = vmul.f32 0.5, %v7081_v49 }
0x1bd3   : > { %v7110_v51 = vmul.f32 0.70710677, %v7078_v12  ;;  %v7111_v28 = vmul.f32 0.70710677, %v7079_v61  ;;  %v12200_v46 = vmul.f32 0.5, %v7078_v12  ;;  %v12202_v16 = vmul.f32 0.5, %v7079_v61 }
0x1bd4   : > { %9051 = verf.f32 %v7112_v59  ;;  %v7116_v37 = vmul.f32 0.70710677, %v7084_v45  ;;  %v12204_v33 = vmul.f32 0.5, %v7084_v45  ;;  %v12206_v40 = vmul.f32 0.5, %v7085_v44 }
0x1bd5   : > { %9053 = verf.f32 %v7113_v7  ;;  %v7117_v54 = vmul.f32 0.70710677, %v7085_v44  ;;  %v7114_v42 = vmul.f32 0.70710677, %v7082_v25  ;;  %v7115_v41 = vmul.f32 0.70710677, %v7083_v8 }
0x1bd6   : > { %9055 = verf.f32 %v7110_v51  ;;  %v7048_v34 = vmul.f32 %v12160_v11, %v12100_v0  ;;  %v7049_v53 = vmul.f32 %v12160_v11, %v12106_v43  ;;  %v7046_v58 = vmul.f32 %v12160_v11, %v12088_v20 }
0x1bd7   : > { %9057 = verf.f32 %v7111_v28  ;;  %v7047_v29 = vmul.f32 %v12160_v11, %v12094_v56  ;;  %v7052_v21 = vmul.f32 %v12160_v11, %v12124_v19  ;;  %v7053_v35 = vmul.f32 %v12160_v11, %v12130_v13 }
0x1bd8   : > { %9059 = verf.f32 %v7116_v37  ;;  %v7068_v57 = vmul.f32 %v12157_v26, %v7048_v34  ;;  %v7069_v0 = vmul.f32 %v12157_v26, %v7049_v53  ;;  %v7066_v43 = vmul.f32 %v12157_v26, %v7046_v58 }
0x1bd9   : > { %9061 = verf.f32 %v7117_v54  ;;  %v7067_v36 = vmul.f32 %v12157_v26, %v7047_v29  ;;  %v7072_v56 = vmul.f32 %v12157_v26, %v7052_v21  ;;  %v7073_v10 = vmul.f32 %v12157_v26, %v7053_v35 }
0x1bda   : > { %9063 = verf.f32 %v7114_v42  ;;  %v7088_v20 = vadd.f32 %v12164_v6, %v7068_v57  ;;  %v7089_v19 = vadd.f32 %v12164_v6, %v7069_v0  ;;  %v7086_v5 = vadd.f32 %v12164_v6, %v7066_v43 }
0x1bdb   : > { %9065 = verf.f32 %v7115_v41  ;;  %v7087_v13 = vadd.f32 %v12164_v6, %v7067_v36  ;;  %v7098_v22 = vmul.f32 0.5, %v7082_v25  ;;  %v7092_v1 = vadd.f32 %v12164_v6, %v7072_v56 }
0x1bdc   : > { %v7120_v60 = vmul.f32 0.70710677, %v7088_v20  ;;  %v7093_v38 = vadd.f32 %v12164_v6, %v7073_v10  ;;  %v7099_v63 = vmul.f32 0.5, %v7083_v8  ;;  %v12232_v17 = vmul.f32 0.5, %v7088_v20 }
0x1bdd   : > { %v12234_v24 = vmul.f32 0.5, %v7089_v19  ;;  %v7121_v23 = vmul.f32 0.70710677, %v7089_v19  ;;  %v12236_v30 = vmul.f32 0.5, %v7086_v5  ;;  %v7118_v62 = vmul.f32 0.70710677, %v7086_v5 }
0x1bde   : > { %v9052_v15 = vpop.eup %9051  ;;  %9067 = verf.f32 %v7120_v60  ;;  %v7119_v52 = vmul.f32 0.70710677, %v7087_v13  ;;  %v12238_v32 = vmul.f32 0.5, %v7087_v13  ;;  %v7124_v47 = vmul.f32 0.70710677, %v7092_v1 }
0x1bdf   : > { %v9054_v9 = vpop.eup %9053  ;;  %v7144_v2 = vadd.f32 1.0, %v9052_v15  ;;  %9069 = verf.f32 %v7121_v23  ;;  %v7125_v49 = vmul.f32 0.70710677, %v7093_v38  ;;  %v7050_v12 = vmul.f32 %v12160_v11, %v12112_v3 }
0x1be0   : > { %v9056_v18 = vpop.eup %9055  ;;  %v7145_v27 = vadd.f32 1.0, %v9054_v9  ;;  %9071 = verf.f32 %v7118_v62  ;;  %v7051_v25 = vmul.f32 %v12160_v11, %v12118_v39  ;;  %v7108_v58 = vmul.f32 0.5, %v7092_v1 }
0x1be1   : > { %v9058_v61 = vpop.eup %9057  ;;  %v7160_v45 = vmul.f32 %v7144_v2, %v7096_v50  ;;  %v7142_v44 = vadd.f32 1.0, %v9056_v18  ;;  %9073 = verf.f32 %v7119_v52  ;;  %v7070_v51 = vmul.f32 %v12157_v26, %v7050_v12 }
0x1be2   : > { %v9060_v8 = vpop.eup %9059  ;;  %v7161_v59 = vmul.f32 %v7145_v27, %v12198_v14  ;;  %v7143_v7 = vadd.f32 1.0, %v9058_v61  ;;  %9075 = verf.f32 %v7124_v47  ;;  %v7071_v3 = vmul.f32 %v12157_v26, %v7051_v25 }
0x1be3   : > { %v9062_v28 = vpop.eup %9061  ;;  %v7158_v37 = vmul.f32 %v7142_v44, %v12200_v46  ;;  %v7148_v54 = vadd.f32 1.0, %v9060_v8  ;;  %9077 = verf.f32 %v7125_v49  ;;  %v7090_v11 = vadd.f32 %v12164_v6, %v7070_v51 }
0x1be4   : > { %v9064_v50 = vpop.eup %9063  ;;  %v12248_v42 = vpack.c.bf16 %v7161_v59, %v7160_v45  ;;  %v7159_v41 = vmul.f32 %v7143_v7, %v12202_v16  ;;  %v7149_v39 = vadd.f32 1.0, %v9062_v28  ;;  %v7091_v29 = vadd.f32 %v12164_v6, %v7071_v3 }
0x1be5   : > { %v9066_v14 = vpop.eup %9065  ;;  %v7164_v34 = vmul.f32 %v7148_v54, %v12204_v33  ;;  %v7146_v53 = vadd.f32 1.0, %v9064_v50  ;;  %v7109_v35 = vmul.f32 0.5, %v7093_v38  ;;  %v12258_v0 = vmul.f32 0.5, %v7090_v11 }
0x1be6   : > { %7307 = vrot.lane.b32.xlu1 %v12248_v42, %s9318_s20  ;;  %v7174_v46 = vpack.c.bf16 %v7159_v41, %v7158_v37  ;;  %v7165_v26 = vmul.f32 %v7149_v39, %v12206_v40  ;;  %v7147_v57 = vadd.f32 1.0, %v9066_v14  ;;  %v7218_v21 = vshll.u32 %v12248_v42, 16 }
0x1be7   : > { %v7162_v16 = vmul.f32 %v7146_v53, %v7098_v22  ;;  %v7122_v43 = vmul.f32 0.70710677, %v7090_v11  ;;  %v7123_v40 = vmul.f32 0.70710677, %v7091_v29  ;;  %v7107_v7 = vmul.f32 0.5, %v7091_v29 }
0x1be8   : > { %v9068_v36 = vpop.eup %9067  ;;  %7305 = vrot.lane.b32.xlu0 %v7174_v46, %s9318_s20  ;;  %v12261_v33 = vpack.c.bf16 %v7165_v26, %v7164_v34  ;;  %v7163_v6 = vmul.f32 %v7147_v57, %v7099_v63  ;;  %v7208_v20 = vshrl.u32 %v7174_v46, 16  ;;  %v7211_v56 = vshll.u32 %v7174_v46, 16 }
0x1be9   : > { %v9070_v10 = vpop.eup %9069  ;;  %v7274_v19 = vrot.slane %v7218_v21, 1  ;;  %v7152_v5 = vadd.f32 1.0, %v9068_v36  ;;  %9079 = verf.f32 %v7122_v43  ;;  %v7215_v63 = vshrl.u32 %v12248_v42, 16 }
0x1bea   : > { %v9072_v13 = vpop.eup %9071  ;;  %7311 = vrot.lane.b32.xlu1 %v12261_v33, %s9318_s20  ;;  %v7176_v22 = vpack.c.bf16 %v7163_v6, %v7162_v16  ;;  %v7272_v60 = vrot.slane %v7211_v56, 1  ;;  %v7153_v1 = vadd.f32 1.0, %v9070_v10  ;;  %v7210_v38 = vrot.slane %v7208_v20, 7 }
0x1beb   : > { %v9074_v23 = vpop.eup %9073  ;;  %v7168_v15 = vmul.f32 %v7152_v5, %v12232_v17  ;;  %v7150_v62 = vadd.f32 1.0, %v9072_v13  ;;  %9081 = verf.f32 %v7123_v40  ;;  %v7276_v45 = vor.u32 %v7274_v19, %v7215_v63 }
0x1bec   : > { %v9076_v52 = vpop.eup %9075  ;;  %7309 = vrot.lane.b32.xlu0 %v7176_v22, %s9318_s20  ;;  %v7273_v9 = vor.u32 %v7272_v60, %v7208_v20  ;;  %v7169_v2 = vmul.f32 %v7153_v1, %v12234_v24  ;;  %v7151_v47 = vadd.f32 1.0, %v9074_v23  ;;  %v12269_v18 = vor.u32 %v7211_v56, %v7210_v38 }
0x1bed   : > { %v9078_v27 = vpop.eup %9077  ;;  %v7166_v49 = vmul.f32 %v7150_v62, %v12236_v30  ;;  %v7156_v12 = vadd.f32 1.0, %v9076_v52  ;;  %v7226_v61 = vshll.u32 %v7176_v22, 16  ;;  %v7217_v51 = vrot.slane %v7215_v63, 7 }
0x1bee   : > { %v7275_v17 = vsel %vm557_vm3, %v7273_v9, %v7274_v19  ;;  %v7179_v44 = vpack.c.bf16 %v7169_v2, %v7168_v15  ;;  %v7167_v25 = vmul.f32 %v7151_v47, %v12238_v32  ;;  %v7157_v8 = vadd.f32 1.0, %v9078_v27 }
0x1bef   : > { %8039 = vmatprep.mubr.msk.bf16.mxu1 %vm716_vm11, %v7275_v17  ;;  %v7172_v59 = vmul.f32 %v7156_v12, %v7108_v58  ;;  %v7277_v24 = vrot.slane %v7226_v61, 1  ;;  %v7223_v30 = vshrl.u32 %v7176_v22, 16  ;;  %v7234_v54 = vshll.u32 %v12261_v33, 16 }
0x1bf0   : > { %7315 = vrot.lane.b32.xlu1 %v7179_v44, %s9318_s20  ;;  %v7178_v28 = vpack.c.bf16 %v7167_v25, %v7166_v49  ;;  %v7173_v37 = vmul.f32 %v7157_v8, %v7109_v35  ;;  %v7220_v50 = vor.u32 %v7218_v21, %v7217_v51  ;;  %v7231_v42 = vshrl.u32 %v12261_v33, 16 }
0x1bf1   : > { %v7278_v3 = vsel %vm557_vm3, %v7276_v45, %v7277_v24  ;;  %v7250_v32 = vshll.u32 %v7179_v44, 16  ;;  %v7279_v39 = vor.u32 %v7277_v24, %v7223_v30  ;;  %v7280_v11 = vrot.slane %v7234_v54, 1 }
0x1bf2   : > { %7313 = vrot.lane.b32.xlu0 %v7178_v28, %s9318_s20  ;;  %v12280_v41 = vpack.c.bf16 %v7173_v37, %v7172_v59  ;;  %v7225_v14 = vrot.slane %v7223_v30, 7  ;;  %v7221_v53 = vsel %vm550_vm6, %v7210_v38, %v7220_v50  ;;  %v7242_v58 = vshll.u32 %v7178_v28, 16 }
0x1bf3   : > { %v9080_v34 = vpop.eup %9079  ;;  %v7233_v29 = vrot.slane %v7231_v42, 7  ;;  %v7239_v46 = vshrl.u32 %v7178_v28, 16  ;;  %v7281_v57 = vsel %vm557_vm3, %v7279_v39, %v7280_v11  ;;  %v7282_v16 = vor.u32 %v7280_v11, %v7231_v42 }
0x1bf4   : > { %7319 = vrot.lane.b32.xlu1 %v12280_v41, %s9318_s20  ;;  %v7154_v26 = vadd.f32 1.0, %v9080_v34  ;;  %v7228_v21 = vor.u32 %v7226_v61, %v7225_v14  ;;  %v7283_v43 = vrot.slane %v7242_v58, 1  ;;  %v7286_v33 = vrot.slane %v7250_v32, 1 }
0x1bf5   : > { %v9082_v35 = vpop.eup %9081  ;;  %v7236_v36 = vor.u32 %v7234_v54, %v7233_v29  ;;  %v7241_v6 = vrot.slane %v7239_v46, 7  ;;  %v7247_v19 = vshrl.u32 %v7179_v44, 16  ;;  %v7263_v15 = vshrl.u32 %v12280_v41, 16 }
0x1bf6   : > { %v7155_v20 = vadd.f32 1.0, %v9082_v35  ;;  %v7170_v56 = vmul.f32 %v7154_v26, %v12258_v0  ;;  %v7229_v10 = vsel %vm550_vm6, %v7217_v51, %v7228_v21  ;;  %v7284_v5 = vsel %vm557_vm3, %v7282_v16, %v7283_v43 }
0x1bf7   : > { %v7237_v40 = vsel %vm550_vm6, %v7225_v14, %v7236_v36  ;;  %v7285_v13 = vor.u32 %v7283_v43, %v7239_v46  ;;  %v7244_v22 = vor.u32 %v7242_v58, %v7241_v6  ;;  %v7249_v1 = vrot.slane %v7247_v19, 7  ;;  %v12614_v46 = vld [vmem:[#allocation34_spill] sm:$0xff] }
0x1bf8   : > { %v7171_v60 = vmul.f32 %v7155_v20, %v7107_v7  ;;  %v7266_v0 = vshll.u32 %v12280_v41, 16  ;;  %v7265_v52 = vrot.slane %v7263_v15, 7  ;;  %v7288_v2 = vor.u32 %v7286_v33, %v7247_v19 }
0x1bf9   : > { %v7287_v38 = vsel %vm557_vm3, %v7285_v13, %v7286_v33  ;;  %v7245_v23 = vsel %vm550_vm6, %v7233_v29, %v7244_v22  ;;  %v7252_v63 = vor.u32 %v7250_v32, %v7249_v1  ;;  %v7271_v51 = vsel %vm9610_vm7, 0, %v12269_v18  ;;  %v7639_v29 = vld [vmem:[%s12422_s13] sm:$0x3] }
0x1bfa   : > { %v7180_v62 = vpack.c.bf16 %v7171_v60, %v7170_v56  ;;  %v7268_v49 = vor.u32 %v7266_v0, %v7265_v52  ;;  %v7292_v45 = vrot.slane %v7266_v0, 1  ;;  %v12325_v26 = vrot.slane %v11933_v55, %v12614_v46 }
0x1bfb   : > { %v7253_v47 = vsel %vm550_vm6, %v7241_v6, %v7252_v63 }
0x1bfc   : > { %7317 = vrot.lane.b32.xlu0 %v7180_v62, %s9318_s20  ;;  %v7258_v9 = vshll.u32 %v7180_v62, 16  ;;  %v7255_v27 = vshrl.u32 %v7180_v62, 16  ;;  %v7294_v11 = vor.u32 %v7292_v45, %v7263_v15  ;;  %s9327_s20 = smov [#allocation10]  }
0x1bfd   : > { %s9233_s19 = sshll.u32 %s9327_s20, 4  ;;  %s9234_s19 = int_to_ptr.vmem [resolvable:$false] %s9233_s19 }
0x1bfe   : > { %v7289_v12 = vrot.slane %v7258_v9, 1  ;;  %v7257_v61 = vrot.slane %v7255_v27, 7  ;;  %v7296_v34 = vsel %vm9601_vm4, %v7294_v11, 0  ;;  %s9235_s12 = scalar_lea.vmem %s9234_s19, 64  ;;  %p9236_p6 = scmp.lt.s32.totalorder %s12369_s26, %s9234_s19 }
0x1bff   : > { %p9237_p9 = scmp.lt.s32.totalorder %s9235_s12, %s9229_s17 }
0x1c00   : > { %v7290_v17 = vsel %vm557_vm3, %v7288_v2, %v7289_v12  ;;  %v7291_v44 = vor.u32 %v7289_v12, %v7255_v27  ;;  %v7260_v25 = vor.u32 %v7258_v9, %v7257_v61  ;;  %v7269_v8 = vsel %vm550_vm6, %v7257_v61, %v7268_v49  ;;  %7642 = vperm.xlu0 %8622, %v7639_v29  }
0x1c01   : > { %p9238_p5 = por %p9237_p9, %p9236_p6 }
0x1c02   : > { %v7293_v59 = vsel %vm557_vm3, %v7291_v44, %v7292_v45  ;;  %v7261_v7 = vsel %vm550_vm6, %v7249_v1, %v7260_v25 }
0x1c03   : > { %p9239_p10 = pnand %p9238_p5, %p9232_p1 }
0x1c58   : > { %v7308_v37 = vpop.permute.xlu1 %7307 }
0x1c59   : > { %v7327_v30 = vsel %vm716_vm11, %v7221_v53, %v7308_v37 }
0x1c5a   : > { %v7306_v24 = vpop.permute.xlu0 %7305 }
0x1c5b   : > { %v7323_v28 = vsel %vm716_vm11, %v7271_v51, %v7306_v24 }
0x1c5c   : > { %7486 = vmatmul.mubr.bf16.vlgmr.msra.gmra.mrb[52].mxu1 %v7323_v28  ;;  %v7312_v42 = vpop.permute.xlu1 %7311 }
0x1c5d   : > { %8040 = vmatprep.mubr.msk.bf16.mxu1 %vm716_vm11, %v7278_v3  ;;  %v7335_v48 = vsel %vm716_vm11, %v7237_v40, %v7312_v42 }
0x1c5e   : > { %v7310_v54 = vpop.permute.xlu0 %7309 }
0x1c5f   : > { %v7331_v50 = vsel %vm716_vm11, %v7229_v10, %v7310_v54 }
0x1c62   : > { %v7316_v32 = vpop.permute.xlu1 %7315 }
0x1c63   : > { %v7343_v41 = vsel %vm716_vm11, %v7253_v47, %v7316_v32 }
0x1c64   : > { %7494 = vmatmul.mubr.bf16.gmra.mrb[56].mxu1 %v7327_v30  ;;  %v7314_v18 = vpop.permute.xlu0 %7313 }
0x1c65   : > { %8041 = vmatprep.mubr.msk.bf16.mxu1 %vm716_vm11, %v7281_v57  ;;  %v7339_v3 = vsel %vm716_vm11, %v7245_v23, %v7314_v18 }
0x1c66   : > { %v7320_v53 = vpop.permute.xlu1 %7319 }
0x1c67   : > { %v7351_v58 = vsel %vm716_vm11, %v7269_v8, %v7320_v53 }
0x1c6c   : > { %7502 = vmatmul.mubr.bf16.gmra.mrb[60].mxu1 %v7331_v50 }
0x1c6d   : > { %8042 = vmatprep.mubr.msk.bf16.mxu1 %vm716_vm11, %v7284_v5 }
0x1c6e   : > { %v7318_v39 = vpop.permute.xlu0 %7317 }
0x1c6f   : > { %v7347_v14 = vsel %vm716_vm11, %v7261_v7, %v7318_v39 }
0x1c74   : > { %7510 = vmatmul.mubr.bf16.gmra.mrb[64].mxu1 %v7335_v48 }
0x1c75   : > { %8043 = vmatprep.mubr.msk.bf16.mxu1 %vm716_vm11, %v7287_v38 }
0x1c7c   : > { %7518 = vmatmul.mubr.bf16.gmra.mrb[68].mxu1 %v7339_v3 }
0x1c7d   : > { %8044 = vmatprep.mubr.msk.bf16.mxu1 %vm716_vm11, %v7290_v17 }
0x1c84   : > { %7526 = vmatmul.mubr.bf16.gmra.mrb[72].mxu1 %v7343_v41 }
0x1c85   : > { %8045 = vmatprep.mubr.msk.bf16.mxu1 %vm716_vm11, %v7293_v59 }
0x1c8c   : > { %7534 = vmatmul.mubr.bf16.gmra.mrb[76].mxu1 %v7347_v14 }
0x1c8d   : > { %8046 = vmatprep.mubr.msk.bf16.mxu1 %vm716_vm11, %v7296_v34 }
0x1c94   : > { %7542 = vmatmul.mubr.bf16.gmra.mrb[80].mxu1 %v7351_v58 }
0x1d2f   : > { %v7487_v57 = vpop.f32.mrb[52].mxu1 }
0x1d30   : > { %v7488_v21 = vadd.f32 %v7487_v57, %v12325_v26  ;;  %v7489_v4 = vpop.f32.mrb[53].mxu1 }
0x1d31   : > { %v7490_v16 = vpop.f32.mrb[54].mxu1 }
0x1d32   : > { %v7566_v35 = vmul.f32 0.70710677, %v7488_v21  ;;  %v7491_v43 = vadd.f32 %v7490_v16, %v12325_v26  ;;  %v7492_v36 = vpop.f32.mrb[55].mxu1  ;;  %v7550_v15 = vmul.f32 0.5, %v7488_v21 }
0x1d34   : > { %9083 = verf.f32 %v7566_v35  ;;  %v7567_v33 = vmul.f32 0.70710677, %v7491_v43  ;;  %v7551_v62 = vmul.f32 0.5, %v7491_v43 }
0x1d36   : > { %9085 = verf.f32 %v7567_v33 }
0x1d37   : > { %v7495_v6 = vpop.f32.mrb[56].mxu1 }
0x1d38   : > { %v7496_v20 = vadd.f32 %v7495_v6, %v12325_v26  ;;  %v7497_v56 = vpop.f32.mrb[57].mxu1 }
0x1d39   : > { %v7498_v10 = vpop.f32.mrb[58].mxu1 }
0x1d3a   : > { %v7568_v19 = vmul.f32 0.70710677, %v7496_v20  ;;  %v7499_v55 = vadd.f32 %v7498_v10, %v12325_v26  ;;  %v7500_v5 = vpop.f32.mrb[59].mxu1  ;;  %v7552_v7 = vmul.f32 0.5, %v7496_v20 }
0x1d3c   : > { %9087 = verf.f32 %v7568_v19  ;;  %v7569_v40 = vmul.f32 0.70710677, %v7499_v55  ;;  %v7553_v24 = vmul.f32 0.5, %v7499_v55 }
0x1d3e   : > { %v9084_v13 = vpop.eup %9083  ;;  %9089 = verf.f32 %v7569_v40 }
0x1d3f   : > { %v7598_v22 = vadd.f32 1.0, %v9084_v13  ;;  %v7503_v60 = vpop.f32.mrb[60].mxu1 }
0x1d40   : > { %v9086_v1 = vpop.eup %9085  ;;  %v7504_v38 = vadd.f32 %v7503_v60, %v12325_v26  ;;  %v7505_v23 = vpop.f32.mrb[61].mxu1 }
0x1d41   : > { %v7599_v63 = vadd.f32 1.0, %v9086_v1  ;;  %v7506_v0 = vpop.f32.mrb[62].mxu1  ;;  %v7614_v47 = vmul.f32 %v7598_v22, %v7550_v15 }
0x1d42   : > { %v7570_v52 = vmul.f32 0.70710677, %v7504_v38  ;;  %v7507_v9 = vadd.f32 %v7506_v0, %v12325_v26  ;;  %v7508_v2 = vpop.f32.mrb[63].mxu1  ;;  %v7554_v53 = vmul.f32 0.5, %v7504_v38 }
0x1d43   : > { %v7615_v27 = vmul.f32 %v7599_v63, %v7551_v62 }
0x1d44   : > { %9091 = verf.f32 %v7570_v52  ;;  %v7571_v49 = vmul.f32 0.70710677, %v7507_v9  ;;  %v7555_v58 = vmul.f32 0.5, %v7507_v9 }
0x1d45   : > { %v7631_v12 = vpack.c.bf16 %v7615_v27, %v7614_v47 }
0x1d46   : > { %v9088_v61 = vpop.eup %9087  ;;  %9093 = verf.f32 %v7571_v49 }
0x1d47   : > { %v7600_v45 = vadd.f32 1.0, %v9088_v61  ;;  %v7511_v17 = vpop.f32.mrb[64].mxu1  ;;  %v7649_v44 = vsel %vm716_vm11, %v7631_v12, 0 }
0x1d48   : > { %v9090_v25 = vpop.eup %9089  ;;  %v7512_v8 = vadd.f32 %v7511_v17, %v12325_v26  ;;  %v7513_v59 = vpop.f32.mrb[65].mxu1  ;;  %8418 = vmatpush3.bf16.xpose.msra.mxu0 %v7649_v44 }
0x1d49   : > { %v7601_v51 = vadd.f32 1.0, %v9090_v25  ;;  %v7514_v28 = vpop.f32.mrb[66].mxu1  ;;  %8419 = vmatprep.subr.bf16.mxu0 %v12540_v31  ;;  %v7616_v50 = vmul.f32 %v7600_v45, %v7552_v7 }
0x1d4a   : > { %v7572_v37 = vmul.f32 0.70710677, %v7512_v8  ;;  %v7515_v30 = vadd.f32 %v7514_v28, %v12325_v26  ;;  %v7516_v54 = vpop.f32.mrb[67].mxu1  ;;  %v7556_v5 = vmul.f32 0.5, %v7512_v8 }
0x1d4b   : > { %v7617_v42 = vmul.f32 %v7601_v51, %v7553_v24 }
0x1d4c   : > { %9095 = verf.f32 %v7572_v37  ;;  %v7573_v48 = vmul.f32 0.70710677, %v7515_v30  ;;  %v7557_v40 = vmul.f32 0.5, %v7515_v30 }
0x1d4d   : > { %v7632_v18 = vpack.c.bf16 %v7617_v42, %v7616_v50 }
0x1d4e   : > { %v9092_v3 = vpop.eup %9091  ;;  %9097 = verf.f32 %v7573_v48 }
0x1d4f   : > { %v7602_v32 = vadd.f32 1.0, %v9092_v3  ;;  %v7519_v41 = vpop.f32.mrb[68].mxu1  ;;  %v7652_v39 = vsel %vm716_vm11, %v7632_v18, 0 }
0x1d50   : > { %v9094_v11 = vpop.eup %9093  ;;  %v7520_v14 = vadd.f32 %v7519_v41, %v12325_v26  ;;  %v7521_v34 = vpop.f32.mrb[69].mxu1  ;;  %8420 = vmatpush3.bf16.xpose.msra.mxu0 %v7652_v39 }
0x1d51   : > { %v7603_v29 = vadd.f32 1.0, %v9094_v11  ;;  %v7522_v46 = vpop.f32.mrb[70].mxu1  ;;  %8421 = vmatprep.subr.bf16.mxu0 %v12540_v31  ;;  %v7618_v16 = vmul.f32 %v7602_v32, %v7554_v53 }
0x1d52   : > { %v7574_v57 = vmul.f32 0.70710677, %v7520_v14  ;;  %v7523_v21 = vadd.f32 %v7522_v46, %v12325_v26  ;;  %v7524_v4 = vpop.f32.mrb[71].mxu1  ;;  %v7558_v12 = vmul.f32 0.5, %v7520_v14 }
0x1d53   : > { %v7619_v35 = vmul.f32 %v7603_v29, %v7555_v58 }
0x1d54   : > { %9099 = verf.f32 %v7574_v57  ;;  %v7575_v43 = vmul.f32 0.70710677, %v7523_v21  ;;  %v7559_v61 = vmul.f32 0.5, %v7523_v21 }
0x1d55   : > { %v7633_v36 = vpack.c.bf16 %v7619_v35, %v7618_v16 }
0x1d56   : > { %v9096_v33 = vpop.eup %9095  ;;  %9101 = verf.f32 %v7575_v43 }
0x1d57   : > { %v7604_v6 = vadd.f32 1.0, %v9096_v33  ;;  %v7527_v20 = vpop.f32.mrb[72].mxu1  ;;  %v7655_v56 = vsel %vm716_vm11, %v7633_v36, 0 }
0x1d58   : > { %v9098_v10 = vpop.eup %9097  ;;  %v7528_v19 = vadd.f32 %v7527_v20, %v12325_v26  ;;  %v7529_v55 = vpop.f32.mrb[73].mxu1  ;;  %8422 = vmatpush3.bf16.xpose.msra.mxu0 %v7655_v56 }
0x1d59   : > { %v7605_v13 = vadd.f32 1.0, %v9098_v10  ;;  %v7530_v22 = vpop.f32.mrb[74].mxu1  ;;  %8423 = vmatprep.subr.bf16.mxu0 %v12540_v31  ;;  %v7620_v23 = vmul.f32 %v7604_v6, %v7556_v5 }
0x1d5a   : > { %v7576_v60 = vmul.f32 0.70710677, %v7528_v19  ;;  %v7531_v1 = vadd.f32 %v7530_v22, %v12325_v26  ;;  %v7532_v38 = vpop.f32.mrb[75].mxu1  ;;  %v7560_v18 = vmul.f32 0.5, %v7528_v19 }
0x1d5b   : > { %v7621_v15 = vmul.f32 %v7605_v13, %v7557_v40  ;;  %v7643_v38 = vpop.permute.xlu0 %7642 }
0x1d5c   : > { %9103 = verf.f32 %v7576_v60  ;;  %v7577_v62 = vmul.f32 0.70710677, %v7531_v1  ;;  %v7561_v3 = vmul.f32 0.5, %v7531_v1  ;;  %v7630_v1 = vld [vmem:[%s12616_s28] sm:$0x1] }
0x1d5d   : > { %v7634_v63 = vpack.c.bf16 %v7621_v15, %v7620_v23 }
0x1d5e   : > { %v9100_v0 = vpop.eup %9099  ;;  %9105 = verf.f32 %v7577_v62 }
0x1d5f   : > { %v7606_v52 = vadd.f32 1.0, %v9100_v0  ;;  %v7535_v9 = vpop.f32.mrb[76].mxu1  ;;  %v7658_v2 = vsel %vm716_vm11, %v7634_v63, 0 }
0x1d60   : > { %v9102_v47 = vpop.eup %9101  ;;  %v7536_v27 = vadd.f32 %v7535_v9, %v12325_v26  ;;  %v7537_v49 = vpop.f32.mrb[77].mxu1  ;;  %8424 = vmatpush3.bf16.xpose.msra.mxu0 %v7658_v2 }
0x1d61   : > { %v7607_v45 = vadd.f32 1.0, %v9102_v47  ;;  %v7538_v17 = vpop.f32.mrb[78].mxu1  ;;  %8425 = vmatprep.subr.bf16.mxu0 %v12540_v31  ;;  %v7622_v59 = vmul.f32 %v7606_v52, %v7558_v12 }
0x1d62   : > { %v7578_v44 = vmul.f32 0.70710677, %v7536_v27  ;;  %v7539_v25 = vadd.f32 %v7538_v17, %v12325_v26  ;;  %v7540_v8 = vpop.f32.mrb[79].mxu1  ;;  %v7562_v16 = vmul.f32 0.5, %v7536_v27 }
0x1d63   : > { %v7623_v7 = vmul.f32 %v7607_v45, %v7559_v61 }
0x1d64   : > { %9107 = verf.f32 %v7578_v44  ;;  %v7579_v24 = vmul.f32 0.70710677, %v7539_v25  ;;  %v7563_v35 = vmul.f32 0.5, %v7539_v25 }
0x1d65   : > { %v7635_v51 = vpack.c.bf16 %v7623_v7, %v7622_v59 }
0x1d66   : > { %v9104_v28 = vpop.eup %9103  ;;  %9109 = verf.f32 %v7579_v24 }
0x1d67   : > { %v7608_v37 = vadd.f32 1.0, %v9104_v28  ;;  %v7543_v30 = vpop.f32.mrb[80].mxu1  ;;  %v7661_v54 = vsel %vm716_vm11, %v7635_v51, 0 }
0x1d68   : > { %v9106_v50 = vpop.eup %9105  ;;  %v7544_v42 = vadd.f32 %v7543_v30, %v12325_v26  ;;  %v7545_v48 = vpop.f32.mrb[81].mxu1  ;;  %8426 = vmatpush3.bf16.xpose.msra.mxu0 %v7661_v54 }
0x1d69   : > { %v7609_v32 = vadd.f32 1.0, %v9106_v50  ;;  %v7546_v41 = vpop.f32.mrb[82].mxu1  ;;  %8427 = vmatprep.subr.bf16.mxu0 %v12540_v31  ;;  %v7624_v34 = vmul.f32 %v7608_v37, %v7560_v18 }
0x1d6a   : > { %v7580_v39 = vmul.f32 0.70710677, %v7544_v42  ;;  %v7547_v11 = vadd.f32 %v7546_v41, %v12325_v26  ;;  %v7548_v14 = vpop.f32.mrb[83].mxu1  ;;  %v7564_v19 = vmul.f32 0.5, %v7544_v42 }
0x1d6b   : > { %v7625_v53 = vmul.f32 %v7609_v32, %v7561_v3 }
0x1d6c   : > { %9111 = verf.f32 %v7580_v39  ;;  %v7581_v58 = vmul.f32 0.70710677, %v7547_v11  ;;  %v7565_v55 = vmul.f32 0.5, %v7547_v11 }
0x1d6d   : > { %v7636_v29 = vpack.c.bf16 %v7625_v53, %v7624_v34 }
0x1d6e   : > { %v9108_v46 = vpop.eup %9107  ;;  %9113 = verf.f32 %v7581_v58 }
0x1d6f   : > { %v7610_v57 = vadd.f32 1.0, %v9108_v46  ;;  %v7664_v21 = vsel %vm716_vm11, %v7636_v29, 0 }
0x1d70   : > { %v9110_v4 = vpop.eup %9109  ;;  %8428 = vmatpush3.bf16.xpose.msra.mxu0 %v7664_v21 }
0x1d71   : > { %v7611_v43 = vadd.f32 1.0, %v9110_v4  ;;  %8429 = vmatprep.subr.bf16.mxu0 %v12540_v31  ;;  %v7626_v36 = vmul.f32 %v7610_v57, %v7562_v16 }
0x1d73   : > { %v7627_v26 = vmul.f32 %v7611_v43, %v7563_v35 }
0x1d75   : > { %v7637_v33 = vpack.c.bf16 %v7627_v26, %v7626_v36 }
0x1d76   : > { %v9112_v6 = vpop.eup %9111 }
0x1d77   : > { %v7612_v20 = vadd.f32 1.0, %v9112_v6  ;;  %v7667_v56 = vsel %vm716_vm11, %v7637_v33, 0 }
0x1d78   : > { %v9114_v10 = vpop.eup %9113  ;;  %8430 = vmatpush3.bf16.xpose.msra.mxu0 %v7667_v56 }
0x1d79   : > { %v7613_v5 = vadd.f32 1.0, %v9114_v10  ;;  %8431 = vmatprep.subr.bf16.mxu0 %v12540_v31  ;;  %v7628_v40 = vmul.f32 %v7612_v20, %v7564_v19 }
0x1d7b   : > { %v7629_v13 = vmul.f32 %v7613_v5, %v7565_v55 }
0x1d7d   : > { %v7638_v22 = vpack.c.bf16 %v7629_v13, %v7628_v40 }
0x1d7f   : > { %v7670_v60 = vsel %vm716_vm11, %v7638_v22, 0 }
0x1d80   : > { %8432 = vmatpush3.bf16.xpose.msra.mxu0 %v7670_v60 }
0x1d87   : > { %8434 = vmatmul.mubr.msk.bf16.vlgmr.msra.gmra.mrb[100].mxu0 %vm716_vm11, %v7630_v1 }
0x1e5a   : > { %v7706_v31 = vpop.f32.mrb[100].mxu0 }
0x1e5b   : > { %v7707_v23 = vadd.f32 %v7706_v31, %v7643_v38  ;;  %v8435_v15 = vpop.f32.mrb[101].mxu0 }
0x1e5c   : > { %v7709_v62 = vpop.f32.mrb[102].mxu0 }
0x1e5d   : > { %7712 = vst [vmem:[%s519_s24] sm:$0x3] %v7707_v23  ;;  %v8436_v63 = vpop.f32.mrb[103].mxu0 }
0x1e5e   : > { %9242 = shalt.err (!%p9239_p10)
}
0x1e5f   : > { %s9243_s16 = scalar_lea.hbm %s12367_s22, 32  ;;  %s9247_s14 = scalar_lea.hbm %s12618_s27, 64 }
0x1e60   : > { %p9244_p0 = scmp.ne.s32.totalorder %s12367_s22, %s9243_s16  ;;  %p9248_p4 = scmp.lt.u32.totalorder %s12367_s22, %s12618_s27 }
0x1e61   : > { %p9249_p12 = scmp.lt.u32.totalorder %s9247_s14, %s9243_s16  ;;  %p9251_p8 = scmp.lt.u32.totalorder %s9243_s16, %s12367_s22 }
0x1e62   : > { %p9245_p2 = pnand %p9244_p0, %p12619_p11 }
0x1e63   : > { %p9250_p7 = por %p9249_p12, %p9248_p4 }
0x1e64   : > { %p9246_p3 = pneg %p9245_p2 }
0x1e65   : > { %p9252_p13 = por %p9251_p8, %p9250_p7 }
0x1e67   : > { %p9253_p1 = pnand %p9252_p13, %p9246_p3 }
0x1e69   : > { %9256 = shalt.err (!%p9253_p1)
}
0x1e6a   : > { %8525 = dma.vmem_to_hbm [thread:$0]  (%p12619_p11), %s12369_s26, 32, %s12367_s22, %s7714_s15  }
0x1e6b PF: > { %s12620_s24 = sld [smem:[#allocation18_spill]]  ;;  %s12621_s18 = sld [smem:[#allocation15_spill]] }
0x1e6c   : > { %s12622_s21 = sld [smem:[#allocation22_spill]] }
0x1e71   : > { %p8552_p6 = scmp.ge.s32.totalorder %s12620_s24, 2  ;;  %s7739_s17 = sand.u32 1, %s12621_s18  }
0x1e72   : > { %p12623_p9 = scmp.ne.s32.totalorder %s12622_s21, 0  ;;  %s7740_s20 = scalar_lea.sflag [#allocation4], %s7739_s17 }
0x1e74   : > { %p8541_p5 = pnand %p8552_p6, %p12623_p9 }
0x1e76   : > { %9286 = dma.done.wait (!%p8541_p5), %s7740_s20, 32  }
0x1e77   : > { %9288 = vsyncadd (!%p8541_p5), %s7740_s20, 4294967264  ;;  %s12624_s16 = sld [smem:[#allocation19_spill]]  ;;  %s12625_s29 = sld [smem:[#allocation16_spill]] }
0x1e78   : > { %s12626_s30 = sld [smem:[#allocation17_spill]]  ;;  %s12627_s15 = sld [smem:[#allocation20_spill]] }
0x1e7d   : > { %p27_p10 = scmp.ge.s32.totalorder %s12624_s16, 4  }
0x1e7f   :  { %29 = sbr.rel (!%p27_p10) target bundleno = 9 (0x9), region = 136 }
0x1e86   :  { %7745 = vsyncpa [#allocation3], 1 }
0x1e87   :  { %7747 = vsyncpa [#allocation3 + $0x1], 1 }
0x1e88   :  { %7748 = vsyncpa [#allocation6], 1 }
0x1e89   :  { %7749 = vsyncpa [#allocation9], 1 }
0x1e8a   :  { %7750 = vsyncpa [#allocation4], 1 }
0x1e8b   :  { %7752 = vsyncpa [#allocation4 + $0x1], 1 }

</bundles_post_ra>
